<compile_context>
chip_gen: v7x
topology: tpu7x:2x2x1
jax: 0.10.0
libtpu: 0.0.40
codegen_flags: <defaults>
</compile_context>

<pallas_src>
import jax
import jax.numpy as jnp
from jax.experimental import pallas as pl
from jax.experimental.pallas import tpu as pltpu

LANE = 128
SUBLANE = 8


def _round_up(x, m):
    return (x + m - 1) // m * m


# --------------------------------------------------------------------------
# Fused kernel: in-kernel im2col conv3x3 + bias + ReLU -> GAP -> Linear head
# --------------------------------------------------------------------------
def _make_fused_forward(B, B_pad, H, W, H_pad, Cin, TH, Cout_pad, NC_pad,
                        vmem_limit, single_buffer_weights=True):
    nt = H_pad // TH                 # row tiles per image
    M = TH * W                       # output pixels per grid step
    assert M % SUBLANE == 0
    inv_hw = 1.0 / float(H * W)
    HP2, WP2 = H_pad + 2, W + 2      # halo-padded activation extents
    mask_needed = (H_pad != H)

    def kernel(x_ref, cw_ref, cb_ref, hw_ref, hb_ref, o_ref,
               gacc_ref, pooled_ref):
        b = pl.program_id(0)
        t = pl.program_id(1)

        @pl.when((b == 0) & (t == 0))
        def _():
            pooled_ref[...] = jnp.zeros_like(pooled_ref)

        @pl.when(t == 0)
        def _():
            gacc_ref[...] = jnp.zeros_like(gacc_ref)

        r0 = t * TH
        # Conv-as-9-shifted-dots: bf16 operands, f32 accumulation on the MXU.
        acc = jnp.zeros((M, Cout_pad), jnp.float32)
        for di in range(3):
            for dj in range(3):
                row0 = di if nt == 1 else r0 + di   # static slice when untiled
                sl = x_ref[0, pl.ds(row0, TH), dj:dj + W, :]   # (TH, W, Cin)
                acc += jnp.dot(sl.reshape(M, Cin), cw_ref[di * 3 + dj],
                               preferred_element_type=jnp.float32)
        act = jnp.maximum(acc + cb_ref[...], 0.0)              # bias + ReLU, f32

        if mask_needed:
            # Tail handling: zero the rows that only exist due to row-tile pad.
            rows = r0 + jax.lax.broadcasted_iota(jnp.int32, (TH, W), 0)
            act = jnp.where(rows.reshape(M, 1) < H, act, 0.0)

        # GAP partial sums: sublane-aligned fold -> VPU adds only; the single
        # cross-sublane (XLU) reduce happens once per image at finalize.
        gacc_ref[...] += jnp.sum(act.reshape(M // SUBLANE, SUBLANE, Cout_pad),
                                 axis=0)

        @pl.when(t == nt - 1)
        def _():
            pooled = jnp.sum(gacc_ref[...], axis=0, keepdims=True) * inv_hw
            rowsel = jax.lax.broadcasted_iota(jnp.int32, (B_pad, Cout_pad), 0) == b
            pooled_ref[...] += jnp.where(rowsel, pooled, 0.0)   # write row b

        @pl.when((b == B - 1) & (t == nt - 1))
        def _():
            # Batched classifier head: one (B_pad, Cout) x (Cout, NC) matmul,
            # pooled features kept in f32.  Lane-dense, sublane-full store.
            logits = jnp.dot(pooled_ref[...], hw_ref[...],
                             preferred_element_type=jnp.float32) + hb_ref[...]
            o_ref[...] = logits

    def wspec(shape):
        zeros = (0,) * len(shape)
        kw = {}
        if single_buffer_weights:
            # Grid-invariant operands: no need to double-buffer them in VMEM.
            kw["pipeline_mode"] = pl.Buffered(1)
        return pl.BlockSpec(shape, lambda b, t: zeros, **kw)

    grid_spec = pltpu.PrefetchScalarGridSpec(
        num_scalar_prefetch=0,
        grid=(B, nt),
        in_specs=[
            # Whole halo-padded image per batch (constant over t -> fetched
            # once per image, double-buffered across the batch axis).
            pl.BlockSpec((1, HP2, WP2, Cin), lambda b, t: (b, 0, 0, 0)),
            wspec((9, Cin, Cout_pad)),      # conv weight, bf16
            wspec((1, Cout_pad)),           # conv bias,  f32
            wspec((Cout_pad, NC_pad)),      # head weight, f32
            wspec((1, NC_pad)),             # head bias,   f32
        ],
        out_specs=pl.BlockSpec((B_pad, NC_pad), lambda b, t: (0, 0)),
        scratch_shapes=[
            pltpu.VMEM((SUBLANE, Cout_pad), jnp.float32),   # GAP fold acc
            pltpu.VMEM((B_pad, Cout_pad), jnp.float32),     # pooled rows
        ],
    )

    return pl.pallas_call(
        kernel,
        out_shape=jax.ShapeDtypeStruct((B_pad, NC_pad), jnp.float32),
        grid_spec=grid_spec,
        compiler_params=pltpu.CompilerParams(
            # Output / pooled scratch are grid-resident across both axes.
            dimension_semantics=("arbitrary", "arbitrary"),
            vmem_limit_bytes=vmem_limit,
        ),
    )


# --------------------------------------------------------------------------
# Wrapper emulating BaseTimmWrapper.forward
# --------------------------------------------------------------------------
def base_timm_wrapper_forward(x_nchw, kparams, num_classes):
    B, Cin, H, W = x_nchw.shape
    Cout_pad = kparams["conv_w"].shape[-1]
    NC_pad = kparams["head_w"].shape[-1]

    # Row-tile size: ~1024 output pixels per grid step (amortizes per-step
    # overhead), or the whole image when it is small; keep the GAP fold
    # sublane-aligned.  Remainder rows are masked in-kernel.
    TH = max(1, min(H, max(1, 1024 // W)))
    while (TH * W) % SUBLANE:
        TH += 1
    H_pad = _round_up(H, TH)
    B_pad = _round_up(B, SUBLANE)

    # Single NCHW->NHWC + halo-pad + bf16 pass (no 9x im2col, no K pad in HBM).
    # TODO(synk): accept NHWC bf16 activations directly to drop this pass too.
    x = jnp.transpose(x_nchw, (0, 2, 3, 1))
    x = jnp.pad(x, ((0, 0), (1, 1 + H_pad - H), (1, 1), (0, 0))).astype(jnp.bfloat16)

    # VMEM budget from actual buffer math (image x2 buffers, weights, scratch,
    # output) with 2x headroom; capped to stay within v7x's 64 MiB physical.
    img_b = (H_pad + 2) * (W + 2) * Cin * 2
    w_b = (9 * Cin * Cout_pad * 2 + Cout_pad * 4
           + Cout_pad * NC_pad * 4 + NC_pad * 4)
    scratch_b = (SUBLANE + B_pad) * Cout_pad * 4 + B_pad * NC_pad * 4
    vmem_limit = int(min(max(2 * (2 * img_b + 2 * w_b + scratch_b), 16 << 20),
                         48 << 20))

    args = (x, kparams["conv_w"], kparams["conv_b"],
            kparams["head_w"], kparams["head_b"])
    try:
        fwd = _make_fused_forward(B, B_pad, H, W, H_pad, Cin, TH, Cout_pad,
                                  NC_pad, vmem_limit, single_buffer_weights=True)
        out = jax.block_until_ready(fwd(*args))
    except Exception:
        # Fallback if pl.Buffered(1) is unsupported by this Pallas version.
        fwd = _make_fused_forward(B, B_pad, H, W, H_pad, Cin, TH, Cout_pad,
                                  NC_pad, vmem_limit, single_buffer_weights=False)
        out = fwd(*args)
    return out[:B, :num_classes]


# --------------------------------------------------------------------------
# Deterministic parameter initialization (synthetic, no checkpoint load)
# --------------------------------------------------------------------------
def init_params(key, cin, cout, num_classes):
    k1, k2, k3, k4 = jax.random.split(key, 4)
    conv_w = jax.random.normal(k1, (9 * cin, cout), jnp.float32) * 0.1
    conv_b = jax.random.normal(k2, (1, cout), jnp.float32) * 0.01
    head_w = jax.random.normal(k3, (cout, num_classes), jnp.float32) * 0.1
    head_b = jax.random.normal(k4, (1, num_classes), jnp.float32) * 0.01
    return dict(conv_w=conv_w, conv_b=conv_b, head_w=head_w, head_b=head_b)


def pad_params_for_kernel(params, cin):
    # Only the lane (output-feature) dims are zero-padded to 128; K = 9*Cin is
    # never padded in HBM.  Conv weight bf16 (MXU), head weight/biases f32.
    _, Cout = params["conv_w"].shape
    _, NC = params["head_w"].shape
    Cout_pad, NC_pad = _round_up(Cout, LANE), _round_up(NC, LANE)
    conv_w = params["conv_w"].reshape(9, cin, Cout)
    conv_w = jnp.pad(conv_w, ((0, 0), (0, 0), (0, Cout_pad - Cout))).astype(jnp.bfloat16)
    return dict(
        conv_w=conv_w,
        conv_b=jnp.pad(params["conv_b"], ((0, 0), (0, Cout_pad - Cout))),
        head_w=jnp.pad(params["head_w"], ((0, Cout_pad - Cout), (0, NC_pad - NC))),
        head_b=jnp.pad(params["head_b"], ((0, 0), (0, NC_pad - NC))),
    )


if __name__ == "__main__":
    key = jax.random.PRNGKey(0)
    kx, kp = jax.random.split(key)

    B, Cin, H, W = 2, 4, 16, 16        # NCHW image, timm data_config style
    Cout, num_classes = 32, 10

    x = jax.random.normal(kx, (B, Cin, H, W), jnp.float32)
    params = init_params(kp, Cin, Cout, num_classes)
    kparams = pad_params_for_kernel(params, Cin)

    logits = base_timm_wrapper_forward(x, kparams, num_classes)
    logits = jax.block_until_ready(logits)

    # Pure-JAX f32 reference for the same synthetic forward.
    x_nhwc = jnp.transpose(x, (0, 2, 3, 1))
    xp = jnp.pad(x_nhwc, ((0, 0), (1, 1), (1, 1), (0, 0)))
    cols = [xp[:, i:i + H, j:j + W, :] for i in range(3) for j in range(3)]
    patches = jnp.stack(cols, axis=3).reshape(B * H * W, 9 * Cin)
    ref_feat = jnp.maximum(patches @ params["conv_w"] + params["conv_b"], 0.0)
    ref_pool = ref_feat.reshape(B, H * W, Cout).mean(axis=1)
    ref_logits = ref_pool @ params["head_w"] + params["head_b"]

    assert logits.shape == (B, num_classes)
    # bf16 conv inputs with f32 accumulation (head fully f32) vs f32 reference.
    assert jnp.allclose(logits, ref_logits, atol=2e-2, rtol=2e-2), (
        float(jnp.max(jnp.abs(logits - ref_logits))))
    print("KERNEL_OK")
</pallas_src>

<mosaic_0001>
module attributes {stable_mosaic.version = 11 : i64} {
  func.func @kernel(%arg0: i32, %arg1: i32, %arg2: memref<1x18x18x4xbf16, #tpu.memory_space<vmem>>, %arg3: memref<9x4x128xbf16, #tpu.memory_space<vmem>>, %arg4: memref<1x128xf32, #tpu.memory_space<vmem>>, %arg5: memref<128x128xf32, #tpu.memory_space<vmem>>, %arg6: memref<1x128xf32, #tpu.memory_space<vmem>>, %arg7: memref<8x128xf32, #tpu.memory_space<vmem>>, %arg8: memref<8x128xf32, #tpu.memory_space<vmem>>, %arg9: memref<8x128xf32, #tpu.memory_space<vmem>>) attributes {dimension_semantics = [#tpu.dimension_semantics<arbitrary>, #tpu.dimension_semantics<arbitrary>], iteration_bounds = array<i64: 2, 1>, scalar_prefetch = 0 : i64, scratch_operands = 2 : i64, tpu.core_type = #tpu.core_type<tc>, window_params = [{transform_indices = @transform_0, window_bounds = array<i64: 1, 18, 18, 4>}, {pipeline_mode = #tpu.pipeline_mode<synchronous>, transform_indices = @transform_1, window_bounds = array<i64: 9, 4, 128>}, {pipeline_mode = #tpu.pipeline_mode<synchronous>, transform_indices = @transform_2, window_bounds = array<i64: 1, 128>}, {pipeline_mode = #tpu.pipeline_mode<synchronous>, transform_indices = @transform_3, window_bounds = array<i64: 128, 128>}, {pipeline_mode = #tpu.pipeline_mode<synchronous>, transform_indices = @transform_4, window_bounds = array<i64: 1, 128>}, {pipeline_mode = #tpu.pipeline_mode<synchronous>, transform_indices = @transform_5, window_bounds = array<i64: 8, 128>}]} {
    %c0_i32 = arith.constant 0 : i32
    %0 = arith.cmpi eq, %arg0, %c0_i32 : i32
    %c0_i32_0 = arith.constant 0 : i32
    %1 = arith.cmpi eq, %arg1, %c0_i32_0 : i32
    %2 = arith.andi %0, %1 : i1
    %3 = arith.extui %2 : i1 to i32
    %c0_i32_1 = arith.constant 0 : i32
    %4 = arith.cmpi ne, %3, %c0_i32_1 : i32
    scf.if %4 {
      %cst_79 = arith.constant 0.000000e+00 : f32
      %90 = vector.broadcast %cst_79 : f32 to vector<8x128xf32>
      %c0_80 = arith.constant 0 : index
      %c0_81 = arith.constant 0 : index
      %91 = vector.load %arg9[%c0_80, %c0_81] : memref<8x128xf32, #tpu.memory_space<vmem>>, vector<8x128xf32>
      tpu.vector_store %arg9[%c0_80, %c0_81], %90 {strides = array<i32>} : memref<8x128xf32, #tpu.memory_space<vmem>>, vector<8x128xf32>,
    } else {
    }
    %c0_i32_2 = arith.constant 0 : i32
    %5 = arith.cmpi eq, %arg1, %c0_i32_2 : i32
    %6 = arith.extui %5 : i1 to i32
    %c0_i32_3 = arith.constant 0 : i32
    %7 = arith.cmpi ne, %6, %c0_i32_3 : i32
    scf.if %7 {
      %cst_79 = arith.constant 0.000000e+00 : f32
      %90 = vector.broadcast %cst_79 : f32 to vector<8x128xf32>
      %c0_80 = arith.constant 0 : index
      %c0_81 = arith.constant 0 : index
      %91 = vector.load %arg8[%c0_80, %c0_81] : memref<8x128xf32, #tpu.memory_space<vmem>>, vector<8x128xf32>
      tpu.vector_store %arg8[%c0_80, %c0_81], %90 {strides = array<i32>} : memref<8x128xf32, #tpu.memory_space<vmem>>, vector<8x128xf32>,
    } else {
    }
    %cst = arith.constant 0.000000e+00 : f32
    %8 = vector.broadcast %cst : f32 to vector<256x128xf32>
    %c0 = arith.constant 0 : index
    %c0_4 = arith.constant 0 : index
    %c0_5 = arith.constant 0 : index
    %c0_6 = arith.constant 0 : index
    %9 = vector.load %arg2[%c0, %c0_4, %c0_5, %c0_6] : memref<1x18x18x4xbf16, #tpu.memory_space<vmem>>, vector<1x16x16x4xbf16>
    %10 = vector.shape_cast %9 : vector<1x16x16x4xbf16> to vector<16x16x4xbf16>
    %11 = vector.shape_cast %10 : vector<16x16x4xbf16> to vector<256x4xbf16>
    %c0_7 = arith.constant 0 : index
    %c0_8 = arith.constant 0 : index
    %c0_9 = arith.constant 0 : index
    %12 = vector.load %arg3[%c0_7, %c0_8, %c0_9] : memref<9x4x128xbf16, #tpu.memory_space<vmem>>, vector<1x4x128xbf16>
    %13 = vector.shape_cast %12 : vector<1x4x128xbf16> to vector<4x128xbf16>
    %cst_10 = arith.constant dense<0.000000e+00> : vector<256x128xf32>
    %14 = tpu.matmul %11, %13, %cst_10 {dimension_numbers = #tpu.dot_dimension_numbers<[1], [0], [0], [1], [0, 0, 1, 1], [], []>} : vector<256x4xbf16>, vector<4x128xbf16>, vector<256x128xf32> -> vector<256x128xf32>
    %15 = arith.addf %8, %14 : vector<256x128xf32>
    %c0_11 = arith.constant 0 : index
    %c0_12 = arith.constant 0 : index
    %c1 = arith.constant 1 : index
    %c0_13 = arith.constant 0 : index
    %16 = vector.load %arg2[%c0_11, %c0_12, %c1, %c0_13] : memref<1x18x18x4xbf16, #tpu.memory_space<vmem>>, vector<1x16x16x4xbf16>
    %17 = vector.shape_cast %16 : vector<1x16x16x4xbf16> to vector<16x16x4xbf16>
    %18 = vector.shape_cast %17 : vector<16x16x4xbf16> to vector<256x4xbf16>
    %c1_14 = arith.constant 1 : index
    %c0_15 = arith.constant 0 : index
    %c0_16 = arith.constant 0 : index
    %19 = vector.load %arg3[%c1_14, %c0_15, %c0_16] : memref<9x4x128xbf16, #tpu.memory_space<vmem>>, vector<1x4x128xbf16>
    %20 = vector.shape_cast %19 : vector<1x4x128xbf16> to vector<4x128xbf16>
    %cst_17 = arith.constant dense<0.000000e+00> : vector<256x128xf32>
    %21 = tpu.matmul %18, %20, %cst_17 {dimension_numbers = #tpu.dot_dimension_numbers<[1], [0], [0], [1], [0, 0, 1, 1], [], []>} : vector<256x4xbf16>, vector<4x128xbf16>, vector<256x128xf32> -> vector<256x128xf32>
    %22 = arith.addf %15, %21 : vector<256x128xf32>
    %c0_18 = arith.constant 0 : index
    %c0_19 = arith.constant 0 : index
    %c2 = arith.constant 2 : index
    %c0_20 = arith.constant 0 : index
    %23 = vector.load %arg2[%c0_18, %c0_19, %c2, %c0_20] : memref<1x18x18x4xbf16, #tpu.memory_space<vmem>>, vector<1x16x16x4xbf16>
    %24 = vector.shape_cast %23 : vector<1x16x16x4xbf16> to vector<16x16x4xbf16>
    %25 = vector.shape_cast %24 : vector<16x16x4xbf16> to vector<256x4xbf16>
    %c2_21 = arith.constant 2 : index
    %c0_22 = arith.constant 0 : index
    %c0_23 = arith.constant 0 : index
    %26 = vector.load %arg3[%c2_21, %c0_22, %c0_23] : memref<9x4x128xbf16, #tpu.memory_space<vmem>>, vector<1x4x128xbf16>
    %27 = vector.shape_cast %26 : vector<1x4x128xbf16> to vector<4x128xbf16>
    %cst_24 = arith.constant dense<0.000000e+00> : vector<256x128xf32>
    %28 = tpu.matmul %25, %27, %cst_24 {dimension_numbers = #tpu.dot_dimension_numbers<[1], [0], [0], [1], [0, 0, 1, 1], [], []>} : vector<256x4xbf16>, vector<4x128xbf16>, vector<256x128xf32> -> vector<256x128xf32>
    %29 = arith.addf %22, %28 : vector<256x128xf32>
    %c0_25 = arith.constant 0 : index
    %c1_26 = arith.constant 1 : index
    %c0_27 = arith.constant 0 : index
    %c0_28 = arith.constant 0 : index
    %30 = vector.load %arg2[%c0_25, %c1_26, %c0_27, %c0_28] : memref<1x18x18x4xbf16, #tpu.memory_space<vmem>>, vector<1x16x16x4xbf16>
    %31 = vector.shape_cast %30 : vector<1x16x16x4xbf16> to vector<16x16x4xbf16>
    %32 = vector.shape_cast %31 : vector<16x16x4xbf16> to vector<256x4xbf16>
    %c3 = arith.constant 3 : index
    %c0_29 = arith.constant 0 : index
    %c0_30 = arith.constant 0 : index
    %33 = vector.load %arg3[%c3, %c0_29, %c0_30] : memref<9x4x128xbf16, #tpu.memory_space<vmem>>, vector<1x4x128xbf16>
    %34 = vector.shape_cast %33 : vector<1x4x128xbf16> to vector<4x128xbf16>
    %cst_31 = arith.constant dense<0.000000e+00> : vector<256x128xf32>
    %35 = tpu.matmul %32, %34, %cst_31 {dimension_numbers = #tpu.dot_dimension_numbers<[1], [0], [0], [1], [0, 0, 1, 1], [], []>} : vector<256x4xbf16>, vector<4x128xbf16>, vector<256x128xf32> -> vector<256x128xf32>
    %36 = arith.addf %29, %35 : vector<256x128xf32>
    %c0_32 = arith.constant 0 : index
    %c1_33 = arith.constant 1 : index
    %c1_34 = arith.constant 1 : index
    %c0_35 = arith.constant 0 : index
    %37 = vector.load %arg2[%c0_32, %c1_33, %c1_34, %c0_35] : memref<1x18x18x4xbf16, #tpu.memory_space<vmem>>, vector<1x16x16x4xbf16>
    %38 = vector.shape_cast %37 : vector<1x16x16x4xbf16> to vector<16x16x4xbf16>
    %39 = vector.shape_cast %38 : vector<16x16x4xbf16> to vector<256x4xbf16>
    %c4 = arith.constant 4 : index
    %c0_36 = arith.constant 0 : index
    %c0_37 = arith.constant 0 : index
    %40 = vector.load %arg3[%c4, %c0_36, %c0_37] : memref<9x4x128xbf16, #tpu.memory_space<vmem>>, vector<1x4x128xbf16>
    %41 = vector.shape_cast %40 : vector<1x4x128xbf16> to vector<4x128xbf16>
    %cst_38 = arith.constant dense<0.000000e+00> : vector<256x128xf32>
    %42 = tpu.matmul %39, %41, %cst_38 {dimension_numbers = #tpu.dot_dimension_numbers<[1], [0], [0], [1], [0, 0, 1, 1], [], []>} : vector<256x4xbf16>, vector<4x128xbf16>, vector<256x128xf32> -> vector<256x128xf32>
    %43 = arith.addf %36, %42 : vector<256x128xf32>
    %c0_39 = arith.constant 0 : index
    %c1_40 = arith.constant 1 : index
    %c2_41 = arith.constant 2 : index
    %c0_42 = arith.constant 0 : index
    %44 = vector.load %arg2[%c0_39, %c1_40, %c2_41, %c0_42] : memref<1x18x18x4xbf16, #tpu.memory_space<vmem>>, vector<1x16x16x4xbf16>
    %45 = vector.shape_cast %44 : vector<1x16x16x4xbf16> to vector<16x16x4xbf16>
    %46 = vector.shape_cast %45 : vector<16x16x4xbf16> to vector<256x4xbf16>
    %c5 = arith.constant 5 : index
    %c0_43 = arith.constant 0 : index
    %c0_44 = arith.constant 0 : index
    %47 = vector.load %arg3[%c5, %c0_43, %c0_44] : memref<9x4x128xbf16, #tpu.memory_space<vmem>>, vector<1x4x128xbf16>
    %48 = vector.shape_cast %47 : vector<1x4x128xbf16> to vector<4x128xbf16>
    %cst_45 = arith.constant dense<0.000000e+00> : vector<256x128xf32>
    %49 = tpu.matmul %46, %48, %cst_45 {dimension_numbers = #tpu.dot_dimension_numbers<[1], [0], [0], [1], [0, 0, 1, 1], [], []>} : vector<256x4xbf16>, vector<4x128xbf16>, vector<256x128xf32> -> vector<256x128xf32>
    %50 = arith.addf %43, %49 : vector<256x128xf32>
    %c0_46 = arith.constant 0 : index
    %c2_47 = arith.constant 2 : index
    %c0_48 = arith.constant 0 : index
    %c0_49 = arith.constant 0 : index
    %51 = vector.load %arg2[%c0_46, %c2_47, %c0_48, %c0_49] : memref<1x18x18x4xbf16, #tpu.memory_space<vmem>>, vector<1x16x16x4xbf16>
    %52 = vector.shape_cast %51 : vector<1x16x16x4xbf16> to vector<16x16x4xbf16>
    %53 = vector.shape_cast %52 : vector<16x16x4xbf16> to vector<256x4xbf16>
    %c6 = arith.constant 6 : index
    %c0_50 = arith.constant 0 : index
    %c0_51 = arith.constant 0 : index
    %54 = vector.load %arg3[%c6, %c0_50, %c0_51] : memref<9x4x128xbf16, #tpu.memory_space<vmem>>, vector<1x4x128xbf16>
    %55 = vector.shape_cast %54 : vector<1x4x128xbf16> to vector<4x128xbf16>
    %cst_52 = arith.constant dense<0.000000e+00> : vector<256x128xf32>
    %56 = tpu.matmul %53, %55, %cst_52 {dimension_numbers = #tpu.dot_dimension_numbers<[1], [0], [0], [1], [0, 0, 1, 1], [], []>} : vector<256x4xbf16>, vector<4x128xbf16>, vector<256x128xf32> -> vector<256x128xf32>
    %57 = arith.addf %50, %56 : vector<256x128xf32>
    %c0_53 = arith.constant 0 : index
    %c2_54 = arith.constant 2 : index
    %c1_55 = arith.constant 1 : index
    %c0_56 = arith.constant 0 : index
    %58 = vector.load %arg2[%c0_53, %c2_54, %c1_55, %c0_56] : memref<1x18x18x4xbf16, #tpu.memory_space<vmem>>, vector<1x16x16x4xbf16>
    %59 = vector.shape_cast %58 : vector<1x16x16x4xbf16> to vector<16x16x4xbf16>
    %60 = vector.shape_cast %59 : vector<16x16x4xbf16> to vector<256x4xbf16>
    %c7 = arith.constant 7 : index
    %c0_57 = arith.constant 0 : index
    %c0_58 = arith.constant 0 : index
    %61 = vector.load %arg3[%c7, %c0_57, %c0_58] : memref<9x4x128xbf16, #tpu.memory_space<vmem>>, vector<1x4x128xbf16>
    %62 = vector.shape_cast %61 : vector<1x4x128xbf16> to vector<4x128xbf16>
    %cst_59 = arith.constant dense<0.000000e+00> : vector<256x128xf32>
    %63 = tpu.matmul %60, %62, %cst_59 {dimension_numbers = #tpu.dot_dimension_numbers<[1], [0], [0], [1], [0, 0, 1, 1], [], []>} : vector<256x4xbf16>, vector<4x128xbf16>, vector<256x128xf32> -> vector<256x128xf32>
    %64 = arith.addf %57, %63 : vector<256x128xf32>
    %c0_60 = arith.constant 0 : index
    %c2_61 = arith.constant 2 : index
    %c2_62 = arith.constant 2 : index
    %c0_63 = arith.constant 0 : index
    %65 = vector.load %arg2[%c0_60, %c2_61, %c2_62, %c0_63] : memref<1x18x18x4xbf16, #tpu.memory_space<vmem>>, vector<1x16x16x4xbf16>
    %66 = vector.shape_cast %65 : vector<1x16x16x4xbf16> to vector<16x16x4xbf16>
    %67 = vector.shape_cast %66 : vector<16x16x4xbf16> to vector<256x4xbf16>
    %c8 = arith.constant 8 : index
    %c0_64 = arith.constant 0 : index
    %c0_65 = arith.constant 0 : index
    %68 = vector.load %arg3[%c8, %c0_64, %c0_65] : memref<9x4x128xbf16, #tpu.memory_space<vmem>>, vector<1x4x128xbf16>
    %69 = vector.shape_cast %68 : vector<1x4x128xbf16> to vector<4x128xbf16>
    %cst_66 = arith.constant dense<0.000000e+00> : vector<256x128xf32>
    %70 = tpu.matmul %67, %69, %cst_66 {dimension_numbers = #tpu.dot_dimension_numbers<[1], [0], [0], [1], [0, 0, 1, 1], [], []>} : vector<256x4xbf16>, vector<4x128xbf16>, vector<256x128xf32> -> vector<256x128xf32>
    %71 = arith.addf %64, %70 : vector<256x128xf32>
    %c0_67 = arith.constant 0 : index
    %c0_68 = arith.constant 0 : index
    %72 = vector.load %arg4[%c0_67, %c0_68] : memref<1x128xf32, #tpu.memory_space<vmem>>, vector<1x128xf32>
    %73 = vector.broadcast %72 : vector<1x128xf32> to vector<256x128xf32>
    %74 = arith.addf %71, %73 : vector<256x128xf32>
    %cst_69 = arith.constant 0.000000e+00 : f32
    %75 = vector.broadcast %cst_69 : f32 to vector<256x128xf32>
    %76 = arith.maximumf %74, %75 : vector<256x128xf32>
    %c0_70 = arith.constant 0 : index
    %c0_71 = arith.constant 0 : index
    %77 = vector.load %arg8[%c0_70, %c0_71] : memref<8x128xf32, #tpu.memory_space<vmem>>, vector<8x128xf32>
    %78 = vector.shape_cast %76 : vector<256x128xf32> to vector<32x8x128xf32>
    %cst_72 = arith.constant dense<0.000000e+00> : vector<8x128xf32>
    %79 = vector.multi_reduction <add>, %78, %cst_72 [0] : vector<32x8x128xf32> to vector<8x128xf32>
    %80 = arith.addf %77, %79 : vector<8x128xf32>
    %c0_73 = arith.constant 0 : index
    %c0_74 = arith.constant 0 : index
    %81 = vector.load %arg8[%c0_73, %c0_74] : memref<8x128xf32, #tpu.memory_space<vmem>>, vector<8x128xf32>
    tpu.vector_store %arg8[%c0_73, %c0_74], %80 {strides = array<i32>} : memref<8x128xf32, #tpu.memory_space<vmem>>, vector<8x128xf32>,
    %c0_i32_75 = arith.constant 0 : i32
    %82 = arith.cmpi eq, %arg1, %c0_i32_75 : i32
    %83 = arith.extui %82 : i1 to i32
    %c0_i32_76 = arith.constant 0 : i32
    %84 = arith.cmpi ne, %83, %c0_i32_76 : i32
    scf.if %84 {
      %c0_79 = arith.constant 0 : index
      %c0_80 = arith.constant 0 : index
      %90 = vector.load %arg8[%c0_79, %c0_80] : memref<8x128xf32, #tpu.memory_space<vmem>>, vector<8x128xf32>
      %cst_81 = arith.constant dense<0.000000e+00> : vector<128xf32>
      %91 = vector.multi_reduction <add>, %90, %cst_81 [0] : vector<8x128xf32> to vector<128xf32>
      %92 = vector.shape_cast %91 : vector<128xf32> to vector<1x128xf32>
      %cst_82 = arith.constant 3.906250e-03 : f32
      %93 = vector.broadcast %cst_82 : f32 to vector<1x128xf32>
      %94 = arith.mulf %92, %93 : vector<1x128xf32>
      %95 = tpu.iota {dimensions = array<i32: 0>} : vector<8x128xi32>
      %96 = vector.broadcast %arg0 : i32 to vector<8x128xi32>
      %97 = arith.cmpi eq, %95, %96 : vector<8x128xi32>
      %c0_83 = arith.constant 0 : index
      %c0_84 = arith.constant 0 : index
      %98 = vector.load %arg9[%c0_83, %c0_84] : memref<8x128xf32, #tpu.memory_space<vmem>>, vector<8x128xf32>
      %cst_85 = arith.constant 0.000000e+00 : f32
      %99 = vector.shape_cast %94 : vector<1x128xf32> to vector<1x128xf32>
      %100 = vector.broadcast %99 : vector<1x128xf32> to vector<8x128xf32>
      %101 = vector.broadcast %cst_85 : f32 to vector<8x128xf32>
      %102 = arith.select %97, %100, %101 : vector<8x128xi1>, vector<8x128xf32>
      %103 = arith.addf %98, %102 : vector<8x128xf32>
      %c0_86 = arith.constant 0 : index
      %c0_87 = arith.constant 0 : index
      %104 = vector.load %arg9[%c0_86, %c0_87] : memref<8x128xf32, #tpu.memory_space<vmem>>, vector<8x128xf32>
      tpu.vector_store %arg9[%c0_86, %c0_87], %103 {strides = array<i32>} : memref<8x128xf32, #tpu.memory_space<vmem>>, vector<8x128xf32>,
    } else {
    }
    %c1_i32 = arith.constant 1 : i32
    %85 = arith.cmpi eq, %arg0, %c1_i32 : i32
    %c0_i32_77 = arith.constant 0 : i32
    %86 = arith.cmpi eq, %arg1, %c0_i32_77 : i32
    %87 = arith.andi %85, %86 : i1
    %88 = arith.extui %87 : i1 to i32
    %c0_i32_78 = arith.constant 0 : i32
    %89 = arith.cmpi ne, %88, %c0_i32_78 : i32
    scf.if %89 {
      %c0_79 = arith.constant 0 : index
      %c0_80 = arith.constant 0 : index
      %90 = vector.load %arg9[%c0_79, %c0_80] : memref<8x128xf32, #tpu.memory_space<vmem>>, vector<8x128xf32>
      %c0_81 = arith.constant 0 : index
      %c0_82 = arith.constant 0 : index
      %91 = vector.load %arg5[%c0_81, %c0_82] : memref<128x128xf32, #tpu.memory_space<vmem>>, vector<128x128xf32>
      %cst_83 = arith.constant dense<0.000000e+00> : vector<8x128xf32>
      %92 = tpu.matmul %90, %91, %cst_83 {dimension_numbers = #tpu.dot_dimension_numbers<[1], [0], [0], [1], [0, 0, 1, 1], [], []>} : vector<8x128xf32>, vector<128x128xf32>, vector<8x128xf32> -> vector<8x128xf32>
      %c0_84 = arith.constant 0 : index
      %c0_85 = arith.constant 0 : index
      %93 = vector.load %arg6[%c0_84, %c0_85] : memref<1x128xf32, #tpu.memory_space<vmem>>, vector<1x128xf32>
      %94 = vector.broadcast %93 : vector<1x128xf32> to vector<8x128xf32>
      %95 = arith.addf %92, %94 : vector<8x128xf32>
      %c0_86 = arith.constant 0 : index
      %c0_87 = arith.constant 0 : index
      %96 = vector.load %arg7[%c0_86, %c0_87] : memref<8x128xf32, #tpu.memory_space<vmem>>, vector<8x128xf32>
      tpu.vector_store %arg7[%c0_86, %c0_87], %95 {strides = array<i32>} : memref<8x128xf32, #tpu.memory_space<vmem>>, vector<8x128xf32>,
    } else {
    }
    return
  }
  func.func @transform_0(%arg0: i32, %arg1: i32) -> (i32, i32, i32, i32) {
    %c0_i32 = arith.constant 0 : i32
    %c0_i32_0 = arith.constant 0 : i32
    %c0_i32_1 = arith.constant 0 : i32
    %c0_i32_2 = arith.constant 0 : i32
    return %arg0, %c0_i32, %c0_i32_0, %c0_i32_1 : i32, i32, i32, i32
  }
  func.func @transform_1(%arg0: i32, %arg1: i32) -> (i32, i32, i32) {
    %c0_i32 = arith.constant 0 : i32
    %c0_i32_0 = arith.constant 0 : i32
    %c0_i32_1 = arith.constant 0 : i32
    %c0_i32_2 = arith.constant 0 : i32
    return %c0_i32, %c0_i32_0, %c0_i32_1 : i32, i32, i32
  }
  func.func @transform_2(%arg0: i32, %arg1: i32) -> (i32, i32) {
    %c0_i32 = arith.constant 0 : i32
    %c0_i32_0 = arith.constant 0 : i32
    %c0_i32_1 = arith.constant 0 : i32
    return %c0_i32, %c0_i32_0 : i32, i32
  }
  func.func @transform_3(%arg0: i32, %arg1: i32) -> (i32, i32) {
    %c0_i32 = arith.constant 0 : i32
    %c0_i32_0 = arith.constant 0 : i32
    %c0_i32_1 = arith.constant 0 : i32
    return %c0_i32, %c0_i32_0 : i32, i32
  }
  func.func @transform_4(%arg0: i32, %arg1: i32) -> (i32, i32) {
    %c0_i32 = arith.constant 0 : i32
    %c0_i32_0 = arith.constant 0 : i32
    %c0_i32_1 = arith.constant 0 : i32
    return %c0_i32, %c0_i32_0 : i32, i32
  }
  func.func @transform_5(%arg0: i32, %arg1: i32) -> (i32, i32) {
    %c0_i32 = arith.constant 0 : i32
    %c0_i32_0 = arith.constant 0 : i32
    %c0_i32_1 = arith.constant 0 : i32
    return %c0_i32, %c0_i32_0 : i32, i32
  }
}

module attributes {stable_mosaic.version = 11 : i64} {
  func.func @kernel(%arg0: i32, %arg1: i32, %arg2: memref<1x18x18x4xbf16, #tpu.memory_space<vmem>>, %arg3: memref<9x4x128xbf16, #tpu.memory_space<vmem>>, %arg4: memref<1x128xf32, #tpu.memory_space<vmem>>, %arg5: memref<128x128xf32, #tpu.memory_space<vmem>>, %arg6: memref<1x128xf32, #tpu.memory_space<vmem>>, %arg7: memref<8x128xf32, #tpu.memory_space<vmem>>, %arg8: memref<8x128xf32, #tpu.memory_space<vmem>>, %arg9: memref<8x128xf32, #tpu.memory_space<vmem>>) attributes {dimension_semantics = [#tpu.dimension_semantics<arbitrary>, #tpu.dimension_semantics<arbitrary>], iteration_bounds = array<i64: 2, 1>, scalar_prefetch = 0 : i64, scratch_operands = 2 : i64, tpu.core_type = #tpu.core_type<tc>, window_params = [{transform_indices = @transform_0, window_bounds = array<i64: 1, 18, 18, 4>}, {pipeline_mode = #tpu.pipeline_mode<synchronous>, transform_indices = @transform_1, window_bounds = array<i64: 9, 4, 128>}, {pipeline_mode = #tpu.pipeline_mode<synchronous>, transform_indices = @transform_2, window_bounds = array<i64: 1, 128>}, {pipeline_mode = #tpu.pipeline_mode<synchronous>, transform_indices = @transform_3, window_bounds = array<i64: 128, 128>}, {pipeline_mode = #tpu.pipeline_mode<synchronous>, transform_indices = @transform_4, window_bounds = array<i64: 1, 128>}, {pipeline_mode = #tpu.pipeline_mode<synchronous>, transform_indices = @transform_5, window_bounds = array<i64: 8, 128>}]} {
    %c0_i32 = arith.constant 0 : i32
    %0 = arith.cmpi eq, %arg0, %c0_i32 : i32
    %c0_i32_0 = arith.constant 0 : i32
    %1 = arith.cmpi eq, %arg1, %c0_i32_0 : i32
    %2 = arith.andi %0, %1 : i1
    %3 = arith.extui %2 : i1 to i32
    %c0_i32_1 = arith.constant 0 : i32
    %4 = arith.cmpi ne, %3, %c0_i32_1 : i32
    scf.if %4 {
      %cst_79 = arith.constant 0.000000e+00 : f32
      %90 = vector.broadcast %cst_79 : f32 to vector<8x128xf32>
      %c0_80 = arith.constant 0 : index
      %c0_81 = arith.constant 0 : index
      %91 = vector.load %arg9[%c0_80, %c0_81] : memref<8x128xf32, #tpu.memory_space<vmem>>, vector<8x128xf32>
      tpu.vector_store %arg9[%c0_80, %c0_81], %90 {strides = array<i32>} : memref<8x128xf32, #tpu.memory_space<vmem>>, vector<8x128xf32>,
    } else {
    }
    %c0_i32_2 = arith.constant 0 : i32
    %5 = arith.cmpi eq, %arg1, %c0_i32_2 : i32
    %6 = arith.extui %5 : i1 to i32
    %c0_i32_3 = arith.constant 0 : i32
    %7 = arith.cmpi ne, %6, %c0_i32_3 : i32
    scf.if %7 {
      %cst_79 = arith.constant 0.000000e+00 : f32
      %90 = vector.broadcast %cst_79 : f32 to vector<8x128xf32>
      %c0_80 = arith.constant 0 : index
      %c0_81 = arith.constant 0 : index
      %91 = vector.load %arg8[%c0_80, %c0_81] : memref<8x128xf32, #tpu.memory_space<vmem>>, vector<8x128xf32>
      tpu.vector_store %arg8[%c0_80, %c0_81], %90 {strides = array<i32>} : memref<8x128xf32, #tpu.memory_space<vmem>>, vector<8x128xf32>,
    } else {
    }
    %cst = arith.constant 0.000000e+00 : f32
    %8 = vector.broadcast %cst : f32 to vector<256x128xf32>
    %c0 = arith.constant 0 : index
    %c0_4 = arith.constant 0 : index
    %c0_5 = arith.constant 0 : index
    %c0_6 = arith.constant 0 : index
    %9 = vector.load %arg2[%c0, %c0_4, %c0_5, %c0_6] : memref<1x18x18x4xbf16, #tpu.memory_space<vmem>>, vector<1x16x16x4xbf16>
    %10 = vector.shape_cast %9 : vector<1x16x16x4xbf16> to vector<16x16x4xbf16>
    %11 = vector.shape_cast %10 : vector<16x16x4xbf16> to vector<256x4xbf16>
    %c0_7 = arith.constant 0 : index
    %c0_8 = arith.constant 0 : index
    %c0_9 = arith.constant 0 : index
    %12 = vector.load %arg3[%c0_7, %c0_8, %c0_9] : memref<9x4x128xbf16, #tpu.memory_space<vmem>>, vector<1x4x128xbf16>
    %13 = vector.shape_cast %12 : vector<1x4x128xbf16> to vector<4x128xbf16>
    %cst_10 = arith.constant dense<0.000000e+00> : vector<256x128xf32>
    %14 = tpu.matmul %11, %13, %cst_10 {dimension_numbers = #tpu.dot_dimension_numbers<[1], [0], [0], [1], [0, 0, 1, 1], [], []>} : vector<256x4xbf16>, vector<4x128xbf16>, vector<256x128xf32> -> vector<256x128xf32>
    %15 = arith.addf %8, %14 : vector<256x128xf32>
    %c0_11 = arith.constant 0 : index
    %c0_12 = arith.constant 0 : index
    %c1 = arith.constant 1 : index
    %c0_13 = arith.constant 0 : index
    %16 = vector.load %arg2[%c0_11, %c0_12, %c1, %c0_13] : memref<1x18x18x4xbf16, #tpu.memory_space<vmem>>, vector<1x16x16x4xbf16>
    %17 = vector.shape_cast %16 : vector<1x16x16x4xbf16> to vector<16x16x4xbf16>
    %18 = vector.shape_cast %17 : vector<16x16x4xbf16> to vector<256x4xbf16>
    %c1_14 = arith.constant 1 : index
    %c0_15 = arith.constant 0 : index
    %c0_16 = arith.constant 0 : index
    %19 = vector.load %arg3[%c1_14, %c0_15, %c0_16] : memref<9x4x128xbf16, #tpu.memory_space<vmem>>, vector<1x4x128xbf16>
    %20 = vector.shape_cast %19 : vector<1x4x128xbf16> to vector<4x128xbf16>
    %cst_17 = arith.constant dense<0.000000e+00> : vector<256x128xf32>
    %21 = tpu.matmul %18, %20, %cst_17 {dimension_numbers = #tpu.dot_dimension_numbers<[1], [0], [0], [1], [0, 0, 1, 1], [], []>} : vector<256x4xbf16>, vector<4x128xbf16>, vector<256x128xf32> -> vector<256x128xf32>
    %22 = arith.addf %15, %21 : vector<256x128xf32>
    %c0_18 = arith.constant 0 : index
    %c0_19 = arith.constant 0 : index
    %c2 = arith.constant 2 : index
    %c0_20 = arith.constant 0 : index
    %23 = vector.load %arg2[%c0_18, %c0_19, %c2, %c0_20] : memref<1x18x18x4xbf16, #tpu.memory_space<vmem>>, vector<1x16x16x4xbf16>
    %24 = vector.shape_cast %23 : vector<1x16x16x4xbf16> to vector<16x16x4xbf16>
    %25 = vector.shape_cast %24 : vector<16x16x4xbf16> to vector<256x4xbf16>
    %c2_21 = arith.constant 2 : index
    %c0_22 = arith.constant 0 : index
    %c0_23 = arith.constant 0 : index
    %26 = vector.load %arg3[%c2_21, %c0_22, %c0_23] : memref<9x4x128xbf16, #tpu.memory_space<vmem>>, vector<1x4x128xbf16>
    %27 = vector.shape_cast %26 : vector<1x4x128xbf16> to vector<4x128xbf16>
    %cst_24 = arith.constant dense<0.000000e+00> : vector<256x128xf32>
    %28 = tpu.matmul %25, %27, %cst_24 {dimension_numbers = #tpu.dot_dimension_numbers<[1], [0], [0], [1], [0, 0, 1, 1], [], []>} : vector<256x4xbf16>, vector<4x128xbf16>, vector<256x128xf32> -> vector<256x128xf32>
    %29 = arith.addf %22, %28 : vector<256x128xf32>
    %c0_25 = arith.constant 0 : index
    %c1_26 = arith.constant 1 : index
    %c0_27 = arith.constant 0 : index
    %c0_28 = arith.constant 0 : index
    %30 = vector.load %arg2[%c0_25, %c1_26, %c0_27, %c0_28] : memref<1x18x18x4xbf16, #tpu.memory_space<vmem>>, vector<1x16x16x4xbf16>
    %31 = vector.shape_cast %30 : vector<1x16x16x4xbf16> to vector<16x16x4xbf16>
    %32 = vector.shape_cast %31 : vector<16x16x4xbf16> to vector<256x4xbf16>
    %c3 = arith.constant 3 : index
    %c0_29 = arith.constant 0 : index
    %c0_30 = arith.constant 0 : index
    %33 = vector.load %arg3[%c3, %c0_29, %c0_30] : memref<9x4x128xbf16, #tpu.memory_space<vmem>>, vector<1x4x128xbf16>
    %34 = vector.shape_cast %33 : vector<1x4x128xbf16> to vector<4x128xbf16>
    %cst_31 = arith.constant dense<0.000000e+00> : vector<256x128xf32>
    %35 = tpu.matmul %32, %34, %cst_31 {dimension_numbers = #tpu.dot_dimension_numbers<[1], [0], [0], [1], [0, 0, 1, 1], [], []>} : vector<256x4xbf16>, vector<4x128xbf16>, vector<256x128xf32> -> vector<256x128xf32>
    %36 = arith.addf %29, %35 : vector<256x128xf32>
    %c0_32 = arith.constant 0 : index
    %c1_33 = arith.constant 1 : index
    %c1_34 = arith.constant 1 : index
    %c0_35 = arith.constant 0 : index
    %37 = vector.load %arg2[%c0_32, %c1_33, %c1_34, %c0_35] : memref<1x18x18x4xbf16, #tpu.memory_space<vmem>>, vector<1x16x16x4xbf16>
    %38 = vector.shape_cast %37 : vector<1x16x16x4xbf16> to vector<16x16x4xbf16>
    %39 = vector.shape_cast %38 : vector<16x16x4xbf16> to vector<256x4xbf16>
    %c4 = arith.constant 4 : index
    %c0_36 = arith.constant 0 : index
    %c0_37 = arith.constant 0 : index
    %40 = vector.load %arg3[%c4, %c0_36, %c0_37] : memref<9x4x128xbf16, #tpu.memory_space<vmem>>, vector<1x4x128xbf16>
    %41 = vector.shape_cast %40 : vector<1x4x128xbf16> to vector<4x128xbf16>
    %cst_38 = arith.constant dense<0.000000e+00> : vector<256x128xf32>
    %42 = tpu.matmul %39, %41, %cst_38 {dimension_numbers = #tpu.dot_dimension_numbers<[1], [0], [0], [1], [0, 0, 1, 1], [], []>} : vector<256x4xbf16>, vector<4x128xbf16>, vector<256x128xf32> -> vector<256x128xf32>
    %43 = arith.addf %36, %42 : vector<256x128xf32>
    %c0_39 = arith.constant 0 : index
    %c1_40 = arith.constant 1 : index
    %c2_41 = arith.constant 2 : index
    %c0_42 = arith.constant 0 : index
    %44 = vector.load %arg2[%c0_39, %c1_40, %c2_41, %c0_42] : memref<1x18x18x4xbf16, #tpu.memory_space<vmem>>, vector<1x16x16x4xbf16>
    %45 = vector.shape_cast %44 : vector<1x16x16x4xbf16> to vector<16x16x4xbf16>
    %46 = vector.shape_cast %45 : vector<16x16x4xbf16> to vector<256x4xbf16>
    %c5 = arith.constant 5 : index
    %c0_43 = arith.constant 0 : index
    %c0_44 = arith.constant 0 : index
    %47 = vector.load %arg3[%c5, %c0_43, %c0_44] : memref<9x4x128xbf16, #tpu.memory_space<vmem>>, vector<1x4x128xbf16>
    %48 = vector.shape_cast %47 : vector<1x4x128xbf16> to vector<4x128xbf16>
    %cst_45 = arith.constant dense<0.000000e+00> : vector<256x128xf32>
    %49 = tpu.matmul %46, %48, %cst_45 {dimension_numbers = #tpu.dot_dimension_numbers<[1], [0], [0], [1], [0, 0, 1, 1], [], []>} : vector<256x4xbf16>, vector<4x128xbf16>, vector<256x128xf32> -> vector<256x128xf32>
    %50 = arith.addf %43, %49 : vector<256x128xf32>
    %c0_46 = arith.constant 0 : index
    %c2_47 = arith.constant 2 : index
    %c0_48 = arith.constant 0 : index
    %c0_49 = arith.constant 0 : index
    %51 = vector.load %arg2[%c0_46, %c2_47, %c0_48, %c0_49] : memref<1x18x18x4xbf16, #tpu.memory_space<vmem>>, vector<1x16x16x4xbf16>
    %52 = vector.shape_cast %51 : vector<1x16x16x4xbf16> to vector<16x16x4xbf16>
    %53 = vector.shape_cast %52 : vector<16x16x4xbf16> to vector<256x4xbf16>
    %c6 = arith.constant 6 : index
    %c0_50 = arith.constant 0 : index
    %c0_51 = arith.constant 0 : index
    %54 = vector.load %arg3[%c6, %c0_50, %c0_51] : memref<9x4x128xbf16, #tpu.memory_space<vmem>>, vector<1x4x128xbf16>
    %55 = vector.shape_cast %54 : vector<1x4x128xbf16> to vector<4x128xbf16>
    %cst_52 = arith.constant dense<0.000000e+00> : vector<256x128xf32>
    %56 = tpu.matmul %53, %55, %cst_52 {dimension_numbers = #tpu.dot_dimension_numbers<[1], [0], [0], [1], [0, 0, 1, 1], [], []>} : vector<256x4xbf16>, vector<4x128xbf16>, vector<256x128xf32> -> vector<256x128xf32>
    %57 = arith.addf %50, %56 : vector<256x128xf32>
    %c0_53 = arith.constant 0 : index
    %c2_54 = arith.constant 2 : index
    %c1_55 = arith.constant 1 : index
    %c0_56 = arith.constant 0 : index
    %58 = vector.load %arg2[%c0_53, %c2_54, %c1_55, %c0_56] : memref<1x18x18x4xbf16, #tpu.memory_space<vmem>>, vector<1x16x16x4xbf16>
    %59 = vector.shape_cast %58 : vector<1x16x16x4xbf16> to vector<16x16x4xbf16>
    %60 = vector.shape_cast %59 : vector<16x16x4xbf16> to vector<256x4xbf16>
    %c7 = arith.constant 7 : index
    %c0_57 = arith.constant 0 : index
    %c0_58 = arith.constant 0 : index
    %61 = vector.load %arg3[%c7, %c0_57, %c0_58] : memref<9x4x128xbf16, #tpu.memory_space<vmem>>, vector<1x4x128xbf16>
    %62 = vector.shape_cast %61 : vector<1x4x128xbf16> to vector<4x128xbf16>
    %cst_59 = arith.constant dense<0.000000e+00> : vector<256x128xf32>
    %63 = tpu.matmul %60, %62, %cst_59 {dimension_numbers = #tpu.dot_dimension_numbers<[1], [0], [0], [1], [0, 0, 1, 1], [], []>} : vector<256x4xbf16>, vector<4x128xbf16>, vector<256x128xf32> -> vector<256x128xf32>
    %64 = arith.addf %57, %63 : vector<256x128xf32>
    %c0_60 = arith.constant 0 : index
    %c2_61 = arith.constant 2 : index
    %c2_62 = arith.constant 2 : index
    %c0_63 = arith.constant 0 : index
    %65 = vector.load %arg2[%c0_60, %c2_61, %c2_62, %c0_63] : memref<1x18x18x4xbf16, #tpu.memory_space<vmem>>, vector<1x16x16x4xbf16>
    %66 = vector.shape_cast %65 : vector<1x16x16x4xbf16> to vector<16x16x4xbf16>
    %67 = vector.shape_cast %66 : vector<16x16x4xbf16> to vector<256x4xbf16>
    %c8 = arith.constant 8 : index
    %c0_64 = arith.constant 0 : index
    %c0_65 = arith.constant 0 : index
    %68 = vector.load %arg3[%c8, %c0_64, %c0_65] : memref<9x4x128xbf16, #tpu.memory_space<vmem>>, vector<1x4x128xbf16>
    %69 = vector.shape_cast %68 : vector<1x4x128xbf16> to vector<4x128xbf16>
    %cst_66 = arith.constant dense<0.000000e+00> : vector<256x128xf32>
    %70 = tpu.matmul %67, %69, %cst_66 {dimension_numbers = #tpu.dot_dimension_numbers<[1], [0], [0], [1], [0, 0, 1, 1], [], []>} : vector<256x4xbf16>, vector<4x128xbf16>, vector<256x128xf32> -> vector<256x128xf32>
    %71 = arith.addf %64, %70 : vector<256x128xf32>
    %c0_67 = arith.constant 0 : index
    %c0_68 = arith.constant 0 : index
    %72 = vector.load %arg4[%c0_67, %c0_68] : memref<1x128xf32, #tpu.memory_space<vmem>>, vector<1x128xf32>
    %73 = vector.broadcast %72 : vector<1x128xf32> to vector<256x128xf32>
    %74 = arith.addf %71, %73 : vector<256x128xf32>
    %cst_69 = arith.constant 0.000000e+00 : f32
    %75 = vector.broadcast %cst_69 : f32 to vector<256x128xf32>
    %76 = arith.maximumf %74, %75 : vector<256x128xf32>
    %c0_70 = arith.constant 0 : index
    %c0_71 = arith.constant 0 : index
    %77 = vector.load %arg8[%c0_70, %c0_71] : memref<8x128xf32, #tpu.memory_space<vmem>>, vector<8x128xf32>
    %78 = vector.shape_cast %76 : vector<256x128xf32> to vector<32x8x128xf32>
    %cst_72 = arith.constant dense<0.000000e+00> : vector<8x128xf32>
    %79 = vector.multi_reduction <add>, %78, %cst_72 [0] : vector<32x8x128xf32> to vector<8x128xf32>
    %80 = arith.addf %77, %79 : vector<8x128xf32>
    %c0_73 = arith.constant 0 : index
    %c0_74 = arith.constant 0 : index
    %81 = vector.load %arg8[%c0_73, %c0_74] : memref<8x128xf32, #tpu.memory_space<vmem>>, vector<8x128xf32>
    tpu.vector_store %arg8[%c0_73, %c0_74], %80 {strides = array<i32>} : memref<8x128xf32, #tpu.memory_space<vmem>>, vector<8x128xf32>,
    %c0_i32_75 = arith.constant 0 : i32
    %82 = arith.cmpi eq, %arg1, %c0_i32_75 : i32
    %83 = arith.extui %82 : i1 to i32
    %c0_i32_76 = arith.constant 0 : i32
    %84 = arith.cmpi ne, %83, %c0_i32_76 : i32
    scf.if %84 {
      %c0_79 = arith.constant 0 : index
      %c0_80 = arith.constant 0 : index
      %90 = vector.load %arg8[%c0_79, %c0_80] : memref<8x128xf32, #tpu.memory_space<vmem>>, vector<8x128xf32>
      %cst_81 = arith.constant dense<0.000000e+00> : vector<128xf32>
      %91 = vector.multi_reduction <add>, %90, %cst_81 [0] : vector<8x128xf32> to vector<128xf32>
      %92 = vector.shape_cast %91 : vector<128xf32> to vector<1x128xf32>
      %cst_82 = arith.constant 3.906250e-03 : f32
      %93 = vector.broadcast %cst_82 : f32 to vector<1x128xf32>
      %94 = arith.mulf %92, %93 : vector<1x128xf32>
      %95 = tpu.iota {dimensions = array<i32: 0>} : vector<8x128xi32>
      %96 = vector.broadcast %arg0 : i32 to vector<8x128xi32>
      %97 = arith.cmpi eq, %95, %96 : vector<8x128xi32>
      %c0_83 = arith.constant 0 : index
      %c0_84 = arith.constant 0 : index
      %98 = vector.load %arg9[%c0_83, %c0_84] : memref<8x128xf32, #tpu.memory_space<vmem>>, vector<8x128xf32>
      %cst_85 = arith.constant 0.000000e+00 : f32
      %99 = vector.shape_cast %94 : vector<1x128xf32> to vector<1x128xf32>
      %100 = vector.broadcast %99 : vector<1x128xf32> to vector<8x128xf32>
      %101 = vector.broadcast %cst_85 : f32 to vector<8x128xf32>
      %102 = arith.select %97, %100, %101 : vector<8x128xi1>, vector<8x128xf32>
      %103 = arith.addf %98, %102 : vector<8x128xf32>
      %c0_86 = arith.constant 0 : index
      %c0_87 = arith.constant 0 : index
      %104 = vector.load %arg9[%c0_86, %c0_87] : memref<8x128xf32, #tpu.memory_space<vmem>>, vector<8x128xf32>
      tpu.vector_store %arg9[%c0_86, %c0_87], %103 {strides = array<i32>} : memref<8x128xf32, #tpu.memory_space<vmem>>, vector<8x128xf32>,
    } else {
    }
    %c1_i32 = arith.constant 1 : i32
    %85 = arith.cmpi eq, %arg0, %c1_i32 : i32
    %c0_i32_77 = arith.constant 0 : i32
    %86 = arith.cmpi eq, %arg1, %c0_i32_77 : i32
    %87 = arith.andi %85, %86 : i1
    %88 = arith.extui %87 : i1 to i32
    %c0_i32_78 = arith.constant 0 : i32
    %89 = arith.cmpi ne, %88, %c0_i32_78 : i32
    scf.if %89 {
      %c0_79 = arith.constant 0 : index
      %c0_80 = arith.constant 0 : index
      %90 = vector.load %arg9[%c0_79, %c0_80] : memref<8x128xf32, #tpu.memory_space<vmem>>, vector<8x128xf32>
      %c0_81 = arith.constant 0 : index
      %c0_82 = arith.constant 0 : index
      %91 = vector.load %arg5[%c0_81, %c0_82] : memref<128x128xf32, #tpu.memory_space<vmem>>, vector<128x128xf32>
      %cst_83 = arith.constant dense<0.000000e+00> : vector<8x128xf32>
      %92 = tpu.matmul %90, %91, %cst_83 {dimension_numbers = #tpu.dot_dimension_numbers<[1], [0], [0], [1], [0, 0, 1, 1], [], []>} : vector<8x128xf32>, vector<128x128xf32>, vector<8x128xf32> -> vector<8x128xf32>
      %c0_84 = arith.constant 0 : index
      %c0_85 = arith.constant 0 : index
      %93 = vector.load %arg6[%c0_84, %c0_85] : memref<1x128xf32, #tpu.memory_space<vmem>>, vector<1x128xf32>
      %94 = vector.broadcast %93 : vector<1x128xf32> to vector<8x128xf32>
      %95 = arith.addf %92, %94 : vector<8x128xf32>
      %c0_86 = arith.constant 0 : index
      %c0_87 = arith.constant 0 : index
      %96 = vector.load %arg7[%c0_86, %c0_87] : memref<8x128xf32, #tpu.memory_space<vmem>>, vector<8x128xf32>
      tpu.vector_store %arg7[%c0_86, %c0_87], %95 {strides = array<i32>} : memref<8x128xf32, #tpu.memory_space<vmem>>, vector<8x128xf32>,
    } else {
    }
    return
  }
  func.func @transform_0(%arg0: i32, %arg1: i32) -> (i32, i32, i32, i32) {
    %c0_i32 = arith.constant 0 : i32
    %c0_i32_0 = arith.constant 0 : i32
    %c0_i32_1 = arith.constant 0 : i32
    %c0_i32_2 = arith.constant 0 : i32
    return %arg0, %c0_i32, %c0_i32_0, %c0_i32_1 : i32, i32, i32, i32
  }
  func.func @transform_1(%arg0: i32, %arg1: i32) -> (i32, i32, i32) {
    %c0_i32 = arith.constant 0 : i32
    %c0_i32_0 = arith.constant 0 : i32
    %c0_i32_1 = arith.constant 0 : i32
    %c0_i32_2 = arith.constant 0 : i32
    return %c0_i32, %c0_i32_0, %c0_i32_1 : i32, i32, i32
  }
  func.func @transform_2(%arg0: i32, %arg1: i32) -> (i32, i32) {
    %c0_i32 = arith.constant 0 : i32
    %c0_i32_0 = arith.constant 0 : i32
    %c0_i32_1 = arith.constant 0 : i32
    return %c0_i32, %c0_i32_0 : i32, i32
  }
  func.func @transform_3(%arg0: i32, %arg1: i32) -> (i32, i32) {
    %c0_i32 = arith.constant 0 : i32
    %c0_i32_0 = arith.constant 0 : i32
    %c0_i32_1 = arith.constant 0 : i32
    return %c0_i32, %c0_i32_0 : i32, i32
  }
  func.func @transform_4(%arg0: i32, %arg1: i32) -> (i32, i32) {
    %c0_i32 = arith.constant 0 : i32
    %c0_i32_0 = arith.constant 0 : i32
    %c0_i32_1 = arith.constant 0 : i32
    return %c0_i32, %c0_i32_0 : i32, i32
  }
  func.func @transform_5(%arg0: i32, %arg1: i32) -> (i32, i32) {
    %c0_i32 = arith.constant 0 : i32
    %c0_i32_0 = arith.constant 0 : i32
    %c0_i32_1 = arith.constant 0 : i32
    return %c0_i32, %c0_i32_0 : i32, i32
  }
}

</mosaic_0001>

<bundles_post_ra>
// kernel: tpu_custom_call.1
= control target key start
LH: loop header
LB: loop body
LE: loop exit
PB: predicated region body
PF: predicated region fallthrough
CT: control target
= control target key end

     0   :  { %10 = vsyncpa [#allocation5], 0  ;;  %s6656_s18 = smov 0   ;;  %s6658_s19 = smov 0   ;;  %s8519_s0 = inlined_call_operand.vmem [shape: bf16[2,18,18,4], index: 0, kind: input, shape index: {}]   ;;  %s8520_s1 = inlined_call_operand.vmem [shape: bf16[9,4,128], index: 1, kind: input, shape index: {}]   ;;  %s8521_s2 = inlined_call_operand.vmem [shape: f32[1,128], index: 2, kind: input, shape index: {}]   ;;  %s8522_s3 = inlined_call_operand.vmem [shape: f32[128,128], index: 3, kind: input, shape index: {}]   ;;  %s8523_s4 = inlined_call_operand.vmem [shape: f32[1,128], index: 4, kind: input, shape index: {}]   ;;  %s8524_s5 = inlined_call_operand.hbm [shape: f32[8,128], index: 5, kind: output, shape index: {}]  }
   0x1   :  { %s6660_s20 = smov 0  }
   0x2 LB: > { %s5073_s21 = sadd.s32 4294967295, %s6619_s20   ;;  %s28_s22 = sadd.s32 1, %s6615_s19  ;;  %s6619_s20 = sphi %s6660_s20, %s16_s20   ;;  %s6615_s19 = sphi %s6658_s19, %s8590_s19   ;;  %s6611_s18 = sphi %s6656_s18, %s8589_s18  }
   0x3   : > { %p30_p0 = scmp.ge.s32.totalorder %s28_s22, 2  ;;  %p5076_p1 = scmp.ge.s32.totalorder %s6619_s20, 1 }
   0x4   : > { %p195_p2 = scmp.lt.s32.totalorder %s6619_s20, 3 }
   0x5   : > { %s8592_s22 = smov (%p30_p0, %s28_s22), 0 }
   0x6   : > { %p196_p3 = pnand %p5076_p1, %p195_p2 }
   0x8   : > { %199 = sbr.rel (%p196_p3) target bundleno = 866 (0x362), region = 40 }
   0xf   : > { %p218_p4 = scmp.lt.s32.totalorder %s6611_s18, 1  ;;  %p224_p5 = scmp.eq.s32.totalorder %s6611_s18, 0 }
  0x10   : > { %v6621_v0 = vmov (%p224_p5), 0.0  }
  0x11   : > { %s219_s23 = scalar_select %p218_p4, %s6611_s18, 1 }
  0x12   : > { %229 = sbr.rel (!%p224_p5) target bundleno = 25 (0x19), region = 44  ;;  %230 = vst [vmem:[#allocation3] sm:$0xff] (%p224_p5), %v6621_v0 }
  0x13   : > { %s6427_s24 = smul.u32 216, %s219_s23 }
  0x15   : > { %s6683_s27 = scalar_lea.vmem %s8519_s0, %s6427_s24 }
  0x19 PF: > { %v5079_v1 = vld [vmem:[%s8520_s1 + $0x2] sm:$0x3]  ;;  %vm770_vm0 = vcmask 1041408   ;;  %v5306_v2 = vld [vmem:[%s8520_s1 + $0x8] sm:$0x3]  ;;  %vm721_vm4 = vcmask 31744  }
  0x1a   : > { %6417 = vmatprep.subr.msk.bf16.mxu1 %vm770_vm0, %v5079_v1  ;;  %6421 = vmatprep.subr.msk.bf16.mxu0 %vm770_vm0, %v5306_v2  ;;  %v772_v3 = vsel %vm770_vm0, %v5079_v1, 0  ;;  %v6695_v4 = vsel %vm770_vm0, %v5306_v2, 0  ;;  %v235_v5 = vld [vmem:[%s6683_s27] sm:$0xf]  ;;  %v236_v6 = vld [vmem:[%s6683_s27 + $0x4] sm:$0xf] }
  0x1b   : > { %8538 = vst [vmem:[#allocation7_spill] sm:$0xff] %v6695_v4  ;;  %5795 = vmatpush3.bf16.msra.mxu1 %v772_v3  ;;  %5931 = vmatpush3.bf16.msra.mxu0 %v6695_v4  ;;  %v268_v7 = vld [vmem:[%s6683_s27 + $0x8] sm:$0x1]  ;;  %vm284_vm1 = vsmask.f32 3328  ;;  %v288_v8 = vshrl.u32 %v235_v5, 16 }
  0x1c   : > { %vm285_vm2 = vsmask.f32 7440  ;;  %v291_v9 = vshll.u32 %v235_v5, 16  ;;  %v297_v10 = vshll.u32 %v236_v6, 16  ;;  %v301_v11 = vshrl.u32 %v236_v6, 16  ;;  %p4918_p6 = scmp.eq.s32.totalorder %s6611_s18, 1 }
  0x1d   : > { %v267_v12 = vld [vmem:[%s8520_s1] sm:$0x3]  ;;  %v307_v13 = vshll.u32 %v268_v7, 16  ;;  %v5258_v14 = vld [vmem:[%s6683_s27 + $0xc] sm:$0xf]  ;;  %v290_v16 = vrot.slane %v288_v8, 4  ;;  %vm6725_vm3 = vmor %vm284_vm1, %vm285_vm2 }
  0x1e   : > { %6418 = vmatprep.subr.msk.bf16.mxu1 %vm770_vm0, %v267_v12  ;;  %v6707_v15 = vld [vmem:[%s6683_s27 + $0x10] sm:$0xf]  ;;  %v293_v17 = vrot.slane %v291_v9, 5  ;;  %v299_v18 = vrot.slane %v297_v10, 5  ;;  %v303_v19 = vrot.slane %v301_v11, 4  ;;  %v2092_v22 = vshrl.u32 %v5258_v14, 16 }
  0x1f   : > { %v6710_v20 = vld [vmem:[%s6683_s27 + $0x14] sm:$0x1]  ;;  %v309_v21 = vrot.slane %v307_v13, 5  ;;  %v2095_v23 = vshll.u32 %v5258_v14, 16  ;;  %v2101_v24 = vshll.u32 %v6707_v15, 16  ;;  %v2105_v28 = vshrl.u32 %v6707_v15, 16 }
  0x20   : > { %v6716_v25 = vld [vmem:[%s8520_s1 + $0xa] sm:$0x3]  ;;  %v294_v26 = vor.u32 %v293_v17, %v290_v16  ;;  %v304_v27 = vor.u32 %v303_v19, %v299_v18  ;;  %v2111_v29 = vshll.u32 %v6710_v20, 16  ;;  %v237_v30 = vld [vmem:[%s6683_s27 + $0xc] sm:$0xf]  ;;  %v2094_v32 = vrot.slane %v2092_v22, 4 }
  0x21   : > { %6423 = vmatprep.subr.msk.bf16.mxu0 %vm770_vm0, %v6716_v25  ;;  %v2097_v33 = vrot.slane %v2095_v23, 5  ;;  %v2103_v34 = vrot.slane %v2101_v24, 5  ;;  %v238_v35 = vld [vmem:[%s6683_s27 + $0x10] sm:$0xf]  ;;  %v2107_v38 = vrot.slane %v2105_v28, 4  ;;  %v312_v42 = vshrl.u32 %v237_v30, 16 }
  0x22   : > { %v295_v36 = vrot.slane %v294_v26, 4  ;;  %v305_v37 = vrot.slane %v304_v27, 4  ;;  %v2113_v40 = vrot.slane %v2111_v29, 5  ;;  %v269_v41 = vld [vmem:[%s6683_s27 + $0x14] sm:$0x1]  ;;  %v315_v43 = vshll.u32 %v237_v30, 16 }
  0x23   : > { %v2098_v39 = vor.u32 %v2097_v33, %v2094_v32  ;;  %v2108_v46 = vor.u32 %v2107_v38, %v2103_v34  ;;  %v321_v47 = vshll.u32 %v238_v35, 16  ;;  %v314_v50 = vrot.slane %v312_v42, 4  ;;  %v5261_v56 = vld [vmem:[%s6683_s27 + $0x18] sm:$0xf]  ;;  %v6742_v61 = vld [vmem:[%s6683_s27 + $0x1c] sm:$0xf] }
  0x24   : > { %v300_v44 = vsel %vm6725_vm3, %v295_v36, %v299_v18  ;;  %v310_v45 = vsel %vm6725_vm3, %v305_v37, %v309_v21  ;;  %v317_v51 = vrot.slane %v315_v43, 5  ;;  %v325_v54 = vshrl.u32 %v238_v35, 16  ;;  %v6745_v62 = vld [vmem:[%s6683_s27 + $0x20] sm:$0x1]  ;;  %v239_v17 = vld [vmem:[%s6683_s27 + $0x18] sm:$0xf] }
  0x25   : > { %v5080_v48 = vcombine.low %v300_v44, %v310_v45  ;;  %v2099_v49 = vrot.slane %v2098_v39, 4  ;;  %v2109_v52 = vrot.slane %v2108_v46, 4  ;;  %v323_v53 = vrot.slane %v321_v47, 5  ;;  %v240_v23 = vld [vmem:[%s6683_s27 + $0x1c] sm:$0xf] }
  0x26   : > { %v331_v55 = vshll.u32 %v269_v41, 16  ;;  %v2835_v58 = vrot.slane %v6707_v15, 5  ;;  %v2838_v59 = vrot.slane %v6710_v20, 5  ;;  %v318_v60 = vor.u32 %v317_v51, %v314_v50  ;;  %v270_v29 = vld [vmem:[%s6683_s27 + $0x20] sm:$0x1] }
  0x27   : > { %5796 = vmatprep.mubr.msk.bf16.mxu1 %vm721_vm4, %v5080_v48  ;;  %v2104_v57 = vsel %vm6725_vm3, %v2099_v49, %v2103_v34  ;;  %v2114_v63 = vsel %vm6725_vm3, %v2109_v52, %v2113_v40  ;;  %v327_v0 = vrot.slane %v325_v54, 4  ;;  %v1064_v2 = vsel %vm770_vm0, %v267_v12, 0  ;;  %v5264_v35 = vld [vmem:[%s6683_s27 + $0x24] sm:$0xf]  ;;  %v6771_v44 = vld [vmem:[%s6683_s27 + $0x28] sm:$0xf] }
  0x28   : > { %v333_v1 = vrot.slane %v331_v55, 5  ;;  %v5307_v3 = vcombine.low %v2104_v57, %v2114_v63  ;;  %v319_v5 = vrot.slane %v318_v60, 4  ;;  %v2116_v6 = vshrl.u32 %v5261_v56, 16  ;;  %v6777_v47 = vld [vmem:[%s6683_s27 + $0x2c] sm:$0x1] }
  0x29   : > { %v2119_v7 = vshll.u32 %v5261_v56, 16  ;;  %v328_v8 = vor.u32 %v327_v0, %v323_v53  ;;  %v2125_v9 = vshll.u32 %v6742_v61, 16  ;;  %v2129_v10 = vshrl.u32 %v6742_v61, 16 }
  0x2a   : > { %v2135_v11 = vshll.u32 %v6745_v62, 16  ;;  %5932 = vmatprep.mubr.msk.bf16.mxu0 %vm721_vm4, %v5307_v3  ;;  %v324_v13 = vsel %vm6725_vm3, %v319_v5, %v323_v53  ;;  %v2118_v14 = vrot.slane %v2116_v6, 4  ;;  %v2842_v16 = vrot.slane %v6742_v61, 5  ;;  %v241_v53 = vld [vmem:[%s6683_s27 + $0x24] sm:$0xf] }
  0x2b   : > { %v2121_v12 = vrot.slane %v2119_v7, 5  ;;  %v329_v18 = vrot.slane %v328_v8, 4  ;;  %v2127_v19 = vrot.slane %v2125_v9, 5  ;;  %v2131_v21 = vrot.slane %v2129_v10, 4 }
  0x2c   : > { %v2137_v22 = vrot.slane %v2135_v11, 5  ;;  %v6761_v26 = vrot.slane %v2842_v16, 4  ;;  %v2845_v27 = vrot.slane %v6745_v62, 5  ;;  %v3044_v28 = vsel %vm770_vm0, %v6716_v25, 0 }
  0x2d   : > { %v2122_v24 = vor.u32 %v2121_v12, %v2118_v14  ;;  %v334_v30 = vsel %vm6725_vm3, %v329_v18, %v333_v1  ;;  %v2132_v32 = vor.u32 %v2131_v21, %v2127_v19  ;;  %v336_v33 = vshrl.u32 %v239_v17, 16  ;;  %v5267_v14 = vld [vmem:[%s6683_s27 + $0x30] sm:$0xf] }
  0x2e   : > { %v339_v34 = vshll.u32 %v239_v17, 16  ;;  %v5081_v36 = vcombine.low %v324_v13, %v334_v30  ;;  %v345_v38 = vshll.u32 %v240_v23, 16  ;;  %v349_v39 = vshrl.u32 %v240_v23, 16  ;;  %v271_v13 = vld [vmem:[%s6683_s27 + $0x2c] sm:$0x1] }
  0x2f   : > { %v2123_v37 = vrot.slane %v2122_v24, 4  ;;  %v2133_v40 = vrot.slane %v2132_v32, 4  ;;  %v338_v41 = vrot.slane %v336_v33, 4  ;;  %v355_v43 = vshll.u32 %v270_v29, 16 }
  0x30   : > { %v341_v42 = vrot.slane %v339_v34, 5  ;;  %5797 = vmatmul.mubr.msk.bf16.vlgmr.msra.gmra.mrb[0].mxu1 %vm721_vm4, %v5081_v36  ;;  %v347_v45 = vrot.slane %v345_v38, 5  ;;  %v351_v46 = vrot.slane %v349_v39, 4  ;;  %v2140_v48 = vshrl.u32 %v5264_v35, 16 }
  0x31   : > { %v2128_v25 = vsel %vm6725_vm3, %v2123_v37, %v2127_v19  ;;  %5829 = vmatpush3.bf16.msra.mxu1 %v1064_v2  ;;  %v2138_v49 = vsel %vm6725_vm3, %v2133_v40, %v2137_v22  ;;  %v357_v51 = vrot.slane %v355_v43, 5  ;;  %v2143_v52 = vshll.u32 %v5264_v35, 16  ;;  %v242_v2 = vld [vmem:[%s6683_s27 + $0x28] sm:$0xf]  ;;  %v6800_v37 = vld [vmem:[%s6683_s27 + $0x38] sm:$0x1] }
  0x32   : > { %v342_v50 = vor.u32 %v341_v42, %v338_v41  ;;  %v5308_v54 = vcombine.low %v2128_v25, %v2138_v49  ;;  %v352_v55 = vor.u32 %v351_v46, %v347_v45  ;;  %v2142_v56 = vrot.slane %v2140_v48, 4  ;;  %v243_v43 = vld [vmem:[%s6683_s27 + $0x30] sm:$0xf]  ;;  %v244_v49 = vld [vmem:[%s6683_s27 + $0x34] sm:$0xf] }
  0x33   : > { %v2149_v57 = vshll.u32 %v6771_v44, 16  ;;  %v2145_v63 = vrot.slane %v2143_v52, 5  ;;  %v2153_v0 = vshrl.u32 %v6771_v44, 16  ;;  %v2159_v1 = vshll.u32 %v6777_v47, 16 }
  0x34   : > { %v343_v60 = vrot.slane %v342_v50, 4  ;;  %5933 = vmatmul.mubr.msk.bf16.vlgmr.msra.gmra.mrb[0].mxu0 %vm721_vm4, %v5308_v54  ;;  %v353_v3 = vrot.slane %v352_v55, 4  ;;  %v360_v6 = vshrl.u32 %v241_v53, 16  ;;  %v363_v7 = vshll.u32 %v241_v53, 16 }
  0x35   : > { %v2151_v5 = vrot.slane %v2149_v57, 5  ;;  %5965 = vmatpush3.bf16.msra.mxu0 %v3044_v28  ;;  %v2146_v9 = vor.u32 %v2145_v63, %v2142_v56  ;;  %v2155_v10 = vrot.slane %v2153_v0, 4  ;;  %v2161_v11 = vrot.slane %v2159_v1, 5  ;;  %v6794_v28 = vld [vmem:[%s6683_s27 + $0x34] sm:$0xf] }
  0x36   : > { %v348_v8 = vsel %vm6725_vm3, %v343_v60, %v347_v45  ;;  %v358_v12 = vsel %vm6725_vm3, %v353_v3, %v357_v51  ;;  %v362_v17 = vrot.slane %v360_v6, 4  ;;  %v365_v18 = vrot.slane %v363_v7, 5  ;;  %v272_v57 = vld [vmem:[%s6683_s27 + $0x38] sm:$0x1]  ;;  %v5270_v3 = vld [vmem:[%s6683_s27 + $0x3c] sm:$0xf] }
  0x37   : > { %v369_v19 = vshll.u32 %v242_v2, 16  ;;  %v5082_v21 = vcombine.low %v348_v8, %v358_v12  ;;  %v2147_v22 = vrot.slane %v2146_v9, 4  ;;  %v2156_v23 = vor.u32 %v2155_v10, %v2151_v5  ;;  %v6817_v9 = vld [vmem:[%s6683_s27 + $0x40] sm:$0xf] }
  0x38   : > { %v373_v24 = vshrl.u32 %v242_v2, 16  ;;  %v366_v29 = vor.u32 %v365_v18, %v362_v17  ;;  %v379_v32 = vshll.u32 %v271_v13, 16  ;;  %v2164_v33 = vshrl.u32 %v5267_v14, 16 }
  0x39   : > { %v371_v30 = vrot.slane %v369_v19, 5  ;;  %5800 = vmatprep.mubr.msk.bf16.mxu1 %vm721_vm4, %v5082_v21  ;;  %v2152_v34 = vsel %vm6725_vm3, %v2147_v22, %v2151_v5  ;;  %v2157_v35 = vrot.slane %v2156_v23, 4  ;;  %v2167_v38 = vshll.u32 %v5267_v14, 16  ;;  %v6822_v19 = vld [vmem:[%s6683_s27 + $0x44] sm:$0x1] }
  0x3a   : > { %v375_v36 = vrot.slane %v373_v24, 4  ;;  %v367_v39 = vrot.slane %v366_v29, 4  ;;  %v381_v40 = vrot.slane %v379_v32, 5  ;;  %v2166_v41 = vrot.slane %v2164_v33, 4  ;;  %v6830_v32 = vld [vmem:[%s8520_s1 + $0xc] sm:$0x3] }
  0x3b   : > { %v2173_v42 = vshll.u32 %v6794_v28, 16  ;;  %v2162_v25 = vsel %vm6725_vm3, %v2157_v35, %v2161_v11  ;;  %v2169_v46 = vrot.slane %v2167_v38, 5  ;;  %v2177_v48 = vshrl.u32 %v6794_v28, 16  ;;  %6424 = vmatprep.subr.msk.bf16.mxu0 %vm770_vm0, %v6830_v32 }
  0x3c   : > { %v376_v45 = vor.u32 %v375_v36, %v371_v30  ;;  %v5309_v50 = vcombine.low %v2152_v34, %v2162_v25  ;;  %v372_v51 = vsel %vm6725_vm3, %v367_v39, %v371_v30  ;;  %v2183_v53 = vshll.u32 %v6800_v37, 16  ;;  %v245_v30 = vld [vmem:[%s6683_s27 + $0x3c] sm:$0xf] }
  0x3d   : > { %v2175_v52 = vrot.slane %v2173_v42, 5  ;;  %v2170_v55 = vor.u32 %v2169_v46, %v2166_v41  ;;  %v2179_v56 = vrot.slane %v2177_v48, 4  ;;  %v384_v60 = vshrl.u32 %v243_v43, 16 }
  0x3e   : > { %v377_v54 = vrot.slane %v376_v45, 4  ;;  %5936 = vmatprep.mubr.msk.bf16.mxu0 %vm721_vm4, %v5309_v50  ;;  %v2185_v63 = vrot.slane %v2183_v53, 5  ;;  %v387_v0 = vshll.u32 %v243_v43, 16  ;;  %v393_v1 = vshll.u32 %v244_v49, 16  ;;  %v246_v45 = vld [vmem:[%s6683_s27 + $0x40] sm:$0xf] }
  0x3f   : > { %v397_v2 = vshrl.u32 %v244_v49, 16  ;;  %v2171_v6 = vrot.slane %v2170_v55, 4  ;;  %v2180_v7 = vor.u32 %v2179_v56, %v2175_v52  ;;  %v386_v8 = vrot.slane %v384_v60, 4  ;;  %v5273_v53 = vld [vmem:[%s6683_s27 + $0x48] sm:$0xf] }
  0x40   : > { %v382_v5 = vsel %vm6725_vm3, %v377_v54, %v381_v40  ;;  %v389_v11 = vrot.slane %v387_v0, 5  ;;  %v395_v13 = vrot.slane %v393_v1, 5  ;;  %v403_v18 = vshll.u32 %v272_v57, 16 }
  0x41   : > { %v5083_v10 = vcombine.low %v372_v51, %v382_v5  ;;  %v399_v14 = vrot.slane %v397_v2, 4  ;;  %v2176_v12 = vsel %vm6725_vm3, %v2171_v6, %v2175_v52  ;;  %v2181_v17 = vrot.slane %v2180_v7, 4  ;;  %v273_v51 = vld [vmem:[%s6683_s27 + $0x44] sm:$0x1]  ;;  %v6848_v5 = vld [vmem:[%s6683_s27 + $0x4c] sm:$0xf] }
  0x42   : > { %v2188_v21 = vshrl.u32 %v5270_v3, 16  ;;  %v390_v22 = vor.u32 %v389_v11, %v386_v8  ;;  %v2191_v24 = vshll.u32 %v5270_v3, 16  ;;  %v2197_v29 = vshll.u32 %v6817_v9, 16 }
  0x43   : > { %5801 = vmatmul.mubr.msk.bf16.gmra.mrb[4].mxu1 %vm721_vm4, %v5083_v10  ;;  %v400_v23 = vor.u32 %v399_v14, %v395_v13  ;;  %v2186_v33 = vsel %vm6725_vm3, %v2181_v17, %v2185_v63  ;;  %v405_v34 = vrot.slane %v403_v18, 5  ;;  %v2201_v36 = vshrl.u32 %v6817_v9, 16  ;;  %v6853_v14 = vld [vmem:[%s6683_s27 + $0x50] sm:$0x1] }
  0x44   : > { %v2190_v35 = vrot.slane %v2188_v21, 4  ;;  %v5310_v38 = vcombine.low %v2176_v12, %v2186_v33  ;;  %v391_v39 = vrot.slane %v390_v22, 4  ;;  %v2193_v41 = vrot.slane %v2191_v24, 5  ;;  %v6856_v12 = vld [vmem:[%s6683_s27 + $0x48] sm:$0xf] }
  0x45   : > { %v401_v40 = vrot.slane %v400_v23, 4  ;;  %v2199_v42 = vrot.slane %v2197_v29, 5  ;;  %v2203_v43 = vrot.slane %v2201_v36, 4  ;;  %v2207_v25 = vshll.u32 %v6822_v19, 16  ;;  %v6864_v36 = vld [vmem:[%s6683_s27 + $0x4c] sm:$0xf] }
  0x46   : > { %v408_v46 = vshrl.u32 %v245_v30, 16  ;;  %5937 = vmatmul.mubr.msk.bf16.gmra.mrb[4].mxu0 %vm721_vm4, %v5310_v38  ;;  %v396_v48 = vsel %vm6725_vm3, %v391_v39, %v395_v13  ;;  %v2194_v50 = vor.u32 %v2193_v41, %v2190_v35  ;;  %v411_v52 = vshll.u32 %v245_v30, 16 }
  0x47   : > { %v406_v49 = vsel %vm6725_vm3, %v401_v40, %v405_v34  ;;  %v2204_v55 = vor.u32 %v2203_v43, %v2199_v42  ;;  %v2209_v56 = vrot.slane %v2207_v25, 5  ;;  %v417_v0 = vshll.u32 %v246_v45, 16 }
  0x48   : > { %v5084_v54 = vcombine.low %v396_v48, %v406_v49  ;;  %v410_v57 = vrot.slane %v408_v46, 4  ;;  %v2195_v60 = vrot.slane %v2194_v50, 4  ;;  %v413_v63 = vrot.slane %v411_v52, 5  ;;  %v5276_v49 = vld [vmem:[%s6683_s27 + $0x54] sm:$0xf] }
  0x49   : > { %v421_v1 = vshrl.u32 %v246_v45, 16  ;;  %v2205_v2 = vrot.slane %v2204_v55, 4  ;;  %v427_v3 = vshll.u32 %v273_v51, 16  ;;  %v2212_v6 = vshrl.u32 %v5273_v53, 16 }
  0x4a   : > { %5804 = vmatprep.mubr.msk.bf16.mxu1 %vm721_vm4, %v5084_v54  ;;  %v2215_v7 = vshll.u32 %v5273_v53, 16  ;;  %v2200_v8 = vsel %vm6725_vm3, %v2195_v60, %v2199_v42  ;;  %v414_v10 = vor.u32 %v413_v63, %v410_v57  ;;  %v419_v11 = vrot.slane %v417_v0, 5  ;;  %v274_v42 = vld [vmem:[%s6683_s27 + $0x50] sm:$0x1]  ;;  %v6878_v54 = vld [vmem:[%s6683_s27 + $0x58] sm:$0xf] }
  0x4b   : > { %v423_v13 = vrot.slane %v421_v1, 4  ;;  %v2210_v17 = vsel %vm6725_vm3, %v2205_v2, %v2209_v56  ;;  %v429_v18 = vrot.slane %v427_v3, 5  ;;  %v2214_v21 = vrot.slane %v2212_v6, 4  ;;  %v6883_v2 = vld [vmem:[%s6683_s27 + $0x5c] sm:$0x1] }
  0x4c   : > { %v2217_v22 = vrot.slane %v2215_v7, 5  ;;  %v5311_v23 = vcombine.low %v2200_v8, %v2210_v17  ;;  %v415_v24 = vrot.slane %v414_v10, 4  ;;  %v2221_v30 = vshll.u32 %v6848_v5, 16 }
  0x4d   : > { %v424_v29 = vor.u32 %v423_v13, %v419_v11  ;;  %v2225_v34 = vshrl.u32 %v6848_v5, 16  ;;  %v2231_v35 = vshll.u32 %v6853_v14, 16  ;;  %v432_v38 = vshrl.u32 %v6856_v12, 16 }
  0x4e   : > { %v2218_v33 = vor.u32 %v2217_v22, %v2214_v21  ;;  %5940 = vmatprep.mubr.msk.bf16.mxu0 %vm721_vm4, %v5311_v23  ;;  %v420_v39 = vsel %vm6725_vm3, %v415_v24, %v419_v11  ;;  %v2223_v41 = vrot.slane %v2221_v30, 5  ;;  %v435_v43 = vshll.u32 %v6856_v12, 16  ;;  %v6889_v21 = vld [vmem:[%s6683_s27 + $0x54] sm:$0xf]  ;;  %v6895_v30 = vld [vmem:[%s6683_s27 + $0x58] sm:$0xf] }
  0x4f   : > { %v425_v40 = vrot.slane %v424_v29, 4  ;;  %v2227_v45 = vrot.slane %v2225_v34, 4  ;;  %v2233_v46 = vrot.slane %v2231_v35, 5  ;;  %v434_v48 = vrot.slane %v432_v38, 4 }
  0x50   : > { %v2219_v25 = vrot.slane %v2218_v33, 4  ;;  %v437_v51 = vrot.slane %v435_v43, 5  ;;  %v441_v52 = vshll.u32 %v6864_v36, 16  ;;  %v445_v53 = vshrl.u32 %v6864_v36, 16 }
  0x51   : > { %v430_v50 = vsel %vm6725_vm3, %v425_v40, %v429_v18  ;;  %v2228_v57 = vor.u32 %v2227_v45, %v2223_v41  ;;  %v451_v60 = vshll.u32 %v274_v42, 16  ;;  %v2236_v3 = vshrl.u32 %v5276_v49, 16 }
  0x52   : > { %v5085_v55 = vcombine.low %v420_v39, %v430_v50  ;;  %v2224_v56 = vsel %vm6725_vm3, %v2219_v25, %v2223_v41  ;;  %v438_v63 = vor.u32 %v437_v51, %v434_v48  ;;  %v443_v0 = vrot.slane %v441_v52, 5  ;;  %v275_v41 = vld [vmem:[%s6683_s27 + $0x5c] sm:$0x1]  ;;  %v6911_v50 = vld [vmem:[%s8520_s1 + $0x4] sm:$0x3] }
  0x53   : > { %v447_v1 = vrot.slane %v445_v53, 4  ;;  %v2229_v6 = vrot.slane %v2228_v57, 4  ;;  %v453_v7 = vrot.slane %v451_v60, 5  ;;  %v2239_v8 = vshll.u32 %v5276_v49, 16  ;;  %v5279_v49 = vld [vmem:[%s6683_s27 + $0x60] sm:$0xf]  ;;  %6419 = vmatprep.subr.msk.bf16.mxu1 %vm770_vm0, %v6911_v50 }
  0x54   : > { %5805 = vmatmul.mubr.msk.bf16.gmra.mrb[8].mxu1 %vm721_vm4, %v5085_v55  ;;  %v2245_v10 = vshll.u32 %v6878_v54, 16  ;;  %v439_v11 = vrot.slane %v438_v63, 4  ;;  %v2238_v17 = vrot.slane %v2236_v3, 4  ;;  %v2249_v18 = vshrl.u32 %v6878_v54, 16 }
  0x55   : > { %v448_v13 = vor.u32 %v447_v1, %v443_v0  ;;  %v2234_v22 = vsel %vm6725_vm3, %v2229_v6, %v2233_v46  ;;  %v2241_v23 = vrot.slane %v2239_v8, 5  ;;  %v2255_v29 = vshll.u32 %v6883_v2, 16  ;;  %v6922_v6 = vld [vmem:[%s6683_s27 + $0x68] sm:$0x1] }
  0x56   : > { %v2247_v24 = vrot.slane %v2245_v10, 5  ;;  %v5312_v33 = vcombine.low %v2224_v56, %v2234_v22  ;;  %v444_v34 = vsel %vm6725_vm3, %v439_v11, %v443_v0  ;;  %v2251_v38 = vrot.slane %v2249_v18, 4  ;;  %v6914_v56 = vld [vmem:[%s6683_s27 + $0x64] sm:$0xf]  ;;  %v6928_v18 = vld [vmem:[%s6683_s27 + $0x60] sm:$0xf] }
  0x57   : > { %v449_v35 = vrot.slane %v448_v13, 4  ;;  %v2242_v39 = vor.u32 %v2241_v23, %v2238_v17  ;;  %v2257_v40 = vrot.slane %v2255_v29, 5  ;;  %v456_v42 = vshrl.u32 %v6889_v21, 16 }
  0x58   : > { %v459_v43 = vshll.u32 %v6889_v21, 16  ;;  %5941 = vmatmul.mubr.msk.bf16.gmra.mrb[8].mxu0 %vm721_vm4, %v5312_v33  ;;  %v2252_v45 = vor.u32 %v2251_v38, %v2247_v24  ;;  %v465_v46 = vshll.u32 %v6895_v30, 16  ;;  %v469_v48 = vshrl.u32 %v6895_v30, 16 }
  0x59   : > { %v454_v25 = vsel %vm6725_vm3, %v449_v35, %v453_v7  ;;  %v2243_v52 = vrot.slane %v2242_v39, 4  ;;  %v458_v53 = vrot.slane %v456_v42, 4  ;;  %v475_v0 = vshll.u32 %v275_v41, 16  ;;  %v276_v42 = vld [vmem:[%s6683_s27 + $0x68] sm:$0x1] }
  0x5a   : > { %v5086_v51 = vcombine.low %v444_v34, %v454_v25  ;;  %v461_v55 = vrot.slane %v459_v43, 5  ;;  %v2253_v57 = vrot.slane %v2252_v45, 4  ;;  %v467_v60 = vrot.slane %v465_v46, 5 }
  0x5b   : > { %v471_v63 = vrot.slane %v469_v48, 4  ;;  %v2248_v1 = vsel %vm6725_vm3, %v2243_v52, %v2247_v24  ;;  %v2260_v7 = vshrl.u32 %v5279_v49, 16  ;;  %v2263_v8 = vshll.u32 %v5279_v49, 16  ;;  %v6931_v24 = vld [vmem:[%s6683_s27 + $0x64] sm:$0xf] }
  0x5c   : > { %5808 = vmatprep.mubr.msk.bf16.mxu1 %vm721_vm4, %v5086_v51  ;;  %v462_v3 = vor.u32 %v461_v55, %v458_v53  ;;  %v2258_v10 = vsel %vm6725_vm3, %v2253_v57, %v2257_v40  ;;  %v477_v13 = vrot.slane %v475_v0, 5  ;;  %v2269_v17 = vshll.u32 %v6914_v56, 16  ;;  %v5339_v57 = vld [vmem:[%s6683_s27 + $0xc] sm:$0xe] }
  0x5d   : > { %v472_v11 = vor.u32 %v471_v63, %v467_v60  ;;  %v5313_v22 = vcombine.low %v2248_v1, %v2258_v10  ;;  %v2262_v29 = vrot.slane %v2260_v7, 4  ;;  %v2265_v33 = vrot.slane %v2263_v8, 5  ;;  %v6953_v10 = vld [vmem:[%s6683_s27 + $0x70] sm:$0xf] }
  0x5e   : > { %v463_v23 = vrot.slane %v462_v3, 4  ;;  %v2271_v35 = vrot.slane %v2269_v17, 5  ;;  %v2273_v38 = vshrl.u32 %v6914_v56, 16  ;;  %v2279_v39 = vshll.u32 %v6922_v6, 16  ;;  %v6947_v3 = vld [vmem:[%s6683_s27 + $0x6c] sm:$0xf] }
  0x5f   : > { %v473_v34 = vrot.slane %v472_v11, 4  ;;  %5944 = vmatprep.mubr.msk.bf16.mxu0 %vm721_vm4, %v5313_v22  ;;  %v2266_v41 = vor.u32 %v2265_v33, %v2262_v29  ;;  %v480_v43 = vshrl.u32 %v6928_v18, 16  ;;  %v483_v25 = vshll.u32 %v6928_v18, 16 }
  0x60   : > { %v468_v40 = vsel %vm6725_vm3, %v463_v23, %v467_v60  ;;  %v2275_v46 = vrot.slane %v2273_v38, 4  ;;  %v2281_v48 = vrot.slane %v2279_v39, 5  ;;  %v489_v49 = vshll.u32 %v6931_v24, 16 }
  0x61   : > { %v478_v45 = vsel %vm6725_vm3, %v473_v34, %v477_v13  ;;  %v2267_v52 = vrot.slane %v2266_v41, 4  ;;  %v482_v53 = vrot.slane %v480_v43, 4  ;;  %v485_v55 = vrot.slane %v483_v25, 5  ;;  %v277_v41 = vld [vmem:[%s6683_s27 + $0x74] sm:$0x1] }
  0x62   : > { %v5087_v51 = vcombine.low %v468_v40, %v478_v45  ;;  %v2276_v60 = vor.u32 %v2275_v46, %v2271_v35  ;;  %v491_v63 = vrot.slane %v489_v49, 5  ;;  %v493_v0 = vshrl.u32 %v6931_v24, 16  ;;  %v5340_v43 = vld [vmem:[%s6683_s27 + $0x18] sm:$0xe] }
  0x63   : > { %v499_v1 = vshll.u32 %v276_v42, 16  ;;  %v2272_v7 = vsel %vm6725_vm3, %v2267_v52, %v2271_v35  ;;  %v486_v8 = vor.u32 %v485_v55, %v482_v53  ;;  %vm1275_vm5 = vcmask 1042432   ;;  %v6979_v49 = vld [vmem:[%s6683_s27 + $0x78] sm:$0xf]  ;;  %v6982_v53 = vld [vmem:[%s6683_s27 + $0x7c] sm:$0xf] }
  0x64   : > { %5809 = vmatmul.mubr.msk.bf16.gmra.mrb[12].mxu1 %vm721_vm4, %v5087_v51  ;;  %vm1276_vm6 = vcmask 1046532   ;;  %v2277_v11 = vrot.slane %v2276_v60, 4  ;;  %v495_v13 = vrot.slane %v493_v0, 4  ;;  %v5355_v23 = vrot.slane %v5339_v57, 9 }
  0x65   : > { %v501_v17 = vrot.slane %v499_v1, 5  ;;  %vm6955_vm7 = vmor %vm1275_vm5, %vm1276_vm6  ;;  %v487_v29 = vrot.slane %v486_v8, 4  ;;  %v2837_v33 = vrot.slane %v2835_v58, 4  ;;  %v504_v34 = vshrl.u32 %v6947_v3, 16 }
  0x66   : > { %v507_v35 = vshll.u32 %v6947_v3, 16  ;;  %v2282_v38 = vsel %vm6725_vm3, %v2277_v11, %v2281_v48  ;;  %v496_v39 = vor.u32 %v495_v13, %v491_v63  ;;  %v2836_v40 = vsel %vm6955_vm7, %v5355_v23, %v2835_v58 }
  0x67   : > { %v513_v42 = vshll.u32 %v6953_v10, 16  ;;  %v5314_v25 = vcombine.low %v2272_v7, %v2282_v38  ;;  %v492_v45 = vsel %vm6725_vm3, %v487_v29, %v491_v63  ;;  %v2839_v46 = vsel %vm6955_vm7, %v2837_v33, %v2838_v59  ;;  %v278_v59 = vld [vmem:[%s6683_s27 + $0x80] sm:$0x1]  ;;  %v7005_v33 = vld [vmem:[%s6683_s27 + $0x84] sm:$0xf] }
  0x68   : > { %v506_v48 = vrot.slane %v504_v34, 4  ;;  %v497_v15 = vrot.slane %v496_v39, 4  ;;  %v5372_v51 = vcombine.low %v2836_v40, %v2839_v46  ;;  %v509_v58 = vrot.slane %v507_v35, 5  ;;  %v7011_v38 = vld [vmem:[%s6683_s27 + $0x88] sm:$0xf] }
  0x69   : > { %v515_v52 = vrot.slane %v513_v42, 5  ;;  %5945 = vmatmul.mubr.msk.bf16.gmra.mrb[12].mxu0 %vm721_vm4, %v5314_v25  ;;  %v517_v55 = vshrl.u32 %v6953_v10, 16  ;;  %v523_v57 = vshll.u32 %v277_v41, 16  ;;  %v5356_v60 = vrot.slane %v5340_v43, 9  ;;  %v7019_v42 = vld [vmem:[%s8520_s1 + $0xe] sm:$0x3] }
  0x6a   : > { %v2846_v20 = vsel %vm6955_vm7, %v6761_v26, %v2845_v27  ;;  %v502_v63 = vsel %vm6725_vm3, %v497_v15, %v501_v17  ;;  %5966 = vmatprep.mubr.msk.bf16.mxu0 %vm721_vm4, %v5372_v51  ;;  %v510_v0 = vor.u32 %v509_v58, %v506_v48  ;;  %v3403_v1 = vsel %vm770_vm0, %v6830_v32, 0  ;;  %v5341_v27 = vld [vmem:[%s6683_s27 + $0x24] sm:$0xe]  ;;  %v279_v48 = vld [vmem:[%s6683_s27 + $0x8c] sm:$0x1] }
  0x6b   : > { %v528_v7 = vshrl.u32 %v6979_v49, 16  ;;  %v5088_v8 = vcombine.low %v492_v45, %v502_v63  ;;  %v519_v62 = vrot.slane %v517_v55, 4  ;;  %v525_v11 = vrot.slane %v523_v57, 5  ;;  %v5342_v55 = vld [vmem:[%s6683_s27 + $0x30] sm:$0xe] }
  0x6c   : > { %v2843_v26 = vsel %vm6955_vm7, %v5356_v60, %v2842_v16  ;;  %v511_v13 = vrot.slane %v510_v0, 4  ;;  %v531_v29 = vshll.u32 %v6979_v49, 16  ;;  %v537_v34 = vshll.u32 %v6982_v53, 16 }
  0x6d   : > { %v5373_v17 = vcombine.low %v2843_v26, %v2846_v20  ;;  %v530_v23 = vrot.slane %v528_v7, 4  ;;  %5812 = vmatprep.mubr.msk.bf16.mxu1 %vm721_vm4, %v5088_v8  ;;  %v520_v32 = vor.u32 %v519_v62, %v515_v52  ;;  %v541_v35 = vshrl.u32 %v6982_v53, 16  ;;  %v7035_v7 = vld [vmem:[%s6683_s27 + $0x90] sm:$0xf] }
  0x6e   : > { %v547_v61 = vshll.u32 %v278_v59, 16  ;;  %v516_v16 = vsel %vm6725_vm3, %v511_v13, %v515_v52  ;;  %v533_v39 = vrot.slane %v531_v29, 5  ;;  %v5357_v40 = vrot.slane %v5341_v27, 9  ;;  %v7038_v27 = vld [vmem:[%s6683_s27 + $0x94] sm:$0xf] }
  0x6f   : > { %v2849_v41 = vrot.slane %v6771_v44, 5  ;;  %v521_v43 = vrot.slane %v520_v32, 4  ;;  %v539_v25 = vrot.slane %v537_v34, 5  ;;  %v543_v45 = vrot.slane %v541_v35, 4 }
  0x70   : > { %v549_v46 = vrot.slane %v547_v61, 5  ;;  %v534_v15 = vor.u32 %v533_v39, %v530_v23  ;;  %v2852_v52 = vrot.slane %v6777_v47, 5  ;;  %v552_v60 = vshrl.u32 %v7005_v33, 16  ;;  %v280_v61 = vld [vmem:[%s6683_s27 + $0x98] sm:$0x1] }
  0x71   : > { %v2850_v51 = vsel %vm6955_vm7, %v5357_v40, %v2849_v41  ;;  %v2851_v58 = vrot.slane %v2849_v41, 4  ;;  %v526_v44 = vsel %vm6725_vm3, %v521_v43, %v525_v11  ;;  %5967 = vmatmul.mubr.msk.bf16.vlgmr.msra.gmra.mrb[0].mxu0 %vm721_vm4, %v5373_v17  ;;  %v544_v57 = vor.u32 %v543_v45, %v539_v25  ;;  %v5343_v43 = vld [vmem:[%s6683_s27 + $0x3c] sm:$0xe] }
  0x72   : > { %v555_v20 = vshll.u32 %v7005_v33, 16  ;;  %v5089_v59 = vcombine.low %v516_v16, %v526_v44  ;;  %5999 = vmatpush3.bf16.msra.mxu0 %v3403_v1  ;;  %v535_v63 = vrot.slane %v534_v15, 4  ;;  %v561_v47 = vshll.u32 %v7011_v38, 16  ;;  %v7057_v15 = vld [vmem:[%s6683_s27 + $0x9c] sm:$0xf] }
  0x73   : > { %v2853_v0 = vsel %vm6955_vm7, %v2851_v58, %v2852_v52  ;;  %v545_v8 = vrot.slane %v544_v57, 4  ;;  %v554_v11 = vrot.slane %v552_v60, 4  ;;  %6425 = vmatprep.subr.msk.bf16.mxu0 %vm770_vm0, %v7019_v42  ;;  %v565_v17 = vshrl.u32 %v7011_v38, 16  ;;  %v7068_v60 = vld [vmem:[%s6683_s27 + $0xa0] sm:$0xf] }
  0x74   : > { %v5374_v62 = vcombine.low %v2850_v51, %v2853_v0  ;;  %v557_v26 = vrot.slane %v555_v20, 5  ;;  %5813 = vmatmul.mubr.msk.bf16.gmra.mrb[16].mxu1 %vm721_vm4, %v5089_v59  ;;  %v540_v1 = vsel %vm6725_vm3, %v535_v63, %v539_v25  ;;  %v563_v13 = vrot.slane %v561_v47, 5 }
  0x75   : > { %v571_v23 = vshll.u32 %v279_v48, 16  ;;  %v550_v29 = vsel %vm6725_vm3, %v545_v8, %v549_v46  ;;  %v5358_v34 = vrot.slane %v5342_v55, 9  ;;  %v2856_v35 = vrot.slane %v6794_v28, 5 }
  0x76   : > { %5970 = vmatprep.mubr.msk.bf16.mxu0 %vm721_vm4, %v5374_v62  ;;  %v558_v32 = vor.u32 %v557_v26, %v554_v11  ;;  %v5090_v16 = vcombine.low %v540_v1, %v550_v29  ;;  %v567_v39 = vrot.slane %v565_v17, 4  ;;  %v2859_v41 = vrot.slane %v6800_v37, 5  ;;  %v281_v26 = vld [vmem:[%s6683_s27 + $0xa4] sm:$0x1] }
  0x77   : > { %v573_v40 = vrot.slane %v571_v23, 5  ;;  %v2857_v45 = vsel %vm6955_vm7, %v5358_v34, %v2856_v35  ;;  %v2858_v48 = vrot.slane %v2856_v35, 4  ;;  %v576_v46 = vshrl.u32 %v7035_v7, 16 }
  0x78   : > { %v559_v25 = vrot.slane %v558_v32, 4  ;;  %5816 = vmatprep.mubr.msk.bf16.mxu1 %vm721_vm4, %v5090_v16  ;;  %v568_v28 = vor.u32 %v567_v39, %v563_v13  ;;  %v579_v51 = vshll.u32 %v7035_v7, 16  ;;  %v585_v58 = vshll.u32 %v7038_v27, 16 }
  0x79   : > { %v589_v37 = vshrl.u32 %v7038_v27, 16  ;;  %v2860_v55 = vsel %vm6955_vm7, %v2858_v48, %v2859_v41  ;;  %v578_v44 = vrot.slane %v576_v46, 4  ;;  %v595_v57 = vshll.u32 %v280_v61, 16  ;;  %v7083_v41 = vld [vmem:[%s6683_s27 + $0xa8] sm:$0xf] }
  0x7a   : > { %v564_v52 = vsel %vm6725_vm3, %v559_v25, %v563_v13  ;;  %v569_v20 = vrot.slane %v568_v28, 4  ;;  %v5375_v59 = vcombine.low %v2857_v45, %v2860_v55  ;;  %v581_v63 = vrot.slane %v579_v51, 5  ;;  %v7090_v48 = vld [vmem:[%s6683_s27 + $0xac] sm:$0xf] }
  0x7b   : > { %v587_v0 = vrot.slane %v585_v58, 5  ;;  %v591_v47 = vrot.slane %v589_v37, 4  ;;  %v597_v8 = vrot.slane %v595_v57, 5  ;;  %v5359_v62 = vrot.slane %v5343_v43, 9  ;;  %v282_v57 = vld [vmem:[%s6683_s27 + $0xb0] sm:$0x1] }
  0x7c   : > { %v2863_v11 = vrot.slane %v6817_v9, 5  ;;  %v574_v1 = vsel %vm6725_vm3, %v569_v20, %v573_v40  ;;  %5971 = vmatmul.mubr.msk.bf16.gmra.mrb[4].mxu0 %vm721_vm4, %v5375_v59  ;;  %v582_v13 = vor.u32 %v581_v63, %v578_v44  ;;  %v2866_v17 = vrot.slane %v6822_v19, 5  ;;  %v5344_v9 = vld [vmem:[%s6683_s27 + $0x48] sm:$0xe] }
  0x7d   : > { %v600_v23 = vshrl.u32 %v7057_v15, 16  ;;  %v5091_v29 = vcombine.low %v564_v52, %v574_v1  ;;  %v592_v32 = vor.u32 %v591_v47, %v587_v0  ;;  %v603_v39 = vshll.u32 %v7057_v15, 16 }
  0x7e   : > { %v2864_v34 = vsel %vm6955_vm7, %v5359_v62, %v2863_v11  ;;  %v2865_v35 = vrot.slane %v2863_v11, 4  ;;  %v583_v61 = vrot.slane %v582_v13, 4  ;;  %v609_v40 = vshll.u32 %v7068_v60, 16 }
  0x7f   : > { %v602_v16 = vrot.slane %v600_v23, 4  ;;  %5817 = vmatmul.mubr.msk.bf16.gmra.mrb[20].mxu1 %vm721_vm4, %v5091_v29  ;;  %v593_v19 = vrot.slane %v592_v32, 4  ;;  %v613_v25 = vshrl.u32 %v7068_v60, 16  ;;  %v619_v45 = vshll.u32 %v281_v26, 16  ;;  %v5345_v26 = vld [vmem:[%s6683_s27 + $0x54] sm:$0xe] }
  0x80   : > { %v2867_v43 = vsel %vm6955_vm7, %v2865_v35, %v2866_v17  ;;  %v588_v46 = vsel %vm6725_vm3, %v583_v61, %v587_v0  ;;  %v605_v51 = vrot.slane %v603_v39, 5  ;;  %v611_v58 = vrot.slane %v609_v40, 5 }
  0x81   : > { %v5376_v28 = vcombine.low %v2864_v34, %v2867_v43  ;;  %v598_v37 = vsel %vm6725_vm3, %v593_v19, %v597_v8  ;;  %v615_v52 = vrot.slane %v613_v25, 4  ;;  %v621_v55 = vrot.slane %v619_v45, 5  ;;  %v7118_v25 = vld [vmem:[%s6683_s27 + $0xb8] sm:$0xf] }
  0x82   : > { %v5360_v44 = vrot.slane %v5344_v9, 9  ;;  %v5092_v20 = vcombine.low %v588_v46, %v598_v37  ;;  %v606_v59 = vor.u32 %v605_v51, %v602_v16  ;;  %v2870_v63 = vrot.slane %v6848_v5, 5  ;;  %v7113_v16 = vld [vmem:[%s6683_s27 + $0xb4] sm:$0xf] }
  0x83   : > { %5974 = vmatprep.mubr.msk.bf16.mxu0 %vm721_vm4, %v5376_v28  ;;  %v2873_v47 = vrot.slane %v6853_v14, 5  ;;  %v616_v0 = vor.u32 %v615_v52, %v611_v58  ;;  %v624_v62 = vshrl.u32 %v7083_v41, 16  ;;  %v627_v11 = vshll.u32 %v7083_v41, 16  ;;  %v7124_v52 = vld [vmem:[%s6683_s27 + $0xbc] sm:$0x1] }
  0x84   : > { %v633_v8 = vshll.u32 %v7090_v48, 16  ;;  %5820 = vmatprep.mubr.msk.bf16.mxu1 %vm721_vm4, %v5092_v20  ;;  %v607_v1 = vrot.slane %v606_v59, 4  ;;  %v2871_v13 = vsel %vm6955_vm7, %v5360_v44, %v2870_v63  ;;  %v2872_v17 = vrot.slane %v2870_v63, 4 }
  0x85   : > { %v637_v5 = vshrl.u32 %v7090_v48, 16  ;;  %v617_v14 = vrot.slane %v616_v0, 4  ;;  %v626_v23 = vrot.slane %v624_v62, 4  ;;  %v629_v29 = vrot.slane %v627_v11, 5  ;;  %v5346_v62 = vld [vmem:[%s6683_s27 + $0x60] sm:$0xe] }
  0x86   : > { %v635_v32 = vrot.slane %v633_v8, 5  ;;  %v612_v34 = vsel %vm6725_vm3, %v607_v1, %v611_v58  ;;  %v2874_v35 = vsel %vm6955_vm7, %v2872_v17, %v2873_v47  ;;  %v643_v61 = vshll.u32 %v282_v57, 16  ;;  %v5347_v17 = vld [vmem:[%s6683_s27 + $0x6c] sm:$0xe] }
  0x87   : > { %v639_v9 = vrot.slane %v637_v5, 4  ;;  %v622_v39 = vsel %vm6725_vm3, %v617_v14, %v621_v55  ;;  %v5377_v40 = vcombine.low %v2871_v13, %v2874_v35  ;;  %v630_v19 = vor.u32 %v629_v29, %v626_v23  ;;  %v5283_v13 = vld [vmem:[%s6683_s27 + $0x70] sm:$0xf] }
  0x88   : > { %v5361_v43 = vrot.slane %v5345_v26, 9  ;;  %v5093_v45 = vcombine.low %v612_v34, %v622_v39  ;;  %v645_v28 = vrot.slane %v643_v61, 5  ;;  %v2877_v51 = vrot.slane %v6878_v54, 5 }
  0x89   : > { %v640_v46 = vor.u32 %v639_v9, %v635_v32  ;;  %5975 = vmatmul.mubr.msk.bf16.gmra.mrb[8].mxu0 %vm721_vm4, %v5377_v40  ;;  %v631_v58 = vrot.slane %v630_v19, 4  ;;  %v2880_v37 = vrot.slane %v6883_v2, 5  ;;  %v648_v55 = vshrl.u32 %v7113_v16, 16 }
  0x8a   : > { %v651_v44 = vshll.u32 %v7113_v16, 16  ;;  %5821 = vmatmul.mubr.msk.bf16.gmra.mrb[24].mxu1 %vm721_vm4, %v5093_v45  ;;  %v2878_v54 = vsel %vm6955_vm7, %v5361_v43, %v2877_v51  ;;  %v2879_v20 = vrot.slane %v2877_v51, 4  ;;  %v657_v59 = vshll.u32 %v7118_v25, 16 }
  0x8b   : > { %v641_v57 = vrot.slane %v640_v46, 4  ;;  %v636_v2 = vsel %vm6725_vm3, %v631_v58, %v635_v32  ;;  %v650_v63 = vrot.slane %v648_v55, 4  ;;  %v661_v0 = vshrl.u32 %v7118_v25, 16  ;;  %v5284_v32 = vld [vmem:[%s6683_s27 + $0x74] sm:$0x1] }
  0x8c   : > { %v653_v47 = vrot.slane %v651_v44, 5  ;;  %v2881_v8 = vsel %vm6955_vm7, %v2879_v20, %v2880_v37  ;;  %v659_v26 = vrot.slane %v657_v59, 5  ;;  %v667_v1 = vshll.u32 %v7124_v52, 16  ;;  %v7157_v55 = vld [vmem:[%s6683_s27 + $0x7c] sm:$0xf] }
  0x8d   : > { %v646_v11 = vsel %vm6725_vm3, %v641_v57, %v645_v28  ;;  %v5378_v14 = vcombine.low %v2878_v54, %v2881_v8  ;;  %v663_v29 = vrot.slane %v661_v0, 4  ;;  %v5362_v35 = vrot.slane %v5346_v62, 9  ;;  %v7160_v44 = vld [vmem:[%s6683_s27 + $0x80] sm:$0x1]  ;;  %v5348_v57 = vld [vmem:[%s6683_s27 + $0x78] sm:$0xe] }
  0x8e   : > { %v5094_v5 = vcombine.low %v636_v2, %v646_v11  ;;  %v654_v23 = vor.u32 %v653_v47, %v650_v63  ;;  %v669_v34 = vrot.slane %v667_v1, 5  ;;  %v2884_v9 = vrot.slane %v6914_v56, 5  ;;  %v6511_v59 = vld [vmem:[%s6683_s27] sm:$0xf]  ;;  %v7167_v2 = vld [vmem:[%s6683_s27 + $0x4] sm:$0xf] }
  0x8f   : > { %v2887_v61 = vrot.slane %v6922_v6, 5  ;;  %5978 = vmatprep.mubr.msk.bf16.mxu0 %vm721_vm4, %v5378_v14  ;;  %v664_v40 = vor.u32 %v663_v29, %v659_v26  ;;  %v5363_v19 = vrot.slane %v5347_v17, 9  ;;  %v2891_v43 = vrot.slane %v5283_v13, 5  ;;  %v5289_v0 = vld [vmem:[%s6683_s27 + $0x88] sm:$0xf] }
  0x90   : > { %5824 = vmatprep.mubr.msk.bf16.mxu1 %vm721_vm4, %v5094_v5  ;;  %v655_v39 = vrot.slane %v654_v23, 4  ;;  %v2885_v45 = vsel %vm6955_vm7, %v5362_v35, %v2884_v9  ;;  %v2886_v46 = vrot.slane %v2884_v9, 4  ;;  %v2894_v56 = vrot.slane %v5284_v32, 5  ;;  %v5349_v62 = vld [vmem:[%s6683_s27 + $0x84] sm:$0xe] }
  0x91   : > { %v665_v28 = vrot.slane %v664_v40, 4  ;;  %v2892_v51 = vsel %vm6955_vm7, %v5363_v19, %v2891_v43  ;;  %v2893_v58 = vrot.slane %v2891_v43, 4  ;;  %v5112_v63 = vcombine.low %v6511_v59, %v7167_v2  ;;  %v5292_v23 = vld [vmem:[%s6683_s27 + $0x94] sm:$0xf]  ;;  %v5350_v29 = vld [vmem:[%s6683_s27 + $0x90] sm:$0xe] }
  0x92   : > { %v660_v6 = vsel %vm6725_vm3, %v655_v39, %v659_v26  ;;  %v2888_v37 = vsel %vm6955_vm7, %v2886_v46, %v2887_v61  ;;  %v5290_v26 = vld [vmem:[%s6683_s27 + $0x8c] sm:$0x1]  ;;  %v5364_v1 = vrot.slane %v5348_v57, 9  ;;  %v2898_v13 = vrot.slane %v7157_v55, 5  ;;  %v5293_v9 = vld [vmem:[%s6683_s27 + $0x98] sm:$0x1] }
  0x93   : > { %v670_v54 = vsel %vm6725_vm3, %v665_v28, %v669_v34  ;;  %v5379_v20 = vcombine.low %v2885_v45, %v2888_v37  ;;  %v2895_v47 = vsel %vm6955_vm7, %v2893_v58, %v2894_v56  ;;  %v2901_v17 = vrot.slane %v7160_v44, 5  ;;  %v5295_v61 = vld [vmem:[%s6683_s27 + $0xa0] sm:$0xf]  ;;  %v6513_v39 = vld [vmem:[%s6683_s27 + $0xc] sm:$0xf] }
  0x94   : > { %v5095_v11 = vcombine.low %v660_v6, %v670_v54  ;;  %v5380_v8 = vcombine.low %v2892_v51, %v2895_v47  ;;  %v5365_v5 = vrot.slane %v5349_v62, 9  ;;  %v2905_v14 = vrot.slane %v5289_v0, 5  ;;  %v7189_v40 = vld [vmem:[%s6683_s27 + $0x10] sm:$0xf]  ;;  %v5296_v46 = vld [vmem:[%s6683_s27 + $0xa4] sm:$0x1] }
  0x95   : > { %5979 = vmatmul.mubr.msk.bf16.gmra.mrb[12].mxu0 %vm721_vm4, %v5379_v20  ;;  %v2899_v32 = vsel %vm6955_vm7, %v5364_v1, %v2898_v13  ;;  %v2900_v34 = vrot.slane %v2898_v13, 4  ;;  %v2908_v35 = vrot.slane %v5290_v26, 5  ;;  %v5113_v19 = vcombine.low %v6513_v39, %v7189_v40  ;;  %v5351_v56 = vld [vmem:[%s6683_s27 + $0x9c] sm:$0xe]  ;;  %v6515_v28 = vld [vmem:[%s6683_s27 + $0x18] sm:$0xf] }
  0x96   : > { %5825 = vmatmul.mubr.msk.bf16.gmra.mrb[28].mxu1 %vm721_vm4, %v5095_v11  ;;  %5982 = vmatprep.mubr.msk.bf16.mxu0 %vm721_vm4, %v5380_v8  ;;  %v2906_v43 = vsel %vm6955_vm7, %v5365_v5, %v2905_v14  ;;  %v2907_v45 = vrot.slane %v2905_v14, 4  ;;  %v7200_v51 = vld [vmem:[%s6683_s27 + $0x1c] sm:$0xf]  ;;  %v5366_v37 = vrot.slane %v5350_v29, 9  ;;  %v2912_v57 = vrot.slane %v5292_v23, 5 }
  0x97   : > { %5830 = vmatprep.mubr.msk.bf16.mxu1 %vm721_vm4, %v5112_v63  ;;  %v2902_v6 = vsel %vm6955_vm7, %v2900_v34, %v2901_v17  ;;  %v5114_v58 = vcombine.low %v6515_v28, %v7200_v51  ;;  %v2915_v59 = vrot.slane %v5293_v9, 5  ;;  %v2919_v63 = vrot.slane %v5295_v61, 5  ;;  %v5298_v47 = vld [vmem:[%s6683_s27 + $0xac] sm:$0xf]  ;;  %v5301_v26 = vld [vmem:[%s6683_s27 + $0xb8] sm:$0xf] }
  0x98   : > { %v5381_v54 = vcombine.low %v2899_v32, %v2902_v6  ;;  %v2909_v20 = vsel %vm6955_vm7, %v2907_v45, %v2908_v35  ;;  %v2914_v62 = vrot.slane %v2912_v57, 4  ;;  %v5367_v11 = vrot.slane %v5351_v56, 9  ;;  %v7213_v17 = vld [vmem:[%s8520_s1 + $0x6] sm:$0x3]  ;;  %v5299_v14 = vld [vmem:[%s6683_s27 + $0xb0] sm:$0x1] }
  0x99   : > { %v5382_v0 = vcombine.low %v2906_v43, %v2909_v20  ;;  %v2922_v8 = vrot.slane %v5296_v46, 5  ;;  %v1489_v1 = vsel %vm770_vm0, %v6911_v50, 0  ;;  %v2921_v13 = vrot.slane %v2919_v63, 4  ;;  %v5352_v34 = vld [vmem:[%s6683_s27 + $0xa8] sm:$0xe] }
  0x9a   : > { %v2913_v5 = vsel %vm6955_vm7, %v5366_v37, %v2912_v57  ;;  %v2916_v50 = vsel %vm6955_vm7, %v2914_v62, %v2915_v59  ;;  %v2926_v23 = vrot.slane %v5298_v47, 5  ;;  %v2920_v29 = vsel %vm6955_vm7, %v5367_v11, %v2919_v63  ;;  %v5302_v9 = vld [vmem:[%s6683_s27 + $0xbc] sm:$0x1]  ;;  %v5353_v61 = vld [vmem:[%s6683_s27 + $0xb4] sm:$0xe] }
  0x9b   : > { %v2923_v32 = vsel %vm6955_vm7, %v2921_v13, %v2922_v8  ;;  %v2933_v35 = vrot.slane %v5301_v26, 5  ;;  %v6517_v39 = vld [vmem:[%s6683_s27 + $0x24] sm:$0xf]  ;;  %v5383_v45 = vcombine.low %v2913_v5, %v2916_v50  ;;  %v5368_v56 = vrot.slane %v5352_v34, 9  ;;  %v7239_v37 = vld [vmem:[%s6683_s27 + $0x34] sm:$0xf] }
  0x9c   : > { %v5384_v46 = vcombine.low %v2920_v29, %v2923_v32  ;;  %v2928_v6 = vrot.slane %v2926_v23, 4  ;;  %v2929_v28 = vrot.slane %v5299_v14, 5  ;;  %v2936_v59 = vrot.slane %v5302_v9, 5  ;;  %v5304_v63 = vld [vmem:[%s6683_s27 + $0xc4] sm:$0xf] }
  0x9d   : > { %5983 = vmatmul.mubr.msk.bf16.gmra.mrb[16].mxu0 %vm721_vm4, %v5381_v54  ;;  %v5369_v54 = vrot.slane %v5353_v61, 9  ;;  %v2935_v20 = vrot.slane %v2933_v35, 4  ;;  %v2927_v47 = vsel %vm6955_vm7, %v5368_v56, %v2926_v23  ;;  %v2940_v62 = vrot.slane %v5304_v63, 5  ;;  %v5305_v26 = vld [vmem:[%s6683_s27 + $0xc8] sm:$0x1] }
  0x9e   : > { %5831 = vmatmul.mubr.msk.bf16.vlgmr.msra.gmra.mrb[0].mxu1 %vm721_vm4, %v5113_v19  ;;  %5986 = vmatprep.mubr.msk.bf16.mxu0 %vm721_vm4, %v5382_v0  ;;  %v7234_v19 = vld [vmem:[%s6683_s27 + $0x28] sm:$0xf]  ;;  %v2930_v0 = vsel %vm6955_vm7, %v2928_v6, %v2929_v28  ;;  %v6521_v13 = vld [vmem:[%s6683_s27 + $0x3c] sm:$0xf]  ;;  %v7259_v5 = vld [vmem:[%s6683_s27 + $0x40] sm:$0xf]  ;;  %v5118_v9 = vcombine.low %v6856_v12, %v6864_v36  ;;  %v5120_v6 = vcombine.low %v6928_v18, %v6931_v24 }
  0x9f   : > { %5863 = vmatpush3.bf16.msra.mxu1 %v1489_v1  ;;  %5834 = vmatprep.mubr.msk.bf16.mxu1 %vm721_vm4, %v5114_v58  ;;  %v5115_v43 = vcombine.low %v6517_v39, %v7234_v19  ;;  %v6519_v58 = vld [vmem:[%s6683_s27 + $0x30] sm:$0xf]  ;;  %v2934_v11 = vsel %vm6955_vm7, %v5369_v54, %v2933_v35  ;;  %v2937_v8 = vsel %vm6955_vm7, %v2935_v20, %v2936_v59  ;;  %v5354_v1 = vld [vmem:[%s6683_s27 + $0xc0] sm:$0xe]  ;;  %v2942_v32 = vrot.slane %v2940_v62, 4 }
  0xa0   : > { %6420 = vmatprep.subr.msk.bf16.mxu1 %vm770_vm0, %v7213_v17  ;;  %v5116_v57 = vcombine.low %v6519_v58, %v7239_v37  ;;  %v5117_v50 = vcombine.low %v6521_v13, %v7259_v5  ;;  %v5385_v14 = vcombine.low %v2927_v47, %v2930_v0  ;;  %v5386_v23 = vcombine.low %v2934_v11, %v2937_v8  ;;  %v1227_v58 = vld [vmem:[%s6683_s27] sm:$0xe]  ;;  %v1228_v20 = vld [vmem:[%s6683_s27 + $0xc] sm:$0xe]  ;;  %v6523_v18 = vld [vmem:[%s6683_s27 + $0x8] sm:$0x1] }
  0xa1   : > { %v5370_v29 = vrot.slane %v5354_v1, 9  ;;  %v2943_v34 = vrot.slane %v5305_v26, 5  ;;  %v2317_v35 = vshll.u32 %v7157_v55, 16  ;;  %v2321_v61 = vshrl.u32 %v7157_v55, 16  ;;  %v6474_v47 = vld [vmem:[%s6683_s27 + $0x24] sm:$0xff]  }
  0xa2   : > { %v2327_v56 = vshll.u32 %v7160_v44, 16  ;;  %v1280_v54 = vrot.slane %v7167_v2, 5  ;;  %v1283_v24 = vrot.slane %v6523_v18, 5  ;;  %v6524_v44 = vld [vmem:[%s6683_s27 + $0x14] sm:$0x1]  ;;  %v5121_v63 = vcombine.low %v6947_v3, %v6953_v10 }
  0xa3   : > { %v2941_v39 = vsel %vm6955_vm7, %v5370_v29, %v2940_v62  ;;  %v7274_v12 = vrot.slane %v2317_v35, 5  ;;  %v2323_v36 = vrot.slane %v2321_v61, 4  ;;  %v1290_v59 = vrot.slane %v6524_v44, 5  ;;  %v1230_v62 = vld [vmem:[%s6683_s27 + $0x24] sm:$0xe] }
  0xa4   : > { %v5144_v0 = vrot.slane %v1227_v58, 9  ;;  %v4129_v11 = vsel %vm770_vm0, %v7019_v42, 0  ;;  %v1282_v8 = vrot.slane %v1280_v54, 4  ;;  %v1231_v13 = vld [vmem:[%s6683_s27 + $0x30] sm:$0xe]  ;;  %v1301_v3 = vrot.slane %v7234_v19, 5 }
  0xa5   : > { %5987 = vmatmul.mubr.msk.bf16.gmra.mrb[20].mxu0 %vm721_vm4, %v5383_v45  ;;  %8543 = vst [vmem:[#allocation8_spill] sm:$0xff] %v7274_v12  ;;  %v5119_v45 = vcombine.low %v6889_v21, %v6895_v30  ;;  %v2324_v28 = vor.u32 %v2323_v36, %v7274_v12  ;;  %v1229_v21 = vld [vmem:[%s6683_s27 + $0x18] sm:$0xe]  ;;  %v1294_v30 = vrot.slane %v7200_v51, 5  ;;  %v5145_v51 = vrot.slane %v1228_v20, 9  ;;  %v6478_v58 = vld [vmem:[%s6683_s27 + $0x3c] sm:$0xff]  }
  0xa6   : > { %5835 = vmatmul.mubr.msk.bf16.gmra.mrb[4].mxu1 %vm721_vm4, %v5115_v43  ;;  %5990 = vmatprep.mubr.msk.bf16.mxu0 %vm721_vm4, %v5384_v46  ;;  %v2944_v43 = vsel %vm6955_vm7, %v2942_v32, %v2943_v34  ;;  %v6472_v46 = vld [vmem:[%s6683_s27 + $0x18] sm:$0xff]   ;;  %v5146_v1 = vrot.slane %v1229_v21, 9  ;;  %v6476_v32 = vld [vmem:[%s6683_s27 + $0x30] sm:$0xff]   ;;  %v5123_v34 = vcombine.low %v7005_v33, %v7011_v38  ;;  %v5124_v42 = vcombine.low %v7035_v7, %v7038_v27  ;;  %v7440_v27 = vld [vmem:[%s6683_s27 + $0x64] sm:$0xf] }
  0xa7   : > { %5838 = vmatprep.mubr.msk.bf16.mxu1 %vm721_vm4, %v5116_v57  ;;  %v5387_v55 = vcombine.low %v2941_v39, %v2944_v43  ;;  %v1287_v57 = vrot.slane %v7189_v40, 5  ;;  %v7294_v40 = vrot.slane %v2327_v56, 5  ;;  %v7297_v2 = vrot.slane %v2324_v28, 4  ;;  %v1232_v10 = vld [vmem:[%s6683_s27 + $0x3c] sm:$0xe]  ;;  %v6482_v33 = vld [vmem:[%s6683_s27 + $0x54] sm:$0xff]  }
  0xa8   : > { %v1308_v35 = vrot.slane %v7239_v37, 5  ;;  %v7328_v19 = vsel %vm6955_vm7, %v5144_v0, %v1280_v54  ;;  %v1315_v39 = vrot.slane %v7259_v5, 5  ;;  %v7338_v37 = vsel %vm6955_vm7, %v1282_v8, %v1283_v24  ;;  %v6526_v56 = vld [vmem:[%s6683_s27 + $0x2c] sm:$0x1]  ;;  %v6527_v20 = vld [vmem:[%s6683_s27 + $0x38] sm:$0x1] }
  0xa9   : > { %8544 = vst [vmem:[#allocation9_spill] sm:$0xff] %v7294_v40  ;;  %8545 = vst [vmem:[#allocation10_spill] sm:$0xff] %v7297_v2  ;;  %v1289_v26 = vrot.slane %v1287_v57, 4  ;;  %v7332_v61 = vsel %vm6955_vm7, %v5145_v51, %v1287_v57  ;;  %v7346_v36 = vsel %vm6955_vm7, %v5146_v1, %v1294_v30  ;;  %v5148_v28 = vrot.slane %v1231_v13, 9  ;;  %v5469_v18 = vld [vmem:[%s6683_s27 + $0x18] sm:$0xf] }
  0xaa   : > { %v1310_v54 = vrot.slane %v1308_v35, 4  ;;  %v1311_v21 = vrot.slane %v6527_v20, 5  ;;  %v6480_v24 = vld [vmem:[%s6683_s27 + $0x48] sm:$0xff]   ;;  %v7367_v44 = vsel %vm770_vm0, %v7213_v17, 0  ;;  %v1234_v1 = vld [vmem:[%s6683_s27 + $0x54] sm:$0xe] }
  0xab   : > { %v7342_v43 = vsel %vm6955_vm7, %v1289_v26, %v1290_v59  ;;  %v1317_v59 = vrot.slane %v1315_v39, 4  ;;  %v6529_v0 = vld [vmem:[%s6683_s27 + $0x4c] sm:$0xf]  ;;  %v5472_v13 = vld [vmem:[%s6683_s27 + $0x24] sm:$0xf]  ;;  %vm6623_vm9 = vmmov (%p4918_p6), 0  }
  0xac   : > { %v1322_v51 = vrot.slane %v6529_v0, 5  ;;  %v3674_v20 = vshll.u32 %v5472_v13, 16  ;;  %v5474_v17 = vld [vmem:[%s6683_s27 + $0x2c] sm:$0x1]  ;;  %v6535_v8 = vld [vmem:[%s6683_s27 + $0x70] sm:$0xf] }
  0xad   : > { %5991 = vmatmul.mubr.msk.bf16.gmra.mrb[24].mxu0 %vm721_vm4, %v5385_v14  ;;  %v1296_v14 = vrot.slane %v1294_v30, 4  ;;  %v5149_v30 = vrot.slane %v1232_v10, 9  ;;  %v6530_v10 = vld [vmem:[%s6683_s27 + $0x50] sm:$0x1]  ;;  %v6545_v2 = vld [vmem:[%s6683_s27 + $0xa4] sm:$0x1] }
  0xae   : > { %5839 = vmatmul.mubr.msk.bf16.gmra.mrb[8].mxu1 %vm721_vm4, %v5117_v50  ;;  %5994 = vmatprep.mubr.msk.bf16.mxu0 %vm721_vm4, %v5386_v23  ;;  %v5122_v50 = vcombine.low %v6979_v49, %v6982_v53  ;;  %v6525_v23 = vld [vmem:[%s6683_s27 + $0x20] sm:$0x1]  ;;  %v7322_v49 = vld [vmem:[%s8520_s1 + $0x10] sm:$0x3]  ;;  %v5126_v53 = vcombine.low %v7083_v41, %v7090_v48 }
  0xaf   : > { %5842 = vmatprep.mubr.msk.bf16.mxu1 %vm721_vm4, %v5118_v9  ;;  %v1297_v29 = vrot.slane %v6525_v23, 5  ;;  %v5125_v9 = vcombine.low %v7057_v15, %v7068_v60  ;;  %v7393_v23 = vsel %vm6955_vm7, %v5148_v28, %v1308_v35  ;;  %v1324_v35 = vrot.slane %v1322_v51, 4 }
  0xb1   : > { %v7354_v5 = vsel %vm6955_vm7, %v1296_v14, %v1297_v29 }
  0xb5   : > { %5995 = vmatmul.mubr.msk.bf16.gmra.mrb[28].mxu0 %vm721_vm4, %v5387_v55  ;;  %v5147_v55 = vrot.slane %v1230_v62, 9  ;;  %v5470_v62 = vld [vmem:[%s6683_s27 + $0x1c] sm:$0xf] }
  0xb6   : > { %5843 = vmatmul.mubr.msk.bf16.gmra.mrb[12].mxu1 %vm721_vm4, %v5119_v45  ;;  %6000 = vmatprep.mubr.msk.bf16.mxu0 %vm721_vm4, %v6472_v46  ;;  %v7349_v45 = vld [vmem:[%s6683_s27 + $0x48] sm:$0xe]  ;;  %v1303_v46 = vrot.slane %v1301_v3, 4  ;;  %v3660_v28 = vshrl.u32 %v5470_v62, 16 }
  0xb7   : > { %5846 = vmatprep.mubr.msk.bf16.mxu1 %vm721_vm4, %v5120_v6  ;;  %v1304_v6 = vrot.slane %v6526_v56, 5  ;;  %v7382_v26 = vsel %vm6955_vm7, %v5147_v55, %v1301_v3  ;;  %v5150_v29 = vrot.slane %v7349_v45, 9  ;;  %v7399_v56 = vsel %vm6955_vm7, %v1310_v54, %v1311_v21 }
  0xb8   : > { %v7403_v3 = vsel %vm6955_vm7, %v5149_v30, %v1315_v39  ;;  %v3647_v55 = vshrl.u32 %v5469_v18, 16  ;;  %v3656_v45 = vshll.u32 %v5470_v62, 16  ;;  %v3671_v54 = vshrl.u32 %v5472_v13, 16  ;;  %v6484_v62 = vld [vmem:[%s6683_s27 + $0x60] sm:$0xff]  }
  0xb9   : > { %v7389_v14 = vsel %vm6955_vm7, %v1303_v46, %v1304_v6  ;;  %v3650_v46 = vshll.u32 %v5469_v18, 16  ;;  %v5151_v18 = vrot.slane %v1234_v1, 9  ;;  %v5471_v1 = vld [vmem:[%s6683_s27 + $0x20] sm:$0x1] }
  0xba   : > { %v7444_v13 = vrot.slane %v3656_v45, 5 }
  0xbb   : > { %v3652_v0 = vrot.slane %v3650_v46, 5  ;;  %v5475_v46 = vld [vmem:[%s6683_s27 + $0x30] sm:$0xf] }
  0xbd   : > { %6001 = vmatmul.mubr.msk.bf16.vlgmr.msra.gmra.mrb[0].mxu0 %vm721_vm4, %v6474_v47 }
  0xbe   : > { %5847 = vmatmul.mubr.msk.bf16.gmra.mrb[16].mxu1 %vm721_vm4, %v5121_v63  ;;  %6033 = vmatpush3.bf16.msra.mxu0 %v4129_v11  ;;  %v6528_v63 = vld [vmem:[%s6683_s27 + $0x44] sm:$0x1]  ;;  %v3695_v11 = vshrl.u32 %v5475_v46, 16 }
  0xbf   : > { %5850 = vmatprep.mubr.msk.bf16.mxu1 %vm721_vm4, %v5122_v50  ;;  %6004 = vmatprep.mubr.msk.bf16.mxu0 %vm721_vm4, %v6476_v32  ;;  %v1318_v47 = vrot.slane %v6528_v63, 5  ;;  %v5473_v50 = vld [vmem:[%s6683_s27 + $0x28] sm:$0xf]  ;;  %v1325_v32 = vrot.slane %v6530_v10, 5 }
  0xc0   : > { %6426 = vmatprep.subr.msk.bf16.mxu0 %vm770_vm0, %v7322_v49  ;;  %v3680_v21 = vshll.u32 %v5473_v50, 16  ;;  %v3684_v39 = vshrl.u32 %v5473_v50, 16  ;;  %v3673_v50 = vrot.slane %v3671_v54, 4 }
  0xc1   : > { %v7407_v6 = vsel %vm6955_vm7, %v1317_v59, %v1318_v47  ;;  %v6531_v59 = vld [vmem:[%s6683_s27 + $0x58] sm:$0xf]  ;;  %v3649_v47 = vrot.slane %v3647_v55, 4  ;;  %v7437_v7 = vsel %vm6955_vm7, %v1324_v35, %v1325_v32  ;;  %v6533_v35 = vld [vmem:[%s6683_s27 + $0x5c] sm:$0x1] }
  0xc2   : > { %v1329_v63 = vrot.slane %v6531_v59, 5  ;;  %v7446_v10 = vrot.slane %v3680_v21, 5  ;;  %v3686_v55 = vrot.slane %v3684_v39, 4  ;;  %v1332_v59 = vrot.slane %v6533_v35, 5  ;;  %v5476_v21 = vld [vmem:[%s6683_s27 + $0x34] sm:$0xf] }
  0xc3   : > { %v3653_v54 = vor.u32 %v3652_v0, %v3649_v47  ;;  %v1236_v35 = vld [vmem:[%s6683_s27 + $0x6c] sm:$0xe]  ;;  %v3690_v47 = vshll.u32 %v5474_v17, 16  ;;  %v6536_v0 = vld [vmem:[%s6683_s27 + $0x7c] sm:$0xf] }
  0xc4   : > { %v1331_v32 = vrot.slane %v1329_v63, 4  ;;  %v6537_v17 = vld [vmem:[%s6683_s27 + $0x74] sm:$0x1] }
  0xc5   : > { %6005 = vmatmul.mubr.msk.bf16.gmra.mrb[4].mxu0 %vm721_vm4, %v6478_v58  ;;  %v6534_v58 = vld [vmem:[%s6683_s27 + $0x68] sm:$0x1]  ;;  %v3654_v15 = vrot.slane %v3653_v54, 4 }
  0xc6   : > { %5851 = vmatmul.mubr.msk.bf16.gmra.mrb[20].mxu1 %vm721_vm4, %v5123_v34  ;;  %6008 = vmatprep.mubr.msk.bf16.mxu0 %vm721_vm4, %v6480_v24  ;;  %v7429_v34 = vsel %vm6955_vm7, %v5150_v29, %v1322_v51  ;;  %v7432_v24 = vld [vmem:[%s6683_s27 + $0x60] sm:$0xe]  ;;  %v3662_v51 = vrot.slane %v3660_v28, 4  ;;  %v3676_v29 = vrot.slane %v3674_v20, 5  ;;  %v1339_v30 = vrot.slane %v6534_v58, 5 }
  0xc7   : > { %5854 = vmatprep.mubr.msk.bf16.mxu1 %vm721_vm4, %v5124_v42  ;;  %v8525_v42 = vrot.slane %v7440_v27, 5  ;;  %v5152_v38 = vrot.slane %v7432_v24, 9  ;;  %v7457_v28 = vsel %vm6955_vm7, %v5151_v18, %v1329_v63  ;;  %v3666_v20 = vshll.u32 %v5471_v1, 16 }
  0xc8   : > { %v3663_v39 = vor.u32 %v3662_v51, %v7444_v13  ;;  %v1343_v24 = vrot.slane %v6535_v8, 5  ;;  %v3698_v58 = vshll.u32 %v5475_v46, 16  ;;  %v3677_v18 = vor.u32 %v3676_v29, %v3673_v50 }
  0xc9   : > { %v1338_v45 = vrot.slane %v8525_v42, 4  ;;  %v3687_v63 = vor.u32 %v3686_v55, %v7446_v10  ;;  %v7474_v8 = vsel %vm6955_vm7, %v1331_v32, %v1332_v59  ;;  %v1350_v1 = vrot.slane %v6536_v0, 5  ;;  %v6486_v59 = vld [vmem:[%s6683_s27 + $0x6c] sm:$0xff]   ;;  %v6487_v0 = vld [vmem:[%s6683_s27 + $0x78] sm:$0xff]  }
  0xca   : > { %v3704_v51 = vshll.u32 %v5476_v21, 16  ;;  %v3708_v50 = vshrl.u32 %v5476_v21, 16  ;;  %v3668_v60 = vrot.slane %v3666_v20, 5  ;;  %v3664_v29 = vrot.slane %v3663_v39, 4  ;;  %v7487_v20 = vld [vmem:[%s6683_s27 + $0x38] sm:$0x1] }
  0xcb   : > { %v1345_v55 = vrot.slane %v1343_v24, 4  ;;  %v3697_v46 = vrot.slane %v3695_v11, 4  ;;  %v3700_v32 = vrot.slane %v3698_v58, 5  ;;  %v3678_v21 = vrot.slane %v3677_v18, 4  ;;  %8546 = vst [vmem:[#allocation11_spill] sm:$0xff] %v7487_v20 }
  0xcc   : > { %v3688_v57 = vrot.slane %v3687_v63, 4  ;;  %v3692_v42 = vrot.slane %v3690_v47, 5  ;;  %v1352_v48 = vrot.slane %v1350_v1, 4  ;;  %v8547_v39 = vrot.slane %v7440_v27, 5  ;;  %v1238_v47 = vld [vmem:[%s6683_s27 + $0x84] sm:$0xe] }
  0xcd   : > { %6009 = vmatmul.mubr.msk.bf16.gmra.mrb[8].mxu0 %vm721_vm4, %v6482_v33  ;;  %v1237_v33 = vld [vmem:[%s6683_s27 + $0x78] sm:$0xe]  ;;  %v7501_v18 = vsel %vm6955_vm7, %v1338_v45, %v1339_v30  ;;  %v3669_v30 = vsel %vm6725_vm3, %v3664_v29, %v3668_v60  ;;  %v3683_v45 = vsel %vm6725_vm3, %v3678_v21, %v7446_v10  ;;  %v8549_v29 = vcombine.low %v7328_v19, %v7338_v37 }
  0xce   : > { %5855 = vmatmul.mubr.msk.bf16.gmra.mrb[24].mxu1 %vm721_vm4, %v5125_v9  ;;  %6012 = vmatprep.mubr.msk.bf16.mxu0 %vm721_vm4, %v6484_v62  ;;  %v5153_v9 = vrot.slane %v1236_v35, 9  ;;  %v1346_v62 = vrot.slane %v6537_v17, 5  ;;  %v5154_v41 = vrot.slane %v1237_v33, 9  ;;  %v7489_v35 = vrot.slane %v3704_v51, 5 }
  0xcf   : > { %5858 = vmatprep.mubr.msk.bf16.mxu1 %vm721_vm4, %v5126_v53  ;;  %v6538_v53 = vld [vmem:[%s6683_s27 + $0x80] sm:$0x1]  ;;  %v3710_v17 = vrot.slane %v3708_v50, 4  ;;  %v7497_v58 = vsel %vm6955_vm7, %v5152_v38, %v8547_v39  ;;  %v3659_v33 = vsel %vm6725_vm3, %v3654_v15, %v7444_v13  ;;  %v3701_v51 = vor.u32 %v3700_v32, %v3697_v46  ;;  %v6539_v38 = vld [vmem:[%s6683_s27 + $0x88] sm:$0xf] }
  0xd0   : > { %v1353_v54 = vrot.slane %v6538_v53, 5  ;;  %v7505_v63 = vsel %vm6955_vm7, %v5153_v9, %v1343_v24  ;;  %v7513_v27 = vsel %vm6955_vm7, %v1345_v55, %v1346_v62  ;;  %v1357_v50 = vrot.slane %v6539_v38, 5  ;;  %v5478_v15 = vld [vmem:[%s6683_s27 + $0x3c] sm:$0xf]  ;;  %v6540_v55 = vld [vmem:[%s6683_s27 + $0x8c] sm:$0x1] }
  0xd1   : > { %v7524_v13 = vsel %vm6955_vm7, %v5154_v41, %v1350_v1  ;;  %v3714_v24 = vshll.u32 %v7487_v20, 16  ;;  %v8548_v9 = vcombine.low %v7113_v16, %v7118_v25  ;;  %v3693_v60 = vsel %vm6725_vm3, %v3688_v57, %v3692_v42  ;;  %v7554_v32 = vld [vmem:[%s6683_s27 + $0x40] sm:$0xf]  ;;  %v7558_v41 = vld [vmem:[%s6683_s27 + $0x4c] sm:$0xf] }
  0xd2   : > { %v7537_v10 = vsel %vm6955_vm7, %v1352_v48, %v1353_v54  ;;  %v3711_v1 = vor.u32 %v3710_v17, %v7489_v35  ;;  %v5155_v62 = vrot.slane %v1238_v47, 9  ;;  %v7550_v42 = vsel %vm770_vm0, %v7322_v49, 0  ;;  %8550 = vst [vmem:[#allocation12_spill] sm:$0xff] %v7554_v32  ;;  %v6488_v48 = vld [vmem:[%s6683_s27 + $0x84] sm:$0xff]   ;;  %v5484_v39 = vld [vmem:[%s6683_s27 + $0x54] sm:$0xf] }
  0xd3   : > { %v1360_v46 = vrot.slane %v6540_v55, 5  ;;  %v3702_v19 = vrot.slane %v3701_v51, 4  ;;  %v1359_v37 = vrot.slane %v1357_v50, 4  ;;  %v3722_v21 = vshll.u32 %v5478_v15, 16  ;;  %v6489_v47 = vld [vmem:[%s6683_s27 + $0x90] sm:$0xff]  }
  0xd4   : > { %v7561_v53 = vcombine.low %v3659_v33, %v3669_v30  ;;  %v7563_v54 = vcombine.low %v3683_v45, %v3693_v60  ;;  %v3716_v17 = vrot.slane %v3714_v24, 5  ;;  %v3712_v51 = vrot.slane %v3711_v1, 4  ;;  %v7576_v33 = vld [vmem:[%s6683_s27 + $0x58] sm:$0xf]  ;;  %v7579_v30 = vld [vmem:[%s6683_s27 + $0x44] sm:$0x1] }
  0xd5   : > { %6013 = vmatmul.mubr.msk.bf16.gmra.mrb[12].mxu0 %vm721_vm4, %v6486_v59  ;;  %v5481_v59 = vld [vmem:[%s6683_s27 + $0x48] sm:$0xf]  ;;  %v7571_v38 = vsel %vm6955_vm7, %v5155_v62, %v1357_v50  ;;  %8551 = vst [vmem:[#allocation13_spill] sm:$0xff] %v7579_v30  ;;  %v3752_v24 = vshll.u32 %v7558_v41, 16  ;;  %v3707_v1 = vsel %vm6725_vm3, %v3702_v19, %v7489_v35  ;;  %v7588_v50 = vsel %vm6955_vm7, %v1359_v37, %v1360_v46  ;;  %v7592_v49 = vld [vmem:[%s6683_s27 + $0x90] sm:$0xe] }
  0xd6   : > { %5859 = vmatmul.mubr.msk.bf16.gmra.mrb[28].mxu1 %vm721_vm4, %v8548_v9  ;;  %6016 = vmatprep.mubr.msk.bf16.mxu0 %vm721_vm4, %v6487_v0  ;;  %v3719_v0 = vshrl.u32 %v5478_v15, 16  ;;  %v3728_v15 = vshll.u32 %v7554_v32, 16  ;;  %v3732_v9 = vshrl.u32 %v7554_v32, 16  ;;  %v3743_v45 = vshrl.u32 %v5481_v59, 16  ;;  %v6544_v20 = vld [vmem:[%s6683_s27 + $0xa0] sm:$0xf] }
  0xd7   : > { %5864 = vmatprep.mubr.msk.bf16.mxu1 %vm721_vm4, %v8549_v29  ;;  %v3746_v60 = vshll.u32 %v5481_v59, 16  ;;  %v3756_v29 = vshrl.u32 %v7558_v41, 16  ;;  %v3724_v55 = vrot.slane %v3722_v21, 5  ;;  %v3767_v59 = vshrl.u32 %v5484_v39, 16 }
  0xd8   : > { %v3721_v62 = vrot.slane %v3719_v0, 4  ;;  %v3770_v57 = vshll.u32 %v5484_v39, 16  ;;  %v3776_v16 = vshll.u32 %v7576_v33, 16  ;;  %v3780_v11 = vshrl.u32 %v7576_v33, 16 }
  0xd9   : > { %v8552_v35 = vcombine.low %v7332_v61, %v7342_v43  ;;  %v3717_v46 = vsel %vm6725_vm3, %v3712_v51, %v3716_v17  ;;  %v7603_v19 = vrot.slane %v3728_v15, 5  ;;  %v3734_v37 = vrot.slane %v3732_v9, 4  ;;  %v7612_v61 = vld [vmem:[%s6683_s27 + $0x50] sm:$0x1]  ;;  %v7622_v9 = vld [vmem:[%s6683_s27 + $0x5c] sm:$0x1] }
  0xda   : > { %v3738_v0 = vshll.u32 %v7579_v30, 16  ;;  %v8553_v21 = vcombine.low %v7346_v36, %v7354_v5  ;;  %v3745_v43 = vrot.slane %v3743_v45, 4  ;;  %v7614_v39 = vrot.slane %v3752_v24, 5  ;;  %v6541_v36 = vld [vmem:[%s6683_s27 + $0x94] sm:$0xf] }
  0xdb   : > { %v3758_v17 = vrot.slane %v3756_v29, 4  ;;  %v3725_v15 = vor.u32 %v3724_v55, %v3721_v62  ;;  %v1364_v5 = vrot.slane %v6541_v36, 5  ;;  %v6542_v45 = vld [vmem:[%s8520_s1 + $0x8] sm:$0x3]  ;;  %v3772_v24 = vrot.slane %v3770_v57, 5 }
  0xdc   : > { %v7628_v29 = vrot.slane %v3776_v16, 5  ;;  %v3782_v62 = vrot.slane %v3780_v11, 4  ;;  %v6491_v55 = vld [vmem:[%s6683_s27 + $0xa8] sm:$0xff]   ;;  %v7635_v36 = vrot.slane %v3738_v0, 5  ;;  %v3762_v51 = vshll.u32 %v7612_v61, 16 }
  0xdd   : > { %6017 = vmatmul.mubr.msk.bf16.gmra.mrb[16].mxu0 %vm721_vm4, %v6488_v48  ;;  %v3748_v48 = vrot.slane %v3746_v60, 5  ;;  %v3769_v60 = vrot.slane %v3767_v59, 4  ;;  %v7639_v30 = vld [vmem:[%s6683_s27 + $0x64] sm:$0xf]  ;;  %v3759_v57 = vor.u32 %v3758_v17, %v7614_v39  ;;  %v1240_v16 = vld [vmem:[%s6683_s27 + $0x9c] sm:$0xe] }
  0xde   : > { %5865 = vmatmul.mubr.msk.bf16.vlgmr.msra.gmra.mrb[0].mxu1 %vm721_vm4, %v8552_v35  ;;  %6020 = vmatprep.mubr.msk.bf16.mxu0 %vm721_vm4, %v6489_v47  ;;  %v6490_v47 = vld [vmem:[%s6683_s27 + $0x9c] sm:$0xff]   ;;  %v7632_v35 = vcombine.low %v3707_v1, %v3717_v46  ;;  %8554 = vst [vmem:[#allocation14_spill] sm:$0xff] %v7639_v30  ;;  %v1371_v11 = vrot.slane %v6544_v20, 5  ;;  %v7645_v12 = vrot.slane %v3725_v15, 4  ;;  %v3786_v1 = vshll.u32 %v7622_v9, 16 }
  0xdf   : > { %5897 = vmatpush3.bf16.msra.mxu1 %v7367_v44  ;;  %5868 = vmatprep.mubr.msk.bf16.mxu1 %vm721_vm4, %v8553_v21  ;;  %v5156_v44 = vrot.slane %v7592_v49, 9  ;;  %v5487_v49 = vld [vmem:[%s6683_s27 + $0x60] sm:$0xf]  ;;  %v3735_v21 = vor.u32 %v3734_v37, %v7603_v19  ;;  %v3749_v59 = vor.u32 %v3748_v48, %v3745_v43  ;;  %v3773_v0 = vor.u32 %v3772_v24, %v3769_v60 }
  0xe0   : > { %6422 = vmatprep.subr.msk.bf16.mxu1 %vm770_vm0, %v6542_v45  ;;  %v6543_v45 = vld [vmem:[%s6683_s27 + $0x98] sm:$0x1]  ;;  %v3791_v46 = vshrl.u32 %v5487_v49, 16  ;;  %v3794_v37 = vshll.u32 %v5487_v49, 16  ;;  %v3783_v4 = vor.u32 %v3782_v62, %v7628_v29  ;;  %v3800_v43 = vshll.u32 %v7639_v30, 16 }
  0xe1   : > { %v1367_v32 = vrot.slane %v6543_v45, 5  ;;  %v3804_v48 = vshrl.u32 %v7639_v30, 16  ;;  %v8555_v20 = vcombine.low %v7382_v26, %v7389_v14  ;;  %v3736_v17 = vrot.slane %v3735_v21, 4 }
  0xe2   : > { %v1366_v15 = vrot.slane %v1364_v5, 4  ;;  %v5157_v60 = vrot.slane %v1240_v16, 9  ;;  %v8556_v24 = vcombine.low %v7393_v23, %v7399_v56  ;;  %v3750_v62 = vrot.slane %v3749_v59, 4 }
  0xe3   : > { %v3760_v49 = vrot.slane %v3759_v57, 4  ;;  %v1373_v45 = vrot.slane %v1371_v11, 4  ;;  %v1374_v26 = vrot.slane %v6545_v2, 5  ;;  %v3788_v14 = vrot.slane %v3786_v1, 5  ;;  %v6493_v57 = vld [vmem:[%s6683_s27 + $0xc0] sm:$0xff]  }
  0xe4   : > { %v3793_v40 = vrot.slane %v3791_v46, 4  ;;  %v3796_v30 = vrot.slane %v3794_v37, 5  ;;  %v3774_v16 = vrot.slane %v3773_v0, 4  ;;  %v3784_v23 = vrot.slane %v3783_v4, 4  ;;  %v7684_v37 = vld [vmem:[%s6683_s27 + $0x68] sm:$0x1] }
  0xe5   : > { %6021 = vmatmul.mubr.msk.bf16.gmra.mrb[20].mxu0 %vm721_vm4, %v6490_v47  ;;  %v3764_v47 = vrot.slane %v3762_v51, 5  ;;  %v6492_v51 = vld [vmem:[%s6683_s27 + $0xb4] sm:$0xff]   ;;  %v7665_v56 = vrot.slane %v3800_v43, 5  ;;  %v3806_v59 = vrot.slane %v3804_v48, 4  ;;  %v3731_v2 = vsel %vm6725_vm3, %v7645_v12, %v7603_v19  ;;  %8557 = vst [vmem:[#allocation15_spill] sm:$0xff] %v7684_v37 }
  0xe6   : > { %5869 = vmatmul.mubr.msk.bf16.gmra.mrb[4].mxu1 %vm721_vm4, %v8555_v20  ;;  %6024 = vmatprep.mubr.msk.bf16.mxu0 %vm721_vm4, %v6491_v55  ;;  %v1241_v20 = vld [vmem:[%s6683_s27 + $0xa8] sm:$0xe]  ;;  %v6546_v55 = vld [vmem:[%s6683_s27 + $0xac] sm:$0xf]  ;;  %v3741_v1 = vsel %vm6725_vm3, %v3736_v17, %v7635_v36  ;;  %v7677_v46 = vsel %vm6955_vm7, %v5156_v44, %v1364_v5  ;;  %v7681_v4 = vsel %vm6955_vm7, %v1366_v15, %v1367_v32  ;;  %v1242_v5 = vld [vmem:[%s6683_s27 + $0xb4] sm:$0xe] }
  0xe7   : > { %5872 = vmatprep.mubr.msk.bf16.mxu1 %vm721_vm4, %v8556_v24  ;;  %v1378_v21 = vrot.slane %v6546_v55, 5  ;;  %v3755_v0 = vsel %vm6725_vm3, %v3750_v62, %v7614_v39  ;;  %v7691_v12 = vsel %vm6955_vm7, %v5157_v60, %v1371_v11  ;;  %v7695_v19 = vsel %vm6955_vm7, %v1373_v45, %v1374_v26  ;;  %v5490_v36 = vld [vmem:[%s6683_s27 + $0x6c] sm:$0xf]  ;;  %v6547_v48 = vld [vmem:[%s6683_s27 + $0xb0] sm:$0x1] }
  0xe8   : > { %8558 = vst [vmem:[#allocation16_spill] sm:$0xff] %v7695_v19  ;;  %v5158_v44 = vrot.slane %v1241_v20, 9  ;;  %v3765_v32 = vsel %vm6725_vm3, %v3760_v49, %v3764_v47  ;;  %v1381_v17 = vrot.slane %v6547_v48, 5  ;;  %v3797_v39 = vor.u32 %v3796_v30, %v3793_v40  ;;  %v7719_v62 = vld [vmem:[%s6683_s27 + $0x70] sm:$0xf] }
  0xe9   : > { %v1380_v43 = vrot.slane %v1378_v21, 4  ;;  %v3779_v11 = vsel %vm6725_vm3, %v3774_v16, %v7628_v29  ;;  %v3789_v15 = vsel %vm6725_vm3, %v3784_v23, %v3788_v14  ;;  %v3807_v60 = vor.u32 %v3806_v59, %v7665_v56  ;;  %8560 = vst [vmem:[#allocation17_spill] sm:$0xff] %v7719_v62  ;;  %v5493_v20 = vld [vmem:[%s6683_s27 + $0x78] sm:$0xf]  ;;  %v7738_v55 = vld [vmem:[%s6683_s27 + $0x7c] sm:$0xf] }
  0xea   : > { %v3810_v47 = vshll.u32 %v7684_v37, 16  ;;  %v8559_v24 = vcombine.low %v7403_v3, %v7407_v6  ;;  %v5159_v30 = vrot.slane %v1242_v5, 9  ;;  %v1385_v29 = vrot.slane %v7118_v25, 5  ;;  %v6494_v3 = vld [vmem:[%s6683_s27 + $0xcc] sm:$0xff]   ;;  %8562 = vst [vmem:[#allocation18_spill] sm:$0xff] %v7738_v55 }
  0xeb   : > { %v3815_v49 = vshrl.u32 %v5490_v36, 16  ;;  %v8561_v45 = vcombine.low %v7429_v34, %v7437_v7  ;;  %v7726_v6 = vcombine.low %v3731_v2, %v3741_v1  ;;  %v7728_v26 = vcombine.low %v3755_v0, %v3765_v32  ;;  %v5496_v23 = vld [vmem:[%s6683_s27 + $0x84] sm:$0xf]  ;;  %v7751_v59 = vld [vmem:[%s6683_s27 + $0x88] sm:$0xf] }
  0xec   : > { %v7734_v25 = vsel %vm6955_vm7, %v5158_v44, %v1378_v21  ;;  %v7740_v34 = vcombine.low %v3779_v11, %v3789_v15  ;;  %v7744_v7 = vsel %vm6955_vm7, %v1380_v43, %v1381_v17  ;;  %8563 = vst [vmem:[#allocation19_spill] sm:$0xff] %v7751_v59  ;;  %v7755_v21 = vrot.slane %v3810_v47, 5  ;;  %v5499_v0 = vld [vmem:[%s6683_s27 + $0x90] sm:$0xf]  ;;  %v7767_v48 = vld [vmem:[%s6683_s27 + $0x94] sm:$0xf] }
  0xed   : > { %6025 = vmatmul.mubr.msk.bf16.gmra.mrb[24].mxu0 %vm721_vm4, %v6492_v51  ;;  %v7746_v51 = vrot.slane %v3797_v39, 4  ;;  %v3818_v2 = vshll.u32 %v5490_v36, 16  ;;  %v3824_v1 = vshll.u32 %v7719_v62, 16  ;;  %v7761_v44 = vsel %vm6955_vm7, %v5159_v30, %v1385_v29  ;;  %8564 = vst [vmem:[#allocation20_spill] sm:$0xff] %v7767_v48  ;;  %v7775_v30 = vld [vmem:[%s6683_s27 + $0x74] sm:$0x1] }
  0xee   : > { %5873 = vmatmul.mubr.msk.bf16.gmra.mrb[8].mxu1 %vm721_vm4, %v8559_v24  ;;  %6028 = vmatprep.mubr.msk.bf16.mxu0 %vm721_vm4, %v6493_v57  ;;  %v7753_v57 = vrot.slane %v3807_v60, 4  ;;  %v7763_v5 = vrot.slane %v1385_v29, 4  ;;  %v3817_v32 = vrot.slane %v3815_v49, 4  ;;  %v3828_v43 = vshrl.u32 %v7719_v62, 16  ;;  %v7792_v16 = vld [vmem:[%s6683_s27 + $0x80] sm:$0x1] }
  0xef   : > { %5876 = vmatprep.mubr.msk.bf16.mxu1 %vm721_vm4, %v8561_v45  ;;  %v3839_v17 = vshrl.u32 %v5493_v20, 16  ;;  %v3842_v39 = vshll.u32 %v5493_v20, 16  ;;  %v3848_v11 = vshll.u32 %v7738_v55, 16  ;;  %v3852_v36 = vshrl.u32 %v7738_v55, 16 }
  0xf0   : > { %v3863_v15 = vshrl.u32 %v5496_v23, 16  ;;  %v3866_v60 = vshll.u32 %v5496_v23, 16  ;;  %v3872_v47 = vshll.u32 %v7751_v59, 16  ;;  %v3876_v24 = vshrl.u32 %v7751_v59, 16  ;;  %v5502_v59 = vld [vmem:[%s6683_s27 + $0x9c] sm:$0xf] }
  0xf1   : > { %v3887_v29 = vshrl.u32 %v5499_v0, 16  ;;  %v3890_v49 = vshll.u32 %v5499_v0, 16  ;;  %v3896_v45 = vshll.u32 %v7767_v48, 16  ;;  %v3900_v20 = vshrl.u32 %v7767_v48, 16 }
  0xf2   : > { %v8565_v14 = vcombine.low %v7457_v28, %v7474_v8  ;;  %v3820_v23 = vrot.slane %v3818_v2, 5  ;;  %v7789_v0 = vrot.slane %v3824_v1, 5  ;;  %v3830_v40 = vrot.slane %v3828_v43, 4 }
  0xf3   : > { %v8566_v48 = vcombine.low %v7497_v58, %v7501_v18  ;;  %v3841_v28 = vrot.slane %v3839_v17, 4  ;;  %v3844_v8 = vrot.slane %v3842_v39, 5  ;;  %v3865_v2 = vrot.slane %v3863_v15, 4 }
  0xf4   : > { %v3868_v1 = vrot.slane %v3866_v60, 5  ;;  %v7804_v43 = vrot.slane %v3872_v47, 5  ;;  %v3878_v55 = vrot.slane %v3876_v24, 4  ;;  %v3889_v62 = vrot.slane %v3887_v29, 4 }
  0xf5   : > { %6029 = vmatmul.mubr.msk.bf16.gmra.mrb[28].mxu0 %vm721_vm4, %v6494_v3  ;;  %v7802_v3 = vld [vmem:[%s6683_s27 + $0x8c] sm:$0x1]  ;;  %v3892_v37 = vrot.slane %v3890_v49, 5  ;;  %v7806_v58 = vrot.slane %v3896_v45, 5  ;;  %v3902_v18 = vrot.slane %v3900_v20, 4  ;;  %v3821_v17 = vor.u32 %v3820_v23, %v3817_v32 }
  0xf6   : > { %5877 = vmatmul.mubr.msk.bf16.gmra.mrb[12].mxu1 %vm721_vm4, %v8565_v14  ;;  %6034 = vmatprep.mubr.msk.bf16.mxu0 %vm721_vm4, %v7561_v53  ;;  %v7798_v53 = vrot.slane %v3848_v11, 5  ;;  %v3854_v14 = vrot.slane %v3852_v36, 4  ;;  %v3834_v39 = vshll.u32 %v7775_v30, 16  ;;  %v7813_v11 = vld [vmem:[%s6683_s27 + $0x98] sm:$0x1]  ;;  %v3911_v36 = vshrl.u32 %v5502_v59, 16 }
  0xf7   : > { %5880 = vmatprep.mubr.msk.bf16.mxu1 %vm721_vm4, %v8566_v48  ;;  %v7809_v48 = vld [vmem:[%s6683_s27 + $0xa0] sm:$0xf]  ;;  %v3914_v19 = vshll.u32 %v5502_v59, 16  ;;  %v3831_v15 = vor.u32 %v3830_v40, %v7789_v0  ;;  %v3845_v60 = vor.u32 %v3844_v8, %v3841_v28  ;;  %v3858_v24 = vshll.u32 %v7792_v16, 16 }
  0xf8   : > { %v3855_v47 = vor.u32 %v3854_v14, %v7798_v53  ;;  %v3869_v29 = vor.u32 %v3868_v1, %v3865_v2  ;;  %v3882_v49 = vshll.u32 %v7802_v3, 16  ;;  %v3920_v45 = vshll.u32 %v7809_v48, 16 }
  0xf9   : > { %v3924_v32 = vshrl.u32 %v7809_v48, 16  ;;  %v3879_v20 = vor.u32 %v3878_v55, %v7804_v43  ;;  %v3893_v59 = vor.u32 %v3892_v37, %v3889_v62  ;;  %v3903_v40 = vor.u32 %v3902_v18, %v7806_v58  ;;  %v5505_v55 = vld [vmem:[%s6683_s27 + $0xa8] sm:$0xf] }
  0xfa   : > { %v3906_v23 = vshll.u32 %v7813_v11, 16  ;;  %v8567_v28 = vcombine.low %v7505_v63, %v7513_v27  ;;  %v3822_v8 = vrot.slane %v3821_v17, 4  ;;  %v3836_v14 = vrot.slane %v3834_v39, 5 }
  0xfb   : > { %v3913_v2 = vrot.slane %v3911_v36, 4  ;;  %v3916_v1 = vrot.slane %v3914_v19, 5  ;;  %v3832_v37 = vrot.slane %v3831_v15, 4  ;;  %v3846_v63 = vrot.slane %v3845_v60, 4  ;;  %v7848_v60 = vld [vmem:[%s6683_s27 + $0xac] sm:$0xf] }
  0xfc   : > { %v3856_v27 = vrot.slane %v3855_v47, 4  ;;  %v3860_v62 = vrot.slane %v3858_v24, 5  ;;  %v3884_v18 = vrot.slane %v3882_v49, 5  ;;  %v7838_v17 = vrot.slane %v3920_v45, 5 }
  0xfd   : > { %6035 = vmatmul.mubr.msk.bf16.vlgmr.msra.gmra.mrb[0].mxu0 %vm721_vm4, %v7563_v54  ;;  %v8568_v54 = vcombine.low %v7524_v13, %v7537_v10  ;;  %v3926_v19 = vrot.slane %v3924_v32, 4  ;;  %v3880_v39 = vrot.slane %v3879_v20, 4  ;;  %v3894_v36 = vrot.slane %v3893_v59, 4 }
  0xfe   : > { %5881 = vmatmul.mubr.msk.bf16.gmra.mrb[16].mxu1 %vm721_vm4, %v8567_v28  ;;  %6067 = vmatpush3.bf16.msra.mxu0 %v7550_v42  ;;  %v3870_v42 = vrot.slane %v3869_v29, 4  ;;  %v3904_v13 = vrot.slane %v3903_v40, 4  ;;  %v3908_v10 = vrot.slane %v3906_v23, 5  ;;  %v7841_v28 = vld [vmem:[%s6683_s27 + $0xa4] sm:$0x1]  ;;  %v3917_v15 = vor.u32 %v3916_v1, %v3913_v2 }
  0xff   : > { %5884 = vmatprep.mubr.msk.bf16.mxu1 %vm721_vm4, %v8568_v54  ;;  %6038 = vmatprep.mubr.msk.bf16.mxu0 %vm721_vm4, %v7632_v35  ;;  %v3813_v35 = vsel %vm6725_vm3, %v7753_v57, %v7755_v21  ;;  %v3935_v47 = vshrl.u32 %v5505_v55, 16  ;;  %v3938_v24 = vshll.u32 %v5505_v55, 16  ;;  %v8569_v29 = vrot.slane %v7124_v52, 5  ;;  %v7882_v40 = vld [vmem:[%s6683_s27 + $0xb0] sm:$0x1] }
 0x100   : > { %v3827_v45 = vsel %vm6725_vm3, %v3822_v8, %v7789_v0  ;;  %v3837_v57 = vsel %vm6725_vm3, %v3832_v37, %v3836_v14  ;;  %v3851_v21 = vsel %vm6725_vm3, %v3846_v63, %v7798_v53  ;;  %v3861_v32 = vsel %vm6725_vm3, %v3856_v27, %v3860_v62  ;;  %v7893_v2 = vld [vmem:[%s6683_s27 + $0xb4] sm:$0xf]  ;;  %v5554_v63 = vld [vmem:[%s6683_s27 + $0x48] sm:$0xe] }
 0x101   : > { %v7855_v49 = vsel %vm6955_vm7, %v7763_v5, %v8569_v29  ;;  %v3875_v52 = vsel %vm6725_vm3, %v3870_v42, %v7804_v43  ;;  %v3927_v5 = vor.u32 %v3926_v19, %v7838_v17  ;;  %v3930_v20 = vshll.u32 %v7841_v28, 16 }
 0x102   : > { %v3885_v0 = vsel %vm6725_vm3, %v3880_v39, %v3884_v18  ;;  %v3899_v53 = vsel %vm6725_vm3, %v3894_v36, %v7806_v58  ;;  %v3909_v59 = vsel %vm6725_vm3, %v3904_v13, %v3908_v10  ;;  %v3944_v43 = vshll.u32 %v7848_v60, 16 }
 0x103   : > { %v8570_v23 = vcombine.low %v7571_v38, %v7588_v50  ;;  %v3937_v8 = vrot.slane %v3935_v47, 4  ;;  %v3940_v58 = vrot.slane %v3938_v24, 5  ;;  %v3948_v14 = vshrl.u32 %v7848_v60, 16  ;;  %v5556_v47 = vld [vmem:[%s6683_s27 + $0x60] sm:$0xe] }
 0x104   : > { %v8571_v1 = vcombine.low %v7677_v46, %v7681_v4  ;;  %v5175_v38 = vcombine.low %v7734_v25, %v7744_v7  ;;  %v8572_v50 = vsel %vm6725_vm3, %v7746_v51, %v7665_v56  ;;  %v5176_v54 = vcombine.low %v7761_v44, %v7855_v49  ;;  %v5555_v25 = vld [vmem:[%s6683_s27 + $0x54] sm:$0xe]  ;;  %v7922_v51 = vld [vmem:[%s6683_s27 + $0xb8] sm:$0xf]  ;;  %v8579_v49 = vld [vmem:[#allocation9_spill] sm:$0xff] }
 0x105   : > { %6039 = vmatmul.mubr.msk.bf16.gmra.mrb[4].mxu0 %vm721_vm4, %v7726_v6  ;;  %v3918_v6 = vrot.slane %v3917_v15, 4  ;;  %v7908_v37 = vcombine.low %v3827_v45, %v3837_v57  ;;  %v7911_v27 = vcombine.low %v3851_v21, %v3861_v32  ;;  %v3928_v46 = vrot.slane %v3927_v5, 4  ;;  %v5557_v32 = vld [vmem:[%s6683_s27 + $0x6c] sm:$0xe] }
 0x106   : > { %5885 = vmatmul.mubr.msk.bf16.gmra.mrb[20].mxu1 %vm721_vm4, %v8570_v23  ;;  %6042 = vmatprep.mubr.msk.bf16.mxu0 %vm721_vm4, %v7728_v26  ;;  %v5524_v26 = vcombine.low %v8572_v50, %v3813_v35  ;;  %v3932_v4 = vrot.slane %v3930_v20, 5  ;;  %v3954_v62 = vshll.u32 %v7882_v40, 16  ;;  %v7915_v7 = vcombine.low %v3875_v52, %v3885_v0  ;;  %v8573_v52 = vld [vmem:[#allocation16_spill] sm:$0xff] }
 0x107   : > { %5888 = vmatprep.mubr.msk.bf16.mxu1 %vm721_vm4, %v8571_v1  ;;  %v7917_v55 = vcombine.low %v3899_v53, %v3909_v59  ;;  %v7919_v56 = vrot.slane %v3944_v43, 5  ;;  %v3959_v42 = vshrl.u32 %v7893_v2, 16  ;;  %v3923_v18 = vsel %vm6725_vm3, %v3918_v6, %v7838_v17  ;;  %v8575_v53 = vld [vmem:[#allocation14_spill] sm:$0xff]  ;;  %v8576_v43 = vld [vmem:[#allocation15_spill] sm:$0xff]  ;;  %v7968_v6 = vld [vmem:[%s6683_s27 + $0xbc] sm:$0x1] }
 0x108   : > { %v3941_v19 = vor.u32 %v3940_v58, %v3937_v8  ;;  %v3950_v39 = vrot.slane %v3948_v14, 4  ;;  %v3962_v36 = vshll.u32 %v7893_v2, 16  ;;  %v5570_v13 = vrot.slane %v5554_v63, 9  ;;  %v8577_v2 = vld [vmem:[#allocation17_spill] sm:$0xff] }
 0x109   : > { %v4418_v10 = vrot.slane %v7558_v41, 5  ;;  %v4421_v35 = vrot.slane %v7612_v61, 5  ;;  %v5571_v15 = vrot.slane %v5555_v25, 9  ;;  %v3933_v24 = vsel %vm6725_vm3, %v3928_v46, %v3932_v4  ;;  %v7989_v25 = vld [vmem:[%s6683_s27 + $0xc4] sm:$0xf] }
 0x10a   : > { %v7934_v29 = vrot.slane %v3954_v62, 5  ;;  %v3968_v45 = vshll.u32 %v7922_v51, 16  ;;  %v4425_v17 = vrot.slane %v7576_v33, 5  ;;  %v7940_v57 = vrot.slane %v3959_v42, 4 }
 0x10b   : > { %v7944_v41 = vsel %vm6955_vm7, %v5570_v13, %v4418_v10  ;;  %v4420_v61 = vrot.slane %v4418_v10, 4  ;;  %v4428_v21 = vrot.slane %v7622_v9, 5  ;;  %v8574_v5 = vcombine.low %v7691_v12, %v8573_v52  ;;  %v5559_v52 = vld [vmem:[%s6683_s27 + $0x84] sm:$0xe] }
 0x10c   : > { %v7953_v33 = vrot.slane %v3941_v19, 4  ;;  %v4427_v20 = vrot.slane %v4425_v17, 4  ;;  %v5572_v0 = vrot.slane %v5556_v47, 9  ;;  %v3951_v9 = vor.u32 %v3950_v39, %v7919_v56  ;;  %v6495_v39 = vld [vmem:[%s6683_s27 + $0xc] sm:$0xff]  }
 0x10d   : > { %6043 = vmatmul.mubr.msk.bf16.gmra.mrb[8].mxu0 %vm721_vm4, %v7740_v34  ;;  %v7957_v34 = vsel %vm6955_vm7, %v5571_v15, %v4425_v17  ;;  %v7963_v12 = vsel %vm6955_vm7, %v4420_v61, %v4421_v35  ;;  %v4432_v59 = vrot.slane %v8575_v53, 5  ;;  %v4435_v23 = vrot.slane %v8576_v43, 5  ;;  %v5558_v35 = vld [vmem:[%s6683_s27 + $0x78] sm:$0xe] }
 0x10e   : > { %5889 = vmatmul.mubr.msk.bf16.gmra.mrb[24].mxu1 %vm721_vm4, %v8574_v5  ;;  %6046 = vmatprep.mubr.msk.bf16.mxu0 %vm721_vm4, %v5524_v26  ;;  %v5587_v8 = vcombine.low %v7944_v41, %v7963_v12  ;;  %v7974_v58 = vsel %vm6955_vm7, %v4427_v20, %v4428_v21  ;;  %v5573_v14 = vrot.slane %v5557_v32, 9  ;;  %v4439_v1 = vrot.slane %v8577_v2, 5 }
 0x10f   : > { %5892 = vmatprep.mubr.msk.bf16.mxu1 %vm721_vm4, %v5175_v38  ;;  %v5511_v38 = vld [vmem:[%s6683_s27 + $0xc0] sm:$0xf]  ;;  %v5588_v50 = vcombine.low %v7957_v34, %v7974_v58  ;;  %v7982_v26 = vsel %vm6955_vm7, %v5572_v0, %v4432_v59  ;;  %v4434_v63 = vrot.slane %v4432_v59, 4  ;;  %v4442_v46 = vrot.slane %v7775_v30, 5  ;;  %v6558_v58 = vld [vmem:[%s6683_s27 + $0x8c] sm:$0x1] }
 0x110   : > { %v7985_v4 = vcombine.low %v3923_v18, %v3933_v24  ;;  %v3972_v62 = vshrl.u32 %v7922_v51, 16  ;;  %v7993_v42 = vsel %vm6955_vm7, %v5573_v14, %v4439_v1  ;;  %v4441_v19 = vrot.slane %v4439_v1, 4  ;;  %v5514_v1 = vld [vmem:[%s6683_s27 + $0xcc] sm:$0xf] }
 0x111   : > { %v7996_v13 = vrot.slane %v3962_v36, 5  ;;  %v7998_v10 = vrot.slane %v3968_v45, 5  ;;  %v3978_v30 = vshll.u32 %v7968_v6, 16  ;;  %v8003_v18 = vsel %vm6955_vm7, %v4434_v63, %v4435_v23  ;;  %v5285_v45 = vld [vmem:[%s6683_s27 + $0x78] sm:$0xf] }
 0x112   : > { %v3947_v15 = vsel %vm6725_vm3, %v7953_v33, %v7919_v56  ;;  %v3983_v47 = vshrl.u32 %v5511_v38, 16  ;;  %v5589_v24 = vcombine.low %v7982_v26, %v8003_v18  ;;  %v8014_v36 = vsel %vm6955_vm7, %v4441_v19, %v4442_v46  ;;  %v8581_v46 = vld [vmem:[#allocation19_spill] sm:$0xff]  ;;  %v6496_v19 = vld [vmem:[%s6683_s27 + $0x18] sm:$0xff]  }
 0x113   : > { %v3952_v17 = vrot.slane %v3951_v9, 4  ;;  %v3986_v61 = vshll.u32 %v5511_v38, 16  ;;  %v3992_v21 = vshll.u32 %v7989_v25, 16  ;;  %v5590_v32 = vcombine.low %v7993_v42, %v8014_v36  ;;  %v6561_v36 = vld [vmem:[%s6683_s27 + $0xac] sm:$0xf] }
 0x114   : > { %v3974_v5 = vrot.slane %v3972_v62, 4  ;;  %v5574_v20 = vrot.slane %v5558_v35, 9  ;;  %v4449_v9 = vrot.slane %v7792_v16, 5  ;;  %v3996_v53 = vshrl.u32 %v7989_v25, 16 }
 0x115   : > { %6047 = vmatmul.mubr.msk.bf16.gmra.mrb[12].mxu0 %vm721_vm4, %v7908_v37  ;;  %v8578_v37 = vld [vmem:[#allocation18_spill] sm:$0xff]  ;;  %v2308_v59 = vshrl.u32 %v5285_v45, 16  ;;  %v2311_v44 = vshll.u32 %v5285_v45, 16  ;;  %v5575_v16 = vrot.slane %v5559_v52, 9  ;;  %v3988_v2 = vrot.slane %v3986_v61, 5 }
 0x116   : > { %5893 = vmatmul.mubr.msk.bf16.gmra.mrb[28].mxu1 %vm721_vm4, %v5176_v54  ;;  %6050 = vmatprep.mubr.msk.bf16.mxu0 %vm721_vm4, %v7911_v27  ;;  %v4446_v0 = vrot.slane %v8578_v37, 5  ;;  %v8580_v54 = vld [vmem:[#allocation10_spill] sm:$0xff]  ;;  %v3985_v27 = vrot.slane %v3983_v47, 4  ;;  %v4453_v62 = vrot.slane %v8581_v46, 5  ;;  %v8046_v35 = vrot.slane %v3992_v21, 5 }
 0x117   : > { %5898 = vmatprep.mubr.msk.bf16.mxu1 %vm721_vm4, %v6495_v39  ;;  %v2330_v43 = vsel %vm6725_vm3, %v8580_v54, %v8579_v49  ;;  %v2310_v38 = vrot.slane %v2308_v59, 4  ;;  %v2313_v63 = vrot.slane %v2311_v44, 5  ;;  %v3965_v39 = vor.u32 %v7996_v13, %v7940_v57  ;;  %v8049_v47 = vld [vmem:[%s6683_s27 + $0xd0] sm:$0xf]  ;;  %v6497_v52 = vld [vmem:[%s6683_s27 + $0x24] sm:$0xff]  }
 0x118   : > { %v8039_v23 = vsel %vm6955_vm7, %v5574_v20, %v4446_v0  ;;  %v4448_v14 = vrot.slane %v4446_v0, 4  ;;  %v4456_v61 = vrot.slane %v7802_v3, 5  ;;  %v3957_v20 = vsel %vm6725_vm3, %v3952_v17, %v7934_v29  ;;  %v5560_v13 = vld [vmem:[%s6683_s27 + $0x90] sm:$0xe]  ;;  %v8065_v59 = vld [vmem:[%s6683_s27 + $0xc8] sm:$0x1] }
 0x119   : > { %v3998_v37 = vrot.slane %v3996_v53, 4  ;;  %v2314_v57 = vor.u32 %v2313_v63, %v2310_v38  ;;  %v3975_v21 = vor.u32 %v3974_v5, %v7998_v10  ;;  %v4007_v44 = vshrl.u32 %v5514_v1, 16  ;;  %v8584_v38 = vld [vmem:[#allocation8_spill] sm:$0xff] }
 0x11a   : > { %v8053_v45 = vsel %vm6955_vm7, %v4448_v14, %v4449_v9  ;;  %v8069_v9 = vsel %vm6955_vm7, %v5575_v16, %v4453_v62  ;;  %v4455_v3 = vrot.slane %v4453_v62, 4  ;;  %v3989_v29 = vor.u32 %v3988_v2, %v3985_v27  ;;  %v8583_v16 = vld [vmem:[#allocation7_spill] sm:$0xff] }
 0x11b   : > { %v5591_v0 = vcombine.low %v8039_v23, %v8053_v45  ;;  %v4010_v17 = vshll.u32 %v5514_v1, 16  ;;  %v4016_v53 = vshll.u32 %v8049_v47, 16  ;;  %v2315_v49 = vrot.slane %v2314_v57, 4  ;;  %v8103_v57 = vld [vmem:[%s6683_s27 + $0xd4] sm:$0x1] }
 0x11c   : > { %v4020_v5 = vshrl.u32 %v8049_v47, 16  ;;  %v8080_v54 = vsel %vm6955_vm7, %v4455_v3, %v4456_v61  ;;  %v5576_v14 = vrot.slane %v5560_v13, 9  ;;  %v3999_v2 = vor.u32 %v3998_v37, %v8046_v35  ;;  %v6562_v45 = vld [vmem:[%s6683_s27 + $0xb8] sm:$0xf] }
 0x11d   : > { %6051 = vmatmul.mubr.msk.bf16.gmra.mrb[16].mxu0 %vm721_vm4, %v7915_v7  ;;  %v8582_v7 = vld [vmem:[#allocation20_spill] sm:$0xff]  ;;  %v4002_v1 = vshll.u32 %v8065_v59, 16  ;;  %v5592_v63 = vcombine.low %v8069_v9, %v8080_v54  ;;  %v5530_v46 = vcombine.low %v3947_v15, %v3957_v20  ;;  %v3966_v62 = vrot.slane %v3965_v39, 4 }
 0x11e   : > { %5899 = vmatmul.mubr.msk.bf16.vlgmr.msra.gmra.mrb[0].mxu1 %vm721_vm4, %v6496_v19  ;;  %6054 = vmatprep.mubr.msk.bf16.mxu0 %vm721_vm4, %v7917_v55  ;;  %v4460_v27 = vrot.slane %v8582_v7, 5  ;;  %v2320_v55 = vsel %vm6725_vm3, %v2315_v49, %v8584_v38  ;;  %v3980_v19 = vrot.slane %v3978_v30, 5  ;;  %v3976_v37 = vrot.slane %v3975_v21, 4  ;;  %v5561_v20 = vld [vmem:[%s6683_s27 + $0x9c] sm:$0xe] }
 0x11f   : > { %6160 = vmatpush3.bf16.msra.mxu1 %v8583_v16  ;;  %5902 = vmatprep.mubr.msk.bf16.mxu1 %vm721_vm4, %v6497_v52  ;;  %v8099_v61 = vcombine.low %v2320_v55, %v2330_v43  ;;  %v6498_v52 = vld [vmem:[%s6683_s27 + $0x30] sm:$0xff]   ;;  %v4463_v49 = vrot.slane %v7813_v11, 5  ;;  %v4009_v56 = vrot.slane %v4007_v44, 4  ;;  %v4012_v33 = vrot.slane %v4010_v17, 5  ;;  %v6499_v30 = vld [vmem:[%s6683_s27 + $0x3c] sm:$0xff]  }
 0x120   : > { %v8107_v13 = vsel %vm6955_vm7, %v5576_v14, %v4460_v27  ;;  %v4462_v3 = vrot.slane %v4460_v27, 4  ;;  %v8110_v15 = vrot.slane %v4016_v53, 5  ;;  %v4022_v39 = vrot.slane %v4020_v5, 4  ;;  %v6548_v38 = vld [vmem:[%s6683_s27 + $0x1c] sm:$0xf] }
 0x121   : > { %v3990_v43 = vrot.slane %v3989_v29, 4  ;;  %v4000_v7 = vrot.slane %v3999_v2, 4  ;;  %v4004_v21 = vrot.slane %v4002_v1, 5  ;;  %v3971_v11 = vsel %vm6725_vm3, %v3966_v62, %v7998_v10  ;;  %v5562_v62 = vld [vmem:[%s6683_s27 + $0xa8] sm:$0xe] }
 0x122   : > { %v8116_v16 = vsel %vm6955_vm7, %v4462_v3, %v4463_v49  ;;  %v3981_v44 = vsel %vm6725_vm3, %v3976_v37, %v3980_v19  ;;  %v4026_v29 = vshll.u32 %v8103_v57, 16  ;;  %v5577_v17 = vrot.slane %v5561_v20, 9  ;;  %v6500_v37 = vld [vmem:[%s6683_s27 + $0x48] sm:$0xff]   ;;  %v6549_v20 = vld [vmem:[%s6683_s27 + $0x20] sm:$0x1] }
 0x123   : > { %v5593_v14 = vcombine.low %v8107_v13, %v8116_v16  ;;  %v4013_v53 = vor.u32 %v4012_v33, %v4009_v56  ;;  %v4023_v5 = vor.u32 %v4022_v39, %v8110_v15  ;;  %v4467_v27 = vrot.slane %v7809_v48, 5  ;;  %v6501_v33 = vld [vmem:[%s6683_s27 + $0x54] sm:$0xff]  }
 0x124   : > { %v4470_v10 = vrot.slane %v7841_v28, 5  ;;  %v3995_v2 = vsel %vm6725_vm3, %v3990_v43, %v8046_v35  ;;  %v4005_v1 = vsel %vm6725_vm3, %v4000_v7, %v4004_v21  ;;  %v4390_v55 = vrot.slane %v6548_v38, 5  ;;  %v5552_v38 = vld [vmem:[%s6683_s27 + $0x30] sm:$0xe] }
 0x125   : > { %6055 = vmatmul.mubr.msk.bf16.gmra.mrb[20].mxu0 %vm721_vm4, %v7985_v4  ;;  %v5550_v4 = vld [vmem:[%s6683_s27 + $0x18] sm:$0xe]  ;;  %v4469_v48 = vrot.slane %v4467_v27, 4  ;;  %v5531_v28 = vcombine.low %v3971_v11, %v3981_v44  ;;  %v4028_v19 = vrot.slane %v4026_v29, 5  ;;  %v5532_v3 = vcombine.low %v3995_v2, %v4005_v1  ;;  %v5551_v11 = vld [vmem:[%s6683_s27 + $0x24] sm:$0xe] }
 0x126   : > { %5903 = vmatmul.mubr.msk.bf16.gmra.mrb[4].mxu1 %vm721_vm4, %v6498_v52  ;;  %6058 = vmatprep.mubr.msk.bf16.mxu0 %vm721_vm4, %v5530_v46  ;;  %v8143_v46 = vsel %vm6955_vm7, %v5577_v17, %v4467_v27  ;;  %v5566_v52 = vrot.slane %v5550_v4, 9  ;;  %v4014_v35 = vrot.slane %v4013_v53, 4  ;;  %v4024_v49 = vrot.slane %v4023_v5, 4  ;;  %v6550_v44 = vld [vmem:[%s6683_s27 + $0x28] sm:$0xf] }
 0x127   : > { %5906 = vmatprep.mubr.msk.bf16.mxu1 %vm721_vm4, %v6499_v30  ;;  %v8149_v56 = vsel %vm6955_vm7, %v4469_v48, %v4470_v10  ;;  %v4392_v39 = vrot.slane %v4390_v55, 4  ;;  %v4393_v30 = vrot.slane %v6549_v20, 5  ;;  %v5578_v7 = vrot.slane %v5562_v62, 9  ;;  %v6551_v10 = vld [vmem:[%s6683_s27 + $0x34] sm:$0xf] }
 0x128   : > { %v5594_v43 = vcombine.low %v8143_v46, %v8149_v56  ;;  %v4474_v21 = vrot.slane %v7848_v60, 5  ;;  %v4397_v29 = vrot.slane %v6550_v44, 5  ;;  %v4477_v17 = vrot.slane %v7882_v40, 5  ;;  %v5563_v2 = vld [vmem:[%s6683_s27 + $0xb4] sm:$0xe] }
 0x129   : > { %v4019_v53 = vsel %vm6725_vm3, %v4014_v35, %v8110_v15  ;;  %v4029_v60 = vsel %vm6725_vm3, %v4024_v49, %v4028_v19  ;;  %v4391_v40 = vsel %vm6955_vm7, %v5566_v52, %v4390_v55  ;;  %v4394_v27 = vsel %vm6955_vm7, %v4392_v39, %v4393_v30  ;;  %v6552_v19 = vld [vmem:[%s6683_s27 + $0x2c] sm:$0x1]  ;;  %v6502_v52 = vld [vmem:[%s6683_s27 + $0x60] sm:$0xff]   ;;  %v6566_v46 = vld [vmem:[%s6683_s27 + $0xc8] sm:$0x1] }
 0x12a   : > { %v8169_v5 = vsel %vm6955_vm7, %v5578_v7, %v4474_v21  ;;  %v4476_v4 = vrot.slane %v4474_v21, 4  ;;  %v4404_v15 = vrot.slane %v6551_v10, 5  ;;  %v5567_v1 = vrot.slane %v5551_v11, 9  ;;  %v6503_v39 = vld [vmem:[%s6683_s27 + $0x6c] sm:$0xff]   ;;  %v8586_v11 = vld [vmem:[#allocation12_spill] sm:$0xff] }
 0x12b   : > { %v5533_v62 = vcombine.low %v4019_v53, %v4029_v60  ;;  %v5579_v35 = vrot.slane %v5563_v2, 9  ;;  %v4481_v49 = vrot.slane %v7922_v51, 5  ;;  %v5568_v20 = vrot.slane %v5552_v38, 9  ;;  %v8585_v7 = vld [vmem:[#allocation11_spill] sm:$0xff]  ;;  %v5564_v60 = vld [vmem:[%s6683_s27 + $0xc0] sm:$0xe] }
 0x12c   : > { %v8181_v48 = vsel %vm6955_vm7, %v4476_v4, %v4477_v17  ;;  %v4406_v30 = vrot.slane %v4404_v15, 4  ;;  %v4407_v21 = vrot.slane %v8585_v7, 5  ;;  %v4411_v44 = vrot.slane %v8586_v11, 5  ;;  %v5553_v4 = vld [vmem:[%s6683_s27 + $0x3c] sm:$0xe] }
 0x12d   : > { %6059 = vmatmul.mubr.msk.bf16.gmra.mrb[24].mxu0 %vm721_vm4, %v5531_v28  ;;  %v4399_v28 = vrot.slane %v4397_v29, 4  ;;  %v5595_v55 = vcombine.low %v8169_v5, %v8181_v48  ;;  %v8194_v17 = vsel %vm6955_vm7, %v5579_v35, %v4481_v49  ;;  %v4483_v53 = vrot.slane %v4481_v49, 4  ;;  %v5282_v35 = vld [vmem:[%s6683_s27 + $0x6c] sm:$0xf]  ;;  %v6553_v11 = vld [vmem:[%s6683_s27 + $0x70] sm:$0xf] }
 0x12e   : > { %5907 = vmatmul.mubr.msk.bf16.gmra.mrb[8].mxu1 %vm721_vm4, %v6500_v37  ;;  %6062 = vmatprep.mubr.msk.bf16.mxu0 %vm721_vm4, %v5532_v3  ;;  %v4400_v37 = vrot.slane %v6552_v19, 5  ;;  %v5583_v3 = vcombine.low %v4391_v40, %v4394_v27  ;;  %v4398_v51 = vsel %vm6955_vm7, %v5567_v1, %v4397_v29  ;;  %v4405_v27 = vsel %vm6955_vm7, %v5568_v20, %v4404_v15  ;;  %v5565_v20 = vld [vmem:[%s6683_s27 + $0xcc] sm:$0xe] }
 0x12f   : > { %5910 = vmatprep.mubr.msk.bf16.mxu1 %vm721_vm4, %v6501_v33  ;;  %v4484_v33 = vrot.slane %v7968_v6, 5  ;;  %v4408_v10 = vsel %vm6955_vm7, %v4406_v30, %v4407_v21  ;;  %v5580_v2 = vrot.slane %v5564_v60, 9  ;;  %v5569_v1 = vrot.slane %v5553_v4, 9 }
 0x130   : > { %v4401_v6 = vsel %vm6955_vm7, %v4399_v28, %v4400_v37  ;;  %v4413_v38 = vrot.slane %v4411_v44, 4  ;;  %v4488_v19 = vrot.slane %v7989_v25, 5  ;;  %v5585_v15 = vcombine.low %v4405_v27, %v4408_v10 }
 0x131   : > { %v8207_v40 = vsel %vm6955_vm7, %v4483_v53, %v4484_v33  ;;  %v5584_v37 = vcombine.low %v4398_v51, %v4401_v6  ;;  %v4412_v30 = vsel %vm6955_vm7, %v5569_v1, %v4411_v44  ;;  %v2287_v21 = vshll.u32 %v5282_v35, 16 }
 0x132   : > { %v5596_v29 = vcombine.low %v8194_v17, %v8207_v40  ;;  %v8223_v49 = vsel %vm6955_vm7, %v5580_v2, %v4488_v19  ;;  %v4490_v33 = vrot.slane %v4488_v19, 4  ;;  %v2293_v53 = vshll.u32 %v6553_v11, 16 }
 0x133   : > { %v2297_v44 = vshrl.u32 %v6553_v11, 16  ;;  %v5581_v4 = vrot.slane %v5565_v20, 9  ;;  %v4495_v51 = vrot.slane %v8049_v47, 5  ;;  %v4498_v6 = vrot.slane %v8103_v57, 5  ;;  %v5288_v57 = vld [vmem:[%s6683_s27 + $0x84] sm:$0xf] }
 0x134   : > { %v6555_v20 = vld [vmem:[%s6683_s27 + $0x88] sm:$0xf]  ;;  %v2471_v56 = vshll.u32 %v6566_v46, 16 }
 0x135   : > { %6063 = vmatmul.mubr.msk.bf16.gmra.mrb[28].mxu0 %vm721_vm4, %v5533_v62  ;;  %v8587_v62 = vld [vmem:[#allocation13_spill] sm:$0xff]  ;;  %v8246_v27 = vsel %vm6955_vm7, %v5581_v4, %v4495_v51  ;;  %v4497_v10 = vrot.slane %v4495_v51, 4  ;;  %v2299_v19 = vrot.slane %v2297_v44, 4  ;;  %v5294_v44 = vld [vmem:[%s6683_s27 + $0x9c] sm:$0xf]  ;;  %v6509_v4 = vld [vmem:[%s6683_s27 + $0xb4] sm:$0xff]  }
 0x136   : > { %5911 = vmatmul.mubr.msk.bf16.gmra.mrb[12].mxu1 %vm721_vm4, %v6502_v52  ;;  %6068 = vmatprep.mubr.msk.bf16.mxu0 %vm721_vm4, %v5583_v3  ;;  %v4414_v28 = vrot.slane %v8587_v62, 5  ;;  %v4491_v52 = vrot.slane %v8065_v59, 5  ;;  %v6504_v3 = vld [vmem:[%s6683_s27 + $0x78] sm:$0xff]   ;;  %v2284_v59 = vshrl.u32 %v5282_v35, 16  ;;  %v2289_v62 = vrot.slane %v2287_v21, 5  ;;  %v6508_v21 = vld [vmem:[%s6683_s27 + $0xa8] sm:$0xff]  }
 0x137   : > { %5914 = vmatprep.mubr.msk.bf16.mxu1 %vm721_vm4, %v6503_v39  ;;  %v6505_v39 = vld [vmem:[%s6683_s27 + $0x84] sm:$0xff]   ;;  %v8251_v47 = vsel %vm6955_vm7, %v4497_v10, %v4498_v6 }
 0x138   : > { %v4415_v25 = vsel %vm6955_vm7, %v4413_v38, %v4414_v28  ;;  %v8233_v7 = vsel %vm6955_vm7, %v4490_v33, %v4491_v52  ;;  %v2286_v1 = vrot.slane %v2284_v59, 4  ;;  %v6506_v38 = vld [vmem:[%s6683_s27 + $0x90] sm:$0xff]   ;;  %v2295_v28 = vrot.slane %v2293_v53, 5 }
 0x139   : > { %v5597_v60 = vcombine.low %v8223_v49, %v8233_v7  ;;  %v5586_v2 = vcombine.low %v4412_v30, %v4415_v25  ;;  %v5598_v52 = vcombine.low %v8246_v27, %v8251_v47  ;;  %v2332_v33 = vshrl.u32 %v5288_v57, 16  ;;  %v5291_v59 = vld [vmem:[%s6683_s27 + $0x90] sm:$0xf] }
 0x13a   : > { %v2290_v22 = vor.u32 %v2289_v62, %v2286_v1  ;;  %v2300_v35 = vor.u32 %v2299_v19, %v2295_v28  ;;  %v2341_v30 = vshll.u32 %v6555_v20, 16  ;;  %v2345_v25 = vshrl.u32 %v6555_v20, 16  ;;  %v6556_v1 = vld [vmem:[%s6683_s27 + $0x94] sm:$0xf] }
 0x13b   : > { %v2334_v12 = vrot.slane %v2332_v33, 4  ;;  %v2356_v10 = vshrl.u32 %v5291_v59, 16  ;;  %v2369_v62 = vshrl.u32 %v6556_v1, 16  ;;  %v2380_v19 = vshrl.u32 %v5294_v44, 16 }
 0x13c   : > { %v2291_v53 = vrot.slane %v2290_v22, 4  ;;  %v2301_v41 = vrot.slane %v2300_v35, 4  ;;  %v8270_v51 = vrot.slane %v2341_v30, 5  ;;  %v2347_v6 = vrot.slane %v2345_v25, 4 }
 0x13d   : > { %6069 = vmatmul.mubr.msk.bf16.vlgmr.msra.gmra.mrb[0].mxu0 %vm721_vm4, %v5584_v37  ;;  %v6507_v37 = vld [vmem:[%s6683_s27 + $0x9c] sm:$0xff]   ;;  %v2382_v20 = vrot.slane %v2380_v19, 4 }
 0x13e   : > { %5915 = vmatmul.mubr.msk.bf16.gmra.mrb[16].mxu1 %vm721_vm4, %v6504_v3  ;;  %6072 = vmatprep.mubr.msk.bf16.mxu0 %vm721_vm4, %v5585_v15  ;;  %v6554_v3 = vld [vmem:[%s6683_s27 + $0x74] sm:$0x1]  ;;  %v2296_v22 = vsel %vm6725_vm3, %v2291_v53, %v2295_v28  ;;  %v2348_v33 = vor.u32 %v2347_v6, %v8270_v51 }
 0x13f   : > { %5918 = vmatprep.mubr.msk.bf16.mxu1 %vm721_vm4, %v6505_v39  ;;  %v2303_v15 = vshll.u32 %v6554_v3, 16  ;;  %v2335_v39 = vshll.u32 %v5288_v57, 16  ;;  %v6557_v57 = vld [vmem:[%s6683_s27 + $0xa0] sm:$0xf] }
 0x140   : > { %v2389_v3 = vshll.u32 %v6557_v57, 16 }
 0x141   : > { %v2305_v11 = vrot.slane %v2303_v15, 5  ;;  %v2393_v15 = vshrl.u32 %v6557_v57, 16 }
 0x142   : > { %v8292_v28 = vrot.slane %v2389_v3, 5 }
 0x143   : > { %v2306_v34 = vsel %vm6725_vm3, %v2301_v41, %v2305_v11  ;;  %v2395_v25 = vrot.slane %v2393_v15, 4  ;;  %v2349_v41 = vrot.slane %v2348_v33, 4 }
 0x145   : > { %6073 = vmatmul.mubr.msk.bf16.gmra.mrb[4].mxu0 %vm721_vm4, %v5586_v2  ;;  %v2359_v2 = vshll.u32 %v5291_v59, 16  ;;  %v6510_v59 = vld [vmem:[%s6683_s27 + $0xc0] sm:$0xff]  }
 0x146   : > { %5919 = vmatmul.mubr.msk.bf16.gmra.mrb[20].mxu1 %vm721_vm4, %v6506_v38  ;;  %6076 = vmatprep.mubr.msk.bf16.mxu0 %vm721_vm4, %v5587_v8  ;;  %v2337_v8 = vrot.slane %v2335_v39, 5  ;;  %v2365_v38 = vshll.u32 %v6556_v1, 16  ;;  %v2358_v39 = vrot.slane %v2356_v10, 4  ;;  %v6560_v1 = vld [vmem:[%s6683_s27 + $0xa4] sm:$0x1] }
 0x147   : > { %5922 = vmatprep.mubr.msk.bf16.mxu1 %vm721_vm4, %v6507_v37  ;;  %v2383_v37 = vshll.u32 %v5294_v44, 16  ;;  %v2361_v26 = vrot.slane %v2359_v2, 5  ;;  %v2396_v2 = vor.u32 %v2395_v25, %v8292_v28 }
 0x148   : > { %v2338_v35 = vor.u32 %v2337_v8, %v2334_v12  ;;  %v8290_v18 = vrot.slane %v2365_v38, 5  ;;  %v6559_v8 = vld [vmem:[%s6683_s27 + $0x98] sm:$0x1]  ;;  %v2399_v38 = vshll.u32 %v6560_v1, 16 }
 0x149   : > { %v2385_v30 = vrot.slane %v2383_v37, 5  ;;  %v2362_v12 = vor.u32 %v2361_v26, %v2358_v39  ;;  %v2375_v44 = vshll.u32 %v6559_v8, 16  ;;  %v2417_v37 = vshrl.u32 %v6561_v36, 16 }
 0x14a   : > { %v2339_v53 = vrot.slane %v2338_v35, 4  ;;  %v2397_v33 = vrot.slane %v2396_v2, 4  ;;  %v2401_v39 = vrot.slane %v2399_v38, 5  ;;  %v6565_v38 = vld [vmem:[%s6683_s27 + $0xbc] sm:$0x1] }
 0x14b   : > { %v2386_v10 = vor.u32 %v2385_v30, %v2382_v20  ;;  %v2363_v15 = vrot.slane %v2362_v12, 4  ;;  %v2419_v30 = vrot.slane %v2417_v37, 4  ;;  %v2447_v13 = vshll.u32 %v6565_v38, 16 }
 0x14c   : > { %v2344_v57 = vsel %vm6725_vm3, %v2339_v53, %v8270_v51  ;;  %v5303_v53 = vld [vmem:[%s6683_s27 + $0xc0] sm:$0xf]  ;;  %v2402_v9 = vsel %vm6725_vm3, %v2397_v33, %v2401_v39 }
 0x14d   : > { %6077 = vmatmul.mubr.msk.bf16.gmra.mrb[8].mxu0 %vm721_vm4, %v5588_v50  ;;  %v2351_v50 = vshll.u32 %v6558_v58, 16  ;;  %v2441_v58 = vshrl.u32 %v6562_v45, 16  ;;  %v2387_v35 = vrot.slane %v2386_v10, 4 }
 0x14e   : > { %5923 = vmatmul.mubr.msk.bf16.gmra.mrb[24].mxu1 %vm721_vm4, %v6508_v21  ;;  %6080 = vmatprep.mubr.msk.bf16.mxu0 %vm721_vm4, %v5589_v24  ;;  %v2371_v24 = vrot.slane %v2369_v62, 4  ;;  %v5315_v21 = vcombine.low %v2296_v22, %v2306_v34  ;;  %v5300_v62 = vld [vmem:[%s6683_s27 + $0xb4] sm:$0xf]  ;;  %v2377_v22 = vrot.slane %v2375_v44, 5 }
 0x14f   : > { %5926 = vmatprep.mubr.msk.bf16.mxu1 %vm721_vm4, %v6509_v4  ;;  %v2353_v11 = vrot.slane %v2351_v50, 5  ;;  %v5297_v4 = vld [vmem:[%s6683_s27 + $0xa8] sm:$0xf]  ;;  %v2428_v34 = vshrl.u32 %v5300_v62, 16  ;;  %v2431_v23 = vshll.u32 %v5300_v62, 16  ;;  %v2392_v8 = vsel %vm6725_vm3, %v2387_v35, %v8292_v28 }
 0x150   : > { %v2372_v6 = vor.u32 %v2371_v24, %v8290_v18  ;;  %v2404_v19 = vshrl.u32 %v5297_v4, 16  ;;  %v2407_v42 = vshll.u32 %v5297_v4, 16  ;;  %v2452_v4 = vshrl.u32 %v5303_v53, 16 }
 0x151   : > { %v2354_v3 = vsel %vm6725_vm3, %v2349_v41, %v2353_v11  ;;  %v2430_v25 = vrot.slane %v2428_v34, 4  ;;  %v2443_v11 = vrot.slane %v2441_v58, 4  ;;  %v2368_v41 = vsel %vm6725_vm3, %v2363_v15, %v8290_v18  ;;  %v6563_v18 = vld [vmem:[%s6683_s27 + $0xb0] sm:$0x1] }
 0x152   : > { %v2373_v50 = vrot.slane %v2372_v6, 4  ;;  %v2406_v26 = vrot.slane %v2404_v19, 4  ;;  %v2409_v24 = vrot.slane %v2407_v42, 5  ;;  %v5317_v51 = vcombine.low %v2344_v57, %v2354_v3  ;;  %v6564_v6 = vld [vmem:[%s6683_s27 + $0xc4] sm:$0xf] }
 0x153   : > { %v2423_v44 = vshll.u32 %v6563_v18, 16  ;;  %v2455_v28 = vshll.u32 %v5303_v53, 16  ;;  %v2461_v10 = vshll.u32 %v6564_v6, 16  ;;  %v2465_v2 = vshrl.u32 %v6564_v6, 16  ;;  %v8391_v53 = vld [vmem:[%s8521_s2] ss:$0 sm:$0xff] }
 0x154   : > { %v2378_v12 = vsel %vm6725_vm3, %v2373_v50, %v2377_v22  ;;  %v2410_v54 = vor.u32 %v2409_v24, %v2406_v26  ;;  %v2449_v22 = vrot.slane %v2447_v13, 5  ;;  %v2473_v35 = vrot.slane %v2471_v56, 5 }
 0x155   : > { %6081 = vmatmul.mubr.msk.bf16.gmra.mrb[12].mxu0 %vm721_vm4, %v5590_v32  ;;  %v2413_v32 = vshll.u32 %v6561_v36, 16  ;;  %v5318_v16 = vcombine.low %v2368_v41, %v2378_v12  ;;  %v2425_v42 = vrot.slane %v2423_v44, 5  ;;  %v2454_v36 = vrot.slane %v2452_v4, 4 }
 0x156   : > { %5927 = vmatmul.mubr.msk.bf16.gmra.mrb[28].mxu1 %vm721_vm4, %v6510_v59  ;;  %6084 = vmatprep.mubr.msk.bf16.mxu0 %vm721_vm4, %v5591_v0  ;;  %v2437_v0 = vshll.u32 %v6562_v45, 16  ;;  %v2433_v59 = vrot.slane %v2431_v23, 5  ;;  %v2411_v62 = vrot.slane %v2410_v54, 4  ;;  %v2463_v37 = vrot.slane %v2461_v10, 5 }
 0x157   : > { %5948 = vmatprep.mubr.msk.bf16.mxu1 %vm721_vm4, %v5315_v21  ;;  %v2415_v20 = vrot.slane %v2413_v32, 5  ;;  %v2457_v32 = vrot.slane %v2455_v28, 5  ;;  %v2467_v57 = vrot.slane %v2465_v2, 4 }
 0x158   : > { %v2439_v21 = vrot.slane %v2437_v0, 5 }
 0x159   : > { %v2416_v34 = vsel %vm6725_vm3, %v2411_v62, %v2415_v20  ;;  %v2458_v45 = vor.u32 %v2457_v32, %v2454_v36  ;;  %v2468_v0 = vor.u32 %v2467_v57, %v2463_v37 }
 0x15a   : > { %v2444_v1 = vor.u32 %v2443_v11, %v2439_v21 }
 0x15b   : > { %v2459_v58 = vrot.slane %v2458_v45, 4  ;;  %v2469_v50 = vrot.slane %v2468_v0, 4 }
 0x15c   : > { %v2445_v15 = vrot.slane %v2444_v1, 4 }
 0x15d   : > { %6085 = vmatmul.mubr.msk.bf16.gmra.mrb[16].mxu0 %vm721_vm4, %v5592_v63  ;;  %v2420_v63 = vor.u32 %v2419_v30, %v2415_v20  ;;  %v2464_v33 = vsel %vm6725_vm3, %v2459_v58, %v2463_v37  ;;  %v2474_v39 = vsel %vm6725_vm3, %v2469_v50, %v2473_v35 }
 0x15e   : > { %5949 = vmatmul.mubr.msk.bf16.vlgmr.msra.gmra.mrb[16].mxu1 %vm721_vm4, %v8099_v61  ;;  %6088 = vmatprep.mubr.msk.bf16.mxu0 %vm721_vm4, %v5593_v14  ;;  %v2434_v61 = vor.u32 %v2433_v59, %v2430_v25  ;;  %v5319_v14 = vcombine.low %v2392_v8, %v2402_v9  ;;  %v2450_v5 = vsel %vm6725_vm3, %v2445_v15, %v2449_v22 }
 0x15f   : > { %5952 = vmatprep.mubr.msk.bf16.mxu1 %vm721_vm4, %v5317_v51  ;;  %v2421_v19 = vrot.slane %v2420_v63, 4  ;;  %v5322_v26 = vcombine.low %v2464_v33, %v2474_v39 }
 0x160   : > { %v2435_v3 = vrot.slane %v2434_v61, 4 }
 0x161   : > { %v2426_v23 = vsel %vm6725_vm3, %v2421_v19, %v2425_v42 }
 0x162   : > { %v5320_v48 = vcombine.low %v2416_v34, %v2426_v23 }
 0x165   : > { %6089 = vmatmul.mubr.msk.bf16.gmra.mrb[20].mxu0 %vm721_vm4, %v5594_v43  ;;  %v2440_v43 = vsel %vm6725_vm3, %v2435_v3, %v2439_v21 }
 0x166   : > { %5953 = vmatmul.mubr.msk.bf16.gmra.mrb[20].mxu1 %vm721_vm4, %v5318_v16  ;;  %6092 = vmatprep.mubr.msk.bf16.mxu0 %vm721_vm4, %v5595_v55  ;;  %v5321_v55 = vcombine.low %v2440_v43, %v2450_v5 }
 0x167   : > { %5956 = vmatprep.mubr.msk.bf16.mxu1 %vm721_vm4, %v5319_v14 }
 0x16d   : > { %6093 = vmatmul.mubr.msk.bf16.gmra.mrb[24].mxu0 %vm721_vm4, %v5596_v29 }
 0x16e   : > { %5957 = vmatmul.mubr.msk.bf16.gmra.mrb[24].mxu1 %vm721_vm4, %v5320_v48  ;;  %6096 = vmatprep.mubr.msk.bf16.mxu0 %vm721_vm4, %v5597_v60 }
 0x16f   : > { %5960 = vmatprep.mubr.msk.bf16.mxu1 %vm721_vm4, %v5321_v55 }
 0x175   : > { %6097 = vmatmul.mubr.msk.bf16.gmra.mrb[28].mxu0 %vm721_vm4, %v5598_v52 }
 0x176   : > { %5961 = vmatmul.mubr.msk.bf16.gmra.mrb[28].mxu1 %vm721_vm4, %v5322_v26 }
 0x1f1   : > { %v5900_v17 = vpop.f32.mrb[0].mxu1 }
 0x1f2   : > { %v1884_v40 = vpop.f32.mrb[1].mxu1 }
 0x1f3   : > { %v5901_v29 = vpop.f32.mrb[2].mxu1 }
 0x1f4   : > { %v1887_v49 = vpop.f32.mrb[3].mxu1 }
 0x1f9   : > { %v5904_v7 = vpop.f32.mrb[4].mxu1 }
 0x1fa   : > { %v1900_v60 = vpop.f32.mrb[5].mxu1 }
 0x1fb   : > { %v5905_v24 = vpop.f32.mrb[6].mxu1 }
 0x1fc   : > { %v1903_v20 = vpop.f32.mrb[7].mxu1 }
 0x201   : > { %v5908_v30 = vpop.f32.mrb[8].mxu1 }
 0x202   : > { %v1916_v31 = vpop.f32.mrb[9].mxu1 }
 0x203   : > { %v5909_v51 = vpop.f32.mrb[10].mxu1 }
 0x204   : > { %v1919_v25 = vpop.f32.mrb[11].mxu1 }
 0x209   : > { %v5912_v59 = vpop.f32.mrb[12].mxu1 }
 0x20a   : > { %v8382_v21 = vpop.f32.mrb[13].mxu1 }
 0x20b   : > { %v8384_v27 = vpop.f32.mrb[14].mxu1 }
 0x20c   : > { %v8386_v47 = vpop.f32.mrb[15].mxu1 }
 0x210   : > { %v6070_v52 = vpop.f32.mrb[0].mxu0 }
 0x211   : > { %v6161_v11 = vadd.f32 %v6070_v52, %v5900_v17  ;;  %v4635_v41 = vpop.f32.mrb[1].mxu0 }
 0x212   : > { %v6162_v12 = vadd.f32 %v4635_v41, %v1884_v40  ;;  %v6071_v8 = vpop.f32.mrb[2].mxu0 }
 0x213   : > { %v6163_v9 = vadd.f32 %v6071_v8, %v5901_v29  ;;  %v4638_v54 = vpop.f32.mrb[3].mxu0  ;;  %v4803_v44 = vadd.f32 %v6161_v11, %v8391_v53 }
 0x214   : > { %v4801_v63 = vadd.f32 %v6162_v12, %v8391_v53  ;;  %v6164_v18 = vadd.f32 %v4638_v54, %v1887_v49 }
 0x215   : > { %v4804_v6 = vadd.f32 %v6163_v9, %v8391_v53  ;;  %v4835_v38 = vmax.f32 %v4803_v44, 0.0 }
 0x216   : > { %v4802_v4 = vadd.f32 %v6164_v18, %v8391_v53  ;;  %v4833_v28 = vmax.f32 %v4801_v63, 0.0 }
 0x217   : > { %v4836_v42 = vmax.f32 %v4804_v6, 0.0 }
 0x218   : > { %v4834_v10 = vmax.f32 %v4802_v4, 0.0  ;;  %v6074_v2 = vpop.f32.mrb[4].mxu0 }
 0x219   : > { %v6165_v61 = vadd.f32 %v6074_v2, %v5904_v7  ;;  %v4651_v1 = vpop.f32.mrb[5].mxu0 }
 0x21a   : > { %v4866_v13 = vadd.f32 %v4834_v10, %v4833_v28  ;;  %v6166_v16 = vadd.f32 %v4651_v1, %v1900_v60  ;;  %v6075_v14 = vpop.f32.mrb[6].mxu0 }
 0x21b   : > { %v6167_v62 = vadd.f32 %v6075_v14, %v5905_v24  ;;  %v4654_v19 = vpop.f32.mrb[7].mxu0  ;;  %v4807_v57 = vadd.f32 %v6165_v61, %v8391_v53 }
 0x21c   : > { %v4867_v36 = vadd.f32 %v4866_v13, %v4835_v38  ;;  %v4805_v32 = vadd.f32 %v6166_v16, %v8391_v53  ;;  %v6168_v37 = vadd.f32 %v4654_v19, %v1903_v20 }
 0x21d   : > { %v4808_v23 = vadd.f32 %v6167_v62, %v8391_v53  ;;  %v4839_v43 = vmax.f32 %v4807_v57, 0.0 }
 0x21e   : > { %v4837_v3 = vmax.f32 %v4805_v32, 0.0  ;;  %v4868_v15 = vadd.f32 %v4867_v36, %v4836_v42  ;;  %v4806_v22 = vadd.f32 %v6168_v37, %v8391_v53 }
 0x21f   : > { %v4840_v35 = vmax.f32 %v4808_v23, 0.0 }
 0x220   : > { %v4869_v34 = vadd.f32 %v4868_v15, %v4837_v3  ;;  %v4838_v45 = vmax.f32 %v4806_v22, 0.0  ;;  %v6078_v0 = vpop.f32.mrb[8].mxu0 }
 0x221   : > { %v6169_v46 = vadd.f32 %v6078_v0, %v5908_v30  ;;  %v4667_v56 = vpop.f32.mrb[9].mxu0 }
 0x222   : > { %v4870_v5 = vadd.f32 %v4869_v34, %v4838_v45  ;;  %v6170_v48 = vadd.f32 %v4667_v56, %v1916_v31  ;;  %v6079_v55 = vpop.f32.mrb[10].mxu0 }
 0x223   : > { %v6171_v58 = vadd.f32 %v6079_v55, %v5909_v51  ;;  %v4670_v50 = vpop.f32.mrb[11].mxu0  ;;  %v4811_v17 = vadd.f32 %v6169_v46, %v8391_v53 }
 0x224   : > { %v4871_v33 = vadd.f32 %v4870_v5, %v4839_v43  ;;  %v4809_v39 = vadd.f32 %v6170_v48, %v8391_v53  ;;  %v6172_v26 = vadd.f32 %v4670_v50, %v1919_v25 }
 0x225   : > { %v4812_v60 = vadd.f32 %v6171_v58, %v8391_v53  ;;  %v4843_v51 = vmax.f32 %v4811_v17, 0.0 }
 0x226   : > { %v4841_v40 = vmax.f32 %v4809_v39, 0.0  ;;  %v4872_v29 = vadd.f32 %v4871_v33, %v4840_v35  ;;  %v4810_v49 = vadd.f32 %v6172_v26, %v8391_v53 }
 0x227   : > { %v4844_v8 = vmax.f32 %v4812_v60, 0.0 }
 0x228   : > { %v4873_v7 = vadd.f32 %v4872_v29, %v4841_v40  ;;  %v4842_v24 = vmax.f32 %v4810_v49, 0.0  ;;  %v6082_v20 = vpop.f32.mrb[12].mxu0 }
 0x229   : > { %v6173_v30 = vadd.f32 %v6082_v20, %v5912_v59  ;;  %v4683_v31 = vpop.f32.mrb[13].mxu0 }
 0x22a   : > { %v4874_v52 = vadd.f32 %v4873_v7, %v4842_v24  ;;  %v6174_v11 = vadd.f32 %v4683_v31, %v8382_v21  ;;  %v6083_v41 = vpop.f32.mrb[14].mxu0 }
 0x22b   : > { %v6175_v25 = vadd.f32 %v6083_v41, %v8384_v27  ;;  %v4686_v12 = vpop.f32.mrb[15].mxu0  ;;  %v4815_v18 = vadd.f32 %v6173_v30, %v8391_v53 }
 0x22c   : > { %v4875_v9 = vadd.f32 %v4874_v52, %v4843_v51  ;;  %v4813_v54 = vadd.f32 %v6174_v11, %v8391_v53  ;;  %v6176_v63 = vadd.f32 %v4686_v12, %v8386_v47 }
 0x22d   : > { %v4816_v6 = vadd.f32 %v6175_v25, %v8391_v53  ;;  %v4847_v61 = vmax.f32 %v4815_v18, 0.0 }
 0x22e   : > { %v4845_v44 = vmax.f32 %v4813_v54, 0.0  ;;  %v4876_v4 = vadd.f32 %v4875_v9, %v4844_v8  ;;  %v4814_v59 = vadd.f32 %v6176_v63, %v8391_v53 }
 0x22f   : > { %v4848_v19 = vmax.f32 %v4816_v6, 0.0 }
 0x230   : > { %v4877_v28 = vadd.f32 %v4876_v4, %v4845_v44  ;;  %v4846_v21 = vmax.f32 %v4814_v59, 0.0  ;;  %v6086_v10 = vpop.f32.mrb[16].mxu0 }
 0x231   : > { %v5950_v2 = vpop.f32.mrb[16].mxu1  ;;  %v4699_v27 = vpop.f32.mrb[17].mxu0 }
 0x232   : > { %v4878_v1 = vadd.f32 %v4877_v28, %v4846_v21  ;;  %v6177_v38 = vadd.f32 %v6086_v10, %v5950_v2  ;;  %v2674_v13 = vpop.f32.mrb[17].mxu1  ;;  %v6087_v16 = vpop.f32.mrb[18].mxu0 }
 0x233   : > { %v6178_v14 = vadd.f32 %v4699_v27, %v2674_v13  ;;  %v5951_v47 = vpop.f32.mrb[18].mxu1  ;;  %v4702_v62 = vpop.f32.mrb[19].mxu0 }
 0x234   : > { %v4879_v42 = vadd.f32 %v4878_v1, %v4847_v61  ;;  %v6179_v36 = vadd.f32 %v6087_v16, %v5951_v47  ;;  %v2677_v32 = vpop.f32.mrb[19].mxu1  ;;  %v4819_v15 = vadd.f32 %v6177_v38, %v8391_v53 }
 0x235   : > { %v4817_v37 = vadd.f32 %v6178_v14, %v8391_v53  ;;  %v6180_v57 = vadd.f32 %v4702_v62, %v2677_v32 }
 0x236   : > { %v4880_v3 = vadd.f32 %v4879_v42, %v4848_v19  ;;  %v4820_v0 = vadd.f32 %v6179_v36, %v8391_v53  ;;  %v4851_v58 = vmax.f32 %v4819_v15, 0.0 }
 0x237   : > { %v4849_v22 = vmax.f32 %v4817_v37, 0.0  ;;  %v4818_v34 = vadd.f32 %v6180_v57, %v8391_v53 }
 0x238   : > { %v6090_v23 = vpop.f32.mrb[20].mxu0  ;;  %v4852_v40 = vmax.f32 %v4820_v0, 0.0 }
 0x239   : > { %v4881_v45 = vadd.f32 %v4880_v3, %v4849_v22  ;;  %v4850_v46 = vmax.f32 %v4818_v34, 0.0  ;;  %v5954_v56 = vpop.f32.mrb[20].mxu1  ;;  %v4715_v43 = vpop.f32.mrb[21].mxu0 }
 0x23a   : > { %v6181_v5 = vadd.f32 %v6090_v23, %v5954_v56  ;;  %v2690_v48 = vpop.f32.mrb[21].mxu1  ;;  %v6091_v55 = vpop.f32.mrb[22].mxu0 }
 0x23b   : > { %v4882_v50 = vadd.f32 %v4881_v45, %v4850_v46  ;;  %v6182_v35 = vadd.f32 %v4715_v43, %v2690_v48  ;;  %v5955_v33 = vpop.f32.mrb[22].mxu1  ;;  %v4718_v39 = vpop.f32.mrb[23].mxu0 }
 0x23c   : > { %v6183_v26 = vadd.f32 %v6091_v55, %v5955_v33  ;;  %v2693_v17 = vpop.f32.mrb[23].mxu1  ;;  %v4823_v60 = vadd.f32 %v6181_v5, %v8391_v53 }
 0x23d   : > { %v4883_v29 = vadd.f32 %v4882_v50, %v4851_v58  ;;  %v4821_v49 = vadd.f32 %v6182_v35, %v8391_v53  ;;  %v6184_v7 = vadd.f32 %v4718_v39, %v2693_v17 }
 0x23e   : > { %v4824_v52 = vadd.f32 %v6183_v26, %v8391_v53  ;;  %v4855_v54 = vmax.f32 %v4823_v60, 0.0 }
 0x23f   : > { %v4853_v24 = vmax.f32 %v4821_v49, 0.0  ;;  %v4884_v20 = vadd.f32 %v4883_v29, %v4852_v40  ;;  %v4822_v30 = vadd.f32 %v6184_v7, %v8391_v53  ;;  %v4910_v7 = vlaneseq }
 0x240   : > { %v6094_v31 = vpop.f32.mrb[24].mxu0  ;;  %v4856_v6 = vmax.f32 %v4824_v52, 0.0 }
 0x241   : > { %v4885_v51 = vadd.f32 %v4884_v20, %v4853_v24  ;;  %v4854_v11 = vmax.f32 %v4822_v30, 0.0  ;;  %v5958_v41 = vpop.f32.mrb[24].mxu1  ;;  %v4731_v25 = vpop.f32.mrb[25].mxu0  ;;  %v4911_v20 = vshrl.u32 %v4910_v7, 7 }
 0x242   : > { %v6185_v12 = vadd.f32 %v6094_v31, %v5958_v41  ;;  %v2706_v8 = vpop.f32.mrb[25].mxu1  ;;  %v6095_v9 = vpop.f32.mrb[26].mxu0  ;;  %v4912_v31 = vstv %s6611_s18 }
 0x243   : > { %v4886_v63 = vadd.f32 %v4885_v51, %v4854_v11  ;;  %v6186_v18 = vadd.f32 %v4731_v25, %v2706_v8  ;;  %v5959_v44 = vpop.f32.mrb[26].mxu1  ;;  %v4734_v4 = vpop.f32.mrb[27].mxu0  ;;  %vm4913_vm8 = vcmp.eq.s32.totalorder %v4911_v20, %v4912_v31  ;;  %v4914_v11 = vld [vmem:[#allocation3] sm:$0xff]  ;;  %v4926_v8 = vld [vmem:[%s8522_s3 + $0x10] sm:$0xff] (%p4918_p6) }
 0x244   : > { %v6187_v59 = vadd.f32 %v6095_v9, %v5959_v44  ;;  %v2709_v28 = vpop.f32.mrb[27].mxu1  ;;  %v4827_v27 = vadd.f32 %v6185_v12, %v8391_v53  ;;  %v4924_v25 = vld [vmem:[%s8522_s3] sm:$0xff] (%p4918_p6)  ;;  %v4925_v12 = vld [vmem:[%s8522_s3 + $0x8] sm:$0xff] (%p4918_p6)  ;;  %v6622_v9 = vmov (%p4918_p6), 0.0|0.0  }
 0x245   : > { %v4887_v21 = vadd.f32 %v4886_v63, %v4855_v54  ;;  %v4825_v10 = vadd.f32 %v6186_v18, %v8391_v53  ;;  %v6188_v2 = vadd.f32 %v4734_v4, %v2709_v28  ;;  %6135 = vmatprep.subr.bf16.mxu0 (%p4918_p6), %v6622_v9  ;;  %v6136_v54 = vpack.c.bf16 (%p4918_p6), %v4925_v12, %v4924_v25  ;;  %v4927_v63 = vld [vmem:[%s8522_s3 + $0x18] sm:$0xff] (%p4918_p6)  ;;  %v4928_v4 = vld [vmem:[%s8522_s3 + $0x20] sm:$0xff] (%p4918_p6) }
 0x246   : > { %v4828_v14 = vadd.f32 %v6187_v59, %v8391_v53  ;;  %v4859_v37 = vmax.f32 %v4827_v27, 0.0  ;;  %v6624_v18 = vmov (%p4918_p6), 0.0   ;;  %v6139_v44 = vpack.c.bf16 (%p4918_p6), %v4927_v63, %v4926_v8  ;;  %v4929_v59 = vld [vmem:[%s8522_s3 + $0x28] sm:$0xff] (%p4918_p6) }
 0x247   : > { %v4857_v61 = vmax.f32 %v4825_v10, 0.0  ;;  %v4888_v1 = vadd.f32 %v4887_v21, %v4856_v6  ;;  %v4826_v38 = vadd.f32 %v6188_v2, %v8391_v53  ;;  %6132 = vmatprep.mubr.msk.f32.mxu0 (%p4918_p6), %vm6623_vm9, %v6624_v18  ;;  %6137 = vmatpush3.bf16.msra.mxu0 (%p4918_p6), %v6136_v54  ;;  %v6142_v28 = vpack.c.bf16 (%p4918_p6), %v4929_v59, %v4928_v4  ;;  %v4930_v6 = vld [vmem:[%s8522_s3 + $0x30] sm:$0xff] (%p4918_p6)  ;;  %v4931_v21 = vld [vmem:[%s8522_s3 + $0x38] sm:$0xff] (%p4918_p6)  ;;  %v4932_v2 = vld [vmem:[%s8522_s3 + $0x40] sm:$0xff] (%p4918_p6) }
 0x248   : > { %v6098_v13 = vpop.f32.mrb[28].mxu0  ;;  %v4860_v45 = vmax.f32 %v4828_v14, 0.0  ;;  %6138 = vmatprep.subr.bf16.mxu0 (%p4918_p6), %v6622_v9  ;;  %v6145_v10 = vpack.c.bf16 (%p4918_p6), %v4931_v21, %v4930_v6  ;;  %v4933_v27 = vld [vmem:[%s8522_s3 + $0x48] sm:$0xff] (%p4918_p6) }
 0x249   : > { %v4889_v16 = vadd.f32 %v4888_v1, %v4857_v61  ;;  %v4858_v47 = vmax.f32 %v4826_v38, 0.0  ;;  %v5962_v62 = vpop.f32.mrb[28].mxu1  ;;  %v4747_v19 = vpop.f32.mrb[29].mxu0  ;;  %v6148_v61 = vpack.c.bf16 (%p4918_p6), %v4933_v27, %v4932_v2  ;;  %v4934_v1 = vld [vmem:[%s8522_s3 + $0x50] sm:$0xff] (%p4918_p6)  ;;  %v4935_v38 = vld [vmem:[%s8522_s3 + $0x58] sm:$0xff] (%p4918_p6)  ;;  %v4937_v14 = vld [vmem:[%s8522_s3 + $0x68] sm:$0xff] (%p4918_p6) }
 0x24a   : > { %v6189_v42 = vadd.f32 %v6098_v13, %v5962_v62  ;;  %v2722_v36 = vpop.f32.mrb[29].mxu1  ;;  %v6099_v32 = vpop.f32.mrb[30].mxu0  ;;  %v6151_v13 = vpack.c.bf16 (%p4918_p6), %v4935_v38, %v4934_v1  ;;  %v4938_v62 = vld [vmem:[%s8522_s3 + $0x70] sm:$0xff] (%p4918_p6) }
 0x24b   : > { %v4890_v57 = vadd.f32 %v4889_v16, %v4858_v47  ;;  %v6190_v3 = vadd.f32 %v4747_v19, %v2722_v36  ;;  %v5963_v15 = vpop.f32.mrb[30].mxu1  ;;  %v4750_v22 = vpop.f32.mrb[31].mxu0  ;;  %6140 = vmatpush3.bf16.msra.mxu0 (%p4918_p6), %v6139_v44  ;;  %v4936_v16 = vld [vmem:[%s8522_s3 + $0x60] sm:$0xff] (%p4918_p6)  ;;  %v4939_v19 = vld [vmem:[%s8522_s3 + $0x78] sm:$0xff] (%p4918_p6) }
 0x24c   : > { %v6191_v34 = vadd.f32 %v6099_v32, %v5963_v15  ;;  %v2725_v23 = vpop.f32.mrb[31].mxu1  ;;  %v4831_v43 = vadd.f32 %v6189_v42, %v8391_v53  ;;  %6141 = vmatprep.subr.bf16.mxu0 (%p4918_p6), %v6622_v9  ;;  %v6154_v47 = vpack.c.bf16 (%p4918_p6), %v4937_v14, %v4936_v16  ;;  %v6157_v42 = vpack.c.bf16 (%p4918_p6), %v4939_v19, %v4938_v62  ;;  %v5617_v32 = vld [vmem:[%s8523_s4] ss:$0 sm:$0xff] (%p4918_p6) }
 0x24d   : > { %v4891_v0 = vadd.f32 %v4890_v57, %v4859_v37  ;;  %v4829_v46 = vadd.f32 %v6190_v3, %v8391_v53  ;;  %v6192_v56 = vadd.f32 %v4750_v22, %v2725_v23 }
 0x24e   : > { %v4832_v50 = vadd.f32 %v6191_v34, %v8391_v53  ;;  %v4863_v33 = vmax.f32 %v4831_v43, 0.0 }
 0x24f   : > { %v4861_v5 = vmax.f32 %v4829_v46, 0.0  ;;  %v4892_v48 = vadd.f32 %v4891_v0, %v4860_v45  ;;  %v4830_v55 = vadd.f32 %v6192_v56, %v8391_v53  ;;  %6143 = vmatpush3.bf16.msra.mxu0 (%p4918_p6), %v6142_v28 }
 0x250   : > { %v4864_v26 = vmax.f32 %v4832_v50, 0.0  ;;  %6144 = vmatprep.subr.bf16.mxu0 (%p4918_p6), %v6622_v9 }
 0x251   : > { %v4893_v58 = vadd.f32 %v4892_v48, %v4861_v5  ;;  %v4862_v35 = vmax.f32 %v4830_v55, 0.0 }
 0x253   : > { %v4894_v39 = vadd.f32 %v4893_v58, %v4862_v35  ;;  %6146 = vmatpush3.bf16.msra.mxu0 (%p4918_p6), %v6145_v10 }
 0x254   : > { %6147 = vmatprep.subr.bf16.mxu0 (%p4918_p6), %v6622_v9 }
 0x255   : > { %v4895_v17 = vadd.f32 %v4894_v39, %v4863_v33 }
 0x257   : > { %v4896_v40 = vadd.f32 %v4895_v17, %v4864_v26  ;;  %6149 = vmatpush3.bf16.msra.mxu0 (%p4918_p6), %v6148_v61 }
 0x258   : > { %6150 = vmatprep.subr.bf16.mxu0 (%p4918_p6), %v6622_v9 }
 0x259   : > { %v4903_v29 = vrot.slane %v4896_v40, 4 }
 0x25b   : > { %v4904_v49 = vadd.f32 %v4903_v29, %v4896_v40  ;;  %6152 = vmatpush3.bf16.msra.mxu0 (%p4918_p6), %v6151_v13 }
 0x25c   : > { %6153 = vmatprep.subr.bf16.mxu0 (%p4918_p6), %v6622_v9 }
 0x25d   : > { %v4905_v60 = vrot.slane %v4904_v49, 2 }
 0x25f   : > { %v4906_v24 = vadd.f32 %v4905_v60, %v4904_v49  ;;  %6155 = vmatpush3.bf16.msra.mxu0 (%p4918_p6), %v6154_v47 }
 0x260   : > { %6156 = vmatprep.subr.bf16.mxu0 (%p4918_p6), %v6622_v9 }
 0x261   : > { %v4907_v30 = vrot.slane %v4906_v24, 1 }
 0x263   : > { %v4908_v51 = vadd.f32 %v4907_v30, %v4906_v24  ;;  %6158 = vmatpush3.bf16.msra.mxu0 (%p4918_p6), %v6157_v42 }
 0x264   : > { %4922 = sbr.rel (!%p4918_p6) target bundleno = 841 (0x349), region = 56 }
 0x265   : > { %v4909_v52 = vmul.f32 0.00390625, %v4908_v51 }
 0x267   : > { %v4915_v41 = vsel %vm4913_vm8, %v4909_v52, 0.0 }
 0x268   : > { %v4916_v53 = vadd.f32 %v4915_v41, %v4914_v11 }
 0x26a   : > { %4917 = vst [vmem:[#allocation3] sm:$0xff] %v4916_v53 }
 0x271   : > { %v4923_v36 = vld [vmem:[#allocation3] sm:$0xff] }
 0x272   : > { %6133 = vmatmul.mubr.f32.vlgmr.msra.gmra.mrb[0].mxu0 %v4923_v36 }
 0x345   : > { %v5013_v37 = vpop.f32.mrb[0].mxu0 }
 0x346   : > { %v5014_v57 = vadd.f32 %v5617_v32, %v5013_v37  ;;  %v6134_v3 = vpop.f32.mrb[1].mxu0 }
 0x348   : > { %5017 = vst [vmem:[#allocation4] sm:$0xff] %v5014_v57 }
 0x349 PF: > { %p8484_p7 = scmp.eq.s32.totalorder %s5073_s21, 1  ;;  %s6625_s23 = smov [#allocation4]  }
 0x34a   : > { %s5025_s24 = sshll.u32 %s6625_s23, 4  ;;  %s5026_s24 = int_to_ptr.vmem [resolvable:$true] %s5025_s24 }
 0x34b   : > { %s6567_s25 = scalar_lea.vmem %s5026_s24, 128  ;;  %p6574_p11 = scmp.lt.s32.totalorder %s5026_s24, %s5026_s24 }
 0x34c   : > { %p6568_p8 = scmp.ne.s32.totalorder %s5026_s24, %s6567_s25  ;;  %p6575_p12 = scmp.lt.s32.totalorder %s6567_s25, %s6567_s25 }
 0x34e   : > { %p6569_p9 = pnand %p6568_p8, %p8484_p7  ;;  %p6576_p13 = por %p6575_p12, %p6574_p11 }
 0x350   : > { %p6570_p10 = pneg %p6569_p9 }
 0x352   : > { %p6577_p0 = pnand %p6576_p13, %p6570_p10 }
 0x354   : > { %6580 = shalt.err (!%p6577_p0)
}
 0x355   : > { %s6581_s21 = scalar_lea.hbm %s8524_s5, 128 }
 0x356   : > { %p6582_p1 = scmp.ne.s32.totalorder %s8524_s5, %s6581_s21  ;;  %p6587_p4 = scmp.lt.u32.totalorder %s6581_s21, %s8524_s5 }
 0x358   : > { %p6583_p2 = pnand %p6582_p1, %p8484_p7 }
 0x35a   : > { %p6584_p3 = pneg %p6583_p2 }
 0x35c   : > { %p6589_p5 = pnand %p6587_p4, %p6584_p3 }
 0x35e   : > { %6592 = shalt.err (!%p6589_p5)
}
 0x35f   : > { %6429 = dma.vmem_to_hbm [thread:$0]  (%p8484_p7), %s5026_s24, 128, %s8524_s5, [#allocation5]  }
 0x360   : > { %6606 = dma.done.wait (%p8484_p7), [#allocation5], 128  }
 0x361   : > { %6608 = vsyncadd (%p8484_p7), [#allocation5], 4294967168 }
 0x362 PF: > { %s16_s20 = sadd.s32 1, %s6619_s20   ;;  %s8589_s18 = smov %s6615_s19 }
 0x363   : > { %p13_p6 = scmp.ge.s32.totalorder %s16_s20, 4   ;;  %s8590_s19 = smov %s8592_s22 }
 0x365   :  { %15 = sbr.rel (!%p13_p6) target bundleno = 2 (0x2), region = 93 }
 0x36c   :  { %5038 = vsyncpa [#allocation5], 1 }
 0x36d   :  { %5040 = vsyncpa [#allocation5 + $0x1], 1 }

// kernel: tpu_custom_call.1
= control target key start
LH: loop header
LB: loop body
LE: loop exit
PB: predicated region body
PF: predicated region fallthrough
CT: control target
= control target key end

     0   :  { %10 = vsyncpa [#allocation5], 0  ;;  %s6656_s18 = smov 0   ;;  %s6658_s19 = smov 0   ;;  %s8519_s0 = inlined_call_operand.vmem [shape: bf16[2,18,18,4], index: 0, kind: input, shape index: {}]   ;;  %s8520_s1 = inlined_call_operand.vmem [shape: bf16[9,4,128], index: 1, kind: input, shape index: {}]   ;;  %s8521_s2 = inlined_call_operand.vmem [shape: f32[1,128], index: 2, kind: input, shape index: {}]   ;;  %s8522_s3 = inlined_call_operand.vmem [shape: f32[128,128], index: 3, kind: input, shape index: {}]   ;;  %s8523_s4 = inlined_call_operand.vmem [shape: f32[1,128], index: 4, kind: input, shape index: {}]   ;;  %s8524_s5 = inlined_call_operand.hbm [shape: f32[8,128], index: 5, kind: output, shape index: {}]  }
   0x1   :  { %s6660_s20 = smov 0  }
   0x2 LB: > { %s5073_s21 = sadd.s32 4294967295, %s6619_s20   ;;  %s28_s22 = sadd.s32 1, %s6615_s19  ;;  %s6619_s20 = sphi %s6660_s20, %s16_s20   ;;  %s6615_s19 = sphi %s6658_s19, %s8590_s19   ;;  %s6611_s18 = sphi %s6656_s18, %s8589_s18  }
   0x3   : > { %p30_p0 = scmp.ge.s32.totalorder %s28_s22, 2  ;;  %p5076_p1 = scmp.ge.s32.totalorder %s6619_s20, 1 }
   0x4   : > { %p195_p2 = scmp.lt.s32.totalorder %s6619_s20, 3 }
   0x5   : > { %s8592_s22 = smov (%p30_p0, %s28_s22), 0 }
   0x6   : > { %p196_p3 = pnand %p5076_p1, %p195_p2 }
   0x8   : > { %199 = sbr.rel (%p196_p3) target bundleno = 866 (0x362), region = 40 }
   0xf   : > { %p218_p4 = scmp.lt.s32.totalorder %s6611_s18, 1  ;;  %p224_p5 = scmp.eq.s32.totalorder %s6611_s18, 0 }
  0x10   : > { %v6621_v0 = vmov (%p224_p5), 0.0  }
  0x11   : > { %s219_s23 = scalar_select %p218_p4, %s6611_s18, 1 }
  0x12   : > { %229 = sbr.rel (!%p224_p5) target bundleno = 25 (0x19), region = 44  ;;  %230 = vst [vmem:[#allocation3] sm:$0xff] (%p224_p5), %v6621_v0 }
  0x13   : > { %s6427_s24 = smul.u32 216, %s219_s23 }
  0x15   : > { %s6683_s27 = scalar_lea.vmem %s8519_s0, %s6427_s24 }
  0x19 PF: > { %v5079_v1 = vld [vmem:[%s8520_s1 + $0x2] sm:$0x3]  ;;  %vm770_vm0 = vcmask 1041408   ;;  %v5306_v2 = vld [vmem:[%s8520_s1 + $0x8] sm:$0x3]  ;;  %vm721_vm4 = vcmask 31744  }
  0x1a   : > { %6417 = vmatprep.subr.msk.bf16.mxu1 %vm770_vm0, %v5079_v1  ;;  %6421 = vmatprep.subr.msk.bf16.mxu0 %vm770_vm0, %v5306_v2  ;;  %v772_v3 = vsel %vm770_vm0, %v5079_v1, 0  ;;  %v6695_v4 = vsel %vm770_vm0, %v5306_v2, 0  ;;  %v235_v5 = vld [vmem:[%s6683_s27] sm:$0xf]  ;;  %v236_v6 = vld [vmem:[%s6683_s27 + $0x4] sm:$0xf] }
  0x1b   : > { %8538 = vst [vmem:[#allocation7_spill] sm:$0xff] %v6695_v4  ;;  %5795 = vmatpush3.bf16.msra.mxu1 %v772_v3  ;;  %5931 = vmatpush3.bf16.msra.mxu0 %v6695_v4  ;;  %v268_v7 = vld [vmem:[%s6683_s27 + $0x8] sm:$0x1]  ;;  %vm284_vm1 = vsmask.f32 3328  ;;  %v288_v8 = vshrl.u32 %v235_v5, 16 }
  0x1c   : > { %vm285_vm2 = vsmask.f32 7440  ;;  %v291_v9 = vshll.u32 %v235_v5, 16  ;;  %v297_v10 = vshll.u32 %v236_v6, 16  ;;  %v301_v11 = vshrl.u32 %v236_v6, 16  ;;  %p4918_p6 = scmp.eq.s32.totalorder %s6611_s18, 1 }
  0x1d   : > { %v267_v12 = vld [vmem:[%s8520_s1] sm:$0x3]  ;;  %v307_v13 = vshll.u32 %v268_v7, 16  ;;  %v5258_v14 = vld [vmem:[%s6683_s27 + $0xc] sm:$0xf]  ;;  %v290_v16 = vrot.slane %v288_v8, 4  ;;  %vm6725_vm3 = vmor %vm284_vm1, %vm285_vm2 }
  0x1e   : > { %6418 = vmatprep.subr.msk.bf16.mxu1 %vm770_vm0, %v267_v12  ;;  %v6707_v15 = vld [vmem:[%s6683_s27 + $0x10] sm:$0xf]  ;;  %v293_v17 = vrot.slane %v291_v9, 5  ;;  %v299_v18 = vrot.slane %v297_v10, 5  ;;  %v303_v19 = vrot.slane %v301_v11, 4  ;;  %v2092_v22 = vshrl.u32 %v5258_v14, 16 }
  0x1f   : > { %v6710_v20 = vld [vmem:[%s6683_s27 + $0x14] sm:$0x1]  ;;  %v309_v21 = vrot.slane %v307_v13, 5  ;;  %v2095_v23 = vshll.u32 %v5258_v14, 16  ;;  %v2101_v24 = vshll.u32 %v6707_v15, 16  ;;  %v2105_v28 = vshrl.u32 %v6707_v15, 16 }
  0x20   : > { %v6716_v25 = vld [vmem:[%s8520_s1 + $0xa] sm:$0x3]  ;;  %v294_v26 = vor.u32 %v293_v17, %v290_v16  ;;  %v304_v27 = vor.u32 %v303_v19, %v299_v18  ;;  %v2111_v29 = vshll.u32 %v6710_v20, 16  ;;  %v237_v30 = vld [vmem:[%s6683_s27 + $0xc] sm:$0xf]  ;;  %v2094_v32 = vrot.slane %v2092_v22, 4 }
  0x21   : > { %6423 = vmatprep.subr.msk.bf16.mxu0 %vm770_vm0, %v6716_v25  ;;  %v2097_v33 = vrot.slane %v2095_v23, 5  ;;  %v2103_v34 = vrot.slane %v2101_v24, 5  ;;  %v238_v35 = vld [vmem:[%s6683_s27 + $0x10] sm:$0xf]  ;;  %v2107_v38 = vrot.slane %v2105_v28, 4  ;;  %v312_v42 = vshrl.u32 %v237_v30, 16 }
  0x22   : > { %v295_v36 = vrot.slane %v294_v26, 4  ;;  %v305_v37 = vrot.slane %v304_v27, 4  ;;  %v2113_v40 = vrot.slane %v2111_v29, 5  ;;  %v269_v41 = vld [vmem:[%s6683_s27 + $0x14] sm:$0x1]  ;;  %v315_v43 = vshll.u32 %v237_v30, 16 }
  0x23   : > { %v2098_v39 = vor.u32 %v2097_v33, %v2094_v32  ;;  %v2108_v46 = vor.u32 %v2107_v38, %v2103_v34  ;;  %v321_v47 = vshll.u32 %v238_v35, 16  ;;  %v314_v50 = vrot.slane %v312_v42, 4  ;;  %v5261_v56 = vld [vmem:[%s6683_s27 + $0x18] sm:$0xf]  ;;  %v6742_v61 = vld [vmem:[%s6683_s27 + $0x1c] sm:$0xf] }
  0x24   : > { %v300_v44 = vsel %vm6725_vm3, %v295_v36, %v299_v18  ;;  %v310_v45 = vsel %vm6725_vm3, %v305_v37, %v309_v21  ;;  %v317_v51 = vrot.slane %v315_v43, 5  ;;  %v325_v54 = vshrl.u32 %v238_v35, 16  ;;  %v6745_v62 = vld [vmem:[%s6683_s27 + $0x20] sm:$0x1]  ;;  %v239_v17 = vld [vmem:[%s6683_s27 + $0x18] sm:$0xf] }
  0x25   : > { %v5080_v48 = vcombine.low %v300_v44, %v310_v45  ;;  %v2099_v49 = vrot.slane %v2098_v39, 4  ;;  %v2109_v52 = vrot.slane %v2108_v46, 4  ;;  %v323_v53 = vrot.slane %v321_v47, 5  ;;  %v240_v23 = vld [vmem:[%s6683_s27 + $0x1c] sm:$0xf] }
  0x26   : > { %v331_v55 = vshll.u32 %v269_v41, 16  ;;  %v2835_v58 = vrot.slane %v6707_v15, 5  ;;  %v2838_v59 = vrot.slane %v6710_v20, 5  ;;  %v318_v60 = vor.u32 %v317_v51, %v314_v50  ;;  %v270_v29 = vld [vmem:[%s6683_s27 + $0x20] sm:$0x1] }
  0x27   : > { %5796 = vmatprep.mubr.msk.bf16.mxu1 %vm721_vm4, %v5080_v48  ;;  %v2104_v57 = vsel %vm6725_vm3, %v2099_v49, %v2103_v34  ;;  %v2114_v63 = vsel %vm6725_vm3, %v2109_v52, %v2113_v40  ;;  %v327_v0 = vrot.slane %v325_v54, 4  ;;  %v1064_v2 = vsel %vm770_vm0, %v267_v12, 0  ;;  %v5264_v35 = vld [vmem:[%s6683_s27 + $0x24] sm:$0xf]  ;;  %v6771_v44 = vld [vmem:[%s6683_s27 + $0x28] sm:$0xf] }
  0x28   : > { %v333_v1 = vrot.slane %v331_v55, 5  ;;  %v5307_v3 = vcombine.low %v2104_v57, %v2114_v63  ;;  %v319_v5 = vrot.slane %v318_v60, 4  ;;  %v2116_v6 = vshrl.u32 %v5261_v56, 16  ;;  %v6777_v47 = vld [vmem:[%s6683_s27 + $0x2c] sm:$0x1] }
  0x29   : > { %v2119_v7 = vshll.u32 %v5261_v56, 16  ;;  %v328_v8 = vor.u32 %v327_v0, %v323_v53  ;;  %v2125_v9 = vshll.u32 %v6742_v61, 16  ;;  %v2129_v10 = vshrl.u32 %v6742_v61, 16 }
  0x2a   : > { %v2135_v11 = vshll.u32 %v6745_v62, 16  ;;  %5932 = vmatprep.mubr.msk.bf16.mxu0 %vm721_vm4, %v5307_v3  ;;  %v324_v13 = vsel %vm6725_vm3, %v319_v5, %v323_v53  ;;  %v2118_v14 = vrot.slane %v2116_v6, 4  ;;  %v2842_v16 = vrot.slane %v6742_v61, 5  ;;  %v241_v53 = vld [vmem:[%s6683_s27 + $0x24] sm:$0xf] }
  0x2b   : > { %v2121_v12 = vrot.slane %v2119_v7, 5  ;;  %v329_v18 = vrot.slane %v328_v8, 4  ;;  %v2127_v19 = vrot.slane %v2125_v9, 5  ;;  %v2131_v21 = vrot.slane %v2129_v10, 4 }
  0x2c   : > { %v2137_v22 = vrot.slane %v2135_v11, 5  ;;  %v6761_v26 = vrot.slane %v2842_v16, 4  ;;  %v2845_v27 = vrot.slane %v6745_v62, 5  ;;  %v3044_v28 = vsel %vm770_vm0, %v6716_v25, 0 }
  0x2d   : > { %v2122_v24 = vor.u32 %v2121_v12, %v2118_v14  ;;  %v334_v30 = vsel %vm6725_vm3, %v329_v18, %v333_v1  ;;  %v2132_v32 = vor.u32 %v2131_v21, %v2127_v19  ;;  %v336_v33 = vshrl.u32 %v239_v17, 16  ;;  %v5267_v14 = vld [vmem:[%s6683_s27 + $0x30] sm:$0xf] }
  0x2e   : > { %v339_v34 = vshll.u32 %v239_v17, 16  ;;  %v5081_v36 = vcombine.low %v324_v13, %v334_v30  ;;  %v345_v38 = vshll.u32 %v240_v23, 16  ;;  %v349_v39 = vshrl.u32 %v240_v23, 16  ;;  %v271_v13 = vld [vmem:[%s6683_s27 + $0x2c] sm:$0x1] }
  0x2f   : > { %v2123_v37 = vrot.slane %v2122_v24, 4  ;;  %v2133_v40 = vrot.slane %v2132_v32, 4  ;;  %v338_v41 = vrot.slane %v336_v33, 4  ;;  %v355_v43 = vshll.u32 %v270_v29, 16 }
  0x30   : > { %v341_v42 = vrot.slane %v339_v34, 5  ;;  %5797 = vmatmul.mubr.msk.bf16.vlgmr.msra.gmra.mrb[0].mxu1 %vm721_vm4, %v5081_v36  ;;  %v347_v45 = vrot.slane %v345_v38, 5  ;;  %v351_v46 = vrot.slane %v349_v39, 4  ;;  %v2140_v48 = vshrl.u32 %v5264_v35, 16 }
  0x31   : > { %v2128_v25 = vsel %vm6725_vm3, %v2123_v37, %v2127_v19  ;;  %5829 = vmatpush3.bf16.msra.mxu1 %v1064_v2  ;;  %v2138_v49 = vsel %vm6725_vm3, %v2133_v40, %v2137_v22  ;;  %v357_v51 = vrot.slane %v355_v43, 5  ;;  %v2143_v52 = vshll.u32 %v5264_v35, 16  ;;  %v242_v2 = vld [vmem:[%s6683_s27 + $0x28] sm:$0xf]  ;;  %v6800_v37 = vld [vmem:[%s6683_s27 + $0x38] sm:$0x1] }
  0x32   : > { %v342_v50 = vor.u32 %v341_v42, %v338_v41  ;;  %v5308_v54 = vcombine.low %v2128_v25, %v2138_v49  ;;  %v352_v55 = vor.u32 %v351_v46, %v347_v45  ;;  %v2142_v56 = vrot.slane %v2140_v48, 4  ;;  %v243_v43 = vld [vmem:[%s6683_s27 + $0x30] sm:$0xf]  ;;  %v244_v49 = vld [vmem:[%s6683_s27 + $0x34] sm:$0xf] }
  0x33   : > { %v2149_v57 = vshll.u32 %v6771_v44, 16  ;;  %v2145_v63 = vrot.slane %v2143_v52, 5  ;;  %v2153_v0 = vshrl.u32 %v6771_v44, 16  ;;  %v2159_v1 = vshll.u32 %v6777_v47, 16 }
  0x34   : > { %v343_v60 = vrot.slane %v342_v50, 4  ;;  %5933 = vmatmul.mubr.msk.bf16.vlgmr.msra.gmra.mrb[0].mxu0 %vm721_vm4, %v5308_v54  ;;  %v353_v3 = vrot.slane %v352_v55, 4  ;;  %v360_v6 = vshrl.u32 %v241_v53, 16  ;;  %v363_v7 = vshll.u32 %v241_v53, 16 }
  0x35   : > { %v2151_v5 = vrot.slane %v2149_v57, 5  ;;  %5965 = vmatpush3.bf16.msra.mxu0 %v3044_v28  ;;  %v2146_v9 = vor.u32 %v2145_v63, %v2142_v56  ;;  %v2155_v10 = vrot.slane %v2153_v0, 4  ;;  %v2161_v11 = vrot.slane %v2159_v1, 5  ;;  %v6794_v28 = vld [vmem:[%s6683_s27 + $0x34] sm:$0xf] }
  0x36   : > { %v348_v8 = vsel %vm6725_vm3, %v343_v60, %v347_v45  ;;  %v358_v12 = vsel %vm6725_vm3, %v353_v3, %v357_v51  ;;  %v362_v17 = vrot.slane %v360_v6, 4  ;;  %v365_v18 = vrot.slane %v363_v7, 5  ;;  %v272_v57 = vld [vmem:[%s6683_s27 + $0x38] sm:$0x1]  ;;  %v5270_v3 = vld [vmem:[%s6683_s27 + $0x3c] sm:$0xf] }
  0x37   : > { %v369_v19 = vshll.u32 %v242_v2, 16  ;;  %v5082_v21 = vcombine.low %v348_v8, %v358_v12  ;;  %v2147_v22 = vrot.slane %v2146_v9, 4  ;;  %v2156_v23 = vor.u32 %v2155_v10, %v2151_v5  ;;  %v6817_v9 = vld [vmem:[%s6683_s27 + $0x40] sm:$0xf] }
  0x38   : > { %v373_v24 = vshrl.u32 %v242_v2, 16  ;;  %v366_v29 = vor.u32 %v365_v18, %v362_v17  ;;  %v379_v32 = vshll.u32 %v271_v13, 16  ;;  %v2164_v33 = vshrl.u32 %v5267_v14, 16 }
  0x39   : > { %v371_v30 = vrot.slane %v369_v19, 5  ;;  %5800 = vmatprep.mubr.msk.bf16.mxu1 %vm721_vm4, %v5082_v21  ;;  %v2152_v34 = vsel %vm6725_vm3, %v2147_v22, %v2151_v5  ;;  %v2157_v35 = vrot.slane %v2156_v23, 4  ;;  %v2167_v38 = vshll.u32 %v5267_v14, 16  ;;  %v6822_v19 = vld [vmem:[%s6683_s27 + $0x44] sm:$0x1] }
  0x3a   : > { %v375_v36 = vrot.slane %v373_v24, 4  ;;  %v367_v39 = vrot.slane %v366_v29, 4  ;;  %v381_v40 = vrot.slane %v379_v32, 5  ;;  %v2166_v41 = vrot.slane %v2164_v33, 4  ;;  %v6830_v32 = vld [vmem:[%s8520_s1 + $0xc] sm:$0x3] }
  0x3b   : > { %v2173_v42 = vshll.u32 %v6794_v28, 16  ;;  %v2162_v25 = vsel %vm6725_vm3, %v2157_v35, %v2161_v11  ;;  %v2169_v46 = vrot.slane %v2167_v38, 5  ;;  %v2177_v48 = vshrl.u32 %v6794_v28, 16  ;;  %6424 = vmatprep.subr.msk.bf16.mxu0 %vm770_vm0, %v6830_v32 }
  0x3c   : > { %v376_v45 = vor.u32 %v375_v36, %v371_v30  ;;  %v5309_v50 = vcombine.low %v2152_v34, %v2162_v25  ;;  %v372_v51 = vsel %vm6725_vm3, %v367_v39, %v371_v30  ;;  %v2183_v53 = vshll.u32 %v6800_v37, 16  ;;  %v245_v30 = vld [vmem:[%s6683_s27 + $0x3c] sm:$0xf] }
  0x3d   : > { %v2175_v52 = vrot.slane %v2173_v42, 5  ;;  %v2170_v55 = vor.u32 %v2169_v46, %v2166_v41  ;;  %v2179_v56 = vrot.slane %v2177_v48, 4  ;;  %v384_v60 = vshrl.u32 %v243_v43, 16 }
  0x3e   : > { %v377_v54 = vrot.slane %v376_v45, 4  ;;  %5936 = vmatprep.mubr.msk.bf16.mxu0 %vm721_vm4, %v5309_v50  ;;  %v2185_v63 = vrot.slane %v2183_v53, 5  ;;  %v387_v0 = vshll.u32 %v243_v43, 16  ;;  %v393_v1 = vshll.u32 %v244_v49, 16  ;;  %v246_v45 = vld [vmem:[%s6683_s27 + $0x40] sm:$0xf] }
  0x3f   : > { %v397_v2 = vshrl.u32 %v244_v49, 16  ;;  %v2171_v6 = vrot.slane %v2170_v55, 4  ;;  %v2180_v7 = vor.u32 %v2179_v56, %v2175_v52  ;;  %v386_v8 = vrot.slane %v384_v60, 4  ;;  %v5273_v53 = vld [vmem:[%s6683_s27 + $0x48] sm:$0xf] }
  0x40   : > { %v382_v5 = vsel %vm6725_vm3, %v377_v54, %v381_v40  ;;  %v389_v11 = vrot.slane %v387_v0, 5  ;;  %v395_v13 = vrot.slane %v393_v1, 5  ;;  %v403_v18 = vshll.u32 %v272_v57, 16 }
  0x41   : > { %v5083_v10 = vcombine.low %v372_v51, %v382_v5  ;;  %v399_v14 = vrot.slane %v397_v2, 4  ;;  %v2176_v12 = vsel %vm6725_vm3, %v2171_v6, %v2175_v52  ;;  %v2181_v17 = vrot.slane %v2180_v7, 4  ;;  %v273_v51 = vld [vmem:[%s6683_s27 + $0x44] sm:$0x1]  ;;  %v6848_v5 = vld [vmem:[%s6683_s27 + $0x4c] sm:$0xf] }
  0x42   : > { %v2188_v21 = vshrl.u32 %v5270_v3, 16  ;;  %v390_v22 = vor.u32 %v389_v11, %v386_v8  ;;  %v2191_v24 = vshll.u32 %v5270_v3, 16  ;;  %v2197_v29 = vshll.u32 %v6817_v9, 16 }
  0x43   : > { %5801 = vmatmul.mubr.msk.bf16.gmra.mrb[4].mxu1 %vm721_vm4, %v5083_v10  ;;  %v400_v23 = vor.u32 %v399_v14, %v395_v13  ;;  %v2186_v33 = vsel %vm6725_vm3, %v2181_v17, %v2185_v63  ;;  %v405_v34 = vrot.slane %v403_v18, 5  ;;  %v2201_v36 = vshrl.u32 %v6817_v9, 16  ;;  %v6853_v14 = vld [vmem:[%s6683_s27 + $0x50] sm:$0x1] }
  0x44   : > { %v2190_v35 = vrot.slane %v2188_v21, 4  ;;  %v5310_v38 = vcombine.low %v2176_v12, %v2186_v33  ;;  %v391_v39 = vrot.slane %v390_v22, 4  ;;  %v2193_v41 = vrot.slane %v2191_v24, 5  ;;  %v6856_v12 = vld [vmem:[%s6683_s27 + $0x48] sm:$0xf] }
  0x45   : > { %v401_v40 = vrot.slane %v400_v23, 4  ;;  %v2199_v42 = vrot.slane %v2197_v29, 5  ;;  %v2203_v43 = vrot.slane %v2201_v36, 4  ;;  %v2207_v25 = vshll.u32 %v6822_v19, 16  ;;  %v6864_v36 = vld [vmem:[%s6683_s27 + $0x4c] sm:$0xf] }
  0x46   : > { %v408_v46 = vshrl.u32 %v245_v30, 16  ;;  %5937 = vmatmul.mubr.msk.bf16.gmra.mrb[4].mxu0 %vm721_vm4, %v5310_v38  ;;  %v396_v48 = vsel %vm6725_vm3, %v391_v39, %v395_v13  ;;  %v2194_v50 = vor.u32 %v2193_v41, %v2190_v35  ;;  %v411_v52 = vshll.u32 %v245_v30, 16 }
  0x47   : > { %v406_v49 = vsel %vm6725_vm3, %v401_v40, %v405_v34  ;;  %v2204_v55 = vor.u32 %v2203_v43, %v2199_v42  ;;  %v2209_v56 = vrot.slane %v2207_v25, 5  ;;  %v417_v0 = vshll.u32 %v246_v45, 16 }
  0x48   : > { %v5084_v54 = vcombine.low %v396_v48, %v406_v49  ;;  %v410_v57 = vrot.slane %v408_v46, 4  ;;  %v2195_v60 = vrot.slane %v2194_v50, 4  ;;  %v413_v63 = vrot.slane %v411_v52, 5  ;;  %v5276_v49 = vld [vmem:[%s6683_s27 + $0x54] sm:$0xf] }
  0x49   : > { %v421_v1 = vshrl.u32 %v246_v45, 16  ;;  %v2205_v2 = vrot.slane %v2204_v55, 4  ;;  %v427_v3 = vshll.u32 %v273_v51, 16  ;;  %v2212_v6 = vshrl.u32 %v5273_v53, 16 }
  0x4a   : > { %5804 = vmatprep.mubr.msk.bf16.mxu1 %vm721_vm4, %v5084_v54  ;;  %v2215_v7 = vshll.u32 %v5273_v53, 16  ;;  %v2200_v8 = vsel %vm6725_vm3, %v2195_v60, %v2199_v42  ;;  %v414_v10 = vor.u32 %v413_v63, %v410_v57  ;;  %v419_v11 = vrot.slane %v417_v0, 5  ;;  %v274_v42 = vld [vmem:[%s6683_s27 + $0x50] sm:$0x1]  ;;  %v6878_v54 = vld [vmem:[%s6683_s27 + $0x58] sm:$0xf] }
  0x4b   : > { %v423_v13 = vrot.slane %v421_v1, 4  ;;  %v2210_v17 = vsel %vm6725_vm3, %v2205_v2, %v2209_v56  ;;  %v429_v18 = vrot.slane %v427_v3, 5  ;;  %v2214_v21 = vrot.slane %v2212_v6, 4  ;;  %v6883_v2 = vld [vmem:[%s6683_s27 + $0x5c] sm:$0x1] }
  0x4c   : > { %v2217_v22 = vrot.slane %v2215_v7, 5  ;;  %v5311_v23 = vcombine.low %v2200_v8, %v2210_v17  ;;  %v415_v24 = vrot.slane %v414_v10, 4  ;;  %v2221_v30 = vshll.u32 %v6848_v5, 16 }
  0x4d   : > { %v424_v29 = vor.u32 %v423_v13, %v419_v11  ;;  %v2225_v34 = vshrl.u32 %v6848_v5, 16  ;;  %v2231_v35 = vshll.u32 %v6853_v14, 16  ;;  %v432_v38 = vshrl.u32 %v6856_v12, 16 }
  0x4e   : > { %v2218_v33 = vor.u32 %v2217_v22, %v2214_v21  ;;  %5940 = vmatprep.mubr.msk.bf16.mxu0 %vm721_vm4, %v5311_v23  ;;  %v420_v39 = vsel %vm6725_vm3, %v415_v24, %v419_v11  ;;  %v2223_v41 = vrot.slane %v2221_v30, 5  ;;  %v435_v43 = vshll.u32 %v6856_v12, 16  ;;  %v6889_v21 = vld [vmem:[%s6683_s27 + $0x54] sm:$0xf]  ;;  %v6895_v30 = vld [vmem:[%s6683_s27 + $0x58] sm:$0xf] }
  0x4f   : > { %v425_v40 = vrot.slane %v424_v29, 4  ;;  %v2227_v45 = vrot.slane %v2225_v34, 4  ;;  %v2233_v46 = vrot.slane %v2231_v35, 5  ;;  %v434_v48 = vrot.slane %v432_v38, 4 }
  0x50   : > { %v2219_v25 = vrot.slane %v2218_v33, 4  ;;  %v437_v51 = vrot.slane %v435_v43, 5  ;;  %v441_v52 = vshll.u32 %v6864_v36, 16  ;;  %v445_v53 = vshrl.u32 %v6864_v36, 16 }
  0x51   : > { %v430_v50 = vsel %vm6725_vm3, %v425_v40, %v429_v18  ;;  %v2228_v57 = vor.u32 %v2227_v45, %v2223_v41  ;;  %v451_v60 = vshll.u32 %v274_v42, 16  ;;  %v2236_v3 = vshrl.u32 %v5276_v49, 16 }
  0x52   : > { %v5085_v55 = vcombine.low %v420_v39, %v430_v50  ;;  %v2224_v56 = vsel %vm6725_vm3, %v2219_v25, %v2223_v41  ;;  %v438_v63 = vor.u32 %v437_v51, %v434_v48  ;;  %v443_v0 = vrot.slane %v441_v52, 5  ;;  %v275_v41 = vld [vmem:[%s6683_s27 + $0x5c] sm:$0x1]  ;;  %v6911_v50 = vld [vmem:[%s8520_s1 + $0x4] sm:$0x3] }
  0x53   : > { %v447_v1 = vrot.slane %v445_v53, 4  ;;  %v2229_v6 = vrot.slane %v2228_v57, 4  ;;  %v453_v7 = vrot.slane %v451_v60, 5  ;;  %v2239_v8 = vshll.u32 %v5276_v49, 16  ;;  %v5279_v49 = vld [vmem:[%s6683_s27 + $0x60] sm:$0xf]  ;;  %6419 = vmatprep.subr.msk.bf16.mxu1 %vm770_vm0, %v6911_v50 }
  0x54   : > { %5805 = vmatmul.mubr.msk.bf16.gmra.mrb[8].mxu1 %vm721_vm4, %v5085_v55  ;;  %v2245_v10 = vshll.u32 %v6878_v54, 16  ;;  %v439_v11 = vrot.slane %v438_v63, 4  ;;  %v2238_v17 = vrot.slane %v2236_v3, 4  ;;  %v2249_v18 = vshrl.u32 %v6878_v54, 16 }
  0x55   : > { %v448_v13 = vor.u32 %v447_v1, %v443_v0  ;;  %v2234_v22 = vsel %vm6725_vm3, %v2229_v6, %v2233_v46  ;;  %v2241_v23 = vrot.slane %v2239_v8, 5  ;;  %v2255_v29 = vshll.u32 %v6883_v2, 16  ;;  %v6922_v6 = vld [vmem:[%s6683_s27 + $0x68] sm:$0x1] }
  0x56   : > { %v2247_v24 = vrot.slane %v2245_v10, 5  ;;  %v5312_v33 = vcombine.low %v2224_v56, %v2234_v22  ;;  %v444_v34 = vsel %vm6725_vm3, %v439_v11, %v443_v0  ;;  %v2251_v38 = vrot.slane %v2249_v18, 4  ;;  %v6914_v56 = vld [vmem:[%s6683_s27 + $0x64] sm:$0xf]  ;;  %v6928_v18 = vld [vmem:[%s6683_s27 + $0x60] sm:$0xf] }
  0x57   : > { %v449_v35 = vrot.slane %v448_v13, 4  ;;  %v2242_v39 = vor.u32 %v2241_v23, %v2238_v17  ;;  %v2257_v40 = vrot.slane %v2255_v29, 5  ;;  %v456_v42 = vshrl.u32 %v6889_v21, 16 }
  0x58   : > { %v459_v43 = vshll.u32 %v6889_v21, 16  ;;  %5941 = vmatmul.mubr.msk.bf16.gmra.mrb[8].mxu0 %vm721_vm4, %v5312_v33  ;;  %v2252_v45 = vor.u32 %v2251_v38, %v2247_v24  ;;  %v465_v46 = vshll.u32 %v6895_v30, 16  ;;  %v469_v48 = vshrl.u32 %v6895_v30, 16 }
  0x59   : > { %v454_v25 = vsel %vm6725_vm3, %v449_v35, %v453_v7  ;;  %v2243_v52 = vrot.slane %v2242_v39, 4  ;;  %v458_v53 = vrot.slane %v456_v42, 4  ;;  %v475_v0 = vshll.u32 %v275_v41, 16  ;;  %v276_v42 = vld [vmem:[%s6683_s27 + $0x68] sm:$0x1] }
  0x5a   : > { %v5086_v51 = vcombine.low %v444_v34, %v454_v25  ;;  %v461_v55 = vrot.slane %v459_v43, 5  ;;  %v2253_v57 = vrot.slane %v2252_v45, 4  ;;  %v467_v60 = vrot.slane %v465_v46, 5 }
  0x5b   : > { %v471_v63 = vrot.slane %v469_v48, 4  ;;  %v2248_v1 = vsel %vm6725_vm3, %v2243_v52, %v2247_v24  ;;  %v2260_v7 = vshrl.u32 %v5279_v49, 16  ;;  %v2263_v8 = vshll.u32 %v5279_v49, 16  ;;  %v6931_v24 = vld [vmem:[%s6683_s27 + $0x64] sm:$0xf] }
  0x5c   : > { %5808 = vmatprep.mubr.msk.bf16.mxu1 %vm721_vm4, %v5086_v51  ;;  %v462_v3 = vor.u32 %v461_v55, %v458_v53  ;;  %v2258_v10 = vsel %vm6725_vm3, %v2253_v57, %v2257_v40  ;;  %v477_v13 = vrot.slane %v475_v0, 5  ;;  %v2269_v17 = vshll.u32 %v6914_v56, 16  ;;  %v5339_v57 = vld [vmem:[%s6683_s27 + $0xc] sm:$0xe] }
  0x5d   : > { %v472_v11 = vor.u32 %v471_v63, %v467_v60  ;;  %v5313_v22 = vcombine.low %v2248_v1, %v2258_v10  ;;  %v2262_v29 = vrot.slane %v2260_v7, 4  ;;  %v2265_v33 = vrot.slane %v2263_v8, 5  ;;  %v6953_v10 = vld [vmem:[%s6683_s27 + $0x70] sm:$0xf] }
  0x5e   : > { %v463_v23 = vrot.slane %v462_v3, 4  ;;  %v2271_v35 = vrot.slane %v2269_v17, 5  ;;  %v2273_v38 = vshrl.u32 %v6914_v56, 16  ;;  %v2279_v39 = vshll.u32 %v6922_v6, 16  ;;  %v6947_v3 = vld [vmem:[%s6683_s27 + $0x6c] sm:$0xf] }
  0x5f   : > { %v473_v34 = vrot.slane %v472_v11, 4  ;;  %5944 = vmatprep.mubr.msk.bf16.mxu0 %vm721_vm4, %v5313_v22  ;;  %v2266_v41 = vor.u32 %v2265_v33, %v2262_v29  ;;  %v480_v43 = vshrl.u32 %v6928_v18, 16  ;;  %v483_v25 = vshll.u32 %v6928_v18, 16 }
  0x60   : > { %v468_v40 = vsel %vm6725_vm3, %v463_v23, %v467_v60  ;;  %v2275_v46 = vrot.slane %v2273_v38, 4  ;;  %v2281_v48 = vrot.slane %v2279_v39, 5  ;;  %v489_v49 = vshll.u32 %v6931_v24, 16 }
  0x61   : > { %v478_v45 = vsel %vm6725_vm3, %v473_v34, %v477_v13  ;;  %v2267_v52 = vrot.slane %v2266_v41, 4  ;;  %v482_v53 = vrot.slane %v480_v43, 4  ;;  %v485_v55 = vrot.slane %v483_v25, 5  ;;  %v277_v41 = vld [vmem:[%s6683_s27 + $0x74] sm:$0x1] }
  0x62   : > { %v5087_v51 = vcombine.low %v468_v40, %v478_v45  ;;  %v2276_v60 = vor.u32 %v2275_v46, %v2271_v35  ;;  %v491_v63 = vrot.slane %v489_v49, 5  ;;  %v493_v0 = vshrl.u32 %v6931_v24, 16  ;;  %v5340_v43 = vld [vmem:[%s6683_s27 + $0x18] sm:$0xe] }
  0x63   : > { %v499_v1 = vshll.u32 %v276_v42, 16  ;;  %v2272_v7 = vsel %vm6725_vm3, %v2267_v52, %v2271_v35  ;;  %v486_v8 = vor.u32 %v485_v55, %v482_v53  ;;  %vm1275_vm5 = vcmask 1042432   ;;  %v6979_v49 = vld [vmem:[%s6683_s27 + $0x78] sm:$0xf]  ;;  %v6982_v53 = vld [vmem:[%s6683_s27 + $0x7c] sm:$0xf] }
  0x64   : > { %5809 = vmatmul.mubr.msk.bf16.gmra.mrb[12].mxu1 %vm721_vm4, %v5087_v51  ;;  %vm1276_vm6 = vcmask 1046532   ;;  %v2277_v11 = vrot.slane %v2276_v60, 4  ;;  %v495_v13 = vrot.slane %v493_v0, 4  ;;  %v5355_v23 = vrot.slane %v5339_v57, 9 }
  0x65   : > { %v501_v17 = vrot.slane %v499_v1, 5  ;;  %vm6955_vm7 = vmor %vm1275_vm5, %vm1276_vm6  ;;  %v487_v29 = vrot.slane %v486_v8, 4  ;;  %v2837_v33 = vrot.slane %v2835_v58, 4  ;;  %v504_v34 = vshrl.u32 %v6947_v3, 16 }
  0x66   : > { %v507_v35 = vshll.u32 %v6947_v3, 16  ;;  %v2282_v38 = vsel %vm6725_vm3, %v2277_v11, %v2281_v48  ;;  %v496_v39 = vor.u32 %v495_v13, %v491_v63  ;;  %v2836_v40 = vsel %vm6955_vm7, %v5355_v23, %v2835_v58 }
  0x67   : > { %v513_v42 = vshll.u32 %v6953_v10, 16  ;;  %v5314_v25 = vcombine.low %v2272_v7, %v2282_v38  ;;  %v492_v45 = vsel %vm6725_vm3, %v487_v29, %v491_v63  ;;  %v2839_v46 = vsel %vm6955_vm7, %v2837_v33, %v2838_v59  ;;  %v278_v59 = vld [vmem:[%s6683_s27 + $0x80] sm:$0x1]  ;;  %v7005_v33 = vld [vmem:[%s6683_s27 + $0x84] sm:$0xf] }
  0x68   : > { %v506_v48 = vrot.slane %v504_v34, 4  ;;  %v497_v15 = vrot.slane %v496_v39, 4  ;;  %v5372_v51 = vcombine.low %v2836_v40, %v2839_v46  ;;  %v509_v58 = vrot.slane %v507_v35, 5  ;;  %v7011_v38 = vld [vmem:[%s6683_s27 + $0x88] sm:$0xf] }
  0x69   : > { %v515_v52 = vrot.slane %v513_v42, 5  ;;  %5945 = vmatmul.mubr.msk.bf16.gmra.mrb[12].mxu0 %vm721_vm4, %v5314_v25  ;;  %v517_v55 = vshrl.u32 %v6953_v10, 16  ;;  %v523_v57 = vshll.u32 %v277_v41, 16  ;;  %v5356_v60 = vrot.slane %v5340_v43, 9  ;;  %v7019_v42 = vld [vmem:[%s8520_s1 + $0xe] sm:$0x3] }
  0x6a   : > { %v2846_v20 = vsel %vm6955_vm7, %v6761_v26, %v2845_v27  ;;  %v502_v63 = vsel %vm6725_vm3, %v497_v15, %v501_v17  ;;  %5966 = vmatprep.mubr.msk.bf16.mxu0 %vm721_vm4, %v5372_v51  ;;  %v510_v0 = vor.u32 %v509_v58, %v506_v48  ;;  %v3403_v1 = vsel %vm770_vm0, %v6830_v32, 0  ;;  %v5341_v27 = vld [vmem:[%s6683_s27 + $0x24] sm:$0xe]  ;;  %v279_v48 = vld [vmem:[%s6683_s27 + $0x8c] sm:$0x1] }
  0x6b   : > { %v528_v7 = vshrl.u32 %v6979_v49, 16  ;;  %v5088_v8 = vcombine.low %v492_v45, %v502_v63  ;;  %v519_v62 = vrot.slane %v517_v55, 4  ;;  %v525_v11 = vrot.slane %v523_v57, 5  ;;  %v5342_v55 = vld [vmem:[%s6683_s27 + $0x30] sm:$0xe] }
  0x6c   : > { %v2843_v26 = vsel %vm6955_vm7, %v5356_v60, %v2842_v16  ;;  %v511_v13 = vrot.slane %v510_v0, 4  ;;  %v531_v29 = vshll.u32 %v6979_v49, 16  ;;  %v537_v34 = vshll.u32 %v6982_v53, 16 }
  0x6d   : > { %v5373_v17 = vcombine.low %v2843_v26, %v2846_v20  ;;  %v530_v23 = vrot.slane %v528_v7, 4  ;;  %5812 = vmatprep.mubr.msk.bf16.mxu1 %vm721_vm4, %v5088_v8  ;;  %v520_v32 = vor.u32 %v519_v62, %v515_v52  ;;  %v541_v35 = vshrl.u32 %v6982_v53, 16  ;;  %v7035_v7 = vld [vmem:[%s6683_s27 + $0x90] sm:$0xf] }
  0x6e   : > { %v547_v61 = vshll.u32 %v278_v59, 16  ;;  %v516_v16 = vsel %vm6725_vm3, %v511_v13, %v515_v52  ;;  %v533_v39 = vrot.slane %v531_v29, 5  ;;  %v5357_v40 = vrot.slane %v5341_v27, 9  ;;  %v7038_v27 = vld [vmem:[%s6683_s27 + $0x94] sm:$0xf] }
  0x6f   : > { %v2849_v41 = vrot.slane %v6771_v44, 5  ;;  %v521_v43 = vrot.slane %v520_v32, 4  ;;  %v539_v25 = vrot.slane %v537_v34, 5  ;;  %v543_v45 = vrot.slane %v541_v35, 4 }
  0x70   : > { %v549_v46 = vrot.slane %v547_v61, 5  ;;  %v534_v15 = vor.u32 %v533_v39, %v530_v23  ;;  %v2852_v52 = vrot.slane %v6777_v47, 5  ;;  %v552_v60 = vshrl.u32 %v7005_v33, 16  ;;  %v280_v61 = vld [vmem:[%s6683_s27 + $0x98] sm:$0x1] }
  0x71   : > { %v2850_v51 = vsel %vm6955_vm7, %v5357_v40, %v2849_v41  ;;  %v2851_v58 = vrot.slane %v2849_v41, 4  ;;  %v526_v44 = vsel %vm6725_vm3, %v521_v43, %v525_v11  ;;  %5967 = vmatmul.mubr.msk.bf16.vlgmr.msra.gmra.mrb[0].mxu0 %vm721_vm4, %v5373_v17  ;;  %v544_v57 = vor.u32 %v543_v45, %v539_v25  ;;  %v5343_v43 = vld [vmem:[%s6683_s27 + $0x3c] sm:$0xe] }
  0x72   : > { %v555_v20 = vshll.u32 %v7005_v33, 16  ;;  %v5089_v59 = vcombine.low %v516_v16, %v526_v44  ;;  %5999 = vmatpush3.bf16.msra.mxu0 %v3403_v1  ;;  %v535_v63 = vrot.slane %v534_v15, 4  ;;  %v561_v47 = vshll.u32 %v7011_v38, 16  ;;  %v7057_v15 = vld [vmem:[%s6683_s27 + $0x9c] sm:$0xf] }
  0x73   : > { %v2853_v0 = vsel %vm6955_vm7, %v2851_v58, %v2852_v52  ;;  %v545_v8 = vrot.slane %v544_v57, 4  ;;  %v554_v11 = vrot.slane %v552_v60, 4  ;;  %6425 = vmatprep.subr.msk.bf16.mxu0 %vm770_vm0, %v7019_v42  ;;  %v565_v17 = vshrl.u32 %v7011_v38, 16  ;;  %v7068_v60 = vld [vmem:[%s6683_s27 + $0xa0] sm:$0xf] }
  0x74   : > { %v5374_v62 = vcombine.low %v2850_v51, %v2853_v0  ;;  %v557_v26 = vrot.slane %v555_v20, 5  ;;  %5813 = vmatmul.mubr.msk.bf16.gmra.mrb[16].mxu1 %vm721_vm4, %v5089_v59  ;;  %v540_v1 = vsel %vm6725_vm3, %v535_v63, %v539_v25  ;;  %v563_v13 = vrot.slane %v561_v47, 5 }
  0x75   : > { %v571_v23 = vshll.u32 %v279_v48, 16  ;;  %v550_v29 = vsel %vm6725_vm3, %v545_v8, %v549_v46  ;;  %v5358_v34 = vrot.slane %v5342_v55, 9  ;;  %v2856_v35 = vrot.slane %v6794_v28, 5 }
  0x76   : > { %5970 = vmatprep.mubr.msk.bf16.mxu0 %vm721_vm4, %v5374_v62  ;;  %v558_v32 = vor.u32 %v557_v26, %v554_v11  ;;  %v5090_v16 = vcombine.low %v540_v1, %v550_v29  ;;  %v567_v39 = vrot.slane %v565_v17, 4  ;;  %v2859_v41 = vrot.slane %v6800_v37, 5  ;;  %v281_v26 = vld [vmem:[%s6683_s27 + $0xa4] sm:$0x1] }
  0x77   : > { %v573_v40 = vrot.slane %v571_v23, 5  ;;  %v2857_v45 = vsel %vm6955_vm7, %v5358_v34, %v2856_v35  ;;  %v2858_v48 = vrot.slane %v2856_v35, 4  ;;  %v576_v46 = vshrl.u32 %v7035_v7, 16 }
  0x78   : > { %v559_v25 = vrot.slane %v558_v32, 4  ;;  %5816 = vmatprep.mubr.msk.bf16.mxu1 %vm721_vm4, %v5090_v16  ;;  %v568_v28 = vor.u32 %v567_v39, %v563_v13  ;;  %v579_v51 = vshll.u32 %v7035_v7, 16  ;;  %v585_v58 = vshll.u32 %v7038_v27, 16 }
  0x79   : > { %v589_v37 = vshrl.u32 %v7038_v27, 16  ;;  %v2860_v55 = vsel %vm6955_vm7, %v2858_v48, %v2859_v41  ;;  %v578_v44 = vrot.slane %v576_v46, 4  ;;  %v595_v57 = vshll.u32 %v280_v61, 16  ;;  %v7083_v41 = vld [vmem:[%s6683_s27 + $0xa8] sm:$0xf] }
  0x7a   : > { %v564_v52 = vsel %vm6725_vm3, %v559_v25, %v563_v13  ;;  %v569_v20 = vrot.slane %v568_v28, 4  ;;  %v5375_v59 = vcombine.low %v2857_v45, %v2860_v55  ;;  %v581_v63 = vrot.slane %v579_v51, 5  ;;  %v7090_v48 = vld [vmem:[%s6683_s27 + $0xac] sm:$0xf] }
  0x7b   : > { %v587_v0 = vrot.slane %v585_v58, 5  ;;  %v591_v47 = vrot.slane %v589_v37, 4  ;;  %v597_v8 = vrot.slane %v595_v57, 5  ;;  %v5359_v62 = vrot.slane %v5343_v43, 9  ;;  %v282_v57 = vld [vmem:[%s6683_s27 + $0xb0] sm:$0x1] }
  0x7c   : > { %v2863_v11 = vrot.slane %v6817_v9, 5  ;;  %v574_v1 = vsel %vm6725_vm3, %v569_v20, %v573_v40  ;;  %5971 = vmatmul.mubr.msk.bf16.gmra.mrb[4].mxu0 %vm721_vm4, %v5375_v59  ;;  %v582_v13 = vor.u32 %v581_v63, %v578_v44  ;;  %v2866_v17 = vrot.slane %v6822_v19, 5  ;;  %v5344_v9 = vld [vmem:[%s6683_s27 + $0x48] sm:$0xe] }
  0x7d   : > { %v600_v23 = vshrl.u32 %v7057_v15, 16  ;;  %v5091_v29 = vcombine.low %v564_v52, %v574_v1  ;;  %v592_v32 = vor.u32 %v591_v47, %v587_v0  ;;  %v603_v39 = vshll.u32 %v7057_v15, 16 }
  0x7e   : > { %v2864_v34 = vsel %vm6955_vm7, %v5359_v62, %v2863_v11  ;;  %v2865_v35 = vrot.slane %v2863_v11, 4  ;;  %v583_v61 = vrot.slane %v582_v13, 4  ;;  %v609_v40 = vshll.u32 %v7068_v60, 16 }
  0x7f   : > { %v602_v16 = vrot.slane %v600_v23, 4  ;;  %5817 = vmatmul.mubr.msk.bf16.gmra.mrb[20].mxu1 %vm721_vm4, %v5091_v29  ;;  %v593_v19 = vrot.slane %v592_v32, 4  ;;  %v613_v25 = vshrl.u32 %v7068_v60, 16  ;;  %v619_v45 = vshll.u32 %v281_v26, 16  ;;  %v5345_v26 = vld [vmem:[%s6683_s27 + $0x54] sm:$0xe] }
  0x80   : > { %v2867_v43 = vsel %vm6955_vm7, %v2865_v35, %v2866_v17  ;;  %v588_v46 = vsel %vm6725_vm3, %v583_v61, %v587_v0  ;;  %v605_v51 = vrot.slane %v603_v39, 5  ;;  %v611_v58 = vrot.slane %v609_v40, 5 }
  0x81   : > { %v5376_v28 = vcombine.low %v2864_v34, %v2867_v43  ;;  %v598_v37 = vsel %vm6725_vm3, %v593_v19, %v597_v8  ;;  %v615_v52 = vrot.slane %v613_v25, 4  ;;  %v621_v55 = vrot.slane %v619_v45, 5  ;;  %v7118_v25 = vld [vmem:[%s6683_s27 + $0xb8] sm:$0xf] }
  0x82   : > { %v5360_v44 = vrot.slane %v5344_v9, 9  ;;  %v5092_v20 = vcombine.low %v588_v46, %v598_v37  ;;  %v606_v59 = vor.u32 %v605_v51, %v602_v16  ;;  %v2870_v63 = vrot.slane %v6848_v5, 5  ;;  %v7113_v16 = vld [vmem:[%s6683_s27 + $0xb4] sm:$0xf] }
  0x83   : > { %5974 = vmatprep.mubr.msk.bf16.mxu0 %vm721_vm4, %v5376_v28  ;;  %v2873_v47 = vrot.slane %v6853_v14, 5  ;;  %v616_v0 = vor.u32 %v615_v52, %v611_v58  ;;  %v624_v62 = vshrl.u32 %v7083_v41, 16  ;;  %v627_v11 = vshll.u32 %v7083_v41, 16  ;;  %v7124_v52 = vld [vmem:[%s6683_s27 + $0xbc] sm:$0x1] }
  0x84   : > { %v633_v8 = vshll.u32 %v7090_v48, 16  ;;  %5820 = vmatprep.mubr.msk.bf16.mxu1 %vm721_vm4, %v5092_v20  ;;  %v607_v1 = vrot.slane %v606_v59, 4  ;;  %v2871_v13 = vsel %vm6955_vm7, %v5360_v44, %v2870_v63  ;;  %v2872_v17 = vrot.slane %v2870_v63, 4 }
  0x85   : > { %v637_v5 = vshrl.u32 %v7090_v48, 16  ;;  %v617_v14 = vrot.slane %v616_v0, 4  ;;  %v626_v23 = vrot.slane %v624_v62, 4  ;;  %v629_v29 = vrot.slane %v627_v11, 5  ;;  %v5346_v62 = vld [vmem:[%s6683_s27 + $0x60] sm:$0xe] }
  0x86   : > { %v635_v32 = vrot.slane %v633_v8, 5  ;;  %v612_v34 = vsel %vm6725_vm3, %v607_v1, %v611_v58  ;;  %v2874_v35 = vsel %vm6955_vm7, %v2872_v17, %v2873_v47  ;;  %v643_v61 = vshll.u32 %v282_v57, 16  ;;  %v5347_v17 = vld [vmem:[%s6683_s27 + $0x6c] sm:$0xe] }
  0x87   : > { %v639_v9 = vrot.slane %v637_v5, 4  ;;  %v622_v39 = vsel %vm6725_vm3, %v617_v14, %v621_v55  ;;  %v5377_v40 = vcombine.low %v2871_v13, %v2874_v35  ;;  %v630_v19 = vor.u32 %v629_v29, %v626_v23  ;;  %v5283_v13 = vld [vmem:[%s6683_s27 + $0x70] sm:$0xf] }
  0x88   : > { %v5361_v43 = vrot.slane %v5345_v26, 9  ;;  %v5093_v45 = vcombine.low %v612_v34, %v622_v39  ;;  %v645_v28 = vrot.slane %v643_v61, 5  ;;  %v2877_v51 = vrot.slane %v6878_v54, 5 }
  0x89   : > { %v640_v46 = vor.u32 %v639_v9, %v635_v32  ;;  %5975 = vmatmul.mubr.msk.bf16.gmra.mrb[8].mxu0 %vm721_vm4, %v5377_v40  ;;  %v631_v58 = vrot.slane %v630_v19, 4  ;;  %v2880_v37 = vrot.slane %v6883_v2, 5  ;;  %v648_v55 = vshrl.u32 %v7113_v16, 16 }
  0x8a   : > { %v651_v44 = vshll.u32 %v7113_v16, 16  ;;  %5821 = vmatmul.mubr.msk.bf16.gmra.mrb[24].mxu1 %vm721_vm4, %v5093_v45  ;;  %v2878_v54 = vsel %vm6955_vm7, %v5361_v43, %v2877_v51  ;;  %v2879_v20 = vrot.slane %v2877_v51, 4  ;;  %v657_v59 = vshll.u32 %v7118_v25, 16 }
  0x8b   : > { %v641_v57 = vrot.slane %v640_v46, 4  ;;  %v636_v2 = vsel %vm6725_vm3, %v631_v58, %v635_v32  ;;  %v650_v63 = vrot.slane %v648_v55, 4  ;;  %v661_v0 = vshrl.u32 %v7118_v25, 16  ;;  %v5284_v32 = vld [vmem:[%s6683_s27 + $0x74] sm:$0x1] }
  0x8c   : > { %v653_v47 = vrot.slane %v651_v44, 5  ;;  %v2881_v8 = vsel %vm6955_vm7, %v2879_v20, %v2880_v37  ;;  %v659_v26 = vrot.slane %v657_v59, 5  ;;  %v667_v1 = vshll.u32 %v7124_v52, 16  ;;  %v7157_v55 = vld [vmem:[%s6683_s27 + $0x7c] sm:$0xf] }
  0x8d   : > { %v646_v11 = vsel %vm6725_vm3, %v641_v57, %v645_v28  ;;  %v5378_v14 = vcombine.low %v2878_v54, %v2881_v8  ;;  %v663_v29 = vrot.slane %v661_v0, 4  ;;  %v5362_v35 = vrot.slane %v5346_v62, 9  ;;  %v7160_v44 = vld [vmem:[%s6683_s27 + $0x80] sm:$0x1]  ;;  %v5348_v57 = vld [vmem:[%s6683_s27 + $0x78] sm:$0xe] }
  0x8e   : > { %v5094_v5 = vcombine.low %v636_v2, %v646_v11  ;;  %v654_v23 = vor.u32 %v653_v47, %v650_v63  ;;  %v669_v34 = vrot.slane %v667_v1, 5  ;;  %v2884_v9 = vrot.slane %v6914_v56, 5  ;;  %v6511_v59 = vld [vmem:[%s6683_s27] sm:$0xf]  ;;  %v7167_v2 = vld [vmem:[%s6683_s27 + $0x4] sm:$0xf] }
  0x8f   : > { %v2887_v61 = vrot.slane %v6922_v6, 5  ;;  %5978 = vmatprep.mubr.msk.bf16.mxu0 %vm721_vm4, %v5378_v14  ;;  %v664_v40 = vor.u32 %v663_v29, %v659_v26  ;;  %v5363_v19 = vrot.slane %v5347_v17, 9  ;;  %v2891_v43 = vrot.slane %v5283_v13, 5  ;;  %v5289_v0 = vld [vmem:[%s6683_s27 + $0x88] sm:$0xf] }
  0x90   : > { %5824 = vmatprep.mubr.msk.bf16.mxu1 %vm721_vm4, %v5094_v5  ;;  %v655_v39 = vrot.slane %v654_v23, 4  ;;  %v2885_v45 = vsel %vm6955_vm7, %v5362_v35, %v2884_v9  ;;  %v2886_v46 = vrot.slane %v2884_v9, 4  ;;  %v2894_v56 = vrot.slane %v5284_v32, 5  ;;  %v5349_v62 = vld [vmem:[%s6683_s27 + $0x84] sm:$0xe] }
  0x91   : > { %v665_v28 = vrot.slane %v664_v40, 4  ;;  %v2892_v51 = vsel %vm6955_vm7, %v5363_v19, %v2891_v43  ;;  %v2893_v58 = vrot.slane %v2891_v43, 4  ;;  %v5112_v63 = vcombine.low %v6511_v59, %v7167_v2  ;;  %v5292_v23 = vld [vmem:[%s6683_s27 + $0x94] sm:$0xf]  ;;  %v5350_v29 = vld [vmem:[%s6683_s27 + $0x90] sm:$0xe] }
  0x92   : > { %v660_v6 = vsel %vm6725_vm3, %v655_v39, %v659_v26  ;;  %v2888_v37 = vsel %vm6955_vm7, %v2886_v46, %v2887_v61  ;;  %v5290_v26 = vld [vmem:[%s6683_s27 + $0x8c] sm:$0x1]  ;;  %v5364_v1 = vrot.slane %v5348_v57, 9  ;;  %v2898_v13 = vrot.slane %v7157_v55, 5  ;;  %v5293_v9 = vld [vmem:[%s6683_s27 + $0x98] sm:$0x1] }
  0x93   : > { %v670_v54 = vsel %vm6725_vm3, %v665_v28, %v669_v34  ;;  %v5379_v20 = vcombine.low %v2885_v45, %v2888_v37  ;;  %v2895_v47 = vsel %vm6955_vm7, %v2893_v58, %v2894_v56  ;;  %v2901_v17 = vrot.slane %v7160_v44, 5  ;;  %v5295_v61 = vld [vmem:[%s6683_s27 + $0xa0] sm:$0xf]  ;;  %v6513_v39 = vld [vmem:[%s6683_s27 + $0xc] sm:$0xf] }
  0x94   : > { %v5095_v11 = vcombine.low %v660_v6, %v670_v54  ;;  %v5380_v8 = vcombine.low %v2892_v51, %v2895_v47  ;;  %v5365_v5 = vrot.slane %v5349_v62, 9  ;;  %v2905_v14 = vrot.slane %v5289_v0, 5  ;;  %v7189_v40 = vld [vmem:[%s6683_s27 + $0x10] sm:$0xf]  ;;  %v5296_v46 = vld [vmem:[%s6683_s27 + $0xa4] sm:$0x1] }
  0x95   : > { %5979 = vmatmul.mubr.msk.bf16.gmra.mrb[12].mxu0 %vm721_vm4, %v5379_v20  ;;  %v2899_v32 = vsel %vm6955_vm7, %v5364_v1, %v2898_v13  ;;  %v2900_v34 = vrot.slane %v2898_v13, 4  ;;  %v2908_v35 = vrot.slane %v5290_v26, 5  ;;  %v5113_v19 = vcombine.low %v6513_v39, %v7189_v40  ;;  %v5351_v56 = vld [vmem:[%s6683_s27 + $0x9c] sm:$0xe]  ;;  %v6515_v28 = vld [vmem:[%s6683_s27 + $0x18] sm:$0xf] }
  0x96   : > { %5825 = vmatmul.mubr.msk.bf16.gmra.mrb[28].mxu1 %vm721_vm4, %v5095_v11  ;;  %5982 = vmatprep.mubr.msk.bf16.mxu0 %vm721_vm4, %v5380_v8  ;;  %v2906_v43 = vsel %vm6955_vm7, %v5365_v5, %v2905_v14  ;;  %v2907_v45 = vrot.slane %v2905_v14, 4  ;;  %v7200_v51 = vld [vmem:[%s6683_s27 + $0x1c] sm:$0xf]  ;;  %v5366_v37 = vrot.slane %v5350_v29, 9  ;;  %v2912_v57 = vrot.slane %v5292_v23, 5 }
  0x97   : > { %5830 = vmatprep.mubr.msk.bf16.mxu1 %vm721_vm4, %v5112_v63  ;;  %v2902_v6 = vsel %vm6955_vm7, %v2900_v34, %v2901_v17  ;;  %v5114_v58 = vcombine.low %v6515_v28, %v7200_v51  ;;  %v2915_v59 = vrot.slane %v5293_v9, 5  ;;  %v2919_v63 = vrot.slane %v5295_v61, 5  ;;  %v5298_v47 = vld [vmem:[%s6683_s27 + $0xac] sm:$0xf]  ;;  %v5301_v26 = vld [vmem:[%s6683_s27 + $0xb8] sm:$0xf] }
  0x98   : > { %v5381_v54 = vcombine.low %v2899_v32, %v2902_v6  ;;  %v2909_v20 = vsel %vm6955_vm7, %v2907_v45, %v2908_v35  ;;  %v2914_v62 = vrot.slane %v2912_v57, 4  ;;  %v5367_v11 = vrot.slane %v5351_v56, 9  ;;  %v7213_v17 = vld [vmem:[%s8520_s1 + $0x6] sm:$0x3]  ;;  %v5299_v14 = vld [vmem:[%s6683_s27 + $0xb0] sm:$0x1] }
  0x99   : > { %v5382_v0 = vcombine.low %v2906_v43, %v2909_v20  ;;  %v2922_v8 = vrot.slane %v5296_v46, 5  ;;  %v1489_v1 = vsel %vm770_vm0, %v6911_v50, 0  ;;  %v2921_v13 = vrot.slane %v2919_v63, 4  ;;  %v5352_v34 = vld [vmem:[%s6683_s27 + $0xa8] sm:$0xe] }
  0x9a   : > { %v2913_v5 = vsel %vm6955_vm7, %v5366_v37, %v2912_v57  ;;  %v2916_v50 = vsel %vm6955_vm7, %v2914_v62, %v2915_v59  ;;  %v2926_v23 = vrot.slane %v5298_v47, 5  ;;  %v2920_v29 = vsel %vm6955_vm7, %v5367_v11, %v2919_v63  ;;  %v5302_v9 = vld [vmem:[%s6683_s27 + $0xbc] sm:$0x1]  ;;  %v5353_v61 = vld [vmem:[%s6683_s27 + $0xb4] sm:$0xe] }
  0x9b   : > { %v2923_v32 = vsel %vm6955_vm7, %v2921_v13, %v2922_v8  ;;  %v2933_v35 = vrot.slane %v5301_v26, 5  ;;  %v6517_v39 = vld [vmem:[%s6683_s27 + $0x24] sm:$0xf]  ;;  %v5383_v45 = vcombine.low %v2913_v5, %v2916_v50  ;;  %v5368_v56 = vrot.slane %v5352_v34, 9  ;;  %v7239_v37 = vld [vmem:[%s6683_s27 + $0x34] sm:$0xf] }
  0x9c   : > { %v5384_v46 = vcombine.low %v2920_v29, %v2923_v32  ;;  %v2928_v6 = vrot.slane %v2926_v23, 4  ;;  %v2929_v28 = vrot.slane %v5299_v14, 5  ;;  %v2936_v59 = vrot.slane %v5302_v9, 5  ;;  %v5304_v63 = vld [vmem:[%s6683_s27 + $0xc4] sm:$0xf] }
  0x9d   : > { %5983 = vmatmul.mubr.msk.bf16.gmra.mrb[16].mxu0 %vm721_vm4, %v5381_v54  ;;  %v5369_v54 = vrot.slane %v5353_v61, 9  ;;  %v2935_v20 = vrot.slane %v2933_v35, 4  ;;  %v2927_v47 = vsel %vm6955_vm7, %v5368_v56, %v2926_v23  ;;  %v2940_v62 = vrot.slane %v5304_v63, 5  ;;  %v5305_v26 = vld [vmem:[%s6683_s27 + $0xc8] sm:$0x1] }
  0x9e   : > { %5831 = vmatmul.mubr.msk.bf16.vlgmr.msra.gmra.mrb[0].mxu1 %vm721_vm4, %v5113_v19  ;;  %5986 = vmatprep.mubr.msk.bf16.mxu0 %vm721_vm4, %v5382_v0  ;;  %v7234_v19 = vld [vmem:[%s6683_s27 + $0x28] sm:$0xf]  ;;  %v2930_v0 = vsel %vm6955_vm7, %v2928_v6, %v2929_v28  ;;  %v6521_v13 = vld [vmem:[%s6683_s27 + $0x3c] sm:$0xf]  ;;  %v7259_v5 = vld [vmem:[%s6683_s27 + $0x40] sm:$0xf]  ;;  %v5118_v9 = vcombine.low %v6856_v12, %v6864_v36  ;;  %v5120_v6 = vcombine.low %v6928_v18, %v6931_v24 }
  0x9f   : > { %5863 = vmatpush3.bf16.msra.mxu1 %v1489_v1  ;;  %5834 = vmatprep.mubr.msk.bf16.mxu1 %vm721_vm4, %v5114_v58  ;;  %v5115_v43 = vcombine.low %v6517_v39, %v7234_v19  ;;  %v6519_v58 = vld [vmem:[%s6683_s27 + $0x30] sm:$0xf]  ;;  %v2934_v11 = vsel %vm6955_vm7, %v5369_v54, %v2933_v35  ;;  %v2937_v8 = vsel %vm6955_vm7, %v2935_v20, %v2936_v59  ;;  %v5354_v1 = vld [vmem:[%s6683_s27 + $0xc0] sm:$0xe]  ;;  %v2942_v32 = vrot.slane %v2940_v62, 4 }
  0xa0   : > { %6420 = vmatprep.subr.msk.bf16.mxu1 %vm770_vm0, %v7213_v17  ;;  %v5116_v57 = vcombine.low %v6519_v58, %v7239_v37  ;;  %v5117_v50 = vcombine.low %v6521_v13, %v7259_v5  ;;  %v5385_v14 = vcombine.low %v2927_v47, %v2930_v0  ;;  %v5386_v23 = vcombine.low %v2934_v11, %v2937_v8  ;;  %v1227_v58 = vld [vmem:[%s6683_s27] sm:$0xe]  ;;  %v1228_v20 = vld [vmem:[%s6683_s27 + $0xc] sm:$0xe]  ;;  %v6523_v18 = vld [vmem:[%s6683_s27 + $0x8] sm:$0x1] }
  0xa1   : > { %v5370_v29 = vrot.slane %v5354_v1, 9  ;;  %v2943_v34 = vrot.slane %v5305_v26, 5  ;;  %v2317_v35 = vshll.u32 %v7157_v55, 16  ;;  %v2321_v61 = vshrl.u32 %v7157_v55, 16  ;;  %v6474_v47 = vld [vmem:[%s6683_s27 + $0x24] sm:$0xff]  }
  0xa2   : > { %v2327_v56 = vshll.u32 %v7160_v44, 16  ;;  %v1280_v54 = vrot.slane %v7167_v2, 5  ;;  %v1283_v24 = vrot.slane %v6523_v18, 5  ;;  %v6524_v44 = vld [vmem:[%s6683_s27 + $0x14] sm:$0x1]  ;;  %v5121_v63 = vcombine.low %v6947_v3, %v6953_v10 }
  0xa3   : > { %v2941_v39 = vsel %vm6955_vm7, %v5370_v29, %v2940_v62  ;;  %v7274_v12 = vrot.slane %v2317_v35, 5  ;;  %v2323_v36 = vrot.slane %v2321_v61, 4  ;;  %v1290_v59 = vrot.slane %v6524_v44, 5  ;;  %v1230_v62 = vld [vmem:[%s6683_s27 + $0x24] sm:$0xe] }
  0xa4   : > { %v5144_v0 = vrot.slane %v1227_v58, 9  ;;  %v4129_v11 = vsel %vm770_vm0, %v7019_v42, 0  ;;  %v1282_v8 = vrot.slane %v1280_v54, 4  ;;  %v1231_v13 = vld [vmem:[%s6683_s27 + $0x30] sm:$0xe]  ;;  %v1301_v3 = vrot.slane %v7234_v19, 5 }
  0xa5   : > { %5987 = vmatmul.mubr.msk.bf16.gmra.mrb[20].mxu0 %vm721_vm4, %v5383_v45  ;;  %8543 = vst [vmem:[#allocation8_spill] sm:$0xff] %v7274_v12  ;;  %v5119_v45 = vcombine.low %v6889_v21, %v6895_v30  ;;  %v2324_v28 = vor.u32 %v2323_v36, %v7274_v12  ;;  %v1229_v21 = vld [vmem:[%s6683_s27 + $0x18] sm:$0xe]  ;;  %v1294_v30 = vrot.slane %v7200_v51, 5  ;;  %v5145_v51 = vrot.slane %v1228_v20, 9  ;;  %v6478_v58 = vld [vmem:[%s6683_s27 + $0x3c] sm:$0xff]  }
  0xa6   : > { %5835 = vmatmul.mubr.msk.bf16.gmra.mrb[4].mxu1 %vm721_vm4, %v5115_v43  ;;  %5990 = vmatprep.mubr.msk.bf16.mxu0 %vm721_vm4, %v5384_v46  ;;  %v2944_v43 = vsel %vm6955_vm7, %v2942_v32, %v2943_v34  ;;  %v6472_v46 = vld [vmem:[%s6683_s27 + $0x18] sm:$0xff]   ;;  %v5146_v1 = vrot.slane %v1229_v21, 9  ;;  %v6476_v32 = vld [vmem:[%s6683_s27 + $0x30] sm:$0xff]   ;;  %v5123_v34 = vcombine.low %v7005_v33, %v7011_v38  ;;  %v5124_v42 = vcombine.low %v7035_v7, %v7038_v27  ;;  %v7440_v27 = vld [vmem:[%s6683_s27 + $0x64] sm:$0xf] }
  0xa7   : > { %5838 = vmatprep.mubr.msk.bf16.mxu1 %vm721_vm4, %v5116_v57  ;;  %v5387_v55 = vcombine.low %v2941_v39, %v2944_v43  ;;  %v1287_v57 = vrot.slane %v7189_v40, 5  ;;  %v7294_v40 = vrot.slane %v2327_v56, 5  ;;  %v7297_v2 = vrot.slane %v2324_v28, 4  ;;  %v1232_v10 = vld [vmem:[%s6683_s27 + $0x3c] sm:$0xe]  ;;  %v6482_v33 = vld [vmem:[%s6683_s27 + $0x54] sm:$0xff]  }
  0xa8   : > { %v1308_v35 = vrot.slane %v7239_v37, 5  ;;  %v7328_v19 = vsel %vm6955_vm7, %v5144_v0, %v1280_v54  ;;  %v1315_v39 = vrot.slane %v7259_v5, 5  ;;  %v7338_v37 = vsel %vm6955_vm7, %v1282_v8, %v1283_v24  ;;  %v6526_v56 = vld [vmem:[%s6683_s27 + $0x2c] sm:$0x1]  ;;  %v6527_v20 = vld [vmem:[%s6683_s27 + $0x38] sm:$0x1] }
  0xa9   : > { %8544 = vst [vmem:[#allocation9_spill] sm:$0xff] %v7294_v40  ;;  %8545 = vst [vmem:[#allocation10_spill] sm:$0xff] %v7297_v2  ;;  %v1289_v26 = vrot.slane %v1287_v57, 4  ;;  %v7332_v61 = vsel %vm6955_vm7, %v5145_v51, %v1287_v57  ;;  %v7346_v36 = vsel %vm6955_vm7, %v5146_v1, %v1294_v30  ;;  %v5148_v28 = vrot.slane %v1231_v13, 9  ;;  %v5469_v18 = vld [vmem:[%s6683_s27 + $0x18] sm:$0xf] }
  0xaa   : > { %v1310_v54 = vrot.slane %v1308_v35, 4  ;;  %v1311_v21 = vrot.slane %v6527_v20, 5  ;;  %v6480_v24 = vld [vmem:[%s6683_s27 + $0x48] sm:$0xff]   ;;  %v7367_v44 = vsel %vm770_vm0, %v7213_v17, 0  ;;  %v1234_v1 = vld [vmem:[%s6683_s27 + $0x54] sm:$0xe] }
  0xab   : > { %v7342_v43 = vsel %vm6955_vm7, %v1289_v26, %v1290_v59  ;;  %v1317_v59 = vrot.slane %v1315_v39, 4  ;;  %v6529_v0 = vld [vmem:[%s6683_s27 + $0x4c] sm:$0xf]  ;;  %v5472_v13 = vld [vmem:[%s6683_s27 + $0x24] sm:$0xf]  ;;  %vm6623_vm9 = vmmov (%p4918_p6), 0  }
  0xac   : > { %v1322_v51 = vrot.slane %v6529_v0, 5  ;;  %v3674_v20 = vshll.u32 %v5472_v13, 16  ;;  %v5474_v17 = vld [vmem:[%s6683_s27 + $0x2c] sm:$0x1]  ;;  %v6535_v8 = vld [vmem:[%s6683_s27 + $0x70] sm:$0xf] }
  0xad   : > { %5991 = vmatmul.mubr.msk.bf16.gmra.mrb[24].mxu0 %vm721_vm4, %v5385_v14  ;;  %v1296_v14 = vrot.slane %v1294_v30, 4  ;;  %v5149_v30 = vrot.slane %v1232_v10, 9  ;;  %v6530_v10 = vld [vmem:[%s6683_s27 + $0x50] sm:$0x1]  ;;  %v6545_v2 = vld [vmem:[%s6683_s27 + $0xa4] sm:$0x1] }
  0xae   : > { %5839 = vmatmul.mubr.msk.bf16.gmra.mrb[8].mxu1 %vm721_vm4, %v5117_v50  ;;  %5994 = vmatprep.mubr.msk.bf16.mxu0 %vm721_vm4, %v5386_v23  ;;  %v5122_v50 = vcombine.low %v6979_v49, %v6982_v53  ;;  %v6525_v23 = vld [vmem:[%s6683_s27 + $0x20] sm:$0x1]  ;;  %v7322_v49 = vld [vmem:[%s8520_s1 + $0x10] sm:$0x3]  ;;  %v5126_v53 = vcombine.low %v7083_v41, %v7090_v48 }
  0xaf   : > { %5842 = vmatprep.mubr.msk.bf16.mxu1 %vm721_vm4, %v5118_v9  ;;  %v1297_v29 = vrot.slane %v6525_v23, 5  ;;  %v5125_v9 = vcombine.low %v7057_v15, %v7068_v60  ;;  %v7393_v23 = vsel %vm6955_vm7, %v5148_v28, %v1308_v35  ;;  %v1324_v35 = vrot.slane %v1322_v51, 4 }
  0xb1   : > { %v7354_v5 = vsel %vm6955_vm7, %v1296_v14, %v1297_v29 }
  0xb5   : > { %5995 = vmatmul.mubr.msk.bf16.gmra.mrb[28].mxu0 %vm721_vm4, %v5387_v55  ;;  %v5147_v55 = vrot.slane %v1230_v62, 9  ;;  %v5470_v62 = vld [vmem:[%s6683_s27 + $0x1c] sm:$0xf] }
  0xb6   : > { %5843 = vmatmul.mubr.msk.bf16.gmra.mrb[12].mxu1 %vm721_vm4, %v5119_v45  ;;  %6000 = vmatprep.mubr.msk.bf16.mxu0 %vm721_vm4, %v6472_v46  ;;  %v7349_v45 = vld [vmem:[%s6683_s27 + $0x48] sm:$0xe]  ;;  %v1303_v46 = vrot.slane %v1301_v3, 4  ;;  %v3660_v28 = vshrl.u32 %v5470_v62, 16 }
  0xb7   : > { %5846 = vmatprep.mubr.msk.bf16.mxu1 %vm721_vm4, %v5120_v6  ;;  %v1304_v6 = vrot.slane %v6526_v56, 5  ;;  %v7382_v26 = vsel %vm6955_vm7, %v5147_v55, %v1301_v3  ;;  %v5150_v29 = vrot.slane %v7349_v45, 9  ;;  %v7399_v56 = vsel %vm6955_vm7, %v1310_v54, %v1311_v21 }
  0xb8   : > { %v7403_v3 = vsel %vm6955_vm7, %v5149_v30, %v1315_v39  ;;  %v3647_v55 = vshrl.u32 %v5469_v18, 16  ;;  %v3656_v45 = vshll.u32 %v5470_v62, 16  ;;  %v3671_v54 = vshrl.u32 %v5472_v13, 16  ;;  %v6484_v62 = vld [vmem:[%s6683_s27 + $0x60] sm:$0xff]  }
  0xb9   : > { %v7389_v14 = vsel %vm6955_vm7, %v1303_v46, %v1304_v6  ;;  %v3650_v46 = vshll.u32 %v5469_v18, 16  ;;  %v5151_v18 = vrot.slane %v1234_v1, 9  ;;  %v5471_v1 = vld [vmem:[%s6683_s27 + $0x20] sm:$0x1] }
  0xba   : > { %v7444_v13 = vrot.slane %v3656_v45, 5 }
  0xbb   : > { %v3652_v0 = vrot.slane %v3650_v46, 5  ;;  %v5475_v46 = vld [vmem:[%s6683_s27 + $0x30] sm:$0xf] }
  0xbd   : > { %6001 = vmatmul.mubr.msk.bf16.vlgmr.msra.gmra.mrb[0].mxu0 %vm721_vm4, %v6474_v47 }
  0xbe   : > { %5847 = vmatmul.mubr.msk.bf16.gmra.mrb[16].mxu1 %vm721_vm4, %v5121_v63  ;;  %6033 = vmatpush3.bf16.msra.mxu0 %v4129_v11  ;;  %v6528_v63 = vld [vmem:[%s6683_s27 + $0x44] sm:$0x1]  ;;  %v3695_v11 = vshrl.u32 %v5475_v46, 16 }
  0xbf   : > { %5850 = vmatprep.mubr.msk.bf16.mxu1 %vm721_vm4, %v5122_v50  ;;  %6004 = vmatprep.mubr.msk.bf16.mxu0 %vm721_vm4, %v6476_v32  ;;  %v1318_v47 = vrot.slane %v6528_v63, 5  ;;  %v5473_v50 = vld [vmem:[%s6683_s27 + $0x28] sm:$0xf]  ;;  %v1325_v32 = vrot.slane %v6530_v10, 5 }
  0xc0   : > { %6426 = vmatprep.subr.msk.bf16.mxu0 %vm770_vm0, %v7322_v49  ;;  %v3680_v21 = vshll.u32 %v5473_v50, 16  ;;  %v3684_v39 = vshrl.u32 %v5473_v50, 16  ;;  %v3673_v50 = vrot.slane %v3671_v54, 4 }
  0xc1   : > { %v7407_v6 = vsel %vm6955_vm7, %v1317_v59, %v1318_v47  ;;  %v6531_v59 = vld [vmem:[%s6683_s27 + $0x58] sm:$0xf]  ;;  %v3649_v47 = vrot.slane %v3647_v55, 4  ;;  %v7437_v7 = vsel %vm6955_vm7, %v1324_v35, %v1325_v32  ;;  %v6533_v35 = vld [vmem:[%s6683_s27 + $0x5c] sm:$0x1] }
  0xc2   : > { %v1329_v63 = vrot.slane %v6531_v59, 5  ;;  %v7446_v10 = vrot.slane %v3680_v21, 5  ;;  %v3686_v55 = vrot.slane %v3684_v39, 4  ;;  %v1332_v59 = vrot.slane %v6533_v35, 5  ;;  %v5476_v21 = vld [vmem:[%s6683_s27 + $0x34] sm:$0xf] }
  0xc3   : > { %v3653_v54 = vor.u32 %v3652_v0, %v3649_v47  ;;  %v1236_v35 = vld [vmem:[%s6683_s27 + $0x6c] sm:$0xe]  ;;  %v3690_v47 = vshll.u32 %v5474_v17, 16  ;;  %v6536_v0 = vld [vmem:[%s6683_s27 + $0x7c] sm:$0xf] }
  0xc4   : > { %v1331_v32 = vrot.slane %v1329_v63, 4  ;;  %v6537_v17 = vld [vmem:[%s6683_s27 + $0x74] sm:$0x1] }
  0xc5   : > { %6005 = vmatmul.mubr.msk.bf16.gmra.mrb[4].mxu0 %vm721_vm4, %v6478_v58  ;;  %v6534_v58 = vld [vmem:[%s6683_s27 + $0x68] sm:$0x1]  ;;  %v3654_v15 = vrot.slane %v3653_v54, 4 }
  0xc6   : > { %5851 = vmatmul.mubr.msk.bf16.gmra.mrb[20].mxu1 %vm721_vm4, %v5123_v34  ;;  %6008 = vmatprep.mubr.msk.bf16.mxu0 %vm721_vm4, %v6480_v24  ;;  %v7429_v34 = vsel %vm6955_vm7, %v5150_v29, %v1322_v51  ;;  %v7432_v24 = vld [vmem:[%s6683_s27 + $0x60] sm:$0xe]  ;;  %v3662_v51 = vrot.slane %v3660_v28, 4  ;;  %v3676_v29 = vrot.slane %v3674_v20, 5  ;;  %v1339_v30 = vrot.slane %v6534_v58, 5 }
  0xc7   : > { %5854 = vmatprep.mubr.msk.bf16.mxu1 %vm721_vm4, %v5124_v42  ;;  %v8525_v42 = vrot.slane %v7440_v27, 5  ;;  %v5152_v38 = vrot.slane %v7432_v24, 9  ;;  %v7457_v28 = vsel %vm6955_vm7, %v5151_v18, %v1329_v63  ;;  %v3666_v20 = vshll.u32 %v5471_v1, 16 }
  0xc8   : > { %v3663_v39 = vor.u32 %v3662_v51, %v7444_v13  ;;  %v1343_v24 = vrot.slane %v6535_v8, 5  ;;  %v3698_v58 = vshll.u32 %v5475_v46, 16  ;;  %v3677_v18 = vor.u32 %v3676_v29, %v3673_v50 }
  0xc9   : > { %v1338_v45 = vrot.slane %v8525_v42, 4  ;;  %v3687_v63 = vor.u32 %v3686_v55, %v7446_v10  ;;  %v7474_v8 = vsel %vm6955_vm7, %v1331_v32, %v1332_v59  ;;  %v1350_v1 = vrot.slane %v6536_v0, 5  ;;  %v6486_v59 = vld [vmem:[%s6683_s27 + $0x6c] sm:$0xff]   ;;  %v6487_v0 = vld [vmem:[%s6683_s27 + $0x78] sm:$0xff]  }
  0xca   : > { %v3704_v51 = vshll.u32 %v5476_v21, 16  ;;  %v3708_v50 = vshrl.u32 %v5476_v21, 16  ;;  %v3668_v60 = vrot.slane %v3666_v20, 5  ;;  %v3664_v29 = vrot.slane %v3663_v39, 4  ;;  %v7487_v20 = vld [vmem:[%s6683_s27 + $0x38] sm:$0x1] }
  0xcb   : > { %v1345_v55 = vrot.slane %v1343_v24, 4  ;;  %v3697_v46 = vrot.slane %v3695_v11, 4  ;;  %v3700_v32 = vrot.slane %v3698_v58, 5  ;;  %v3678_v21 = vrot.slane %v3677_v18, 4  ;;  %8546 = vst [vmem:[#allocation11_spill] sm:$0xff] %v7487_v20 }
  0xcc   : > { %v3688_v57 = vrot.slane %v3687_v63, 4  ;;  %v3692_v42 = vrot.slane %v3690_v47, 5  ;;  %v1352_v48 = vrot.slane %v1350_v1, 4  ;;  %v8547_v39 = vrot.slane %v7440_v27, 5  ;;  %v1238_v47 = vld [vmem:[%s6683_s27 + $0x84] sm:$0xe] }
  0xcd   : > { %6009 = vmatmul.mubr.msk.bf16.gmra.mrb[8].mxu0 %vm721_vm4, %v6482_v33  ;;  %v1237_v33 = vld [vmem:[%s6683_s27 + $0x78] sm:$0xe]  ;;  %v7501_v18 = vsel %vm6955_vm7, %v1338_v45, %v1339_v30  ;;  %v3669_v30 = vsel %vm6725_vm3, %v3664_v29, %v3668_v60  ;;  %v3683_v45 = vsel %vm6725_vm3, %v3678_v21, %v7446_v10  ;;  %v8549_v29 = vcombine.low %v7328_v19, %v7338_v37 }
  0xce   : > { %5855 = vmatmul.mubr.msk.bf16.gmra.mrb[24].mxu1 %vm721_vm4, %v5125_v9  ;;  %6012 = vmatprep.mubr.msk.bf16.mxu0 %vm721_vm4, %v6484_v62  ;;  %v5153_v9 = vrot.slane %v1236_v35, 9  ;;  %v1346_v62 = vrot.slane %v6537_v17, 5  ;;  %v5154_v41 = vrot.slane %v1237_v33, 9  ;;  %v7489_v35 = vrot.slane %v3704_v51, 5 }
  0xcf   : > { %5858 = vmatprep.mubr.msk.bf16.mxu1 %vm721_vm4, %v5126_v53  ;;  %v6538_v53 = vld [vmem:[%s6683_s27 + $0x80] sm:$0x1]  ;;  %v3710_v17 = vrot.slane %v3708_v50, 4  ;;  %v7497_v58 = vsel %vm6955_vm7, %v5152_v38, %v8547_v39  ;;  %v3659_v33 = vsel %vm6725_vm3, %v3654_v15, %v7444_v13  ;;  %v3701_v51 = vor.u32 %v3700_v32, %v3697_v46  ;;  %v6539_v38 = vld [vmem:[%s6683_s27 + $0x88] sm:$0xf] }
  0xd0   : > { %v1353_v54 = vrot.slane %v6538_v53, 5  ;;  %v7505_v63 = vsel %vm6955_vm7, %v5153_v9, %v1343_v24  ;;  %v7513_v27 = vsel %vm6955_vm7, %v1345_v55, %v1346_v62  ;;  %v1357_v50 = vrot.slane %v6539_v38, 5  ;;  %v5478_v15 = vld [vmem:[%s6683_s27 + $0x3c] sm:$0xf]  ;;  %v6540_v55 = vld [vmem:[%s6683_s27 + $0x8c] sm:$0x1] }
  0xd1   : > { %v7524_v13 = vsel %vm6955_vm7, %v5154_v41, %v1350_v1  ;;  %v3714_v24 = vshll.u32 %v7487_v20, 16  ;;  %v8548_v9 = vcombine.low %v7113_v16, %v7118_v25  ;;  %v3693_v60 = vsel %vm6725_vm3, %v3688_v57, %v3692_v42  ;;  %v7554_v32 = vld [vmem:[%s6683_s27 + $0x40] sm:$0xf]  ;;  %v7558_v41 = vld [vmem:[%s6683_s27 + $0x4c] sm:$0xf] }
  0xd2   : > { %v7537_v10 = vsel %vm6955_vm7, %v1352_v48, %v1353_v54  ;;  %v3711_v1 = vor.u32 %v3710_v17, %v7489_v35  ;;  %v5155_v62 = vrot.slane %v1238_v47, 9  ;;  %v7550_v42 = vsel %vm770_vm0, %v7322_v49, 0  ;;  %8550 = vst [vmem:[#allocation12_spill] sm:$0xff] %v7554_v32  ;;  %v6488_v48 = vld [vmem:[%s6683_s27 + $0x84] sm:$0xff]   ;;  %v5484_v39 = vld [vmem:[%s6683_s27 + $0x54] sm:$0xf] }
  0xd3   : > { %v1360_v46 = vrot.slane %v6540_v55, 5  ;;  %v3702_v19 = vrot.slane %v3701_v51, 4  ;;  %v1359_v37 = vrot.slane %v1357_v50, 4  ;;  %v3722_v21 = vshll.u32 %v5478_v15, 16  ;;  %v6489_v47 = vld [vmem:[%s6683_s27 + $0x90] sm:$0xff]  }
  0xd4   : > { %v7561_v53 = vcombine.low %v3659_v33, %v3669_v30  ;;  %v7563_v54 = vcombine.low %v3683_v45, %v3693_v60  ;;  %v3716_v17 = vrot.slane %v3714_v24, 5  ;;  %v3712_v51 = vrot.slane %v3711_v1, 4  ;;  %v7576_v33 = vld [vmem:[%s6683_s27 + $0x58] sm:$0xf]  ;;  %v7579_v30 = vld [vmem:[%s6683_s27 + $0x44] sm:$0x1] }
  0xd5   : > { %6013 = vmatmul.mubr.msk.bf16.gmra.mrb[12].mxu0 %vm721_vm4, %v6486_v59  ;;  %v5481_v59 = vld [vmem:[%s6683_s27 + $0x48] sm:$0xf]  ;;  %v7571_v38 = vsel %vm6955_vm7, %v5155_v62, %v1357_v50  ;;  %8551 = vst [vmem:[#allocation13_spill] sm:$0xff] %v7579_v30  ;;  %v3752_v24 = vshll.u32 %v7558_v41, 16  ;;  %v3707_v1 = vsel %vm6725_vm3, %v3702_v19, %v7489_v35  ;;  %v7588_v50 = vsel %vm6955_vm7, %v1359_v37, %v1360_v46  ;;  %v7592_v49 = vld [vmem:[%s6683_s27 + $0x90] sm:$0xe] }
  0xd6   : > { %5859 = vmatmul.mubr.msk.bf16.gmra.mrb[28].mxu1 %vm721_vm4, %v8548_v9  ;;  %6016 = vmatprep.mubr.msk.bf16.mxu0 %vm721_vm4, %v6487_v0  ;;  %v3719_v0 = vshrl.u32 %v5478_v15, 16  ;;  %v3728_v15 = vshll.u32 %v7554_v32, 16  ;;  %v3732_v9 = vshrl.u32 %v7554_v32, 16  ;;  %v3743_v45 = vshrl.u32 %v5481_v59, 16  ;;  %v6544_v20 = vld [vmem:[%s6683_s27 + $0xa0] sm:$0xf] }
  0xd7   : > { %5864 = vmatprep.mubr.msk.bf16.mxu1 %vm721_vm4, %v8549_v29  ;;  %v3746_v60 = vshll.u32 %v5481_v59, 16  ;;  %v3756_v29 = vshrl.u32 %v7558_v41, 16  ;;  %v3724_v55 = vrot.slane %v3722_v21, 5  ;;  %v3767_v59 = vshrl.u32 %v5484_v39, 16 }
  0xd8   : > { %v3721_v62 = vrot.slane %v3719_v0, 4  ;;  %v3770_v57 = vshll.u32 %v5484_v39, 16  ;;  %v3776_v16 = vshll.u32 %v7576_v33, 16  ;;  %v3780_v11 = vshrl.u32 %v7576_v33, 16 }
  0xd9   : > { %v8552_v35 = vcombine.low %v7332_v61, %v7342_v43  ;;  %v3717_v46 = vsel %vm6725_vm3, %v3712_v51, %v3716_v17  ;;  %v7603_v19 = vrot.slane %v3728_v15, 5  ;;  %v3734_v37 = vrot.slane %v3732_v9, 4  ;;  %v7612_v61 = vld [vmem:[%s6683_s27 + $0x50] sm:$0x1]  ;;  %v7622_v9 = vld [vmem:[%s6683_s27 + $0x5c] sm:$0x1] }
  0xda   : > { %v3738_v0 = vshll.u32 %v7579_v30, 16  ;;  %v8553_v21 = vcombine.low %v7346_v36, %v7354_v5  ;;  %v3745_v43 = vrot.slane %v3743_v45, 4  ;;  %v7614_v39 = vrot.slane %v3752_v24, 5  ;;  %v6541_v36 = vld [vmem:[%s6683_s27 + $0x94] sm:$0xf] }
  0xdb   : > { %v3758_v17 = vrot.slane %v3756_v29, 4  ;;  %v3725_v15 = vor.u32 %v3724_v55, %v3721_v62  ;;  %v1364_v5 = vrot.slane %v6541_v36, 5  ;;  %v6542_v45 = vld [vmem:[%s8520_s1 + $0x8] sm:$0x3]  ;;  %v3772_v24 = vrot.slane %v3770_v57, 5 }
  0xdc   : > { %v7628_v29 = vrot.slane %v3776_v16, 5  ;;  %v3782_v62 = vrot.slane %v3780_v11, 4  ;;  %v6491_v55 = vld [vmem:[%s6683_s27 + $0xa8] sm:$0xff]   ;;  %v7635_v36 = vrot.slane %v3738_v0, 5  ;;  %v3762_v51 = vshll.u32 %v7612_v61, 16 }
  0xdd   : > { %6017 = vmatmul.mubr.msk.bf16.gmra.mrb[16].mxu0 %vm721_vm4, %v6488_v48  ;;  %v3748_v48 = vrot.slane %v3746_v60, 5  ;;  %v3769_v60 = vrot.slane %v3767_v59, 4  ;;  %v7639_v30 = vld [vmem:[%s6683_s27 + $0x64] sm:$0xf]  ;;  %v3759_v57 = vor.u32 %v3758_v17, %v7614_v39  ;;  %v1240_v16 = vld [vmem:[%s6683_s27 + $0x9c] sm:$0xe] }
  0xde   : > { %5865 = vmatmul.mubr.msk.bf16.vlgmr.msra.gmra.mrb[0].mxu1 %vm721_vm4, %v8552_v35  ;;  %6020 = vmatprep.mubr.msk.bf16.mxu0 %vm721_vm4, %v6489_v47  ;;  %v6490_v47 = vld [vmem:[%s6683_s27 + $0x9c] sm:$0xff]   ;;  %v7632_v35 = vcombine.low %v3707_v1, %v3717_v46  ;;  %8554 = vst [vmem:[#allocation14_spill] sm:$0xff] %v7639_v30  ;;  %v1371_v11 = vrot.slane %v6544_v20, 5  ;;  %v7645_v12 = vrot.slane %v3725_v15, 4  ;;  %v3786_v1 = vshll.u32 %v7622_v9, 16 }
  0xdf   : > { %5897 = vmatpush3.bf16.msra.mxu1 %v7367_v44  ;;  %5868 = vmatprep.mubr.msk.bf16.mxu1 %vm721_vm4, %v8553_v21  ;;  %v5156_v44 = vrot.slane %v7592_v49, 9  ;;  %v5487_v49 = vld [vmem:[%s6683_s27 + $0x60] sm:$0xf]  ;;  %v3735_v21 = vor.u32 %v3734_v37, %v7603_v19  ;;  %v3749_v59 = vor.u32 %v3748_v48, %v3745_v43  ;;  %v3773_v0 = vor.u32 %v3772_v24, %v3769_v60 }
  0xe0   : > { %6422 = vmatprep.subr.msk.bf16.mxu1 %vm770_vm0, %v6542_v45  ;;  %v6543_v45 = vld [vmem:[%s6683_s27 + $0x98] sm:$0x1]  ;;  %v3791_v46 = vshrl.u32 %v5487_v49, 16  ;;  %v3794_v37 = vshll.u32 %v5487_v49, 16  ;;  %v3783_v4 = vor.u32 %v3782_v62, %v7628_v29  ;;  %v3800_v43 = vshll.u32 %v7639_v30, 16 }
  0xe1   : > { %v1367_v32 = vrot.slane %v6543_v45, 5  ;;  %v3804_v48 = vshrl.u32 %v7639_v30, 16  ;;  %v8555_v20 = vcombine.low %v7382_v26, %v7389_v14  ;;  %v3736_v17 = vrot.slane %v3735_v21, 4 }
  0xe2   : > { %v1366_v15 = vrot.slane %v1364_v5, 4  ;;  %v5157_v60 = vrot.slane %v1240_v16, 9  ;;  %v8556_v24 = vcombine.low %v7393_v23, %v7399_v56  ;;  %v3750_v62 = vrot.slane %v3749_v59, 4 }
  0xe3   : > { %v3760_v49 = vrot.slane %v3759_v57, 4  ;;  %v1373_v45 = vrot.slane %v1371_v11, 4  ;;  %v1374_v26 = vrot.slane %v6545_v2, 5  ;;  %v3788_v14 = vrot.slane %v3786_v1, 5  ;;  %v6493_v57 = vld [vmem:[%s6683_s27 + $0xc0] sm:$0xff]  }
  0xe4   : > { %v3793_v40 = vrot.slane %v3791_v46, 4  ;;  %v3796_v30 = vrot.slane %v3794_v37, 5  ;;  %v3774_v16 = vrot.slane %v3773_v0, 4  ;;  %v3784_v23 = vrot.slane %v3783_v4, 4  ;;  %v7684_v37 = vld [vmem:[%s6683_s27 + $0x68] sm:$0x1] }
  0xe5   : > { %6021 = vmatmul.mubr.msk.bf16.gmra.mrb[20].mxu0 %vm721_vm4, %v6490_v47  ;;  %v3764_v47 = vrot.slane %v3762_v51, 5  ;;  %v6492_v51 = vld [vmem:[%s6683_s27 + $0xb4] sm:$0xff]   ;;  %v7665_v56 = vrot.slane %v3800_v43, 5  ;;  %v3806_v59 = vrot.slane %v3804_v48, 4  ;;  %v3731_v2 = vsel %vm6725_vm3, %v7645_v12, %v7603_v19  ;;  %8557 = vst [vmem:[#allocation15_spill] sm:$0xff] %v7684_v37 }
  0xe6   : > { %5869 = vmatmul.mubr.msk.bf16.gmra.mrb[4].mxu1 %vm721_vm4, %v8555_v20  ;;  %6024 = vmatprep.mubr.msk.bf16.mxu0 %vm721_vm4, %v6491_v55  ;;  %v1241_v20 = vld [vmem:[%s6683_s27 + $0xa8] sm:$0xe]  ;;  %v6546_v55 = vld [vmem:[%s6683_s27 + $0xac] sm:$0xf]  ;;  %v3741_v1 = vsel %vm6725_vm3, %v3736_v17, %v7635_v36  ;;  %v7677_v46 = vsel %vm6955_vm7, %v5156_v44, %v1364_v5  ;;  %v7681_v4 = vsel %vm6955_vm7, %v1366_v15, %v1367_v32  ;;  %v1242_v5 = vld [vmem:[%s6683_s27 + $0xb4] sm:$0xe] }
  0xe7   : > { %5872 = vmatprep.mubr.msk.bf16.mxu1 %vm721_vm4, %v8556_v24  ;;  %v1378_v21 = vrot.slane %v6546_v55, 5  ;;  %v3755_v0 = vsel %vm6725_vm3, %v3750_v62, %v7614_v39  ;;  %v7691_v12 = vsel %vm6955_vm7, %v5157_v60, %v1371_v11  ;;  %v7695_v19 = vsel %vm6955_vm7, %v1373_v45, %v1374_v26  ;;  %v5490_v36 = vld [vmem:[%s6683_s27 + $0x6c] sm:$0xf]  ;;  %v6547_v48 = vld [vmem:[%s6683_s27 + $0xb0] sm:$0x1] }
  0xe8   : > { %8558 = vst [vmem:[#allocation16_spill] sm:$0xff] %v7695_v19  ;;  %v5158_v44 = vrot.slane %v1241_v20, 9  ;;  %v3765_v32 = vsel %vm6725_vm3, %v3760_v49, %v3764_v47  ;;  %v1381_v17 = vrot.slane %v6547_v48, 5  ;;  %v3797_v39 = vor.u32 %v3796_v30, %v3793_v40  ;;  %v7719_v62 = vld [vmem:[%s6683_s27 + $0x70] sm:$0xf] }
  0xe9   : > { %v1380_v43 = vrot.slane %v1378_v21, 4  ;;  %v3779_v11 = vsel %vm6725_vm3, %v3774_v16, %v7628_v29  ;;  %v3789_v15 = vsel %vm6725_vm3, %v3784_v23, %v3788_v14  ;;  %v3807_v60 = vor.u32 %v3806_v59, %v7665_v56  ;;  %8560 = vst [vmem:[#allocation17_spill] sm:$0xff] %v7719_v62  ;;  %v5493_v20 = vld [vmem:[%s6683_s27 + $0x78] sm:$0xf]  ;;  %v7738_v55 = vld [vmem:[%s6683_s27 + $0x7c] sm:$0xf] }
  0xea   : > { %v3810_v47 = vshll.u32 %v7684_v37, 16  ;;  %v8559_v24 = vcombine.low %v7403_v3, %v7407_v6  ;;  %v5159_v30 = vrot.slane %v1242_v5, 9  ;;  %v1385_v29 = vrot.slane %v7118_v25, 5  ;;  %v6494_v3 = vld [vmem:[%s6683_s27 + $0xcc] sm:$0xff]   ;;  %8562 = vst [vmem:[#allocation18_spill] sm:$0xff] %v7738_v55 }
  0xeb   : > { %v3815_v49 = vshrl.u32 %v5490_v36, 16  ;;  %v8561_v45 = vcombine.low %v7429_v34, %v7437_v7  ;;  %v7726_v6 = vcombine.low %v3731_v2, %v3741_v1  ;;  %v7728_v26 = vcombine.low %v3755_v0, %v3765_v32  ;;  %v5496_v23 = vld [vmem:[%s6683_s27 + $0x84] sm:$0xf]  ;;  %v7751_v59 = vld [vmem:[%s6683_s27 + $0x88] sm:$0xf] }
  0xec   : > { %v7734_v25 = vsel %vm6955_vm7, %v5158_v44, %v1378_v21  ;;  %v7740_v34 = vcombine.low %v3779_v11, %v3789_v15  ;;  %v7744_v7 = vsel %vm6955_vm7, %v1380_v43, %v1381_v17  ;;  %8563 = vst [vmem:[#allocation19_spill] sm:$0xff] %v7751_v59  ;;  %v7755_v21 = vrot.slane %v3810_v47, 5  ;;  %v5499_v0 = vld [vmem:[%s6683_s27 + $0x90] sm:$0xf]  ;;  %v7767_v48 = vld [vmem:[%s6683_s27 + $0x94] sm:$0xf] }
  0xed   : > { %6025 = vmatmul.mubr.msk.bf16.gmra.mrb[24].mxu0 %vm721_vm4, %v6492_v51  ;;  %v7746_v51 = vrot.slane %v3797_v39, 4  ;;  %v3818_v2 = vshll.u32 %v5490_v36, 16  ;;  %v3824_v1 = vshll.u32 %v7719_v62, 16  ;;  %v7761_v44 = vsel %vm6955_vm7, %v5159_v30, %v1385_v29  ;;  %8564 = vst [vmem:[#allocation20_spill] sm:$0xff] %v7767_v48  ;;  %v7775_v30 = vld [vmem:[%s6683_s27 + $0x74] sm:$0x1] }
  0xee   : > { %5873 = vmatmul.mubr.msk.bf16.gmra.mrb[8].mxu1 %vm721_vm4, %v8559_v24  ;;  %6028 = vmatprep.mubr.msk.bf16.mxu0 %vm721_vm4, %v6493_v57  ;;  %v7753_v57 = vrot.slane %v3807_v60, 4  ;;  %v7763_v5 = vrot.slane %v1385_v29, 4  ;;  %v3817_v32 = vrot.slane %v3815_v49, 4  ;;  %v3828_v43 = vshrl.u32 %v7719_v62, 16  ;;  %v7792_v16 = vld [vmem:[%s6683_s27 + $0x80] sm:$0x1] }
  0xef   : > { %5876 = vmatprep.mubr.msk.bf16.mxu1 %vm721_vm4, %v8561_v45  ;;  %v3839_v17 = vshrl.u32 %v5493_v20, 16  ;;  %v3842_v39 = vshll.u32 %v5493_v20, 16  ;;  %v3848_v11 = vshll.u32 %v7738_v55, 16  ;;  %v3852_v36 = vshrl.u32 %v7738_v55, 16 }
  0xf0   : > { %v3863_v15 = vshrl.u32 %v5496_v23, 16  ;;  %v3866_v60 = vshll.u32 %v5496_v23, 16  ;;  %v3872_v47 = vshll.u32 %v7751_v59, 16  ;;  %v3876_v24 = vshrl.u32 %v7751_v59, 16  ;;  %v5502_v59 = vld [vmem:[%s6683_s27 + $0x9c] sm:$0xf] }
  0xf1   : > { %v3887_v29 = vshrl.u32 %v5499_v0, 16  ;;  %v3890_v49 = vshll.u32 %v5499_v0, 16  ;;  %v3896_v45 = vshll.u32 %v7767_v48, 16  ;;  %v3900_v20 = vshrl.u32 %v7767_v48, 16 }
  0xf2   : > { %v8565_v14 = vcombine.low %v7457_v28, %v7474_v8  ;;  %v3820_v23 = vrot.slane %v3818_v2, 5  ;;  %v7789_v0 = vrot.slane %v3824_v1, 5  ;;  %v3830_v40 = vrot.slane %v3828_v43, 4 }
  0xf3   : > { %v8566_v48 = vcombine.low %v7497_v58, %v7501_v18  ;;  %v3841_v28 = vrot.slane %v3839_v17, 4  ;;  %v3844_v8 = vrot.slane %v3842_v39, 5  ;;  %v3865_v2 = vrot.slane %v3863_v15, 4 }
  0xf4   : > { %v3868_v1 = vrot.slane %v3866_v60, 5  ;;  %v7804_v43 = vrot.slane %v3872_v47, 5  ;;  %v3878_v55 = vrot.slane %v3876_v24, 4  ;;  %v3889_v62 = vrot.slane %v3887_v29, 4 }
  0xf5   : > { %6029 = vmatmul.mubr.msk.bf16.gmra.mrb[28].mxu0 %vm721_vm4, %v6494_v3  ;;  %v7802_v3 = vld [vmem:[%s6683_s27 + $0x8c] sm:$0x1]  ;;  %v3892_v37 = vrot.slane %v3890_v49, 5  ;;  %v7806_v58 = vrot.slane %v3896_v45, 5  ;;  %v3902_v18 = vrot.slane %v3900_v20, 4  ;;  %v3821_v17 = vor.u32 %v3820_v23, %v3817_v32 }
  0xf6   : > { %5877 = vmatmul.mubr.msk.bf16.gmra.mrb[12].mxu1 %vm721_vm4, %v8565_v14  ;;  %6034 = vmatprep.mubr.msk.bf16.mxu0 %vm721_vm4, %v7561_v53  ;;  %v7798_v53 = vrot.slane %v3848_v11, 5  ;;  %v3854_v14 = vrot.slane %v3852_v36, 4  ;;  %v3834_v39 = vshll.u32 %v7775_v30, 16  ;;  %v7813_v11 = vld [vmem:[%s6683_s27 + $0x98] sm:$0x1]  ;;  %v3911_v36 = vshrl.u32 %v5502_v59, 16 }
  0xf7   : > { %5880 = vmatprep.mubr.msk.bf16.mxu1 %vm721_vm4, %v8566_v48  ;;  %v7809_v48 = vld [vmem:[%s6683_s27 + $0xa0] sm:$0xf]  ;;  %v3914_v19 = vshll.u32 %v5502_v59, 16  ;;  %v3831_v15 = vor.u32 %v3830_v40, %v7789_v0  ;;  %v3845_v60 = vor.u32 %v3844_v8, %v3841_v28  ;;  %v3858_v24 = vshll.u32 %v7792_v16, 16 }
  0xf8   : > { %v3855_v47 = vor.u32 %v3854_v14, %v7798_v53  ;;  %v3869_v29 = vor.u32 %v3868_v1, %v3865_v2  ;;  %v3882_v49 = vshll.u32 %v7802_v3, 16  ;;  %v3920_v45 = vshll.u32 %v7809_v48, 16 }
  0xf9   : > { %v3924_v32 = vshrl.u32 %v7809_v48, 16  ;;  %v3879_v20 = vor.u32 %v3878_v55, %v7804_v43  ;;  %v3893_v59 = vor.u32 %v3892_v37, %v3889_v62  ;;  %v3903_v40 = vor.u32 %v3902_v18, %v7806_v58  ;;  %v5505_v55 = vld [vmem:[%s6683_s27 + $0xa8] sm:$0xf] }
  0xfa   : > { %v3906_v23 = vshll.u32 %v7813_v11, 16  ;;  %v8567_v28 = vcombine.low %v7505_v63, %v7513_v27  ;;  %v3822_v8 = vrot.slane %v3821_v17, 4  ;;  %v3836_v14 = vrot.slane %v3834_v39, 5 }
  0xfb   : > { %v3913_v2 = vrot.slane %v3911_v36, 4  ;;  %v3916_v1 = vrot.slane %v3914_v19, 5  ;;  %v3832_v37 = vrot.slane %v3831_v15, 4  ;;  %v3846_v63 = vrot.slane %v3845_v60, 4  ;;  %v7848_v60 = vld [vmem:[%s6683_s27 + $0xac] sm:$0xf] }
  0xfc   : > { %v3856_v27 = vrot.slane %v3855_v47, 4  ;;  %v3860_v62 = vrot.slane %v3858_v24, 5  ;;  %v3884_v18 = vrot.slane %v3882_v49, 5  ;;  %v7838_v17 = vrot.slane %v3920_v45, 5 }
  0xfd   : > { %6035 = vmatmul.mubr.msk.bf16.vlgmr.msra.gmra.mrb[0].mxu0 %vm721_vm4, %v7563_v54  ;;  %v8568_v54 = vcombine.low %v7524_v13, %v7537_v10  ;;  %v3926_v19 = vrot.slane %v3924_v32, 4  ;;  %v3880_v39 = vrot.slane %v3879_v20, 4  ;;  %v3894_v36 = vrot.slane %v3893_v59, 4 }
  0xfe   : > { %5881 = vmatmul.mubr.msk.bf16.gmra.mrb[16].mxu1 %vm721_vm4, %v8567_v28  ;;  %6067 = vmatpush3.bf16.msra.mxu0 %v7550_v42  ;;  %v3870_v42 = vrot.slane %v3869_v29, 4  ;;  %v3904_v13 = vrot.slane %v3903_v40, 4  ;;  %v3908_v10 = vrot.slane %v3906_v23, 5  ;;  %v7841_v28 = vld [vmem:[%s6683_s27 + $0xa4] sm:$0x1]  ;;  %v3917_v15 = vor.u32 %v3916_v1, %v3913_v2 }
  0xff   : > { %5884 = vmatprep.mubr.msk.bf16.mxu1 %vm721_vm4, %v8568_v54  ;;  %6038 = vmatprep.mubr.msk.bf16.mxu0 %vm721_vm4, %v7632_v35  ;;  %v3813_v35 = vsel %vm6725_vm3, %v7753_v57, %v7755_v21  ;;  %v3935_v47 = vshrl.u32 %v5505_v55, 16  ;;  %v3938_v24 = vshll.u32 %v5505_v55, 16  ;;  %v8569_v29 = vrot.slane %v7124_v52, 5  ;;  %v7882_v40 = vld [vmem:[%s6683_s27 + $0xb0] sm:$0x1] }
 0x100   : > { %v3827_v45 = vsel %vm6725_vm3, %v3822_v8, %v7789_v0  ;;  %v3837_v57 = vsel %vm6725_vm3, %v3832_v37, %v3836_v14  ;;  %v3851_v21 = vsel %vm6725_vm3, %v3846_v63, %v7798_v53  ;;  %v3861_v32 = vsel %vm6725_vm3, %v3856_v27, %v3860_v62  ;;  %v7893_v2 = vld [vmem:[%s6683_s27 + $0xb4] sm:$0xf]  ;;  %v5554_v63 = vld [vmem:[%s6683_s27 + $0x48] sm:$0xe] }
 0x101   : > { %v7855_v49 = vsel %vm6955_vm7, %v7763_v5, %v8569_v29  ;;  %v3875_v52 = vsel %vm6725_vm3, %v3870_v42, %v7804_v43  ;;  %v3927_v5 = vor.u32 %v3926_v19, %v7838_v17  ;;  %v3930_v20 = vshll.u32 %v7841_v28, 16 }
 0x102   : > { %v3885_v0 = vsel %vm6725_vm3, %v3880_v39, %v3884_v18  ;;  %v3899_v53 = vsel %vm6725_vm3, %v3894_v36, %v7806_v58  ;;  %v3909_v59 = vsel %vm6725_vm3, %v3904_v13, %v3908_v10  ;;  %v3944_v43 = vshll.u32 %v7848_v60, 16 }
 0x103   : > { %v8570_v23 = vcombine.low %v7571_v38, %v7588_v50  ;;  %v3937_v8 = vrot.slane %v3935_v47, 4  ;;  %v3940_v58 = vrot.slane %v3938_v24, 5  ;;  %v3948_v14 = vshrl.u32 %v7848_v60, 16  ;;  %v5556_v47 = vld [vmem:[%s6683_s27 + $0x60] sm:$0xe] }
 0x104   : > { %v8571_v1 = vcombine.low %v7677_v46, %v7681_v4  ;;  %v5175_v38 = vcombine.low %v7734_v25, %v7744_v7  ;;  %v8572_v50 = vsel %vm6725_vm3, %v7746_v51, %v7665_v56  ;;  %v5176_v54 = vcombine.low %v7761_v44, %v7855_v49  ;;  %v5555_v25 = vld [vmem:[%s6683_s27 + $0x54] sm:$0xe]  ;;  %v7922_v51 = vld [vmem:[%s6683_s27 + $0xb8] sm:$0xf]  ;;  %v8579_v49 = vld [vmem:[#allocation9_spill] sm:$0xff] }
 0x105   : > { %6039 = vmatmul.mubr.msk.bf16.gmra.mrb[4].mxu0 %vm721_vm4, %v7726_v6  ;;  %v3918_v6 = vrot.slane %v3917_v15, 4  ;;  %v7908_v37 = vcombine.low %v3827_v45, %v3837_v57  ;;  %v7911_v27 = vcombine.low %v3851_v21, %v3861_v32  ;;  %v3928_v46 = vrot.slane %v3927_v5, 4  ;;  %v5557_v32 = vld [vmem:[%s6683_s27 + $0x6c] sm:$0xe] }
 0x106   : > { %5885 = vmatmul.mubr.msk.bf16.gmra.mrb[20].mxu1 %vm721_vm4, %v8570_v23  ;;  %6042 = vmatprep.mubr.msk.bf16.mxu0 %vm721_vm4, %v7728_v26  ;;  %v5524_v26 = vcombine.low %v8572_v50, %v3813_v35  ;;  %v3932_v4 = vrot.slane %v3930_v20, 5  ;;  %v3954_v62 = vshll.u32 %v7882_v40, 16  ;;  %v7915_v7 = vcombine.low %v3875_v52, %v3885_v0  ;;  %v8573_v52 = vld [vmem:[#allocation16_spill] sm:$0xff] }
 0x107   : > { %5888 = vmatprep.mubr.msk.bf16.mxu1 %vm721_vm4, %v8571_v1  ;;  %v7917_v55 = vcombine.low %v3899_v53, %v3909_v59  ;;  %v7919_v56 = vrot.slane %v3944_v43, 5  ;;  %v3959_v42 = vshrl.u32 %v7893_v2, 16  ;;  %v3923_v18 = vsel %vm6725_vm3, %v3918_v6, %v7838_v17  ;;  %v8575_v53 = vld [vmem:[#allocation14_spill] sm:$0xff]  ;;  %v8576_v43 = vld [vmem:[#allocation15_spill] sm:$0xff]  ;;  %v7968_v6 = vld [vmem:[%s6683_s27 + $0xbc] sm:$0x1] }
 0x108   : > { %v3941_v19 = vor.u32 %v3940_v58, %v3937_v8  ;;  %v3950_v39 = vrot.slane %v3948_v14, 4  ;;  %v3962_v36 = vshll.u32 %v7893_v2, 16  ;;  %v5570_v13 = vrot.slane %v5554_v63, 9  ;;  %v8577_v2 = vld [vmem:[#allocation17_spill] sm:$0xff] }
 0x109   : > { %v4418_v10 = vrot.slane %v7558_v41, 5  ;;  %v4421_v35 = vrot.slane %v7612_v61, 5  ;;  %v5571_v15 = vrot.slane %v5555_v25, 9  ;;  %v3933_v24 = vsel %vm6725_vm3, %v3928_v46, %v3932_v4  ;;  %v7989_v25 = vld [vmem:[%s6683_s27 + $0xc4] sm:$0xf] }
 0x10a   : > { %v7934_v29 = vrot.slane %v3954_v62, 5  ;;  %v3968_v45 = vshll.u32 %v7922_v51, 16  ;;  %v4425_v17 = vrot.slane %v7576_v33, 5  ;;  %v7940_v57 = vrot.slane %v3959_v42, 4 }
 0x10b   : > { %v7944_v41 = vsel %vm6955_vm7, %v5570_v13, %v4418_v10  ;;  %v4420_v61 = vrot.slane %v4418_v10, 4  ;;  %v4428_v21 = vrot.slane %v7622_v9, 5  ;;  %v8574_v5 = vcombine.low %v7691_v12, %v8573_v52  ;;  %v5559_v52 = vld [vmem:[%s6683_s27 + $0x84] sm:$0xe] }
 0x10c   : > { %v7953_v33 = vrot.slane %v3941_v19, 4  ;;  %v4427_v20 = vrot.slane %v4425_v17, 4  ;;  %v5572_v0 = vrot.slane %v5556_v47, 9  ;;  %v3951_v9 = vor.u32 %v3950_v39, %v7919_v56  ;;  %v6495_v39 = vld [vmem:[%s6683_s27 + $0xc] sm:$0xff]  }
 0x10d   : > { %6043 = vmatmul.mubr.msk.bf16.gmra.mrb[8].mxu0 %vm721_vm4, %v7740_v34  ;;  %v7957_v34 = vsel %vm6955_vm7, %v5571_v15, %v4425_v17  ;;  %v7963_v12 = vsel %vm6955_vm7, %v4420_v61, %v4421_v35  ;;  %v4432_v59 = vrot.slane %v8575_v53, 5  ;;  %v4435_v23 = vrot.slane %v8576_v43, 5  ;;  %v5558_v35 = vld [vmem:[%s6683_s27 + $0x78] sm:$0xe] }
 0x10e   : > { %5889 = vmatmul.mubr.msk.bf16.gmra.mrb[24].mxu1 %vm721_vm4, %v8574_v5  ;;  %6046 = vmatprep.mubr.msk.bf16.mxu0 %vm721_vm4, %v5524_v26  ;;  %v5587_v8 = vcombine.low %v7944_v41, %v7963_v12  ;;  %v7974_v58 = vsel %vm6955_vm7, %v4427_v20, %v4428_v21  ;;  %v5573_v14 = vrot.slane %v5557_v32, 9  ;;  %v4439_v1 = vrot.slane %v8577_v2, 5 }
 0x10f   : > { %5892 = vmatprep.mubr.msk.bf16.mxu1 %vm721_vm4, %v5175_v38  ;;  %v5511_v38 = vld [vmem:[%s6683_s27 + $0xc0] sm:$0xf]  ;;  %v5588_v50 = vcombine.low %v7957_v34, %v7974_v58  ;;  %v7982_v26 = vsel %vm6955_vm7, %v5572_v0, %v4432_v59  ;;  %v4434_v63 = vrot.slane %v4432_v59, 4  ;;  %v4442_v46 = vrot.slane %v7775_v30, 5  ;;  %v6558_v58 = vld [vmem:[%s6683_s27 + $0x8c] sm:$0x1] }
 0x110   : > { %v7985_v4 = vcombine.low %v3923_v18, %v3933_v24  ;;  %v3972_v62 = vshrl.u32 %v7922_v51, 16  ;;  %v7993_v42 = vsel %vm6955_vm7, %v5573_v14, %v4439_v1  ;;  %v4441_v19 = vrot.slane %v4439_v1, 4  ;;  %v5514_v1 = vld [vmem:[%s6683_s27 + $0xcc] sm:$0xf] }
 0x111   : > { %v7996_v13 = vrot.slane %v3962_v36, 5  ;;  %v7998_v10 = vrot.slane %v3968_v45, 5  ;;  %v3978_v30 = vshll.u32 %v7968_v6, 16  ;;  %v8003_v18 = vsel %vm6955_vm7, %v4434_v63, %v4435_v23  ;;  %v5285_v45 = vld [vmem:[%s6683_s27 + $0x78] sm:$0xf] }
 0x112   : > { %v3947_v15 = vsel %vm6725_vm3, %v7953_v33, %v7919_v56  ;;  %v3983_v47 = vshrl.u32 %v5511_v38, 16  ;;  %v5589_v24 = vcombine.low %v7982_v26, %v8003_v18  ;;  %v8014_v36 = vsel %vm6955_vm7, %v4441_v19, %v4442_v46  ;;  %v8581_v46 = vld [vmem:[#allocation19_spill] sm:$0xff]  ;;  %v6496_v19 = vld [vmem:[%s6683_s27 + $0x18] sm:$0xff]  }
 0x113   : > { %v3952_v17 = vrot.slane %v3951_v9, 4  ;;  %v3986_v61 = vshll.u32 %v5511_v38, 16  ;;  %v3992_v21 = vshll.u32 %v7989_v25, 16  ;;  %v5590_v32 = vcombine.low %v7993_v42, %v8014_v36  ;;  %v6561_v36 = vld [vmem:[%s6683_s27 + $0xac] sm:$0xf] }
 0x114   : > { %v3974_v5 = vrot.slane %v3972_v62, 4  ;;  %v5574_v20 = vrot.slane %v5558_v35, 9  ;;  %v4449_v9 = vrot.slane %v7792_v16, 5  ;;  %v3996_v53 = vshrl.u32 %v7989_v25, 16 }
 0x115   : > { %6047 = vmatmul.mubr.msk.bf16.gmra.mrb[12].mxu0 %vm721_vm4, %v7908_v37  ;;  %v8578_v37 = vld [vmem:[#allocation18_spill] sm:$0xff]  ;;  %v2308_v59 = vshrl.u32 %v5285_v45, 16  ;;  %v2311_v44 = vshll.u32 %v5285_v45, 16  ;;  %v5575_v16 = vrot.slane %v5559_v52, 9  ;;  %v3988_v2 = vrot.slane %v3986_v61, 5 }
 0x116   : > { %5893 = vmatmul.mubr.msk.bf16.gmra.mrb[28].mxu1 %vm721_vm4, %v5176_v54  ;;  %6050 = vmatprep.mubr.msk.bf16.mxu0 %vm721_vm4, %v7911_v27  ;;  %v4446_v0 = vrot.slane %v8578_v37, 5  ;;  %v8580_v54 = vld [vmem:[#allocation10_spill] sm:$0xff]  ;;  %v3985_v27 = vrot.slane %v3983_v47, 4  ;;  %v4453_v62 = vrot.slane %v8581_v46, 5  ;;  %v8046_v35 = vrot.slane %v3992_v21, 5 }
 0x117   : > { %5898 = vmatprep.mubr.msk.bf16.mxu1 %vm721_vm4, %v6495_v39  ;;  %v2330_v43 = vsel %vm6725_vm3, %v8580_v54, %v8579_v49  ;;  %v2310_v38 = vrot.slane %v2308_v59, 4  ;;  %v2313_v63 = vrot.slane %v2311_v44, 5  ;;  %v3965_v39 = vor.u32 %v7996_v13, %v7940_v57  ;;  %v8049_v47 = vld [vmem:[%s6683_s27 + $0xd0] sm:$0xf]  ;;  %v6497_v52 = vld [vmem:[%s6683_s27 + $0x24] sm:$0xff]  }
 0x118   : > { %v8039_v23 = vsel %vm6955_vm7, %v5574_v20, %v4446_v0  ;;  %v4448_v14 = vrot.slane %v4446_v0, 4  ;;  %v4456_v61 = vrot.slane %v7802_v3, 5  ;;  %v3957_v20 = vsel %vm6725_vm3, %v3952_v17, %v7934_v29  ;;  %v5560_v13 = vld [vmem:[%s6683_s27 + $0x90] sm:$0xe]  ;;  %v8065_v59 = vld [vmem:[%s6683_s27 + $0xc8] sm:$0x1] }
 0x119   : > { %v3998_v37 = vrot.slane %v3996_v53, 4  ;;  %v2314_v57 = vor.u32 %v2313_v63, %v2310_v38  ;;  %v3975_v21 = vor.u32 %v3974_v5, %v7998_v10  ;;  %v4007_v44 = vshrl.u32 %v5514_v1, 16  ;;  %v8584_v38 = vld [vmem:[#allocation8_spill] sm:$0xff] }
 0x11a   : > { %v8053_v45 = vsel %vm6955_vm7, %v4448_v14, %v4449_v9  ;;  %v8069_v9 = vsel %vm6955_vm7, %v5575_v16, %v4453_v62  ;;  %v4455_v3 = vrot.slane %v4453_v62, 4  ;;  %v3989_v29 = vor.u32 %v3988_v2, %v3985_v27  ;;  %v8583_v16 = vld [vmem:[#allocation7_spill] sm:$0xff] }
 0x11b   : > { %v5591_v0 = vcombine.low %v8039_v23, %v8053_v45  ;;  %v4010_v17 = vshll.u32 %v5514_v1, 16  ;;  %v4016_v53 = vshll.u32 %v8049_v47, 16  ;;  %v2315_v49 = vrot.slane %v2314_v57, 4  ;;  %v8103_v57 = vld [vmem:[%s6683_s27 + $0xd4] sm:$0x1] }
 0x11c   : > { %v4020_v5 = vshrl.u32 %v8049_v47, 16  ;;  %v8080_v54 = vsel %vm6955_vm7, %v4455_v3, %v4456_v61  ;;  %v5576_v14 = vrot.slane %v5560_v13, 9  ;;  %v3999_v2 = vor.u32 %v3998_v37, %v8046_v35  ;;  %v6562_v45 = vld [vmem:[%s6683_s27 + $0xb8] sm:$0xf] }
 0x11d   : > { %6051 = vmatmul.mubr.msk.bf16.gmra.mrb[16].mxu0 %vm721_vm4, %v7915_v7  ;;  %v8582_v7 = vld [vmem:[#allocation20_spill] sm:$0xff]  ;;  %v4002_v1 = vshll.u32 %v8065_v59, 16  ;;  %v5592_v63 = vcombine.low %v8069_v9, %v8080_v54  ;;  %v5530_v46 = vcombine.low %v3947_v15, %v3957_v20  ;;  %v3966_v62 = vrot.slane %v3965_v39, 4 }
 0x11e   : > { %5899 = vmatmul.mubr.msk.bf16.vlgmr.msra.gmra.mrb[0].mxu1 %vm721_vm4, %v6496_v19  ;;  %6054 = vmatprep.mubr.msk.bf16.mxu0 %vm721_vm4, %v7917_v55  ;;  %v4460_v27 = vrot.slane %v8582_v7, 5  ;;  %v2320_v55 = vsel %vm6725_vm3, %v2315_v49, %v8584_v38  ;;  %v3980_v19 = vrot.slane %v3978_v30, 5  ;;  %v3976_v37 = vrot.slane %v3975_v21, 4  ;;  %v5561_v20 = vld [vmem:[%s6683_s27 + $0x9c] sm:$0xe] }
 0x11f   : > { %6160 = vmatpush3.bf16.msra.mxu1 %v8583_v16  ;;  %5902 = vmatprep.mubr.msk.bf16.mxu1 %vm721_vm4, %v6497_v52  ;;  %v8099_v61 = vcombine.low %v2320_v55, %v2330_v43  ;;  %v6498_v52 = vld [vmem:[%s6683_s27 + $0x30] sm:$0xff]   ;;  %v4463_v49 = vrot.slane %v7813_v11, 5  ;;  %v4009_v56 = vrot.slane %v4007_v44, 4  ;;  %v4012_v33 = vrot.slane %v4010_v17, 5  ;;  %v6499_v30 = vld [vmem:[%s6683_s27 + $0x3c] sm:$0xff]  }
 0x120   : > { %v8107_v13 = vsel %vm6955_vm7, %v5576_v14, %v4460_v27  ;;  %v4462_v3 = vrot.slane %v4460_v27, 4  ;;  %v8110_v15 = vrot.slane %v4016_v53, 5  ;;  %v4022_v39 = vrot.slane %v4020_v5, 4  ;;  %v6548_v38 = vld [vmem:[%s6683_s27 + $0x1c] sm:$0xf] }
 0x121   : > { %v3990_v43 = vrot.slane %v3989_v29, 4  ;;  %v4000_v7 = vrot.slane %v3999_v2, 4  ;;  %v4004_v21 = vrot.slane %v4002_v1, 5  ;;  %v3971_v11 = vsel %vm6725_vm3, %v3966_v62, %v7998_v10  ;;  %v5562_v62 = vld [vmem:[%s6683_s27 + $0xa8] sm:$0xe] }
 0x122   : > { %v8116_v16 = vsel %vm6955_vm7, %v4462_v3, %v4463_v49  ;;  %v3981_v44 = vsel %vm6725_vm3, %v3976_v37, %v3980_v19  ;;  %v4026_v29 = vshll.u32 %v8103_v57, 16  ;;  %v5577_v17 = vrot.slane %v5561_v20, 9  ;;  %v6500_v37 = vld [vmem:[%s6683_s27 + $0x48] sm:$0xff]   ;;  %v6549_v20 = vld [vmem:[%s6683_s27 + $0x20] sm:$0x1] }
 0x123   : > { %v5593_v14 = vcombine.low %v8107_v13, %v8116_v16  ;;  %v4013_v53 = vor.u32 %v4012_v33, %v4009_v56  ;;  %v4023_v5 = vor.u32 %v4022_v39, %v8110_v15  ;;  %v4467_v27 = vrot.slane %v7809_v48, 5  ;;  %v6501_v33 = vld [vmem:[%s6683_s27 + $0x54] sm:$0xff]  }
 0x124   : > { %v4470_v10 = vrot.slane %v7841_v28, 5  ;;  %v3995_v2 = vsel %vm6725_vm3, %v3990_v43, %v8046_v35  ;;  %v4005_v1 = vsel %vm6725_vm3, %v4000_v7, %v4004_v21  ;;  %v4390_v55 = vrot.slane %v6548_v38, 5  ;;  %v5552_v38 = vld [vmem:[%s6683_s27 + $0x30] sm:$0xe] }
 0x125   : > { %6055 = vmatmul.mubr.msk.bf16.gmra.mrb[20].mxu0 %vm721_vm4, %v7985_v4  ;;  %v5550_v4 = vld [vmem:[%s6683_s27 + $0x18] sm:$0xe]  ;;  %v4469_v48 = vrot.slane %v4467_v27, 4  ;;  %v5531_v28 = vcombine.low %v3971_v11, %v3981_v44  ;;  %v4028_v19 = vrot.slane %v4026_v29, 5  ;;  %v5532_v3 = vcombine.low %v3995_v2, %v4005_v1  ;;  %v5551_v11 = vld [vmem:[%s6683_s27 + $0x24] sm:$0xe] }
 0x126   : > { %5903 = vmatmul.mubr.msk.bf16.gmra.mrb[4].mxu1 %vm721_vm4, %v6498_v52  ;;  %6058 = vmatprep.mubr.msk.bf16.mxu0 %vm721_vm4, %v5530_v46  ;;  %v8143_v46 = vsel %vm6955_vm7, %v5577_v17, %v4467_v27  ;;  %v5566_v52 = vrot.slane %v5550_v4, 9  ;;  %v4014_v35 = vrot.slane %v4013_v53, 4  ;;  %v4024_v49 = vrot.slane %v4023_v5, 4  ;;  %v6550_v44 = vld [vmem:[%s6683_s27 + $0x28] sm:$0xf] }
 0x127   : > { %5906 = vmatprep.mubr.msk.bf16.mxu1 %vm721_vm4, %v6499_v30  ;;  %v8149_v56 = vsel %vm6955_vm7, %v4469_v48, %v4470_v10  ;;  %v4392_v39 = vrot.slane %v4390_v55, 4  ;;  %v4393_v30 = vrot.slane %v6549_v20, 5  ;;  %v5578_v7 = vrot.slane %v5562_v62, 9  ;;  %v6551_v10 = vld [vmem:[%s6683_s27 + $0x34] sm:$0xf] }
 0x128   : > { %v5594_v43 = vcombine.low %v8143_v46, %v8149_v56  ;;  %v4474_v21 = vrot.slane %v7848_v60, 5  ;;  %v4397_v29 = vrot.slane %v6550_v44, 5  ;;  %v4477_v17 = vrot.slane %v7882_v40, 5  ;;  %v5563_v2 = vld [vmem:[%s6683_s27 + $0xb4] sm:$0xe] }
 0x129   : > { %v4019_v53 = vsel %vm6725_vm3, %v4014_v35, %v8110_v15  ;;  %v4029_v60 = vsel %vm6725_vm3, %v4024_v49, %v4028_v19  ;;  %v4391_v40 = vsel %vm6955_vm7, %v5566_v52, %v4390_v55  ;;  %v4394_v27 = vsel %vm6955_vm7, %v4392_v39, %v4393_v30  ;;  %v6552_v19 = vld [vmem:[%s6683_s27 + $0x2c] sm:$0x1]  ;;  %v6502_v52 = vld [vmem:[%s6683_s27 + $0x60] sm:$0xff]   ;;  %v6566_v46 = vld [vmem:[%s6683_s27 + $0xc8] sm:$0x1] }
 0x12a   : > { %v8169_v5 = vsel %vm6955_vm7, %v5578_v7, %v4474_v21  ;;  %v4476_v4 = vrot.slane %v4474_v21, 4  ;;  %v4404_v15 = vrot.slane %v6551_v10, 5  ;;  %v5567_v1 = vrot.slane %v5551_v11, 9  ;;  %v6503_v39 = vld [vmem:[%s6683_s27 + $0x6c] sm:$0xff]   ;;  %v8586_v11 = vld [vmem:[#allocation12_spill] sm:$0xff] }
 0x12b   : > { %v5533_v62 = vcombine.low %v4019_v53, %v4029_v60  ;;  %v5579_v35 = vrot.slane %v5563_v2, 9  ;;  %v4481_v49 = vrot.slane %v7922_v51, 5  ;;  %v5568_v20 = vrot.slane %v5552_v38, 9  ;;  %v8585_v7 = vld [vmem:[#allocation11_spill] sm:$0xff]  ;;  %v5564_v60 = vld [vmem:[%s6683_s27 + $0xc0] sm:$0xe] }
 0x12c   : > { %v8181_v48 = vsel %vm6955_vm7, %v4476_v4, %v4477_v17  ;;  %v4406_v30 = vrot.slane %v4404_v15, 4  ;;  %v4407_v21 = vrot.slane %v8585_v7, 5  ;;  %v4411_v44 = vrot.slane %v8586_v11, 5  ;;  %v5553_v4 = vld [vmem:[%s6683_s27 + $0x3c] sm:$0xe] }
 0x12d   : > { %6059 = vmatmul.mubr.msk.bf16.gmra.mrb[24].mxu0 %vm721_vm4, %v5531_v28  ;;  %v4399_v28 = vrot.slane %v4397_v29, 4  ;;  %v5595_v55 = vcombine.low %v8169_v5, %v8181_v48  ;;  %v8194_v17 = vsel %vm6955_vm7, %v5579_v35, %v4481_v49  ;;  %v4483_v53 = vrot.slane %v4481_v49, 4  ;;  %v5282_v35 = vld [vmem:[%s6683_s27 + $0x6c] sm:$0xf]  ;;  %v6553_v11 = vld [vmem:[%s6683_s27 + $0x70] sm:$0xf] }
 0x12e   : > { %5907 = vmatmul.mubr.msk.bf16.gmra.mrb[8].mxu1 %vm721_vm4, %v6500_v37  ;;  %6062 = vmatprep.mubr.msk.bf16.mxu0 %vm721_vm4, %v5532_v3  ;;  %v4400_v37 = vrot.slane %v6552_v19, 5  ;;  %v5583_v3 = vcombine.low %v4391_v40, %v4394_v27  ;;  %v4398_v51 = vsel %vm6955_vm7, %v5567_v1, %v4397_v29  ;;  %v4405_v27 = vsel %vm6955_vm7, %v5568_v20, %v4404_v15  ;;  %v5565_v20 = vld [vmem:[%s6683_s27 + $0xcc] sm:$0xe] }
 0x12f   : > { %5910 = vmatprep.mubr.msk.bf16.mxu1 %vm721_vm4, %v6501_v33  ;;  %v4484_v33 = vrot.slane %v7968_v6, 5  ;;  %v4408_v10 = vsel %vm6955_vm7, %v4406_v30, %v4407_v21  ;;  %v5580_v2 = vrot.slane %v5564_v60, 9  ;;  %v5569_v1 = vrot.slane %v5553_v4, 9 }
 0x130   : > { %v4401_v6 = vsel %vm6955_vm7, %v4399_v28, %v4400_v37  ;;  %v4413_v38 = vrot.slane %v4411_v44, 4  ;;  %v4488_v19 = vrot.slane %v7989_v25, 5  ;;  %v5585_v15 = vcombine.low %v4405_v27, %v4408_v10 }
 0x131   : > { %v8207_v40 = vsel %vm6955_vm7, %v4483_v53, %v4484_v33  ;;  %v5584_v37 = vcombine.low %v4398_v51, %v4401_v6  ;;  %v4412_v30 = vsel %vm6955_vm7, %v5569_v1, %v4411_v44  ;;  %v2287_v21 = vshll.u32 %v5282_v35, 16 }
 0x132   : > { %v5596_v29 = vcombine.low %v8194_v17, %v8207_v40  ;;  %v8223_v49 = vsel %vm6955_vm7, %v5580_v2, %v4488_v19  ;;  %v4490_v33 = vrot.slane %v4488_v19, 4  ;;  %v2293_v53 = vshll.u32 %v6553_v11, 16 }
 0x133   : > { %v2297_v44 = vshrl.u32 %v6553_v11, 16  ;;  %v5581_v4 = vrot.slane %v5565_v20, 9  ;;  %v4495_v51 = vrot.slane %v8049_v47, 5  ;;  %v4498_v6 = vrot.slane %v8103_v57, 5  ;;  %v5288_v57 = vld [vmem:[%s6683_s27 + $0x84] sm:$0xf] }
 0x134   : > { %v6555_v20 = vld [vmem:[%s6683_s27 + $0x88] sm:$0xf]  ;;  %v2471_v56 = vshll.u32 %v6566_v46, 16 }
 0x135   : > { %6063 = vmatmul.mubr.msk.bf16.gmra.mrb[28].mxu0 %vm721_vm4, %v5533_v62  ;;  %v8587_v62 = vld [vmem:[#allocation13_spill] sm:$0xff]  ;;  %v8246_v27 = vsel %vm6955_vm7, %v5581_v4, %v4495_v51  ;;  %v4497_v10 = vrot.slane %v4495_v51, 4  ;;  %v2299_v19 = vrot.slane %v2297_v44, 4  ;;  %v5294_v44 = vld [vmem:[%s6683_s27 + $0x9c] sm:$0xf]  ;;  %v6509_v4 = vld [vmem:[%s6683_s27 + $0xb4] sm:$0xff]  }
 0x136   : > { %5911 = vmatmul.mubr.msk.bf16.gmra.mrb[12].mxu1 %vm721_vm4, %v6502_v52  ;;  %6068 = vmatprep.mubr.msk.bf16.mxu0 %vm721_vm4, %v5583_v3  ;;  %v4414_v28 = vrot.slane %v8587_v62, 5  ;;  %v4491_v52 = vrot.slane %v8065_v59, 5  ;;  %v6504_v3 = vld [vmem:[%s6683_s27 + $0x78] sm:$0xff]   ;;  %v2284_v59 = vshrl.u32 %v5282_v35, 16  ;;  %v2289_v62 = vrot.slane %v2287_v21, 5  ;;  %v6508_v21 = vld [vmem:[%s6683_s27 + $0xa8] sm:$0xff]  }
 0x137   : > { %5914 = vmatprep.mubr.msk.bf16.mxu1 %vm721_vm4, %v6503_v39  ;;  %v6505_v39 = vld [vmem:[%s6683_s27 + $0x84] sm:$0xff]   ;;  %v8251_v47 = vsel %vm6955_vm7, %v4497_v10, %v4498_v6 }
 0x138   : > { %v4415_v25 = vsel %vm6955_vm7, %v4413_v38, %v4414_v28  ;;  %v8233_v7 = vsel %vm6955_vm7, %v4490_v33, %v4491_v52  ;;  %v2286_v1 = vrot.slane %v2284_v59, 4  ;;  %v6506_v38 = vld [vmem:[%s6683_s27 + $0x90] sm:$0xff]   ;;  %v2295_v28 = vrot.slane %v2293_v53, 5 }
 0x139   : > { %v5597_v60 = vcombine.low %v8223_v49, %v8233_v7  ;;  %v5586_v2 = vcombine.low %v4412_v30, %v4415_v25  ;;  %v5598_v52 = vcombine.low %v8246_v27, %v8251_v47  ;;  %v2332_v33 = vshrl.u32 %v5288_v57, 16  ;;  %v5291_v59 = vld [vmem:[%s6683_s27 + $0x90] sm:$0xf] }
 0x13a   : > { %v2290_v22 = vor.u32 %v2289_v62, %v2286_v1  ;;  %v2300_v35 = vor.u32 %v2299_v19, %v2295_v28  ;;  %v2341_v30 = vshll.u32 %v6555_v20, 16  ;;  %v2345_v25 = vshrl.u32 %v6555_v20, 16  ;;  %v6556_v1 = vld [vmem:[%s6683_s27 + $0x94] sm:$0xf] }
 0x13b   : > { %v2334_v12 = vrot.slane %v2332_v33, 4  ;;  %v2356_v10 = vshrl.u32 %v5291_v59, 16  ;;  %v2369_v62 = vshrl.u32 %v6556_v1, 16  ;;  %v2380_v19 = vshrl.u32 %v5294_v44, 16 }
 0x13c   : > { %v2291_v53 = vrot.slane %v2290_v22, 4  ;;  %v2301_v41 = vrot.slane %v2300_v35, 4  ;;  %v8270_v51 = vrot.slane %v2341_v30, 5  ;;  %v2347_v6 = vrot.slane %v2345_v25, 4 }
 0x13d   : > { %6069 = vmatmul.mubr.msk.bf16.vlgmr.msra.gmra.mrb[0].mxu0 %vm721_vm4, %v5584_v37  ;;  %v6507_v37 = vld [vmem:[%s6683_s27 + $0x9c] sm:$0xff]   ;;  %v2382_v20 = vrot.slane %v2380_v19, 4 }
 0x13e   : > { %5915 = vmatmul.mubr.msk.bf16.gmra.mrb[16].mxu1 %vm721_vm4, %v6504_v3  ;;  %6072 = vmatprep.mubr.msk.bf16.mxu0 %vm721_vm4, %v5585_v15  ;;  %v6554_v3 = vld [vmem:[%s6683_s27 + $0x74] sm:$0x1]  ;;  %v2296_v22 = vsel %vm6725_vm3, %v2291_v53, %v2295_v28  ;;  %v2348_v33 = vor.u32 %v2347_v6, %v8270_v51 }
 0x13f   : > { %5918 = vmatprep.mubr.msk.bf16.mxu1 %vm721_vm4, %v6505_v39  ;;  %v2303_v15 = vshll.u32 %v6554_v3, 16  ;;  %v2335_v39 = vshll.u32 %v5288_v57, 16  ;;  %v6557_v57 = vld [vmem:[%s6683_s27 + $0xa0] sm:$0xf] }
 0x140   : > { %v2389_v3 = vshll.u32 %v6557_v57, 16 }
 0x141   : > { %v2305_v11 = vrot.slane %v2303_v15, 5  ;;  %v2393_v15 = vshrl.u32 %v6557_v57, 16 }
 0x142   : > { %v8292_v28 = vrot.slane %v2389_v3, 5 }
 0x143   : > { %v2306_v34 = vsel %vm6725_vm3, %v2301_v41, %v2305_v11  ;;  %v2395_v25 = vrot.slane %v2393_v15, 4  ;;  %v2349_v41 = vrot.slane %v2348_v33, 4 }
 0x145   : > { %6073 = vmatmul.mubr.msk.bf16.gmra.mrb[4].mxu0 %vm721_vm4, %v5586_v2  ;;  %v2359_v2 = vshll.u32 %v5291_v59, 16  ;;  %v6510_v59 = vld [vmem:[%s6683_s27 + $0xc0] sm:$0xff]  }
 0x146   : > { %5919 = vmatmul.mubr.msk.bf16.gmra.mrb[20].mxu1 %vm721_vm4, %v6506_v38  ;;  %6076 = vmatprep.mubr.msk.bf16.mxu0 %vm721_vm4, %v5587_v8  ;;  %v2337_v8 = vrot.slane %v2335_v39, 5  ;;  %v2365_v38 = vshll.u32 %v6556_v1, 16  ;;  %v2358_v39 = vrot.slane %v2356_v10, 4  ;;  %v6560_v1 = vld [vmem:[%s6683_s27 + $0xa4] sm:$0x1] }
 0x147   : > { %5922 = vmatprep.mubr.msk.bf16.mxu1 %vm721_vm4, %v6507_v37  ;;  %v2383_v37 = vshll.u32 %v5294_v44, 16  ;;  %v2361_v26 = vrot.slane %v2359_v2, 5  ;;  %v2396_v2 = vor.u32 %v2395_v25, %v8292_v28 }
 0x148   : > { %v2338_v35 = vor.u32 %v2337_v8, %v2334_v12  ;;  %v8290_v18 = vrot.slane %v2365_v38, 5  ;;  %v6559_v8 = vld [vmem:[%s6683_s27 + $0x98] sm:$0x1]  ;;  %v2399_v38 = vshll.u32 %v6560_v1, 16 }
 0x149   : > { %v2385_v30 = vrot.slane %v2383_v37, 5  ;;  %v2362_v12 = vor.u32 %v2361_v26, %v2358_v39  ;;  %v2375_v44 = vshll.u32 %v6559_v8, 16  ;;  %v2417_v37 = vshrl.u32 %v6561_v36, 16 }
 0x14a   : > { %v2339_v53 = vrot.slane %v2338_v35, 4  ;;  %v2397_v33 = vrot.slane %v2396_v2, 4  ;;  %v2401_v39 = vrot.slane %v2399_v38, 5  ;;  %v6565_v38 = vld [vmem:[%s6683_s27 + $0xbc] sm:$0x1] }
 0x14b   : > { %v2386_v10 = vor.u32 %v2385_v30, %v2382_v20  ;;  %v2363_v15 = vrot.slane %v2362_v12, 4  ;;  %v2419_v30 = vrot.slane %v2417_v37, 4  ;;  %v2447_v13 = vshll.u32 %v6565_v38, 16 }
 0x14c   : > { %v2344_v57 = vsel %vm6725_vm3, %v2339_v53, %v8270_v51  ;;  %v5303_v53 = vld [vmem:[%s6683_s27 + $0xc0] sm:$0xf]  ;;  %v2402_v9 = vsel %vm6725_vm3, %v2397_v33, %v2401_v39 }
 0x14d   : > { %6077 = vmatmul.mubr.msk.bf16.gmra.mrb[8].mxu0 %vm721_vm4, %v5588_v50  ;;  %v2351_v50 = vshll.u32 %v6558_v58, 16  ;;  %v2441_v58 = vshrl.u32 %v6562_v45, 16  ;;  %v2387_v35 = vrot.slane %v2386_v10, 4 }
 0x14e   : > { %5923 = vmatmul.mubr.msk.bf16.gmra.mrb[24].mxu1 %vm721_vm4, %v6508_v21  ;;  %6080 = vmatprep.mubr.msk.bf16.mxu0 %vm721_vm4, %v5589_v24  ;;  %v2371_v24 = vrot.slane %v2369_v62, 4  ;;  %v5315_v21 = vcombine.low %v2296_v22, %v2306_v34  ;;  %v5300_v62 = vld [vmem:[%s6683_s27 + $0xb4] sm:$0xf]  ;;  %v2377_v22 = vrot.slane %v2375_v44, 5 }
 0x14f   : > { %5926 = vmatprep.mubr.msk.bf16.mxu1 %vm721_vm4, %v6509_v4  ;;  %v2353_v11 = vrot.slane %v2351_v50, 5  ;;  %v5297_v4 = vld [vmem:[%s6683_s27 + $0xa8] sm:$0xf]  ;;  %v2428_v34 = vshrl.u32 %v5300_v62, 16  ;;  %v2431_v23 = vshll.u32 %v5300_v62, 16  ;;  %v2392_v8 = vsel %vm6725_vm3, %v2387_v35, %v8292_v28 }
 0x150   : > { %v2372_v6 = vor.u32 %v2371_v24, %v8290_v18  ;;  %v2404_v19 = vshrl.u32 %v5297_v4, 16  ;;  %v2407_v42 = vshll.u32 %v5297_v4, 16  ;;  %v2452_v4 = vshrl.u32 %v5303_v53, 16 }
 0x151   : > { %v2354_v3 = vsel %vm6725_vm3, %v2349_v41, %v2353_v11  ;;  %v2430_v25 = vrot.slane %v2428_v34, 4  ;;  %v2443_v11 = vrot.slane %v2441_v58, 4  ;;  %v2368_v41 = vsel %vm6725_vm3, %v2363_v15, %v8290_v18  ;;  %v6563_v18 = vld [vmem:[%s6683_s27 + $0xb0] sm:$0x1] }
 0x152   : > { %v2373_v50 = vrot.slane %v2372_v6, 4  ;;  %v2406_v26 = vrot.slane %v2404_v19, 4  ;;  %v2409_v24 = vrot.slane %v2407_v42, 5  ;;  %v5317_v51 = vcombine.low %v2344_v57, %v2354_v3  ;;  %v6564_v6 = vld [vmem:[%s6683_s27 + $0xc4] sm:$0xf] }
 0x153   : > { %v2423_v44 = vshll.u32 %v6563_v18, 16  ;;  %v2455_v28 = vshll.u32 %v5303_v53, 16  ;;  %v2461_v10 = vshll.u32 %v6564_v6, 16  ;;  %v2465_v2 = vshrl.u32 %v6564_v6, 16  ;;  %v8391_v53 = vld [vmem:[%s8521_s2] ss:$0 sm:$0xff] }
 0x154   : > { %v2378_v12 = vsel %vm6725_vm3, %v2373_v50, %v2377_v22  ;;  %v2410_v54 = vor.u32 %v2409_v24, %v2406_v26  ;;  %v2449_v22 = vrot.slane %v2447_v13, 5  ;;  %v2473_v35 = vrot.slane %v2471_v56, 5 }
 0x155   : > { %6081 = vmatmul.mubr.msk.bf16.gmra.mrb[12].mxu0 %vm721_vm4, %v5590_v32  ;;  %v2413_v32 = vshll.u32 %v6561_v36, 16  ;;  %v5318_v16 = vcombine.low %v2368_v41, %v2378_v12  ;;  %v2425_v42 = vrot.slane %v2423_v44, 5  ;;  %v2454_v36 = vrot.slane %v2452_v4, 4 }
 0x156   : > { %5927 = vmatmul.mubr.msk.bf16.gmra.mrb[28].mxu1 %vm721_vm4, %v6510_v59  ;;  %6084 = vmatprep.mubr.msk.bf16.mxu0 %vm721_vm4, %v5591_v0  ;;  %v2437_v0 = vshll.u32 %v6562_v45, 16  ;;  %v2433_v59 = vrot.slane %v2431_v23, 5  ;;  %v2411_v62 = vrot.slane %v2410_v54, 4  ;;  %v2463_v37 = vrot.slane %v2461_v10, 5 }
 0x157   : > { %5948 = vmatprep.mubr.msk.bf16.mxu1 %vm721_vm4, %v5315_v21  ;;  %v2415_v20 = vrot.slane %v2413_v32, 5  ;;  %v2457_v32 = vrot.slane %v2455_v28, 5  ;;  %v2467_v57 = vrot.slane %v2465_v2, 4 }
 0x158   : > { %v2439_v21 = vrot.slane %v2437_v0, 5 }
 0x159   : > { %v2416_v34 = vsel %vm6725_vm3, %v2411_v62, %v2415_v20  ;;  %v2458_v45 = vor.u32 %v2457_v32, %v2454_v36  ;;  %v2468_v0 = vor.u32 %v2467_v57, %v2463_v37 }
 0x15a   : > { %v2444_v1 = vor.u32 %v2443_v11, %v2439_v21 }
 0x15b   : > { %v2459_v58 = vrot.slane %v2458_v45, 4  ;;  %v2469_v50 = vrot.slane %v2468_v0, 4 }
 0x15c   : > { %v2445_v15 = vrot.slane %v2444_v1, 4 }
 0x15d   : > { %6085 = vmatmul.mubr.msk.bf16.gmra.mrb[16].mxu0 %vm721_vm4, %v5592_v63  ;;  %v2420_v63 = vor.u32 %v2419_v30, %v2415_v20  ;;  %v2464_v33 = vsel %vm6725_vm3, %v2459_v58, %v2463_v37  ;;  %v2474_v39 = vsel %vm6725_vm3, %v2469_v50, %v2473_v35 }
 0x15e   : > { %5949 = vmatmul.mubr.msk.bf16.vlgmr.msra.gmra.mrb[16].mxu1 %vm721_vm4, %v8099_v61  ;;  %6088 = vmatprep.mubr.msk.bf16.mxu0 %vm721_vm4, %v5593_v14  ;;  %v2434_v61 = vor.u32 %v2433_v59, %v2430_v25  ;;  %v5319_v14 = vcombine.low %v2392_v8, %v2402_v9  ;;  %v2450_v5 = vsel %vm6725_vm3, %v2445_v15, %v2449_v22 }
 0x15f   : > { %5952 = vmatprep.mubr.msk.bf16.mxu1 %vm721_vm4, %v5317_v51  ;;  %v2421_v19 = vrot.slane %v2420_v63, 4  ;;  %v5322_v26 = vcombine.low %v2464_v33, %v2474_v39 }
 0x160   : > { %v2435_v3 = vrot.slane %v2434_v61, 4 }
 0x161   : > { %v2426_v23 = vsel %vm6725_vm3, %v2421_v19, %v2425_v42 }
 0x162   : > { %v5320_v48 = vcombine.low %v2416_v34, %v2426_v23 }
 0x165   : > { %6089 = vmatmul.mubr.msk.bf16.gmra.mrb[20].mxu0 %vm721_vm4, %v5594_v43  ;;  %v2440_v43 = vsel %vm6725_vm3, %v2435_v3, %v2439_v21 }
 0x166   : > { %5953 = vmatmul.mubr.msk.bf16.gmra.mrb[20].mxu1 %vm721_vm4, %v5318_v16  ;;  %6092 = vmatprep.mubr.msk.bf16.mxu0 %vm721_vm4, %v5595_v55  ;;  %v5321_v55 = vcombine.low %v2440_v43, %v2450_v5 }
 0x167   : > { %5956 = vmatprep.mubr.msk.bf16.mxu1 %vm721_vm4, %v5319_v14 }
 0x16d   : > { %6093 = vmatmul.mubr.msk.bf16.gmra.mrb[24].mxu0 %vm721_vm4, %v5596_v29 }
 0x16e   : > { %5957 = vmatmul.mubr.msk.bf16.gmra.mrb[24].mxu1 %vm721_vm4, %v5320_v48  ;;  %6096 = vmatprep.mubr.msk.bf16.mxu0 %vm721_vm4, %v5597_v60 }
 0x16f   : > { %5960 = vmatprep.mubr.msk.bf16.mxu1 %vm721_vm4, %v5321_v55 }
 0x175   : > { %6097 = vmatmul.mubr.msk.bf16.gmra.mrb[28].mxu0 %vm721_vm4, %v5598_v52 }
 0x176   : > { %5961 = vmatmul.mubr.msk.bf16.gmra.mrb[28].mxu1 %vm721_vm4, %v5322_v26 }
 0x1f1   : > { %v5900_v17 = vpop.f32.mrb[0].mxu1 }
 0x1f2   : > { %v1884_v40 = vpop.f32.mrb[1].mxu1 }
 0x1f3   : > { %v5901_v29 = vpop.f32.mrb[2].mxu1 }
 0x1f4   : > { %v1887_v49 = vpop.f32.mrb[3].mxu1 }
 0x1f9   : > { %v5904_v7 = vpop.f32.mrb[4].mxu1 }
 0x1fa   : > { %v1900_v60 = vpop.f32.mrb[5].mxu1 }
 0x1fb   : > { %v5905_v24 = vpop.f32.mrb[6].mxu1 }
 0x1fc   : > { %v1903_v20 = vpop.f32.mrb[7].mxu1 }
 0x201   : > { %v5908_v30 = vpop.f32.mrb[8].mxu1 }
 0x202   : > { %v1916_v31 = vpop.f32.mrb[9].mxu1 }
 0x203   : > { %v5909_v51 = vpop.f32.mrb[10].mxu1 }
 0x204   : > { %v1919_v25 = vpop.f32.mrb[11].mxu1 }
 0x209   : > { %v5912_v59 = vpop.f32.mrb[12].mxu1 }
 0x20a   : > { %v8382_v21 = vpop.f32.mrb[13].mxu1 }
 0x20b   : > { %v8384_v27 = vpop.f32.mrb[14].mxu1 }
 0x20c   : > { %v8386_v47 = vpop.f32.mrb[15].mxu1 }
 0x210   : > { %v6070_v52 = vpop.f32.mrb[0].mxu0 }
 0x211   : > { %v6161_v11 = vadd.f32 %v6070_v52, %v5900_v17  ;;  %v4635_v41 = vpop.f32.mrb[1].mxu0 }
 0x212   : > { %v6162_v12 = vadd.f32 %v4635_v41, %v1884_v40  ;;  %v6071_v8 = vpop.f32.mrb[2].mxu0 }
 0x213   : > { %v6163_v9 = vadd.f32 %v6071_v8, %v5901_v29  ;;  %v4638_v54 = vpop.f32.mrb[3].mxu0  ;;  %v4803_v44 = vadd.f32 %v6161_v11, %v8391_v53 }
 0x214   : > { %v4801_v63 = vadd.f32 %v6162_v12, %v8391_v53  ;;  %v6164_v18 = vadd.f32 %v4638_v54, %v1887_v49 }
 0x215   : > { %v4804_v6 = vadd.f32 %v6163_v9, %v8391_v53  ;;  %v4835_v38 = vmax.f32 %v4803_v44, 0.0 }
 0x216   : > { %v4802_v4 = vadd.f32 %v6164_v18, %v8391_v53  ;;  %v4833_v28 = vmax.f32 %v4801_v63, 0.0 }
 0x217   : > { %v4836_v42 = vmax.f32 %v4804_v6, 0.0 }
 0x218   : > { %v4834_v10 = vmax.f32 %v4802_v4, 0.0  ;;  %v6074_v2 = vpop.f32.mrb[4].mxu0 }
 0x219   : > { %v6165_v61 = vadd.f32 %v6074_v2, %v5904_v7  ;;  %v4651_v1 = vpop.f32.mrb[5].mxu0 }
 0x21a   : > { %v4866_v13 = vadd.f32 %v4834_v10, %v4833_v28  ;;  %v6166_v16 = vadd.f32 %v4651_v1, %v1900_v60  ;;  %v6075_v14 = vpop.f32.mrb[6].mxu0 }
 0x21b   : > { %v6167_v62 = vadd.f32 %v6075_v14, %v5905_v24  ;;  %v4654_v19 = vpop.f32.mrb[7].mxu0  ;;  %v4807_v57 = vadd.f32 %v6165_v61, %v8391_v53 }
 0x21c   : > { %v4867_v36 = vadd.f32 %v4866_v13, %v4835_v38  ;;  %v4805_v32 = vadd.f32 %v6166_v16, %v8391_v53  ;;  %v6168_v37 = vadd.f32 %v4654_v19, %v1903_v20 }
 0x21d   : > { %v4808_v23 = vadd.f32 %v6167_v62, %v8391_v53  ;;  %v4839_v43 = vmax.f32 %v4807_v57, 0.0 }
 0x21e   : > { %v4837_v3 = vmax.f32 %v4805_v32, 0.0  ;;  %v4868_v15 = vadd.f32 %v4867_v36, %v4836_v42  ;;  %v4806_v22 = vadd.f32 %v6168_v37, %v8391_v53 }
 0x21f   : > { %v4840_v35 = vmax.f32 %v4808_v23, 0.0 }
 0x220   : > { %v4869_v34 = vadd.f32 %v4868_v15, %v4837_v3  ;;  %v4838_v45 = vmax.f32 %v4806_v22, 0.0  ;;  %v6078_v0 = vpop.f32.mrb[8].mxu0 }
 0x221   : > { %v6169_v46 = vadd.f32 %v6078_v0, %v5908_v30  ;;  %v4667_v56 = vpop.f32.mrb[9].mxu0 }
 0x222   : > { %v4870_v5 = vadd.f32 %v4869_v34, %v4838_v45  ;;  %v6170_v48 = vadd.f32 %v4667_v56, %v1916_v31  ;;  %v6079_v55 = vpop.f32.mrb[10].mxu0 }
 0x223   : > { %v6171_v58 = vadd.f32 %v6079_v55, %v5909_v51  ;;  %v4670_v50 = vpop.f32.mrb[11].mxu0  ;;  %v4811_v17 = vadd.f32 %v6169_v46, %v8391_v53 }
 0x224   : > { %v4871_v33 = vadd.f32 %v4870_v5, %v4839_v43  ;;  %v4809_v39 = vadd.f32 %v6170_v48, %v8391_v53  ;;  %v6172_v26 = vadd.f32 %v4670_v50, %v1919_v25 }
 0x225   : > { %v4812_v60 = vadd.f32 %v6171_v58, %v8391_v53  ;;  %v4843_v51 = vmax.f32 %v4811_v17, 0.0 }
 0x226   : > { %v4841_v40 = vmax.f32 %v4809_v39, 0.0  ;;  %v4872_v29 = vadd.f32 %v4871_v33, %v4840_v35  ;;  %v4810_v49 = vadd.f32 %v6172_v26, %v8391_v53 }
 0x227   : > { %v4844_v8 = vmax.f32 %v4812_v60, 0.0 }
 0x228   : > { %v4873_v7 = vadd.f32 %v4872_v29, %v4841_v40  ;;  %v4842_v24 = vmax.f32 %v4810_v49, 0.0  ;;  %v6082_v20 = vpop.f32.mrb[12].mxu0 }
 0x229   : > { %v6173_v30 = vadd.f32 %v6082_v20, %v5912_v59  ;;  %v4683_v31 = vpop.f32.mrb[13].mxu0 }
 0x22a   : > { %v4874_v52 = vadd.f32 %v4873_v7, %v4842_v24  ;;  %v6174_v11 = vadd.f32 %v4683_v31, %v8382_v21  ;;  %v6083_v41 = vpop.f32.mrb[14].mxu0 }
 0x22b   : > { %v6175_v25 = vadd.f32 %v6083_v41, %v8384_v27  ;;  %v4686_v12 = vpop.f32.mrb[15].mxu0  ;;  %v4815_v18 = vadd.f32 %v6173_v30, %v8391_v53 }
 0x22c   : > { %v4875_v9 = vadd.f32 %v4874_v52, %v4843_v51  ;;  %v4813_v54 = vadd.f32 %v6174_v11, %v8391_v53  ;;  %v6176_v63 = vadd.f32 %v4686_v12, %v8386_v47 }
 0x22d   : > { %v4816_v6 = vadd.f32 %v6175_v25, %v8391_v53  ;;  %v4847_v61 = vmax.f32 %v4815_v18, 0.0 }
 0x22e   : > { %v4845_v44 = vmax.f32 %v4813_v54, 0.0  ;;  %v4876_v4 = vadd.f32 %v4875_v9, %v4844_v8  ;;  %v4814_v59 = vadd.f32 %v6176_v63, %v8391_v53 }
 0x22f   : > { %v4848_v19 = vmax.f32 %v4816_v6, 0.0 }
 0x230   : > { %v4877_v28 = vadd.f32 %v4876_v4, %v4845_v44  ;;  %v4846_v21 = vmax.f32 %v4814_v59, 0.0  ;;  %v6086_v10 = vpop.f32.mrb[16].mxu0 }
 0x231   : > { %v5950_v2 = vpop.f32.mrb[16].mxu1  ;;  %v4699_v27 = vpop.f32.mrb[17].mxu0 }
 0x232   : > { %v4878_v1 = vadd.f32 %v4877_v28, %v4846_v21  ;;  %v6177_v38 = vadd.f32 %v6086_v10, %v5950_v2  ;;  %v2674_v13 = vpop.f32.mrb[17].mxu1  ;;  %v6087_v16 = vpop.f32.mrb[18].mxu0 }
 0x233   : > { %v6178_v14 = vadd.f32 %v4699_v27, %v2674_v13  ;;  %v5951_v47 = vpop.f32.mrb[18].mxu1  ;;  %v4702_v62 = vpop.f32.mrb[19].mxu0 }
 0x234   : > { %v4879_v42 = vadd.f32 %v4878_v1, %v4847_v61  ;;  %v6179_v36 = vadd.f32 %v6087_v16, %v5951_v47  ;;  %v2677_v32 = vpop.f32.mrb[19].mxu1  ;;  %v4819_v15 = vadd.f32 %v6177_v38, %v8391_v53 }
 0x235   : > { %v4817_v37 = vadd.f32 %v6178_v14, %v8391_v53  ;;  %v6180_v57 = vadd.f32 %v4702_v62, %v2677_v32 }
 0x236   : > { %v4880_v3 = vadd.f32 %v4879_v42, %v4848_v19  ;;  %v4820_v0 = vadd.f32 %v6179_v36, %v8391_v53  ;;  %v4851_v58 = vmax.f32 %v4819_v15, 0.0 }
 0x237   : > { %v4849_v22 = vmax.f32 %v4817_v37, 0.0  ;;  %v4818_v34 = vadd.f32 %v6180_v57, %v8391_v53 }
 0x238   : > { %v6090_v23 = vpop.f32.mrb[20].mxu0  ;;  %v4852_v40 = vmax.f32 %v4820_v0, 0.0 }
 0x239   : > { %v4881_v45 = vadd.f32 %v4880_v3, %v4849_v22  ;;  %v4850_v46 = vmax.f32 %v4818_v34, 0.0  ;;  %v5954_v56 = vpop.f32.mrb[20].mxu1  ;;  %v4715_v43 = vpop.f32.mrb[21].mxu0 }
 0x23a   : > { %v6181_v5 = vadd.f32 %v6090_v23, %v5954_v56  ;;  %v2690_v48 = vpop.f32.mrb[21].mxu1  ;;  %v6091_v55 = vpop.f32.mrb[22].mxu0 }
 0x23b   : > { %v4882_v50 = vadd.f32 %v4881_v45, %v4850_v46  ;;  %v6182_v35 = vadd.f32 %v4715_v43, %v2690_v48  ;;  %v5955_v33 = vpop.f32.mrb[22].mxu1  ;;  %v4718_v39 = vpop.f32.mrb[23].mxu0 }
 0x23c   : > { %v6183_v26 = vadd.f32 %v6091_v55, %v5955_v33  ;;  %v2693_v17 = vpop.f32.mrb[23].mxu1  ;;  %v4823_v60 = vadd.f32 %v6181_v5, %v8391_v53 }
 0x23d   : > { %v4883_v29 = vadd.f32 %v4882_v50, %v4851_v58  ;;  %v4821_v49 = vadd.f32 %v6182_v35, %v8391_v53  ;;  %v6184_v7 = vadd.f32 %v4718_v39, %v2693_v17 }
 0x23e   : > { %v4824_v52 = vadd.f32 %v6183_v26, %v8391_v53  ;;  %v4855_v54 = vmax.f32 %v4823_v60, 0.0 }
 0x23f   : > { %v4853_v24 = vmax.f32 %v4821_v49, 0.0  ;;  %v4884_v20 = vadd.f32 %v4883_v29, %v4852_v40  ;;  %v4822_v30 = vadd.f32 %v6184_v7, %v8391_v53  ;;  %v4910_v7 = vlaneseq }
 0x240   : > { %v6094_v31 = vpop.f32.mrb[24].mxu0  ;;  %v4856_v6 = vmax.f32 %v4824_v52, 0.0 }
 0x241   : > { %v4885_v51 = vadd.f32 %v4884_v20, %v4853_v24  ;;  %v4854_v11 = vmax.f32 %v4822_v30, 0.0  ;;  %v5958_v41 = vpop.f32.mrb[24].mxu1  ;;  %v4731_v25 = vpop.f32.mrb[25].mxu0  ;;  %v4911_v20 = vshrl.u32 %v4910_v7, 7 }
 0x242   : > { %v6185_v12 = vadd.f32 %v6094_v31, %v5958_v41  ;;  %v2706_v8 = vpop.f32.mrb[25].mxu1  ;;  %v6095_v9 = vpop.f32.mrb[26].mxu0  ;;  %v4912_v31 = vstv %s6611_s18 }
 0x243   : > { %v4886_v63 = vadd.f32 %v4885_v51, %v4854_v11  ;;  %v6186_v18 = vadd.f32 %v4731_v25, %v2706_v8  ;;  %v5959_v44 = vpop.f32.mrb[26].mxu1  ;;  %v4734_v4 = vpop.f32.mrb[27].mxu0  ;;  %vm4913_vm8 = vcmp.eq.s32.totalorder %v4911_v20, %v4912_v31  ;;  %v4914_v11 = vld [vmem:[#allocation3] sm:$0xff]  ;;  %v4926_v8 = vld [vmem:[%s8522_s3 + $0x10] sm:$0xff] (%p4918_p6) }
 0x244   : > { %v6187_v59 = vadd.f32 %v6095_v9, %v5959_v44  ;;  %v2709_v28 = vpop.f32.mrb[27].mxu1  ;;  %v4827_v27 = vadd.f32 %v6185_v12, %v8391_v53  ;;  %v4924_v25 = vld [vmem:[%s8522_s3] sm:$0xff] (%p4918_p6)  ;;  %v4925_v12 = vld [vmem:[%s8522_s3 + $0x8] sm:$0xff] (%p4918_p6)  ;;  %v6622_v9 = vmov (%p4918_p6), 0.0|0.0  }
 0x245   : > { %v4887_v21 = vadd.f32 %v4886_v63, %v4855_v54  ;;  %v4825_v10 = vadd.f32 %v6186_v18, %v8391_v53  ;;  %v6188_v2 = vadd.f32 %v4734_v4, %v2709_v28  ;;  %6135 = vmatprep.subr.bf16.mxu0 (%p4918_p6), %v6622_v9  ;;  %v6136_v54 = vpack.c.bf16 (%p4918_p6), %v4925_v12, %v4924_v25  ;;  %v4927_v63 = vld [vmem:[%s8522_s3 + $0x18] sm:$0xff] (%p4918_p6)  ;;  %v4928_v4 = vld [vmem:[%s8522_s3 + $0x20] sm:$0xff] (%p4918_p6) }
 0x246   : > { %v4828_v14 = vadd.f32 %v6187_v59, %v8391_v53  ;;  %v4859_v37 = vmax.f32 %v4827_v27, 0.0  ;;  %v6624_v18 = vmov (%p4918_p6), 0.0   ;;  %v6139_v44 = vpack.c.bf16 (%p4918_p6), %v4927_v63, %v4926_v8  ;;  %v4929_v59 = vld [vmem:[%s8522_s3 + $0x28] sm:$0xff] (%p4918_p6) }
 0x247   : > { %v4857_v61 = vmax.f32 %v4825_v10, 0.0  ;;  %v4888_v1 = vadd.f32 %v4887_v21, %v4856_v6  ;;  %v4826_v38 = vadd.f32 %v6188_v2, %v8391_v53  ;;  %6132 = vmatprep.mubr.msk.f32.mxu0 (%p4918_p6), %vm6623_vm9, %v6624_v18  ;;  %6137 = vmatpush3.bf16.msra.mxu0 (%p4918_p6), %v6136_v54  ;;  %v6142_v28 = vpack.c.bf16 (%p4918_p6), %v4929_v59, %v4928_v4  ;;  %v4930_v6 = vld [vmem:[%s8522_s3 + $0x30] sm:$0xff] (%p4918_p6)  ;;  %v4931_v21 = vld [vmem:[%s8522_s3 + $0x38] sm:$0xff] (%p4918_p6)  ;;  %v4932_v2 = vld [vmem:[%s8522_s3 + $0x40] sm:$0xff] (%p4918_p6) }
 0x248   : > { %v6098_v13 = vpop.f32.mrb[28].mxu0  ;;  %v4860_v45 = vmax.f32 %v4828_v14, 0.0  ;;  %6138 = vmatprep.subr.bf16.mxu0 (%p4918_p6), %v6622_v9  ;;  %v6145_v10 = vpack.c.bf16 (%p4918_p6), %v4931_v21, %v4930_v6  ;;  %v4933_v27 = vld [vmem:[%s8522_s3 + $0x48] sm:$0xff] (%p4918_p6) }
 0x249   : > { %v4889_v16 = vadd.f32 %v4888_v1, %v4857_v61  ;;  %v4858_v47 = vmax.f32 %v4826_v38, 0.0  ;;  %v5962_v62 = vpop.f32.mrb[28].mxu1  ;;  %v4747_v19 = vpop.f32.mrb[29].mxu0  ;;  %v6148_v61 = vpack.c.bf16 (%p4918_p6), %v4933_v27, %v4932_v2  ;;  %v4934_v1 = vld [vmem:[%s8522_s3 + $0x50] sm:$0xff] (%p4918_p6)  ;;  %v4935_v38 = vld [vmem:[%s8522_s3 + $0x58] sm:$0xff] (%p4918_p6)  ;;  %v4937_v14 = vld [vmem:[%s8522_s3 + $0x68] sm:$0xff] (%p4918_p6) }
 0x24a   : > { %v6189_v42 = vadd.f32 %v6098_v13, %v5962_v62  ;;  %v2722_v36 = vpop.f32.mrb[29].mxu1  ;;  %v6099_v32 = vpop.f32.mrb[30].mxu0  ;;  %v6151_v13 = vpack.c.bf16 (%p4918_p6), %v4935_v38, %v4934_v1  ;;  %v4938_v62 = vld [vmem:[%s8522_s3 + $0x70] sm:$0xff] (%p4918_p6) }
 0x24b   : > { %v4890_v57 = vadd.f32 %v4889_v16, %v4858_v47  ;;  %v6190_v3 = vadd.f32 %v4747_v19, %v2722_v36  ;;  %v5963_v15 = vpop.f32.mrb[30].mxu1  ;;  %v4750_v22 = vpop.f32.mrb[31].mxu0  ;;  %6140 = vmatpush3.bf16.msra.mxu0 (%p4918_p6), %v6139_v44  ;;  %v4936_v16 = vld [vmem:[%s8522_s3 + $0x60] sm:$0xff] (%p4918_p6)  ;;  %v4939_v19 = vld [vmem:[%s8522_s3 + $0x78] sm:$0xff] (%p4918_p6) }
 0x24c   : > { %v6191_v34 = vadd.f32 %v6099_v32, %v5963_v15  ;;  %v2725_v23 = vpop.f32.mrb[31].mxu1  ;;  %v4831_v43 = vadd.f32 %v6189_v42, %v8391_v53  ;;  %6141 = vmatprep.subr.bf16.mxu0 (%p4918_p6), %v6622_v9  ;;  %v6154_v47 = vpack.c.bf16 (%p4918_p6), %v4937_v14, %v4936_v16  ;;  %v6157_v42 = vpack.c.bf16 (%p4918_p6), %v4939_v19, %v4938_v62  ;;  %v5617_v32 = vld [vmem:[%s8523_s4] ss:$0 sm:$0xff] (%p4918_p6) }
 0x24d   : > { %v4891_v0 = vadd.f32 %v4890_v57, %v4859_v37  ;;  %v4829_v46 = vadd.f32 %v6190_v3, %v8391_v53  ;;  %v6192_v56 = vadd.f32 %v4750_v22, %v2725_v23 }
 0x24e   : > { %v4832_v50 = vadd.f32 %v6191_v34, %v8391_v53  ;;  %v4863_v33 = vmax.f32 %v4831_v43, 0.0 }
 0x24f   : > { %v4861_v5 = vmax.f32 %v4829_v46, 0.0  ;;  %v4892_v48 = vadd.f32 %v4891_v0, %v4860_v45  ;;  %v4830_v55 = vadd.f32 %v6192_v56, %v8391_v53  ;;  %6143 = vmatpush3.bf16.msra.mxu0 (%p4918_p6), %v6142_v28 }
 0x250   : > { %v4864_v26 = vmax.f32 %v4832_v50, 0.0  ;;  %6144 = vmatprep.subr.bf16.mxu0 (%p4918_p6), %v6622_v9 }
 0x251   : > { %v4893_v58 = vadd.f32 %v4892_v48, %v4861_v5  ;;  %v4862_v35 = vmax.f32 %v4830_v55, 0.0 }
 0x253   : > { %v4894_v39 = vadd.f32 %v4893_v58, %v4862_v35  ;;  %6146 = vmatpush3.bf16.msra.mxu0 (%p4918_p6), %v6145_v10 }
 0x254   : > { %6147 = vmatprep.subr.bf16.mxu0 (%p4918_p6), %v6622_v9 }
 0x255   : > { %v4895_v17 = vadd.f32 %v4894_v39, %v4863_v33 }
 0x257   : > { %v4896_v40 = vadd.f32 %v4895_v17, %v4864_v26  ;;  %6149 = vmatpush3.bf16.msra.mxu0 (%p4918_p6), %v6148_v61 }
 0x258   : > { %6150 = vmatprep.subr.bf16.mxu0 (%p4918_p6), %v6622_v9 }
 0x259   : > { %v4903_v29 = vrot.slane %v4896_v40, 4 }
 0x25b   : > { %v4904_v49 = vadd.f32 %v4903_v29, %v4896_v40  ;;  %6152 = vmatpush3.bf16.msra.mxu0 (%p4918_p6), %v6151_v13 }
 0x25c   : > { %6153 = vmatprep.subr.bf16.mxu0 (%p4918_p6), %v6622_v9 }
 0x25d   : > { %v4905_v60 = vrot.slane %v4904_v49, 2 }
 0x25f   : > { %v4906_v24 = vadd.f32 %v4905_v60, %v4904_v49  ;;  %6155 = vmatpush3.bf16.msra.mxu0 (%p4918_p6), %v6154_v47 }
 0x260   : > { %6156 = vmatprep.subr.bf16.mxu0 (%p4918_p6), %v6622_v9 }
 0x261   : > { %v4907_v30 = vrot.slane %v4906_v24, 1 }
 0x263   : > { %v4908_v51 = vadd.f32 %v4907_v30, %v4906_v24  ;;  %6158 = vmatpush3.bf16.msra.mxu0 (%p4918_p6), %v6157_v42 }
 0x264   : > { %4922 = sbr.rel (!%p4918_p6) target bundleno = 841 (0x349), region = 56 }
 0x265   : > { %v4909_v52 = vmul.f32 0.00390625, %v4908_v51 }
 0x267   : > { %v4915_v41 = vsel %vm4913_vm8, %v4909_v52, 0.0 }
 0x268   : > { %v4916_v53 = vadd.f32 %v4915_v41, %v4914_v11 }
 0x26a   : > { %4917 = vst [vmem:[#allocation3] sm:$0xff] %v4916_v53 }
 0x271   : > { %v4923_v36 = vld [vmem:[#allocation3] sm:$0xff] }
 0x272   : > { %6133 = vmatmul.mubr.f32.vlgmr.msra.gmra.mrb[0].mxu0 %v4923_v36 }
 0x345   : > { %v5013_v37 = vpop.f32.mrb[0].mxu0 }
 0x346   : > { %v5014_v57 = vadd.f32 %v5617_v32, %v5013_v37  ;;  %v6134_v3 = vpop.f32.mrb[1].mxu0 }
 0x348   : > { %5017 = vst [vmem:[#allocation4] sm:$0xff] %v5014_v57 }
 0x349 PF: > { %p8484_p7 = scmp.eq.s32.totalorder %s5073_s21, 1  ;;  %s6625_s23 = smov [#allocation4]  }
 0x34a   : > { %s5025_s24 = sshll.u32 %s6625_s23, 4  ;;  %s5026_s24 = int_to_ptr.vmem [resolvable:$true] %s5025_s24 }
 0x34b   : > { %s6567_s25 = scalar_lea.vmem %s5026_s24, 128  ;;  %p6574_p11 = scmp.lt.s32.totalorder %s5026_s24, %s5026_s24 }
 0x34c   : > { %p6568_p8 = scmp.ne.s32.totalorder %s5026_s24, %s6567_s25  ;;  %p6575_p12 = scmp.lt.s32.totalorder %s6567_s25, %s6567_s25 }
 0x34e   : > { %p6569_p9 = pnand %p6568_p8, %p8484_p7  ;;  %p6576_p13 = por %p6575_p12, %p6574_p11 }
 0x350   : > { %p6570_p10 = pneg %p6569_p9 }
 0x352   : > { %p6577_p0 = pnand %p6576_p13, %p6570_p10 }
 0x354   : > { %6580 = shalt.err (!%p6577_p0)
}
 0x355   : > { %s6581_s21 = scalar_lea.hbm %s8524_s5, 128 }
 0x356   : > { %p6582_p1 = scmp.ne.s32.totalorder %s8524_s5, %s6581_s21  ;;  %p6587_p4 = scmp.lt.u32.totalorder %s6581_s21, %s8524_s5 }
 0x358   : > { %p6583_p2 = pnand %p6582_p1, %p8484_p7 }
 0x35a   : > { %p6584_p3 = pneg %p6583_p2 }
 0x35c   : > { %p6589_p5 = pnand %p6587_p4, %p6584_p3 }
 0x35e   : > { %6592 = shalt.err (!%p6589_p5)
}
 0x35f   : > { %6429 = dma.vmem_to_hbm [thread:$0]  (%p8484_p7), %s5026_s24, 128, %s8524_s5, [#allocation5]  }
 0x360   : > { %6606 = dma.done.wait (%p8484_p7), [#allocation5], 128  }
 0x361   : > { %6608 = vsyncadd (%p8484_p7), [#allocation5], 4294967168 }
 0x362 PF: > { %s16_s20 = sadd.s32 1, %s6619_s20   ;;  %s8589_s18 = smov %s6615_s19 }
 0x363   : > { %p13_p6 = scmp.ge.s32.totalorder %s16_s20, 4   ;;  %s8590_s19 = smov %s8592_s22 }
 0x365   :  { %15 = sbr.rel (!%p13_p6) target bundleno = 2 (0x2), region = 93 }
 0x36c   :  { %5038 = vsyncpa [#allocation5], 1 }
 0x36d   :  { %5040 = vsyncpa [#allocation5 + $0x1], 1 }

</bundles_post_ra>
